<compile_context>
chip_gen: v7x
topology: tpu7x:2x2x1
jax: 0.10.0
libtpu: 0.0.40
codegen_flags: <defaults>
</compile_context>

<pallas_src>
import functools

import jax
import jax.numpy as jnp
from jax.experimental import pallas as pl
from jax.experimental.pallas import tpu as pltpu


def _round_up(x, m):
    return (x + m - 1) // m * m


# ----------------------------------------------------------------------------
# Fused Pallas kernel:
#   [optional per-column scale + LeakyReLU on the A tile]  -> MXU matmul
#   -> raw conv output  [+ optional per-channel sum / sum-of-squares]
# ----------------------------------------------------------------------------
def _fused_conv_kernel(s_ref, a_ref, w_ref, *out_refs, in_act, with_stats):
    a = a_ref[...]
    if in_act:
        # Folded LeakyReLU(0.2)(scale * x [+ shift]) of the previous layer.
        # (BN shift was pre-added to the activation before im2col, so the
        #  zero border padding stays exactly zero after the activation.)
        a = a * s_ref[...]
        a = jnp.where(a >= 0.0, a, 0.2 * a)
    y = jnp.dot(a, w_ref[...], preferred_element_type=jnp.float32)
    out_refs[0][...] = y
    if with_stats:
        # Per-channel batch statistics for the following BatchNorm.
        out_refs[1][...] = jnp.sum(y, axis=0, keepdims=True)
        out_refs[2][...] = jnp.sum(y * y, axis=0, keepdims=True)


def fused_conv_matmul(a, w, s, *, in_act, with_stats, tm_max=1024):
    """a: [M, K] patches, w: [K, N] weights, s: [1, K] per-column input scale.

    Returns y = (lrelu(a * s) if in_act else a) @ w  as [M, N] f32, plus
    (sum_over_M(y), sum_over_M(y*y)) as [1, N] each when with_stats.
    """
    a = a.astype(jnp.float32)
    w = w.astype(jnp.float32)
    s = s.astype(jnp.float32)
    m, k = a.shape
    k2, n = w.shape
    assert k == k2 and s.shape == (1, k)

    mp = _round_up(max(m, 1), 8)
    tm = mp if mp <= tm_max else tm_max
    mp = _round_up(mp, tm)
    if mp != m:
        a = jnp.pad(a, ((0, mp - m), (0, 0)))
    grid_m = mp // tm
    if with_stats:
        # Stats are accumulated over the full M extent inside one grid step.
        assert grid_m == 1 and mp == m, "BN-stats path needs a single M tile"

    out_shape = jax.ShapeDtypeStruct((mp, n), jnp.float32)
    out_spec = pl.BlockSpec((tm, n), lambda i: (i, 0))
    if with_stats:
        out_shape = (out_shape,
                     jax.ShapeDtypeStruct((1, n), jnp.float32),
                     jax.ShapeDtypeStruct((1, n), jnp.float32))
        out_spec = (out_spec,
                    pl.BlockSpec((1, n), lambda i: (0, 0)),
                    pl.BlockSpec((1, n), lambda i: (0, 0)))

    kernel = functools.partial(_fused_conv_kernel, in_act=in_act,
                               with_stats=with_stats)
    outs = pl.pallas_call(
        kernel,
        out_shape=out_shape,
        grid=(grid_m,),
        in_specs=[
            pl.BlockSpec((1, k), lambda i: (0, 0)),    # per-K-column scale
            pl.BlockSpec((tm, k), lambda i: (i, 0)),   # im2col A tile
            pl.BlockSpec((k, n), lambda i: (0, 0)),    # weights (resident)
        ],
        out_specs=out_spec,
        compiler_params=pltpu.CompilerParams(
            dimension_semantics=("parallel",)),
        cost_estimate=pl.CostEstimate(
            flops=2 * mp * k * n, transcendentals=0,
            bytes_accessed=4 * (mp * k + k * n + mp * n)),
    )(s, a, w)

    if with_stats:
        return outs
    y = outs
    if mp != m:
        y = y[:m]
    return y


# ----------------------------------------------------------------------------
# Conv2d (no bias) as im2col + fused Pallas matmul.  NHWC internally.
# ----------------------------------------------------------------------------
def _im2col(x, kh, kw, stride, pad_h, pad_w):
    """x: [N,H,W,C] -> patches [N*Ho*Wo, kh*kw*C] (tap-major, channel-minor)."""
    n, h, w, c = x.shape
    xp = jnp.pad(x, ((0, 0), (pad_h, pad_h), (pad_w, pad_w), (0, 0)))
    hp, wp = h + 2 * pad_h, w + 2 * pad_w
    ho = (hp - kh) // stride + 1
    wo = (wp - kw) // stride + 1
    taps = []
    for i in range(kh):
        for j in range(kw):
            taps.append(xp[:, i:i + stride * ho:stride,
                           j:j + stride * wo:stride, :])
    patches = jnp.concatenate(taps, axis=-1)           # [N,Ho,Wo,kh*kw*C]
    return patches.reshape(n * ho * wo, kh * kw * c), (n, ho, wo)


def conv_layer(x_nhwc, w_oihw, stride, padding, *, in_act,
               in_scale=None, want_stats=False):
    """Conv2d(bias=False) with the *input* activation fused into the kernel.

    in_act=False : plain conv of x (first layer only).
    in_act=True  : conv of LeakyReLU(in_scale * x) (in_scale=None -> ones),
                   where x already had the BN shift pre-added if applicable.
    want_stats   : also return per-channel (sum, sum_sq) of the raw output.
    """
    cout, cin, kh, kw = w_oihw.shape
    assert x_nhwc.shape[-1] == cin
    a, (n, ho, wo) = _im2col(x_nhwc, kh, kw, stride, padding[0], padding[1])
    k = kh * kw * cin
    # Patch feature ordering is (kh, kw, cin) -> matching weight reshape:
    wm = jnp.transpose(w_oihw, (2, 3, 1, 0)).reshape(k, cout)
    if in_scale is None:
        s = jnp.ones((1, k), jnp.float32)
    else:
        s = jnp.tile(in_scale.astype(jnp.float32), kh * kw).reshape(1, k)
    outs = fused_conv_matmul(a, wm, s, in_act=in_act, with_stats=want_stats)
    if want_stats:
        y, s1, s2 = outs
        return y.reshape(n, ho, wo, cout), (s1[0], s2[0])
    return outs.reshape(n, ho, wo, cout), None


def _bn_fold(y_nhwc, s1, s2, gamma, beta, eps=1e-5):
    """Fold train-mode BatchNorm into a per-channel scale consumed by the next
    conv kernel, plus a pre-shifted activation so the zero-padded border stays
    exactly zero after the fused affine + LeakyReLU."""
    n, h, w, c = y_nhwc.shape
    cnt = float(n * h * w)
    mean = s1 / cnt
    var = jnp.maximum(s2 / cnt - mean * mean, 0.0)     # biased batch variance
    scale = gamma / jnp.sqrt(var + eps)
    shift = beta - mean * scale
    y_shifted = y_nhwc + (shift / scale).reshape(1, 1, 1, c)
    return scale, y_shifted


# ----------------------------------------------------------------------------
# masknet2 parameters + forward
# ----------------------------------------------------------------------------
def init_masknet2_params(key, ndf=8, nc=1, nz=1, lf=(1, 4)):
    shapes = {
        "w1": (ndf, nc, 4, 4),
        "w3": (ndf * 2, ndf, 4, 4),
        "w5": (ndf * 2, ndf * 2, 3, 3),
        "w8": (ndf * 4, ndf * 2, 3, 3),
        "w10": (ndf * 4, ndf * 4, 3, 3),
        "w13": (ndf * 8, ndf * 4, 2, 4),
        "wout": (nz, ndf * 8, lf[0], lf[1]),
    }
    params = {}
    keys = jax.random.split(key, len(shapes))
    for k, (name, shp) in zip(keys, shapes.items()):
        params[name] = 0.05 * jax.random.normal(k, shp, dtype=jnp.float32)
    # BatchNorm2d default init: weight=1, bias=0
    params["g6"] = jnp.ones((ndf * 2,), jnp.float32)
    params["b6"] = jnp.zeros((ndf * 2,), jnp.float32)
    params["g11"] = jnp.ones((ndf * 4,), jnp.float32)
    params["b11"] = jnp.zeros((ndf * 4,), jnp.float32)
    params["g14"] = jnp.ones((ndf * 8,), jnp.float32)
    params["b14"] = jnp.zeros((ndf * 8,), jnp.float32)
    return params


def masknet2_forward(params, inputs_nchw, eps=1e-5):
    x = inputs_nchw
    if x.shape[-1] == 1:
        # torch: inputs.transpose(1, 3), only applied when size(-1) == 1
        x = jnp.transpose(x, (0, 3, 2, 1))
    x = jnp.transpose(x, (0, 2, 3, 1)).astype(jnp.float32)   # NCHW -> NHWC

    l1, _ = conv_layer(x, params["w1"], 2, (1, 1), in_act=False)
    l3, _ = conv_layer(l1, params["w3"], 2, (1, 1), in_act=True)
    l5, st6 = conv_layer(l3, params["w5"], 2, (1, 1), in_act=True,
                         want_stats=True)
    sc6, l5s = _bn_fold(l5, st6[0], st6[1], params["g6"], params["b6"], eps)
    l8, _ = conv_layer(l5s, params["w8"], 2, (1, 1), in_act=True,
                       in_scale=sc6)
    l10, st11 = conv_layer(l8, params["w10"], 2, (1, 1), in_act=True,
                           want_stats=True)
    sc11, l10s = _bn_fold(l10, st11[0], st11[1], params["g11"],
                          params["b11"], eps)
    l13, st14 = conv_layer(l10s, params["w13"], 2, (0, 1), in_act=True,
                           in_scale=sc11, want_stats=True)
    sc14, l13s = _bn_fold(l13, st14[0], st14[1], params["g14"],
                          params["b14"], eps)
    output, _ = conv_layer(l13s, params["wout"], 1, (0, 0), in_act=True,
                           in_scale=sc14)

    to_nchw = lambda t: jnp.transpose(t, (0, 3, 1, 2))
    feats = [to_nchw(t) for t in (l3, l5, l8, l10, l13)]
    return feats, to_nchw(output)


# ----------------------------------------------------------------------------
# Pure-XLA reference of the same module (for correctness check)
# ----------------------------------------------------------------------------
def _ref_forward(params, inputs_nchw, eps=1e-5):
    x = inputs_nchw
    if x.shape[-1] == 1:
        x = jnp.transpose(x, (0, 3, 2, 1))
    x = x.astype(jnp.float32)

    def conv(t, w, stride, pad):
        return jax.lax.conv_general_dilated(
            t, w, (stride, stride), ((pad[0], pad[0]), (pad[1], pad[1])),
            dimension_numbers=("NCHW", "OIHW", "NCHW"),
            precision=jax.lax.Precision.HIGHEST)

    lrelu = lambda t: jnp.where(t >= 0, t, 0.2 * t)

    def bn(t, g, b):
        m = jnp.mean(t, axis=(0, 2, 3), keepdims=True)
        v = jnp.mean((t - m) ** 2, axis=(0, 2, 3), keepdims=True)
        return ((t - m) / jnp.sqrt(v + eps)) * g.reshape(1, -1, 1, 1) \
            + b.reshape(1, -1, 1, 1)

    l1 = conv(x, params["w1"], 2, (1, 1));  l2 = lrelu(l1)
    l3 = conv(l2, params["w3"], 2, (1, 1)); l4 = lrelu(l3)
    l5 = conv(l4, params["w5"], 2, (1, 1))
    l7 = lrelu(bn(l5, params["g6"], params["b6"]))
    l8 = conv(l7, params["w8"], 2, (1, 1)); l9 = lrelu(l8)
    l10 = conv(l9, params["w10"], 2, (1, 1))
    l12 = lrelu(bn(l10, params["g11"], params["b11"]))
    l13 = conv(l12, params["w13"], 2, (0, 1))
    l15 = lrelu(bn(l13, params["g14"], params["b14"]))
    out = conv(l15, params["wout"], 1, (0, 0))
    return [l3, l5, l8, l10, l13], out


if __name__ == "__main__":
    # Smallest shapes consistent with the architecture: spatial must reduce to
    # (1, >=4) before the final (1,4) conv -> 64 x 256 input; ndf=8 keeps
    # channel counts small.
    key = jax.random.PRNGKey(0)
    pkey, xkey = jax.random.split(key)
    params = init_masknet2_params(pkey, ndf=8, nc=1, nz=1, lf=(1, 4))
    x = jax.random.normal(xkey, (2, 1, 64, 256), dtype=jnp.float32)  # NCHW

    fwd = jax.jit(masknet2_forward)
    feats, out = fwd(params, x)
    jax.block_until_ready(out)
    jax.block_until_ready(feats)

    expected_feat_shapes = [
        (2, 16, 16, 64),   # l3
        (2, 16, 8, 32),    # l5
        (2, 32, 4, 16),    # l8
        (2, 32, 2, 8),     # l10
        (2, 64, 1, 4),     # l13
    ]
    assert out.shape == (2, 1, 1, 1), out.shape
    for f, s in zip(feats, expected_feat_shapes):
        assert f.shape == s, (f.shape, s)
    assert all(bool(jnp.isfinite(f).all()) for f in feats)
    assert bool(jnp.isfinite(out).all())

    # Numerical cross-check against the pure-XLA reference.
    ref_feats, ref_out = jax.jit(_ref_forward)(params, x)
    for got, ref in list(zip(feats, ref_feats)) + [(out, ref_out)]:
        assert bool(jnp.allclose(got, ref, rtol=1e-2, atol=1e-2)), \
            float(jnp.max(jnp.abs(got - ref)))

    print("KERNEL_OK")
</pallas_src>

<mosaic_0001>
module attributes {stable_mosaic.version = 11 : i64} {
  func.func @_fused_conv_kernel(%arg0: i32, %arg1: memref<1x16xf32, #tpu.memory_space<vmem>>, %arg2: memref<1024x16xf32, #tpu.memory_space<vmem>>, %arg3: memref<16x8xf32, #tpu.memory_space<vmem>>, %arg4: memref<1024x8xf32, #tpu.memory_space<vmem>>) attributes {dimension_semantics = [#tpu.dimension_semantics<parallel>], iteration_bounds = array<i64: 8>, scalar_prefetch = 0 : i64, scratch_operands = 0 : i64, tpu.core_type = #tpu.core_type<tc>, window_params = [{pipeline_mode = #tpu.pipeline_mode<synchronous>, transform_indices = @transform_0, window_bounds = array<i64: 1, 16>}, {transform_indices = @transform_1, window_bounds = array<i64: 1024, 16>}, {pipeline_mode = #tpu.pipeline_mode<synchronous>, transform_indices = @transform_2, window_bounds = array<i64: 16, 8>}, {transform_indices = @transform_3, window_bounds = array<i64: 1024, 8>}]} {
    %c0 = arith.constant 0 : index
    %c0_0 = arith.constant 0 : index
    %0 = vector.load %arg2[%c0, %c0_0] : memref<1024x16xf32, #tpu.memory_space<vmem>>, vector<1024x16xf32>
    %c0_1 = arith.constant 0 : index
    %c0_2 = arith.constant 0 : index
    %1 = vector.load %arg3[%c0_1, %c0_2] : memref<16x8xf32, #tpu.memory_space<vmem>>, vector<16x8xf32>
    %cst = arith.constant dense<0.000000e+00> : vector<1024x8xf32>
    %2 = tpu.matmul %0, %1, %cst {dimension_numbers = #tpu.dot_dimension_numbers<[1], [0], [0], [1], [0, 0, 1, 1], [], []>} : vector<1024x16xf32>, vector<16x8xf32>, vector<1024x8xf32> -> vector<1024x8xf32>
    %c0_3 = arith.constant 0 : index
    %c0_4 = arith.constant 0 : index
    %3 = vector.load %arg4[%c0_3, %c0_4] : memref<1024x8xf32, #tpu.memory_space<vmem>>, vector<1024x8xf32>
    tpu.vector_store %arg4[%c0_3, %c0_4], %2 {strides = array<i32>} : memref<1024x8xf32, #tpu.memory_space<vmem>>, vector<1024x8xf32>,
    return
  }
  func.func @transform_0(%arg0: i32) -> (i32, i32) {
    %c0_i32 = arith.constant 0 : i32
    %c0_i32_0 = arith.constant 0 : i32
    %c0_i32_1 = arith.constant 0 : i32
    return %c0_i32, %c0_i32_0 : i32, i32
  }
  func.func @transform_1(%arg0: i32) -> (i32, i32) {
    %c0_i32 = arith.constant 0 : i32
    %c0_i32_0 = arith.constant 0 : i32
    return %arg0, %c0_i32 : i32, i32
  }
  func.func @transform_2(%arg0: i32) -> (i32, i32) {
    %c0_i32 = arith.constant 0 : i32
    %c0_i32_0 = arith.constant 0 : i32
    %c0_i32_1 = arith.constant 0 : i32
    return %c0_i32, %c0_i32_0 : i32, i32
  }
  func.func @transform_3(%arg0: i32) -> (i32, i32) {
    %c0_i32 = arith.constant 0 : i32
    %c0_i32_0 = arith.constant 0 : i32
    return %arg0, %c0_i32 : i32, i32
  }
}

module attributes {stable_mosaic.version = 11 : i64} {
  func.func @_fused_conv_kernel(%arg0: i32, %arg1: memref<1x128xf32, #tpu.memory_space<vmem>>, %arg2: memref<1024x128xf32, #tpu.memory_space<vmem>>, %arg3: memref<128x16xf32, #tpu.memory_space<vmem>>, %arg4: memref<1024x16xf32, #tpu.memory_space<vmem>>) attributes {dimension_semantics = [#tpu.dimension_semantics<parallel>], iteration_bounds = array<i64: 2>, scalar_prefetch = 0 : i64, scratch_operands = 0 : i64, tpu.core_type = #tpu.core_type<tc>, window_params = [{pipeline_mode = #tpu.pipeline_mode<synchronous>, transform_indices = @transform_0, window_bounds = array<i64: 1, 128>}, {transform_indices = @transform_1, window_bounds = array<i64: 1024, 128>}, {pipeline_mode = #tpu.pipeline_mode<synchronous>, transform_indices = @transform_2, window_bounds = array<i64: 128, 16>}, {transform_indices = @transform_3, window_bounds = array<i64: 1024, 16>}]} {
    %c0 = arith.constant 0 : index
    %c0_0 = arith.constant 0 : index
    %0 = vector.load %arg2[%c0, %c0_0] : memref<1024x128xf32, #tpu.memory_space<vmem>>, vector<1024x128xf32>
    %c0_1 = arith.constant 0 : index
    %c0_2 = arith.constant 0 : index
    %1 = vector.load %arg1[%c0_1, %c0_2] : memref<1x128xf32, #tpu.memory_space<vmem>>, vector<1x128xf32>
    %2 = vector.broadcast %1 : vector<1x128xf32> to vector<1024x128xf32>
    %3 = arith.mulf %0, %2 : vector<1024x128xf32>
    %cst = arith.constant 0.000000e+00 : f32
    %4 = vector.broadcast %cst : f32 to vector<1024x128xf32>
    %5 = arith.cmpf oge, %3, %4 : vector<1024x128xf32>
    %cst_3 = arith.constant 2.000000e-01 : f32
    %6 = vector.broadcast %cst_3 : f32 to vector<1024x128xf32>
    %7 = arith.mulf %6, %3 : vector<1024x128xf32>
    %8 = arith.select %5, %3, %7 : vector<1024x128xi1>, vector<1024x128xf32>
    %c0_4 = arith.constant 0 : index
    %c0_5 = arith.constant 0 : index
    %9 = vector.load %arg3[%c0_4, %c0_5] : memref<128x16xf32, #tpu.memory_space<vmem>>, vector<128x16xf32>
    %cst_6 = arith.constant dense<0.000000e+00> : vector<1024x16xf32>
    %10 = tpu.matmul %8, %9, %cst_6 {dimension_numbers = #tpu.dot_dimension_numbers<[1], [0], [0], [1], [0, 0, 1, 1], [], []>} : vector<1024x128xf32>, vector<128x16xf32>, vector<1024x16xf32> -> vector<1024x16xf32>
    %c0_7 = arith.constant 0 : index
    %c0_8 = arith.constant 0 : index
    %11 = vector.load %arg4[%c0_7, %c0_8] : memref<1024x16xf32, #tpu.memory_space<vmem>>, vector<1024x16xf32>
    tpu.vector_store %arg4[%c0_7, %c0_8], %10 {strides = array<i32>} : memref<1024x16xf32, #tpu.memory_space<vmem>>, vector<1024x16xf32>,
    return
  }
  func.func @transform_0(%arg0: i32) -> (i32, i32) {
    %c0_i32 = arith.constant 0 : i32
    %c0_i32_0 = arith.constant 0 : i32
    %c0_i32_1 = arith.constant 0 : i32
    return %c0_i32, %c0_i32_0 : i32, i32
  }
  func.func @transform_1(%arg0: i32) -> (i32, i32) {
    %c0_i32 = arith.constant 0 : i32
    %c0_i32_0 = arith.constant 0 : i32
    return %arg0, %c0_i32 : i32, i32
  }
  func.func @transform_2(%arg0: i32) -> (i32, i32) {
    %c0_i32 = arith.constant 0 : i32
    %c0_i32_0 = arith.constant 0 : i32
    %c0_i32_1 = arith.constant 0 : i32
    return %c0_i32, %c0_i32_0 : i32, i32
  }
  func.func @transform_3(%arg0: i32) -> (i32, i32) {
    %c0_i32 = arith.constant 0 : i32
    %c0_i32_0 = arith.constant 0 : i32
    return %arg0, %c0_i32 : i32, i32
  }
}

module attributes {stable_mosaic.version = 11 : i64} {
  func.func @_fused_conv_kernel(%arg0: i32, %arg1: memref<1x144xf32, #tpu.memory_space<vmem>>, %arg2: memref<512x144xf32, #tpu.memory_space<vmem>>, %arg3: memref<144x16xf32, #tpu.memory_space<vmem>>, %arg4: memref<512x16xf32, #tpu.memory_space<vmem>>, %arg5: memref<1x16xf32, #tpu.memory_space<vmem>>, %arg6: memref<1x16xf32, #tpu.memory_space<vmem>>) attributes {dimension_semantics = [#tpu.dimension_semantics<parallel>], iteration_bounds = array<i64: 1>, scalar_prefetch = 0 : i64, scratch_operands = 0 : i64, tpu.core_type = #tpu.core_type<tc>, window_params = [{pipeline_mode = #tpu.pipeline_mode<synchronous>, transform_indices = @transform_0, window_bounds = array<i64: 1, 144>}, {transform_indices = @transform_1, window_bounds = array<i64: 512, 144>}, {pipeline_mode = #tpu.pipeline_mode<synchronous>, transform_indices = @transform_2, window_bounds = array<i64: 144, 16>}, {transform_indices = @transform_3, window_bounds = array<i64: 512, 16>}, {pipeline_mode = #tpu.pipeline_mode<synchronous>, transform_indices = @transform_4, window_bounds = array<i64: 1, 16>}, {pipeline_mode = #tpu.pipeline_mode<synchronous>, transform_indices = @transform_5, window_bounds = array<i64: 1, 16>}]} {
    %c0 = arith.constant 0 : index
    %c0_0 = arith.constant 0 : index
    %0 = vector.load %arg2[%c0, %c0_0] : memref<512x144xf32, #tpu.memory_space<vmem>>, vector<512x144xf32>
    %c0_1 = arith.constant 0 : index
    %c0_2 = arith.constant 0 : index
    %1 = vector.load %arg1[%c0_1, %c0_2] : memref<1x144xf32, #tpu.memory_space<vmem>>, vector<1x144xf32>
    %2 = vector.broadcast %1 : vector<1x144xf32> to vector<512x144xf32>
    %3 = arith.mulf %0, %2 : vector<512x144xf32>
    %cst = arith.constant 0.000000e+00 : f32
    %4 = vector.broadcast %cst : f32 to vector<512x144xf32>
    %5 = arith.cmpf oge, %3, %4 : vector<512x144xf32>
    %cst_3 = arith.constant 2.000000e-01 : f32
    %6 = vector.broadcast %cst_3 : f32 to vector<512x144xf32>
    %7 = arith.mulf %6, %3 : vector<512x144xf32>
    %8 = arith.select %5, %3, %7 : vector<512x144xi1>, vector<512x144xf32>
    %c0_4 = arith.constant 0 : index
    %c0_5 = arith.constant 0 : index
    %9 = vector.load %arg3[%c0_4, %c0_5] : memref<144x16xf32, #tpu.memory_space<vmem>>, vector<144x16xf32>
    %cst_6 = arith.constant dense<0.000000e+00> : vector<512x16xf32>
    %10 = tpu.matmul %8, %9, %cst_6 {dimension_numbers = #tpu.dot_dimension_numbers<[1], [0], [0], [1], [0, 0, 1, 1], [], []>} : vector<512x144xf32>, vector<144x16xf32>, vector<512x16xf32> -> vector<512x16xf32>
    %c0_7 = arith.constant 0 : index
    %c0_8 = arith.constant 0 : index
    %11 = vector.load %arg4[%c0_7, %c0_8] : memref<512x16xf32, #tpu.memory_space<vmem>>, vector<512x16xf32>
    tpu.vector_store %arg4[%c0_7, %c0_8], %10 {strides = array<i32>} : memref<512x16xf32, #tpu.memory_space<vmem>>, vector<512x16xf32>,
    %cst_9 = arith.constant dense<0.000000e+00> : vector<16xf32>
    %12 = vector.multi_reduction <add>, %10, %cst_9 [0] : vector<512x16xf32> to vector<16xf32>
    %13 = vector.shape_cast %12 : vector<16xf32> to vector<1x16xf32>
    %c0_10 = arith.constant 0 : index
    %c0_11 = arith.constant 0 : index
    %14 = vector.load %arg5[%c0_10, %c0_11] : memref<1x16xf32, #tpu.memory_space<vmem>>, vector<1x16xf32>
    tpu.vector_store %arg5[%c0_10, %c0_11], %13 {strides = array<i32>} : memref<1x16xf32, #tpu.memory_space<vmem>>, vector<1x16xf32>,
    %15 = arith.mulf %10, %10 : vector<512x16xf32>
    %cst_12 = arith.constant dense<0.000000e+00> : vector<16xf32>
    %16 = vector.multi_reduction <add>, %15, %cst_12 [0] : vector<512x16xf32> to vector<16xf32>
    %17 = vector.shape_cast %16 : vector<16xf32> to vector<1x16xf32>
    %c0_13 = arith.constant 0 : index
    %c0_14 = arith.constant 0 : index
    %18 = vector.load %arg6[%c0_13, %c0_14] : memref<1x16xf32, #tpu.memory_space<vmem>>, vector<1x16xf32>
    tpu.vector_store %arg6[%c0_13, %c0_14], %17 {strides = array<i32>} : memref<1x16xf32, #tpu.memory_space<vmem>>, vector<1x16xf32>,
    return
  }
  func.func @transform_0(%arg0: i32) -> (i32, i32) {
    %c0_i32 = arith.constant 0 : i32
    %c0_i32_0 = arith.constant 0 : i32
    %c0_i32_1 = arith.constant 0 : i32
    return %c0_i32, %c0_i32_0 : i32, i32
  }
  func.func @transform_1(%arg0: i32) -> (i32, i32) {
    %c0_i32 = arith.constant 0 : i32
    %c0_i32_0 = arith.constant 0 : i32
    return %arg0, %c0_i32 : i32, i32
  }
  func.func @transform_2(%arg0: i32) -> (i32, i32) {
    %c0_i32 = arith.constant 0 : i32
    %c0_i32_0 = arith.constant 0 : i32
    %c0_i32_1 = arith.constant 0 : i32
    return %c0_i32, %c0_i32_0 : i32, i32
  }
  func.func @transform_3(%arg0: i32) -> (i32, i32) {
    %c0_i32 = arith.constant 0 : i32
    %c0_i32_0 = arith.constant 0 : i32
    return %arg0, %c0_i32 : i32, i32
  }
  func.func @transform_4(%arg0: i32) -> (i32, i32) {
    %c0_i32 = arith.constant 0 : i32
    %c0_i32_0 = arith.constant 0 : i32
    %c0_i32_1 = arith.constant 0 : i32
    return %c0_i32, %c0_i32_0 : i32, i32
  }
  func.func @transform_5(%arg0: i32) -> (i32, i32) {
    %c0_i32 = arith.constant 0 : i32
    %c0_i32_0 = arith.constant 0 : i32
    %c0_i32_1 = arith.constant 0 : i32
    return %c0_i32, %c0_i32_0 : i32, i32
  }
}

module attributes {stable_mosaic.version = 11 : i64} {
  func.func @_fused_conv_kernel(%arg0: i32, %arg1: memref<1x144xf32, #tpu.memory_space<vmem>>, %arg2: memref<128x144xf32, #tpu.memory_space<vmem>>, %arg3: memref<144x32xf32, #tpu.memory_space<vmem>>, %arg4: memref<128x32xf32, #tpu.memory_space<vmem>>) attributes {dimension_semantics = [#tpu.dimension_semantics<parallel>], iteration_bounds = array<i64: 1>, scalar_prefetch = 0 : i64, scratch_operands = 0 : i64, tpu.core_type = #tpu.core_type<tc>, window_params = [{pipeline_mode = #tpu.pipeline_mode<synchronous>, transform_indices = @transform_0, window_bounds = array<i64: 1, 144>}, {transform_indices = @transform_1, window_bounds = array<i64: 128, 144>}, {pipeline_mode = #tpu.pipeline_mode<synchronous>, transform_indices = @transform_2, window_bounds = array<i64: 144, 32>}, {transform_indices = @transform_3, window_bounds = array<i64: 128, 32>}]} {
    %c0 = arith.constant 0 : index
    %c0_0 = arith.constant 0 : index
    %0 = vector.load %arg2[%c0, %c0_0] : memref<128x144xf32, #tpu.memory_space<vmem>>, vector<128x144xf32>
    %c0_1 = arith.constant 0 : index
    %c0_2 = arith.constant 0 : index
    %1 = vector.load %arg1[%c0_1, %c0_2] : memref<1x144xf32, #tpu.memory_space<vmem>>, vector<1x144xf32>
    %2 = vector.broadcast %1 : vector<1x144xf32> to vector<128x144xf32>
    %3 = arith.mulf %0, %2 : vector<128x144xf32>
    %cst = arith.constant 0.000000e+00 : f32
    %4 = vector.broadcast %cst : f32 to vector<128x144xf32>
    %5 = arith.cmpf oge, %3, %4 : vector<128x144xf32>
    %cst_3 = arith.constant 2.000000e-01 : f32
    %6 = vector.broadcast %cst_3 : f32 to vector<128x144xf32>
    %7 = arith.mulf %6, %3 : vector<128x144xf32>
    %8 = arith.select %5, %3, %7 : vector<128x144xi1>, vector<128x144xf32>
    %c0_4 = arith.constant 0 : index
    %c0_5 = arith.constant 0 : index
    %9 = vector.load %arg3[%c0_4, %c0_5] : memref<144x32xf32, #tpu.memory_space<vmem>>, vector<144x32xf32>
    %cst_6 = arith.constant dense<0.000000e+00> : vector<128x32xf32>
    %10 = tpu.matmul %8, %9, %cst_6 {dimension_numbers = #tpu.dot_dimension_numbers<[1], [0], [0], [1], [0, 0, 1, 1], [], []>} : vector<128x144xf32>, vector<144x32xf32>, vector<128x32xf32> -> vector<128x32xf32>
    %c0_7 = arith.constant 0 : index
    %c0_8 = arith.constant 0 : index
    %11 = vector.load %arg4[%c0_7, %c0_8] : memref<128x32xf32, #tpu.memory_space<vmem>>, vector<128x32xf32>
    tpu.vector_store %arg4[%c0_7, %c0_8], %10 {strides = array<i32>} : memref<128x32xf32, #tpu.memory_space<vmem>>, vector<128x32xf32>,
    return
  }
  func.func @transform_0(%arg0: i32) -> (i32, i32) {
    %c0_i32 = arith.constant 0 : i32
    %c0_i32_0 = arith.constant 0 : i32
    %c0_i32_1 = arith.constant 0 : i32
    return %c0_i32, %c0_i32_0 : i32, i32
  }
  func.func @transform_1(%arg0: i32) -> (i32, i32) {
    %c0_i32 = arith.constant 0 : i32
    %c0_i32_0 = arith.constant 0 : i32
    return %arg0, %c0_i32 : i32, i32
  }
  func.func @transform_2(%arg0: i32) -> (i32, i32) {
    %c0_i32 = arith.constant 0 : i32
    %c0_i32_0 = arith.constant 0 : i32
    %c0_i32_1 = arith.constant 0 : i32
    return %c0_i32, %c0_i32_0 : i32, i32
  }
  func.func @transform_3(%arg0: i32) -> (i32, i32) {
    %c0_i32 = arith.constant 0 : i32
    %c0_i32_0 = arith.constant 0 : i32
    return %arg0, %c0_i32 : i32, i32
  }
}

module attributes {stable_mosaic.version = 11 : i64} {
  func.func @_fused_conv_kernel(%arg0: i32, %arg1: memref<1x288xf32, #tpu.memory_space<vmem>>, %arg2: memref<32x288xf32, #tpu.memory_space<vmem>>, %arg3: memref<288x32xf32, #tpu.memory_space<vmem>>, %arg4: memref<32x32xf32, #tpu.memory_space<vmem>>, %arg5: memref<1x32xf32, #tpu.memory_space<vmem>>, %arg6: memref<1x32xf32, #tpu.memory_space<vmem>>) attributes {dimension_semantics = [#tpu.dimension_semantics<parallel>], iteration_bounds = array<i64: 1>, scalar_prefetch = 0 : i64, scratch_operands = 0 : i64, tpu.core_type = #tpu.core_type<tc>, window_params = [{pipeline_mode = #tpu.pipeline_mode<synchronous>, transform_indices = @transform_0, window_bounds = array<i64: 1, 288>}, {transform_indices = @transform_1, window_bounds = array<i64: 32, 288>}, {pipeline_mode = #tpu.pipeline_mode<synchronous>, transform_indices = @transform_2, window_bounds = array<i64: 288, 32>}, {transform_indices = @transform_3, window_bounds = array<i64: 32, 32>}, {pipeline_mode = #tpu.pipeline_mode<synchronous>, transform_indices = @transform_4, window_bounds = array<i64: 1, 32>}, {pipeline_mode = #tpu.pipeline_mode<synchronous>, transform_indices = @transform_5, window_bounds = array<i64: 1, 32>}]} {
    %c0 = arith.constant 0 : index
    %c0_0 = arith.constant 0 : index
    %0 = vector.load %arg2[%c0, %c0_0] : memref<32x288xf32, #tpu.memory_space<vmem>>, vector<32x288xf32>
    %c0_1 = arith.constant 0 : index
    %c0_2 = arith.constant 0 : index
    %1 = vector.load %arg1[%c0_1, %c0_2] : memref<1x288xf32, #tpu.memory_space<vmem>>, vector<1x288xf32>
    %2 = vector.broadcast %1 : vector<1x288xf32> to vector<32x288xf32>
    %3 = arith.mulf %0, %2 : vector<32x288xf32>
    %cst = arith.constant 0.000000e+00 : f32
    %4 = vector.broadcast %cst : f32 to vector<32x288xf32>
    %5 = arith.cmpf oge, %3, %4 : vector<32x288xf32>
    %cst_3 = arith.constant 2.000000e-01 : f32
    %6 = vector.broadcast %cst_3 : f32 to vector<32x288xf32>
    %7 = arith.mulf %6, %3 : vector<32x288xf32>
    %8 = arith.select %5, %3, %7 : vector<32x288xi1>, vector<32x288xf32>
    %c0_4 = arith.constant 0 : index
    %c0_5 = arith.constant 0 : index
    %9 = vector.load %arg3[%c0_4, %c0_5] : memref<288x32xf32, #tpu.memory_space<vmem>>, vector<288x32xf32>
    %cst_6 = arith.constant dense<0.000000e+00> : vector<32x32xf32>
    %10 = tpu.matmul %8, %9, %cst_6 {dimension_numbers = #tpu.dot_dimension_numbers<[1], [0], [0], [1], [0, 0, 1, 1], [], []>} : vector<32x288xf32>, vector<288x32xf32>, vector<32x32xf32> -> vector<32x32xf32>
    %c0_7 = arith.constant 0 : index
    %c0_8 = arith.constant 0 : index
    %11 = vector.load %arg4[%c0_7, %c0_8] : memref<32x32xf32, #tpu.memory_space<vmem>>, vector<32x32xf32>
    tpu.vector_store %arg4[%c0_7, %c0_8], %10 {strides = array<i32>} : memref<32x32xf32, #tpu.memory_space<vmem>>, vector<32x32xf32>,
    %cst_9 = arith.constant dense<0.000000e+00> : vector<32xf32>
    %12 = vector.multi_reduction <add>, %10, %cst_9 [0] : vector<32x32xf32> to vector<32xf32>
    %13 = vector.shape_cast %12 : vector<32xf32> to vector<1x32xf32>
    %c0_10 = arith.constant 0 : index
    %c0_11 = arith.constant 0 : index
    %14 = vector.load %arg5[%c0_10, %c0_11] : memref<1x32xf32, #tpu.memory_space<vmem>>, vector<1x32xf32>
    tpu.vector_store %arg5[%c0_10, %c0_11], %13 {strides = array<i32>} : memref<1x32xf32, #tpu.memory_space<vmem>>, vector<1x32xf32>,
    %15 = arith.mulf %10, %10 : vector<32x32xf32>
    %cst_12 = arith.constant dense<0.000000e+00> : vector<32xf32>
    %16 = vector.multi_reduction <add>, %15, %cst_12 [0] : vector<32x32xf32> to vector<32xf32>
    %17 = vector.shape_cast %16 : vector<32xf32> to vector<1x32xf32>
    %c0_13 = arith.constant 0 : index
    %c0_14 = arith.constant 0 : index
    %18 = vector.load %arg6[%c0_13, %c0_14] : memref<1x32xf32, #tpu.memory_space<vmem>>, vector<1x32xf32>
    tpu.vector_store %arg6[%c0_13, %c0_14], %17 {strides = array<i32>} : memref<1x32xf32, #tpu.memory_space<vmem>>, vector<1x32xf32>,
    return
  }
  func.func @transform_0(%arg0: i32) -> (i32, i32) {
    %c0_i32 = arith.constant 0 : i32
    %c0_i32_0 = arith.constant 0 : i32
    %c0_i32_1 = arith.constant 0 : i32
    return %c0_i32, %c0_i32_0 : i32, i32
  }
  func.func @transform_1(%arg0: i32) -> (i32, i32) {
    %c0_i32 = arith.constant 0 : i32
    %c0_i32_0 = arith.constant 0 : i32
    return %arg0, %c0_i32 : i32, i32
  }
  func.func @transform_2(%arg0: i32) -> (i32, i32) {
    %c0_i32 = arith.constant 0 : i32
    %c0_i32_0 = arith.constant 0 : i32
    %c0_i32_1 = arith.constant 0 : i32
    return %c0_i32, %c0_i32_0 : i32, i32
  }
  func.func @transform_3(%arg0: i32) -> (i32, i32) {
    %c0_i32 = arith.constant 0 : i32
    %c0_i32_0 = arith.constant 0 : i32
    return %arg0, %c0_i32 : i32, i32
  }
  func.func @transform_4(%arg0: i32) -> (i32, i32) {
    %c0_i32 = arith.constant 0 : i32
    %c0_i32_0 = arith.constant 0 : i32
    %c0_i32_1 = arith.constant 0 : i32
    return %c0_i32, %c0_i32_0 : i32, i32
  }
  func.func @transform_5(%arg0: i32) -> (i32, i32) {
    %c0_i32 = arith.constant 0 : i32
    %c0_i32_0 = arith.constant 0 : i32
    %c0_i32_1 = arith.constant 0 : i32
    return %c0_i32, %c0_i32_0 : i32, i32
  }
}

module attributes {stable_mosaic.version = 11 : i64} {
  func.func @_fused_conv_kernel(%arg0: i32, %arg1: memref<1x256xf32, #tpu.memory_space<vmem>>, %arg2: memref<8x256xf32, #tpu.memory_space<vmem>>, %arg3: memref<256x64xf32, #tpu.memory_space<vmem>>, %arg4: memref<8x64xf32, #tpu.memory_space<vmem>>, %arg5: memref<1x64xf32, #tpu.memory_space<vmem>>, %arg6: memref<1x64xf32, #tpu.memory_space<vmem>>) attributes {dimension_semantics = [#tpu.dimension_semantics<parallel>], iteration_bounds = array<i64: 1>, scalar_prefetch = 0 : i64, scratch_operands = 0 : i64, tpu.core_type = #tpu.core_type<tc>, window_params = [{pipeline_mode = #tpu.pipeline_mode<synchronous>, transform_indices = @transform_0, window_bounds = array<i64: 1, 256>}, {transform_indices = @transform_1, window_bounds = array<i64: 8, 256>}, {pipeline_mode = #tpu.pipeline_mode<synchronous>, transform_indices = @transform_2, window_bounds = array<i64: 256, 64>}, {transform_indices = @transform_3, window_bounds = array<i64: 8, 64>}, {pipeline_mode = #tpu.pipeline_mode<synchronous>, transform_indices = @transform_4, window_bounds = array<i64: 1, 64>}, {pipeline_mode = #tpu.pipeline_mode<synchronous>, transform_indices = @transform_5, window_bounds = array<i64: 1, 64>}]} {
    %c0 = arith.constant 0 : index
    %c0_0 = arith.constant 0 : index
    %0 = vector.load %arg2[%c0, %c0_0] : memref<8x256xf32, #tpu.memory_space<vmem>>, vector<8x256xf32>
    %c0_1 = arith.constant 0 : index
    %c0_2 = arith.constant 0 : index
    %1 = vector.load %arg1[%c0_1, %c0_2] : memref<1x256xf32, #tpu.memory_space<vmem>>, vector<1x256xf32>
    %2 = vector.broadcast %1 : vector<1x256xf32> to vector<8x256xf32>
    %3 = arith.mulf %0, %2 : vector<8x256xf32>
    %cst = arith.constant 0.000000e+00 : f32
    %4 = vector.broadcast %cst : f32 to vector<8x256xf32>
    %5 = arith.cmpf oge, %3, %4 : vector<8x256xf32>
    %cst_3 = arith.constant 2.000000e-01 : f32
    %6 = vector.broadcast %cst_3 : f32 to vector<8x256xf32>
    %7 = arith.mulf %6, %3 : vector<8x256xf32>
    %8 = arith.select %5, %3, %7 : vector<8x256xi1>, vector<8x256xf32>
    %c0_4 = arith.constant 0 : index
    %c0_5 = arith.constant 0 : index
    %9 = vector.load %arg3[%c0_4, %c0_5] : memref<256x64xf32, #tpu.memory_space<vmem>>, vector<256x64xf32>
    %cst_6 = arith.constant dense<0.000000e+00> : vector<8x64xf32>
    %10 = tpu.matmul %8, %9, %cst_6 {dimension_numbers = #tpu.dot_dimension_numbers<[1], [0], [0], [1], [0, 0, 1, 1], [], []>} : vector<8x256xf32>, vector<256x64xf32>, vector<8x64xf32> -> vector<8x64xf32>
    %c0_7 = arith.constant 0 : index
    %c0_8 = arith.constant 0 : index
    %11 = vector.load %arg4[%c0_7, %c0_8] : memref<8x64xf32, #tpu.memory_space<vmem>>, vector<8x64xf32>
    tpu.vector_store %arg4[%c0_7, %c0_8], %10 {strides = array<i32>} : memref<8x64xf32, #tpu.memory_space<vmem>>, vector<8x64xf32>,
    %cst_9 = arith.constant dense<0.000000e+00> : vector<64xf32>
    %12 = vector.multi_reduction <add>, %10, %cst_9 [0] : vector<8x64xf32> to vector<64xf32>
    %13 = vector.shape_cast %12 : vector<64xf32> to vector<1x64xf32>
    %c0_10 = arith.constant 0 : index
    %c0_11 = arith.constant 0 : index
    %14 = vector.load %arg5[%c0_10, %c0_11] : memref<1x64xf32, #tpu.memory_space<vmem>>, vector<1x64xf32>
    tpu.vector_store %arg5[%c0_10, %c0_11], %13 {strides = array<i32>} : memref<1x64xf32, #tpu.memory_space<vmem>>, vector<1x64xf32>,
    %15 = arith.mulf %10, %10 : vector<8x64xf32>
    %cst_12 = arith.constant dense<0.000000e+00> : vector<64xf32>
    %16 = vector.multi_reduction <add>, %15, %cst_12 [0] : vector<8x64xf32> to vector<64xf32>
    %17 = vector.shape_cast %16 : vector<64xf32> to vector<1x64xf32>
    %c0_13 = arith.constant 0 : index
    %c0_14 = arith.constant 0 : index
    %18 = vector.load %arg6[%c0_13, %c0_14] : memref<1x64xf32, #tpu.memory_space<vmem>>, vector<1x64xf32>
    tpu.vector_store %arg6[%c0_13, %c0_14], %17 {strides = array<i32>} : memref<1x64xf32, #tpu.memory_space<vmem>>, vector<1x64xf32>,
    return
  }
  func.func @transform_0(%arg0: i32) -> (i32, i32) {
    %c0_i32 = arith.constant 0 : i32
    %c0_i32_0 = arith.constant 0 : i32
    %c0_i32_1 = arith.constant 0 : i32
    return %c0_i32, %c0_i32_0 : i32, i32
  }
  func.func @transform_1(%arg0: i32) -> (i32, i32) {
    %c0_i32 = arith.constant 0 : i32
    %c0_i32_0 = arith.constant 0 : i32
    return %arg0, %c0_i32 : i32, i32
  }
  func.func @transform_2(%arg0: i32) -> (i32, i32) {
    %c0_i32 = arith.constant 0 : i32
    %c0_i32_0 = arith.constant 0 : i32
    %c0_i32_1 = arith.constant 0 : i32
    return %c0_i32, %c0_i32_0 : i32, i32
  }
  func.func @transform_3(%arg0: i32) -> (i32, i32) {
    %c0_i32 = arith.constant 0 : i32
    %c0_i32_0 = arith.constant 0 : i32
    return %arg0, %c0_i32 : i32, i32
  }
  func.func @transform_4(%arg0: i32) -> (i32, i32) {
    %c0_i32 = arith.constant 0 : i32
    %c0_i32_0 = arith.constant 0 : i32
    %c0_i32_1 = arith.constant 0 : i32
    return %c0_i32, %c0_i32_0 : i32, i32
  }
  func.func @transform_5(%arg0: i32) -> (i32, i32) {
    %c0_i32 = arith.constant 0 : i32
    %c0_i32_0 = arith.constant 0 : i32
    %c0_i32_1 = arith.constant 0 : i32
    return %c0_i32, %c0_i32_0 : i32, i32
  }
}

module attributes {stable_mosaic.version = 11 : i64} {
  func.func @_fused_conv_kernel(%arg0: i32, %arg1: memref<1x256xf32, #tpu.memory_space<vmem>>, %arg2: memref<8x256xf32, #tpu.memory_space<vmem>>, %arg3: memref<256x1xf32, #tpu.memory_space<vmem>>, %arg4: memref<8x1xf32, #tpu.memory_space<vmem>>) attributes {dimension_semantics = [#tpu.dimension_semantics<parallel>], iteration_bounds = array<i64: 1>, scalar_prefetch = 0 : i64, scratch_operands = 0 : i64, tpu.core_type = #tpu.core_type<tc>, window_params = [{pipeline_mode = #tpu.pipeline_mode<synchronous>, transform_indices = @transform_0, window_bounds = array<i64: 1, 256>}, {transform_indices = @transform_1, window_bounds = array<i64: 8, 256>}, {pipeline_mode = #tpu.pipeline_mode<synchronous>, transform_indices = @transform_2, window_bounds = array<i64: 256, 1>}, {transform_indices = @transform_3, window_bounds = array<i64: 8, 1>}]} {
    %c0 = arith.constant 0 : index
    %c0_0 = arith.constant 0 : index
    %0 = vector.load %arg2[%c0, %c0_0] : memref<8x256xf32, #tpu.memory_space<vmem>>, vector<8x256xf32>
    %c0_1 = arith.constant 0 : index
    %c0_2 = arith.constant 0 : index
    %1 = vector.load %arg1[%c0_1, %c0_2] : memref<1x256xf32, #tpu.memory_space<vmem>>, vector<1x256xf32>
    %2 = vector.broadcast %1 : vector<1x256xf32> to vector<8x256xf32>
    %3 = arith.mulf %0, %2 : vector<8x256xf32>
    %cst = arith.constant 0.000000e+00 : f32
    %4 = vector.broadcast %cst : f32 to vector<8x256xf32>
    %5 = arith.cmpf oge, %3, %4 : vector<8x256xf32>
    %cst_3 = arith.constant 2.000000e-01 : f32
    %6 = vector.broadcast %cst_3 : f32 to vector<8x256xf32>
    %7 = arith.mulf %6, %3 : vector<8x256xf32>
    %8 = arith.select %5, %3, %7 : vector<8x256xi1>, vector<8x256xf32>
    %c0_4 = arith.constant 0 : index
    %c0_5 = arith.constant 0 : index
    %9 = vector.load %arg3[%c0_4, %c0_5] : memref<256x1xf32, #tpu.memory_space<vmem>>, vector<256x1xf32>
    %cst_6 = arith.constant dense<0.000000e+00> : vector<8x1xf32>
    %10 = tpu.matmul %8, %9, %cst_6 {dimension_numbers = #tpu.dot_dimension_numbers<[1], [0], [0], [1], [0, 0, 1, 1], [], []>} : vector<8x256xf32>, vector<256x1xf32>, vector<8x1xf32> -> vector<8x1xf32>
    %c0_7 = arith.constant 0 : index
    %c0_8 = arith.constant 0 : index
    %11 = vector.load %arg4[%c0_7, %c0_8] : memref<8x1xf32, #tpu.memory_space<vmem>>, vector<8x1xf32>
    tpu.vector_store %arg4[%c0_7, %c0_8], %10 {strides = array<i32>} : memref<8x1xf32, #tpu.memory_space<vmem>>, vector<8x1xf32>,
    return
  }
  func.func @transform_0(%arg0: i32) -> (i32, i32) {
    %c0_i32 = arith.constant 0 : i32
    %c0_i32_0 = arith.constant 0 : i32
    %c0_i32_1 = arith.constant 0 : i32
    return %c0_i32, %c0_i32_0 : i32, i32
  }
  func.func @transform_1(%arg0: i32) -> (i32, i32) {
    %c0_i32 = arith.constant 0 : i32
    %c0_i32_0 = arith.constant 0 : i32
    return %arg0, %c0_i32 : i32, i32
  }
  func.func @transform_2(%arg0: i32) -> (i32, i32) {
    %c0_i32 = arith.constant 0 : i32
    %c0_i32_0 = arith.constant 0 : i32
    %c0_i32_1 = arith.constant 0 : i32
    return %c0_i32, %c0_i32_0 : i32, i32
  }
  func.func @transform_3(%arg0: i32) -> (i32, i32) {
    %c0_i32 = arith.constant 0 : i32
    %c0_i32_0 = arith.constant 0 : i32
    return %arg0, %c0_i32 : i32, i32
  }
}

</mosaic_0001>

<bundles_post_ra>
// kernel: masknet2_forward.7
= control target key start
LH: loop header
LB: loop body
LE: loop exit
PB: predicated region body
PF: predicated region fallthrough
CT: control target
= control target key end

     0   :  { %s2086_s12 = smov 0   ;;  %s2632_s0 = inlined_call_operand.vmem [shape: f32[1,16], index: 0, kind: input, shape index: {}]   ;;  %s2633_s1 = inlined_call_operand.vmem [shape: f32[8192,16], index: 1, kind: input, shape index: {}]   ;;  %s2634_s2 = inlined_call_operand.vmem [shape: f32[16,8], index: 2, kind: input, shape index: {}]   ;;  %s2635_s3 = inlined_call_operand.vmem [shape: f32[8192,8], index: 3, kind: output, shape index: {}]  }
   0x1 LB: > { %s1579_s0 = sadd.s32 4294967295, %s2064_s12   ;;  %p1583_p0 = scmp.ge.s32.totalorder %s2064_s12, 1  ;;  %s2064_s12 = sphi %s2086_s12, %s13_s12  }
   0x2   : > { %p138_p1 = scmp.lt.s32.totalorder %s2064_s12, 9 }
   0x4   : > { %p139_p2 = pnand %p1583_p0, %p138_p1 }
   0x5   : > { %v302_v0 = vld [vmem:[%s2634_s2] sm:$0xff] (!%p139_p2)  ;;  %v303_v1 = vld [vmem:[%s2634_s2 + $0x8] sm:$0xff] (!%p139_p2)  ;;  %s1584_s17 = sshll.u32 (!%p139_p2), %s1579_s0, 7  ;;  %vm304_vm0 = vcmask (!%p139_p2), 130048   ;;  %vm1394_vm1 = vcmask (!%p139_p2), 64512  }
   0x6   : > { %142 = sbr.rel (%p139_p2) target bundleno = 357 (0x165), region = 32  ;;  %v2044_v2 = vpack.c.bf16 (!%p139_p2), %v303_v1, %v302_v0  ;;  %p163_p3 = scmp.lt.s32.totalorder (!%p139_p2), %s1584_s17, 1023 }
   0x8   : > { %2045 = vmatprep.subr.bf16.mxu0 (!%p139_p2), %v2044_v2  ;;  %2048 = vmatprep.subr.bf16.mxu1 (!%p139_p2), %v2044_v2 }
   0x9   : > { %2047 = vmatpush3.bf16.msra.mxu0 (!%p139_p2), %v2044_v2  ;;  %2049 = vmatpush3.bf16.msra.mxu1 (!%p139_p2), %v2044_v2 }
   0xd   : > { %s2637_s17 = smov (!%p163_p3, %s1584_s17), 1023 }
   0xe   : > { %s1585_s18 = sshll.u32 %s2637_s17, 3 }
   0xf   : > { %s2108_s21 = scalar_lea.vmem %s2633_s1, %s1585_s18  ;;  %s2371_s24 = scalar_lea.vmem %s2635_s3, %s1585_s18 }
  0x10   : > { %v174_v3 = vld [vmem:[%s2108_s21] sm:$0xff]  ;;  %v175_v5 = vld [vmem:[%s2108_s21 + $0x8] sm:$0xff]  ;;  %v176_v7 = vld [vmem:[%s2108_s21 + $0x10] sm:$0xff] }
  0x11   : > { %v238_v4 = vld [vmem:[%s2108_s21 + $0x200] sm:$0xff]  ;;  %1852 = vmatprep.mubr.msk.f32.mxu0 %vm304_vm0, %v174_v3  ;;  %v239_v6 = vld [vmem:[%s2108_s21 + $0x208] sm:$0xff]  ;;  %v240_v8 = vld [vmem:[%s2108_s21 + $0x210] sm:$0xff] }
  0x12   : > { %1948 = vmatprep.mubr.msk.f32.mxu1 %vm304_vm0, %v238_v4  ;;  %1853 = vmatmul.mubr.msk.f32.vlgmr.msra.gmra.mrb[0].mxu0 %vm304_vm0, %v175_v5  ;;  %v177_v9 = vld [vmem:[%s2108_s21 + $0x18] sm:$0xff]  ;;  %v178_v11 = vld [vmem:[%s2108_s21 + $0x20] sm:$0xff]  ;;  %v179_v13 = vld [vmem:[%s2108_s21 + $0x28] sm:$0xff] }
  0x13   : > { %1949 = vmatmul.mubr.msk.f32.vlgmr.msra.gmra.mrb[0].mxu1 %vm304_vm0, %v239_v6  ;;  %1855 = vmatprep.mubr.msk.f32.mxu0 %vm304_vm0, %v176_v7  ;;  %v241_v10 = vld [vmem:[%s2108_s21 + $0x218] sm:$0xff]  ;;  %v242_v12 = vld [vmem:[%s2108_s21 + $0x220] sm:$0xff]  ;;  %v243_v14 = vld [vmem:[%s2108_s21 + $0x228] sm:$0xff] }
  0x14   : > { %1951 = vmatprep.mubr.msk.f32.mxu1 %vm304_vm0, %v240_v8  ;;  %v180_v15 = vld [vmem:[%s2108_s21 + $0x30] sm:$0xff]  ;;  %v181_v17 = vld [vmem:[%s2108_s21 + $0x38] sm:$0xff]  ;;  %v182_v19 = vld [vmem:[%s2108_s21 + $0x40] sm:$0xff] }
  0x15   : > { %v244_v16 = vld [vmem:[%s2108_s21 + $0x230] sm:$0xff]  ;;  %v245_v18 = vld [vmem:[%s2108_s21 + $0x238] sm:$0xff]  ;;  %v246_v20 = vld [vmem:[%s2108_s21 + $0x240] sm:$0xff] }
  0x16   : > { %1856 = vmatmul.mubr.msk.f32.gmra.mrb[2].mxu0 %vm304_vm0, %v177_v9  ;;  %v183_v21 = vld [vmem:[%s2108_s21 + $0x48] sm:$0xff]  ;;  %v184_v23 = vld [vmem:[%s2108_s21 + $0x50] sm:$0xff]  ;;  %v185_v25 = vld [vmem:[%s2108_s21 + $0x58] sm:$0xff] }
  0x17   : > { %1952 = vmatmul.mubr.msk.f32.gmra.mrb[2].mxu1 %vm304_vm0, %v241_v10  ;;  %1858 = vmatprep.mubr.msk.f32.mxu0 %vm304_vm0, %v178_v11  ;;  %v247_v22 = vld [vmem:[%s2108_s21 + $0x248] sm:$0xff]  ;;  %v248_v24 = vld [vmem:[%s2108_s21 + $0x250] sm:$0xff]  ;;  %v249_v26 = vld [vmem:[%s2108_s21 + $0x258] sm:$0xff] }
  0x18   : > { %1954 = vmatprep.mubr.msk.f32.mxu1 %vm304_vm0, %v242_v12  ;;  %v186_v27 = vld [vmem:[%s2108_s21 + $0x60] sm:$0xff]  ;;  %v187_v29 = vld [vmem:[%s2108_s21 + $0x68] sm:$0xff]  ;;  %v188_v31 = vld [vmem:[%s2108_s21 + $0x70] sm:$0xff] }
  0x19   : > { %v250_v28 = vld [vmem:[%s2108_s21 + $0x260] sm:$0xff]  ;;  %v251_v30 = vld [vmem:[%s2108_s21 + $0x268] sm:$0xff]  ;;  %v252_v32 = vld [vmem:[%s2108_s21 + $0x270] sm:$0xff] }
  0x1a   : > { %1859 = vmatmul.mubr.msk.f32.gmra.mrb[4].mxu0 %vm304_vm0, %v179_v13  ;;  %v189_v33 = vld [vmem:[%s2108_s21 + $0x78] sm:$0xff]  ;;  %v190_v35 = vld [vmem:[%s2108_s21 + $0x80] sm:$0xff]  ;;  %v191_v37 = vld [vmem:[%s2108_s21 + $0x88] sm:$0xff] }
  0x1b   : > { %1955 = vmatmul.mubr.msk.f32.gmra.mrb[4].mxu1 %vm304_vm0, %v243_v14  ;;  %1861 = vmatprep.mubr.msk.f32.mxu0 %vm304_vm0, %v180_v15  ;;  %v253_v34 = vld [vmem:[%s2108_s21 + $0x278] sm:$0xff]  ;;  %v254_v36 = vld [vmem:[%s2108_s21 + $0x280] sm:$0xff]  ;;  %v255_v38 = vld [vmem:[%s2108_s21 + $0x288] sm:$0xff] }
  0x1c   : > { %1957 = vmatprep.mubr.msk.f32.mxu1 %vm304_vm0, %v244_v16  ;;  %v192_v39 = vld [vmem:[%s2108_s21 + $0x90] sm:$0xff]  ;;  %v193_v41 = vld [vmem:[%s2108_s21 + $0x98] sm:$0xff]  ;;  %v194_v43 = vld [vmem:[%s2108_s21 + $0xa0] sm:$0xff] }
  0x1d   : > { %v256_v40 = vld [vmem:[%s2108_s21 + $0x290] sm:$0xff]  ;;  %v257_v42 = vld [vmem:[%s2108_s21 + $0x298] sm:$0xff]  ;;  %v258_v44 = vld [vmem:[%s2108_s21 + $0x2a0] sm:$0xff] }
  0x1e   : > { %1862 = vmatmul.mubr.msk.f32.gmra.mrb[6].mxu0 %vm304_vm0, %v181_v17  ;;  %v195_v45 = vld [vmem:[%s2108_s21 + $0xa8] sm:$0xff]  ;;  %v196_v47 = vld [vmem:[%s2108_s21 + $0xb0] sm:$0xff]  ;;  %v197_v49 = vld [vmem:[%s2108_s21 + $0xb8] sm:$0xff] }
  0x1f   : > { %1958 = vmatmul.mubr.msk.f32.gmra.mrb[6].mxu1 %vm304_vm0, %v245_v18  ;;  %1864 = vmatprep.mubr.msk.f32.mxu0 %vm304_vm0, %v182_v19  ;;  %v259_v46 = vld [vmem:[%s2108_s21 + $0x2a8] sm:$0xff]  ;;  %v260_v48 = vld [vmem:[%s2108_s21 + $0x2b0] sm:$0xff]  ;;  %v261_v50 = vld [vmem:[%s2108_s21 + $0x2b8] sm:$0xff] }
  0x20   : > { %1960 = vmatprep.mubr.msk.f32.mxu1 %vm304_vm0, %v246_v20  ;;  %v198_v51 = vld [vmem:[%s2108_s21 + $0xc0] sm:$0xff]  ;;  %v199_v53 = vld [vmem:[%s2108_s21 + $0xc8] sm:$0xff]  ;;  %v200_v55 = vld [vmem:[%s2108_s21 + $0xd0] sm:$0xff] }
  0x21   : > { %v262_v52 = vld [vmem:[%s2108_s21 + $0x2c0] sm:$0xff]  ;;  %v263_v54 = vld [vmem:[%s2108_s21 + $0x2c8] sm:$0xff]  ;;  %v264_v56 = vld [vmem:[%s2108_s21 + $0x2d0] sm:$0xff] }
  0x22   : > { %1865 = vmatmul.mubr.msk.f32.gmra.mrb[8].mxu0 %vm304_vm0, %v183_v21  ;;  %v201_v57 = vld [vmem:[%s2108_s21 + $0xd8] sm:$0xff]  ;;  %v202_v59 = vld [vmem:[%s2108_s21 + $0xe0] sm:$0xff]  ;;  %v203_v61 = vld [vmem:[%s2108_s21 + $0xe8] sm:$0xff] }
  0x23   : > { %1961 = vmatmul.mubr.msk.f32.gmra.mrb[8].mxu1 %vm304_vm0, %v247_v22  ;;  %1867 = vmatprep.mubr.msk.f32.mxu0 %vm304_vm0, %v184_v23  ;;  %v265_v58 = vld [vmem:[%s2108_s21 + $0x2d8] sm:$0xff]  ;;  %v266_v60 = vld [vmem:[%s2108_s21 + $0x2e0] sm:$0xff]  ;;  %v267_v62 = vld [vmem:[%s2108_s21 + $0x2e8] sm:$0xff] }
  0x24   : > { %1963 = vmatprep.mubr.msk.f32.mxu1 %vm304_vm0, %v248_v24  ;;  %v204_v63 = vld [vmem:[%s2108_s21 + $0xf0] sm:$0xff]  ;;  %v205_v1 = vld [vmem:[%s2108_s21 + $0xf8] sm:$0xff]  ;;  %v206_v3 = vld [vmem:[%s2108_s21 + $0x100] sm:$0xff] }
  0x25   : > { %v268_v0 = vld [vmem:[%s2108_s21 + $0x2f0] sm:$0xff]  ;;  %v269_v2 = vld [vmem:[%s2108_s21 + $0x2f8] sm:$0xff]  ;;  %v270_v4 = vld [vmem:[%s2108_s21 + $0x300] sm:$0xff] }
  0x26   : > { %1868 = vmatmul.mubr.msk.f32.gmra.mrb[10].mxu0 %vm304_vm0, %v185_v25  ;;  %v207_v5 = vld [vmem:[%s2108_s21 + $0x108] sm:$0xff]  ;;  %v208_v7 = vld [vmem:[%s2108_s21 + $0x110] sm:$0xff]  ;;  %v209_v9 = vld [vmem:[%s2108_s21 + $0x118] sm:$0xff] }
  0x27   : > { %1964 = vmatmul.mubr.msk.f32.gmra.mrb[10].mxu1 %vm304_vm0, %v249_v26  ;;  %1870 = vmatprep.mubr.msk.f32.mxu0 %vm304_vm0, %v186_v27  ;;  %v271_v6 = vld [vmem:[%s2108_s21 + $0x308] sm:$0xff]  ;;  %v272_v8 = vld [vmem:[%s2108_s21 + $0x310] sm:$0xff]  ;;  %v273_v10 = vld [vmem:[%s2108_s21 + $0x318] sm:$0xff] }
  0x28   : > { %1966 = vmatprep.mubr.msk.f32.mxu1 %vm304_vm0, %v250_v28  ;;  %v210_v11 = vld [vmem:[%s2108_s21 + $0x120] sm:$0xff]  ;;  %v211_v13 = vld [vmem:[%s2108_s21 + $0x128] sm:$0xff]  ;;  %v212_v15 = vld [vmem:[%s2108_s21 + $0x130] sm:$0xff] }
  0x29   : > { %v274_v12 = vld [vmem:[%s2108_s21 + $0x320] sm:$0xff]  ;;  %v275_v14 = vld [vmem:[%s2108_s21 + $0x328] sm:$0xff]  ;;  %v276_v16 = vld [vmem:[%s2108_s21 + $0x330] sm:$0xff] }
  0x2a   : > { %1871 = vmatmul.mubr.msk.f32.gmra.mrb[12].mxu0 %vm304_vm0, %v187_v29  ;;  %v213_v17 = vld [vmem:[%s2108_s21 + $0x138] sm:$0xff]  ;;  %v214_v19 = vld [vmem:[%s2108_s21 + $0x140] sm:$0xff]  ;;  %v215_v21 = vld [vmem:[%s2108_s21 + $0x148] sm:$0xff] }
  0x2b   : > { %1967 = vmatmul.mubr.msk.f32.gmra.mrb[12].mxu1 %vm304_vm0, %v251_v30  ;;  %1873 = vmatprep.mubr.msk.f32.mxu0 %vm304_vm0, %v188_v31  ;;  %v277_v18 = vld [vmem:[%s2108_s21 + $0x338] sm:$0xff]  ;;  %v278_v20 = vld [vmem:[%s2108_s21 + $0x340] sm:$0xff]  ;;  %v279_v22 = vld [vmem:[%s2108_s21 + $0x348] sm:$0xff] }
  0x2c   : > { %1969 = vmatprep.mubr.msk.f32.mxu1 %vm304_vm0, %v252_v32  ;;  %v216_v23 = vld [vmem:[%s2108_s21 + $0x150] sm:$0xff]  ;;  %v217_v25 = vld [vmem:[%s2108_s21 + $0x158] sm:$0xff]  ;;  %v218_v27 = vld [vmem:[%s2108_s21 + $0x160] sm:$0xff] }
  0x2d   : > { %v280_v24 = vld [vmem:[%s2108_s21 + $0x350] sm:$0xff]  ;;  %v281_v26 = vld [vmem:[%s2108_s21 + $0x358] sm:$0xff]  ;;  %v282_v28 = vld [vmem:[%s2108_s21 + $0x360] sm:$0xff] }
  0x2e   : > { %1874 = vmatmul.mubr.msk.f32.gmra.mrb[14].mxu0 %vm304_vm0, %v189_v33  ;;  %v219_v29 = vld [vmem:[%s2108_s21 + $0x168] sm:$0xff]  ;;  %v220_v31 = vld [vmem:[%s2108_s21 + $0x170] sm:$0xff]  ;;  %v221_v33 = vld [vmem:[%s2108_s21 + $0x178] sm:$0xff] }
  0x2f   : > { %1970 = vmatmul.mubr.msk.f32.gmra.mrb[14].mxu1 %vm304_vm0, %v253_v34  ;;  %1876 = vmatprep.mubr.msk.f32.mxu0 %vm304_vm0, %v190_v35  ;;  %v283_v30 = vld [vmem:[%s2108_s21 + $0x368] sm:$0xff]  ;;  %v284_v32 = vld [vmem:[%s2108_s21 + $0x370] sm:$0xff]  ;;  %v285_v34 = vld [vmem:[%s2108_s21 + $0x378] sm:$0xff] }
  0x30   : > { %1972 = vmatprep.mubr.msk.f32.mxu1 %vm304_vm0, %v254_v36  ;;  %v222_v35 = vld [vmem:[%s2108_s21 + $0x180] sm:$0xff] }
  0x31   : > { %v286_v36 = vld [vmem:[%s2108_s21 + $0x380] sm:$0xff] }
  0x32   : > { %1877 = vmatmul.mubr.msk.f32.gmra.mrb[16].mxu0 %vm304_vm0, %v191_v37  ;;  %v223_v37 = vld [vmem:[%s2108_s21 + $0x188] sm:$0xff] }
  0x33   : > { %1973 = vmatmul.mubr.msk.f32.gmra.mrb[16].mxu1 %vm304_vm0, %v255_v38  ;;  %1879 = vmatprep.mubr.msk.f32.mxu0 %vm304_vm0, %v192_v39  ;;  %v287_v38 = vld [vmem:[%s2108_s21 + $0x388] sm:$0xff]  ;;  %v224_v39 = vld [vmem:[%s2108_s21 + $0x190] sm:$0xff] }
  0x34   : > { %1975 = vmatprep.mubr.msk.f32.mxu1 %vm304_vm0, %v256_v40  ;;  %v288_v40 = vld [vmem:[%s2108_s21 + $0x390] sm:$0xff] }
  0x36   : > { %1880 = vmatmul.mubr.msk.f32.gmra.mrb[18].mxu0 %vm304_vm0, %v193_v41  ;;  %v225_v41 = vld [vmem:[%s2108_s21 + $0x198] sm:$0xff] }
  0x37   : > { %1976 = vmatmul.mubr.msk.f32.gmra.mrb[18].mxu1 %vm304_vm0, %v257_v42  ;;  %1882 = vmatprep.mubr.msk.f32.mxu0 %vm304_vm0, %v194_v43  ;;  %v289_v42 = vld [vmem:[%s2108_s21 + $0x398] sm:$0xff]  ;;  %v226_v43 = vld [vmem:[%s2108_s21 + $0x1a0] sm:$0xff] }
  0x38   : > { %1978 = vmatprep.mubr.msk.f32.mxu1 %vm304_vm0, %v258_v44  ;;  %v290_v44 = vld [vmem:[%s2108_s21 + $0x3a0] sm:$0xff] }
  0x3a   : > { %1883 = vmatmul.mubr.msk.f32.gmra.mrb[20].mxu0 %vm304_vm0, %v195_v45  ;;  %v227_v45 = vld [vmem:[%s2108_s21 + $0x1a8] sm:$0xff] }
  0x3b   : > { %1979 = vmatmul.mubr.msk.f32.gmra.mrb[20].mxu1 %vm304_vm0, %v259_v46  ;;  %1885 = vmatprep.mubr.msk.f32.mxu0 %vm304_vm0, %v196_v47  ;;  %v291_v46 = vld [vmem:[%s2108_s21 + $0x3a8] sm:$0xff]  ;;  %v228_v47 = vld [vmem:[%s2108_s21 + $0x1b0] sm:$0xff] }
  0x3c   : > { %1981 = vmatprep.mubr.msk.f32.mxu1 %vm304_vm0, %v260_v48  ;;  %v292_v48 = vld [vmem:[%s2108_s21 + $0x3b0] sm:$0xff] }
  0x3e   : > { %1886 = vmatmul.mubr.msk.f32.gmra.mrb[22].mxu0 %vm304_vm0, %v197_v49  ;;  %v229_v49 = vld [vmem:[%s2108_s21 + $0x1b8] sm:$0xff] }
  0x3f   : > { %1982 = vmatmul.mubr.msk.f32.gmra.mrb[22].mxu1 %vm304_vm0, %v261_v50  ;;  %1888 = vmatprep.mubr.msk.f32.mxu0 %vm304_vm0, %v198_v51  ;;  %v293_v50 = vld [vmem:[%s2108_s21 + $0x3b8] sm:$0xff]  ;;  %v230_v51 = vld [vmem:[%s2108_s21 + $0x1c0] sm:$0xff] }
  0x40   : > { %1984 = vmatprep.mubr.msk.f32.mxu1 %vm304_vm0, %v262_v52  ;;  %v294_v52 = vld [vmem:[%s2108_s21 + $0x3c0] sm:$0xff] }
  0x42   : > { %1889 = vmatmul.mubr.msk.f32.gmra.mrb[24].mxu0 %vm304_vm0, %v199_v53  ;;  %v231_v53 = vld [vmem:[%s2108_s21 + $0x1c8] sm:$0xff] }
  0x43   : > { %1985 = vmatmul.mubr.msk.f32.gmra.mrb[24].mxu1 %vm304_vm0, %v263_v54  ;;  %1891 = vmatprep.mubr.msk.f32.mxu0 %vm304_vm0, %v200_v55  ;;  %v295_v54 = vld [vmem:[%s2108_s21 + $0x3c8] sm:$0xff]  ;;  %v232_v55 = vld [vmem:[%s2108_s21 + $0x1d0] sm:$0xff] }
  0x44   : > { %1987 = vmatprep.mubr.msk.f32.mxu1 %vm304_vm0, %v264_v56  ;;  %v296_v56 = vld [vmem:[%s2108_s21 + $0x3d0] sm:$0xff] }
  0x46   : > { %1892 = vmatmul.mubr.msk.f32.gmra.mrb[26].mxu0 %vm304_vm0, %v201_v57  ;;  %v233_v57 = vld [vmem:[%s2108_s21 + $0x1d8] sm:$0xff] }
  0x47   : > { %1988 = vmatmul.mubr.msk.f32.gmra.mrb[26].mxu1 %vm304_vm0, %v265_v58  ;;  %1894 = vmatprep.mubr.msk.f32.mxu0 %vm304_vm0, %v202_v59  ;;  %v297_v58 = vld [vmem:[%s2108_s21 + $0x3d8] sm:$0xff]  ;;  %v234_v59 = vld [vmem:[%s2108_s21 + $0x1e0] sm:$0xff] }
  0x48   : > { %1990 = vmatprep.mubr.msk.f32.mxu1 %vm304_vm0, %v266_v60  ;;  %v298_v60 = vld [vmem:[%s2108_s21 + $0x3e0] sm:$0xff] }
  0x4a   : > { %1895 = vmatmul.mubr.msk.f32.gmra.mrb[28].mxu0 %vm304_vm0, %v203_v61  ;;  %v235_v61 = vld [vmem:[%s2108_s21 + $0x1e8] sm:$0xff] }
  0x4b   : > { %1991 = vmatmul.mubr.msk.f32.gmra.mrb[28].mxu1 %vm304_vm0, %v267_v62  ;;  %1897 = vmatprep.mubr.msk.f32.mxu0 %vm304_vm0, %v204_v63  ;;  %v299_v62 = vld [vmem:[%s2108_s21 + $0x3e8] sm:$0xff]  ;;  %v236_v63 = vld [vmem:[%s2108_s21 + $0x1f0] sm:$0xff] }
  0x4c   : > { %1993 = vmatprep.mubr.msk.f32.mxu1 %vm304_vm0, %v268_v0  ;;  %v300_v0 = vld [vmem:[%s2108_s21 + $0x3f0] sm:$0xff] }
  0x4e   : > { %1898 = vmatmul.mubr.msk.f32.gmra.mrb[30].mxu0 %vm304_vm0, %v205_v1  ;;  %v237_v1 = vld [vmem:[%s2108_s21 + $0x1f8] sm:$0xff] }
  0x4f   : > { %1994 = vmatmul.mubr.msk.f32.gmra.mrb[30].mxu1 %vm304_vm0, %v269_v2  ;;  %1900 = vmatprep.mubr.msk.f32.mxu0 %vm304_vm0, %v206_v3  ;;  %v301_v2 = vld [vmem:[%s2108_s21 + $0x3f8] sm:$0xff] }
  0x50   : > { %1996 = vmatprep.mubr.msk.f32.mxu1 %vm304_vm0, %v270_v4 }
  0x52   : > { %1901 = vmatmul.mubr.msk.f32.gmra.mrb[32].mxu0 %vm304_vm0, %v207_v5 }
  0x53   : > { %1997 = vmatmul.mubr.msk.f32.gmra.mrb[32].mxu1 %vm304_vm0, %v271_v6  ;;  %1903 = vmatprep.mubr.msk.f32.mxu0 %vm304_vm0, %v208_v7 }
  0x54   : > { %1999 = vmatprep.mubr.msk.f32.mxu1 %vm304_vm0, %v272_v8 }
  0x56   : > { %1904 = vmatmul.mubr.msk.f32.gmra.mrb[34].mxu0 %vm304_vm0, %v209_v9 }
  0x57   : > { %2000 = vmatmul.mubr.msk.f32.gmra.mrb[34].mxu1 %vm304_vm0, %v273_v10  ;;  %1906 = vmatprep.mubr.msk.f32.mxu0 %vm304_vm0, %v210_v11 }
  0x58   : > { %2002 = vmatprep.mubr.msk.f32.mxu1 %vm304_vm0, %v274_v12 }
  0x5a   : > { %1907 = vmatmul.mubr.msk.f32.gmra.mrb[36].mxu0 %vm304_vm0, %v211_v13 }
  0x5b   : > { %2003 = vmatmul.mubr.msk.f32.gmra.mrb[36].mxu1 %vm304_vm0, %v275_v14  ;;  %1909 = vmatprep.mubr.msk.f32.mxu0 %vm304_vm0, %v212_v15 }
  0x5c   : > { %2005 = vmatprep.mubr.msk.f32.mxu1 %vm304_vm0, %v276_v16 }
  0x5e   : > { %1910 = vmatmul.mubr.msk.f32.gmra.mrb[38].mxu0 %vm304_vm0, %v213_v17 }
  0x5f   : > { %2006 = vmatmul.mubr.msk.f32.gmra.mrb[38].mxu1 %vm304_vm0, %v277_v18  ;;  %1912 = vmatprep.mubr.msk.f32.mxu0 %vm304_vm0, %v214_v19 }
  0x60   : > { %2008 = vmatprep.mubr.msk.f32.mxu1 %vm304_vm0, %v278_v20 }
  0x62   : > { %1913 = vmatmul.mubr.msk.f32.gmra.mrb[40].mxu0 %vm304_vm0, %v215_v21 }
  0x63   : > { %2009 = vmatmul.mubr.msk.f32.gmra.mrb[40].mxu1 %vm304_vm0, %v279_v22  ;;  %1915 = vmatprep.mubr.msk.f32.mxu0 %vm304_vm0, %v216_v23 }
  0x64   : > { %2011 = vmatprep.mubr.msk.f32.mxu1 %vm304_vm0, %v280_v24 }
  0x66   : > { %1916 = vmatmul.mubr.msk.f32.gmra.mrb[42].mxu0 %vm304_vm0, %v217_v25 }
  0x67   : > { %2012 = vmatmul.mubr.msk.f32.gmra.mrb[42].mxu1 %vm304_vm0, %v281_v26  ;;  %1918 = vmatprep.mubr.msk.f32.mxu0 %vm304_vm0, %v218_v27 }
  0x68   : > { %2014 = vmatprep.mubr.msk.f32.mxu1 %vm304_vm0, %v282_v28 }
  0x6a   : > { %1919 = vmatmul.mubr.msk.f32.gmra.mrb[44].mxu0 %vm304_vm0, %v219_v29 }
  0x6b   : > { %2015 = vmatmul.mubr.msk.f32.gmra.mrb[44].mxu1 %vm304_vm0, %v283_v30  ;;  %1921 = vmatprep.mubr.msk.f32.mxu0 %vm304_vm0, %v220_v31 }
  0x6c   : > { %2017 = vmatprep.mubr.msk.f32.mxu1 %vm304_vm0, %v284_v32 }
  0x6e   : > { %1922 = vmatmul.mubr.msk.f32.gmra.mrb[46].mxu0 %vm304_vm0, %v221_v33 }
  0x6f   : > { %2018 = vmatmul.mubr.msk.f32.gmra.mrb[46].mxu1 %vm304_vm0, %v285_v34  ;;  %1924 = vmatprep.mubr.msk.f32.mxu0 %vm304_vm0, %v222_v35 }
  0x70   : > { %2020 = vmatprep.mubr.msk.f32.mxu1 %vm304_vm0, %v286_v36 }
  0x72   : > { %1925 = vmatmul.mubr.msk.f32.gmra.mrb[48].mxu0 %vm304_vm0, %v223_v37 }
  0x73   : > { %2021 = vmatmul.mubr.msk.f32.gmra.mrb[48].mxu1 %vm304_vm0, %v287_v38  ;;  %1927 = vmatprep.mubr.msk.f32.mxu0 %vm304_vm0, %v224_v39 }
  0x74   : > { %2023 = vmatprep.mubr.msk.f32.mxu1 %vm304_vm0, %v288_v40 }
  0x76   : > { %1928 = vmatmul.mubr.msk.f32.gmra.mrb[50].mxu0 %vm304_vm0, %v225_v41 }
  0x77   : > { %2024 = vmatmul.mubr.msk.f32.gmra.mrb[50].mxu1 %vm304_vm0, %v289_v42  ;;  %1930 = vmatprep.mubr.msk.f32.mxu0 %vm304_vm0, %v226_v43 }
  0x78   : > { %2026 = vmatprep.mubr.msk.f32.mxu1 %vm304_vm0, %v290_v44 }
  0x7a   : > { %1931 = vmatmul.mubr.msk.f32.gmra.mrb[52].mxu0 %vm304_vm0, %v227_v45 }
  0x7b   : > { %2027 = vmatmul.mubr.msk.f32.gmra.mrb[52].mxu1 %vm304_vm0, %v291_v46  ;;  %1933 = vmatprep.mubr.msk.f32.mxu0 %vm304_vm0, %v228_v47 }
  0x7c   : > { %2029 = vmatprep.mubr.msk.f32.mxu1 %vm304_vm0, %v292_v48 }
  0x7e   : > { %1934 = vmatmul.mubr.msk.f32.gmra.mrb[54].mxu0 %vm304_vm0, %v229_v49 }
  0x7f   : > { %2030 = vmatmul.mubr.msk.f32.gmra.mrb[54].mxu1 %vm304_vm0, %v293_v50  ;;  %1936 = vmatprep.mubr.msk.f32.mxu0 %vm304_vm0, %v230_v51 }
  0x80   : > { %2032 = vmatprep.mubr.msk.f32.mxu1 %vm304_vm0, %v294_v52 }
  0x82   : > { %1937 = vmatmul.mubr.msk.f32.gmra.mrb[56].mxu0 %vm304_vm0, %v231_v53 }
  0x83   : > { %2033 = vmatmul.mubr.msk.f32.gmra.mrb[56].mxu1 %vm304_vm0, %v295_v54  ;;  %1939 = vmatprep.mubr.msk.f32.mxu0 %vm304_vm0, %v232_v55 }
  0x84   : > { %2035 = vmatprep.mubr.msk.f32.mxu1 %vm304_vm0, %v296_v56 }
  0x86   : > { %1940 = vmatmul.mubr.msk.f32.gmra.mrb[58].mxu0 %vm304_vm0, %v233_v57 }
  0x87   : > { %2036 = vmatmul.mubr.msk.f32.gmra.mrb[58].mxu1 %vm304_vm0, %v297_v58  ;;  %1942 = vmatprep.mubr.msk.f32.mxu0 %vm304_vm0, %v234_v59 }
  0x88   : > { %2038 = vmatprep.mubr.msk.f32.mxu1 %vm304_vm0, %v298_v60 }
  0x8a   : > { %1943 = vmatmul.mubr.msk.f32.gmra.mrb[60].mxu0 %vm304_vm0, %v235_v61 }
  0x8b   : > { %2039 = vmatmul.mubr.msk.f32.gmra.mrb[60].mxu1 %vm304_vm0, %v299_v62  ;;  %1945 = vmatprep.mubr.msk.f32.mxu0 %vm304_vm0, %v236_v63 }
  0x8c   : > { %2041 = vmatprep.mubr.msk.f32.mxu1 %vm304_vm0, %v300_v0 }
  0x8e   : > { %1946 = vmatmul.mubr.msk.f32.gmra.mrb[62].mxu0 %vm304_vm0, %v237_v1 }
  0x8f   : > { %2042 = vmatmul.mubr.msk.f32.gmra.mrb[62].mxu1 %vm304_vm0, %v301_v2 }
  0xe5   : > { %v1854_v3 = vpop.f32.mrb[0].mxu0 }
  0xe6   : > { %v1950_v4 = vpop.f32.mrb[0].mxu1  ;;  %1396 = vst.msk [vmem:[%s2371_s24 + $0x8] sm:$0xff] %vm1394_vm1, %v1854_v3  ;;  %v755_v5 = vpop.f32.mrb[1].mxu0 }
  0xe7   : > { %1460 = vst.msk [vmem:[%s2371_s24 + $0x208] sm:$0xff] %vm1394_vm1, %v1950_v4  ;;  %v1075_v6 = vpop.f32.mrb[1].mxu1  ;;  %1395 = vst.msk [vmem:[%s2371_s24] sm:$0xff] %vm1394_vm1, %v755_v5 }
  0xe8   : > { %1459 = vst.msk [vmem:[%s2371_s24 + $0x200] sm:$0xff] %vm1394_vm1, %v1075_v6 }
  0xe9   : > { %v1857_v7 = vpop.f32.mrb[2].mxu0 }
  0xea   : > { %v1953_v8 = vpop.f32.mrb[2].mxu1  ;;  %1398 = vst.msk [vmem:[%s2371_s24 + $0x18] sm:$0xff] %vm1394_vm1, %v1857_v7  ;;  %v765_v9 = vpop.f32.mrb[3].mxu0 }
  0xeb   : > { %1462 = vst.msk [vmem:[%s2371_s24 + $0x218] sm:$0xff] %vm1394_vm1, %v1953_v8  ;;  %v1085_v10 = vpop.f32.mrb[3].mxu1  ;;  %1397 = vst.msk [vmem:[%s2371_s24 + $0x10] sm:$0xff] %vm1394_vm1, %v765_v9 }
  0xec   : > { %1461 = vst.msk [vmem:[%s2371_s24 + $0x210] sm:$0xff] %vm1394_vm1, %v1085_v10 }
  0xed   : > { %v1860_v11 = vpop.f32.mrb[4].mxu0 }
  0xee   : > { %v1956_v12 = vpop.f32.mrb[4].mxu1  ;;  %1400 = vst.msk [vmem:[%s2371_s24 + $0x28] sm:$0xff] %vm1394_vm1, %v1860_v11  ;;  %v775_v13 = vpop.f32.mrb[5].mxu0 }
  0xef   : > { %1464 = vst.msk [vmem:[%s2371_s24 + $0x228] sm:$0xff] %vm1394_vm1, %v1956_v12  ;;  %v1095_v14 = vpop.f32.mrb[5].mxu1  ;;  %1399 = vst.msk [vmem:[%s2371_s24 + $0x20] sm:$0xff] %vm1394_vm1, %v775_v13 }
  0xf0   : > { %1463 = vst.msk [vmem:[%s2371_s24 + $0x220] sm:$0xff] %vm1394_vm1, %v1095_v14 }
  0xf1   : > { %v1863_v15 = vpop.f32.mrb[6].mxu0 }
  0xf2   : > { %v1959_v16 = vpop.f32.mrb[6].mxu1  ;;  %1402 = vst.msk [vmem:[%s2371_s24 + $0x38] sm:$0xff] %vm1394_vm1, %v1863_v15  ;;  %v785_v17 = vpop.f32.mrb[7].mxu0 }
  0xf3   : > { %1466 = vst.msk [vmem:[%s2371_s24 + $0x238] sm:$0xff] %vm1394_vm1, %v1959_v16  ;;  %v1105_v18 = vpop.f32.mrb[7].mxu1  ;;  %1401 = vst.msk [vmem:[%s2371_s24 + $0x30] sm:$0xff] %vm1394_vm1, %v785_v17 }
  0xf4   : > { %1465 = vst.msk [vmem:[%s2371_s24 + $0x230] sm:$0xff] %vm1394_vm1, %v1105_v18 }
  0xf5   : > { %v1866_v19 = vpop.f32.mrb[8].mxu0 }
  0xf6   : > { %v1962_v20 = vpop.f32.mrb[8].mxu1  ;;  %1404 = vst.msk [vmem:[%s2371_s24 + $0x48] sm:$0xff] %vm1394_vm1, %v1866_v19  ;;  %v795_v21 = vpop.f32.mrb[9].mxu0 }
  0xf7   : > { %1468 = vst.msk [vmem:[%s2371_s24 + $0x248] sm:$0xff] %vm1394_vm1, %v1962_v20  ;;  %v1115_v22 = vpop.f32.mrb[9].mxu1  ;;  %1403 = vst.msk [vmem:[%s2371_s24 + $0x40] sm:$0xff] %vm1394_vm1, %v795_v21 }
  0xf8   : > { %1467 = vst.msk [vmem:[%s2371_s24 + $0x240] sm:$0xff] %vm1394_vm1, %v1115_v22 }
  0xf9   : > { %v1869_v23 = vpop.f32.mrb[10].mxu0 }
  0xfa   : > { %v1965_v24 = vpop.f32.mrb[10].mxu1  ;;  %1406 = vst.msk [vmem:[%s2371_s24 + $0x58] sm:$0xff] %vm1394_vm1, %v1869_v23  ;;  %v805_v25 = vpop.f32.mrb[11].mxu0 }
  0xfb   : > { %1470 = vst.msk [vmem:[%s2371_s24 + $0x258] sm:$0xff] %vm1394_vm1, %v1965_v24  ;;  %v1125_v26 = vpop.f32.mrb[11].mxu1  ;;  %1405 = vst.msk [vmem:[%s2371_s24 + $0x50] sm:$0xff] %vm1394_vm1, %v805_v25 }
  0xfc   : > { %1469 = vst.msk [vmem:[%s2371_s24 + $0x250] sm:$0xff] %vm1394_vm1, %v1125_v26 }
  0xfd   : > { %v1872_v27 = vpop.f32.mrb[12].mxu0 }
  0xfe   : > { %v1968_v28 = vpop.f32.mrb[12].mxu1  ;;  %1408 = vst.msk [vmem:[%s2371_s24 + $0x68] sm:$0xff] %vm1394_vm1, %v1872_v27  ;;  %v815_v29 = vpop.f32.mrb[13].mxu0 }
  0xff   : > { %1472 = vst.msk [vmem:[%s2371_s24 + $0x268] sm:$0xff] %vm1394_vm1, %v1968_v28  ;;  %v1135_v30 = vpop.f32.mrb[13].mxu1  ;;  %1407 = vst.msk [vmem:[%s2371_s24 + $0x60] sm:$0xff] %vm1394_vm1, %v815_v29 }
 0x100   : > { %1471 = vst.msk [vmem:[%s2371_s24 + $0x260] sm:$0xff] %vm1394_vm1, %v1135_v30 }
 0x101   : > { %v1875_v31 = vpop.f32.mrb[14].mxu0 }
 0x102   : > { %v1971_v32 = vpop.f32.mrb[14].mxu1  ;;  %1410 = vst.msk [vmem:[%s2371_s24 + $0x78] sm:$0xff] %vm1394_vm1, %v1875_v31  ;;  %v825_v33 = vpop.f32.mrb[15].mxu0 }
 0x103   : > { %1474 = vst.msk [vmem:[%s2371_s24 + $0x278] sm:$0xff] %vm1394_vm1, %v1971_v32  ;;  %v1145_v34 = vpop.f32.mrb[15].mxu1  ;;  %1409 = vst.msk [vmem:[%s2371_s24 + $0x70] sm:$0xff] %vm1394_vm1, %v825_v33 }
 0x104   : > { %1473 = vst.msk [vmem:[%s2371_s24 + $0x270] sm:$0xff] %vm1394_vm1, %v1145_v34 }
 0x105   : > { %v1878_v35 = vpop.f32.mrb[16].mxu0 }
 0x106   : > { %v1974_v36 = vpop.f32.mrb[16].mxu1  ;;  %1412 = vst.msk [vmem:[%s2371_s24 + $0x88] sm:$0xff] %vm1394_vm1, %v1878_v35  ;;  %v835_v37 = vpop.f32.mrb[17].mxu0 }
 0x107   : > { %1476 = vst.msk [vmem:[%s2371_s24 + $0x288] sm:$0xff] %vm1394_vm1, %v1974_v36  ;;  %v1155_v38 = vpop.f32.mrb[17].mxu1  ;;  %1411 = vst.msk [vmem:[%s2371_s24 + $0x80] sm:$0xff] %vm1394_vm1, %v835_v37 }
 0x108   : > { %1475 = vst.msk [vmem:[%s2371_s24 + $0x280] sm:$0xff] %vm1394_vm1, %v1155_v38 }
 0x109   : > { %v1881_v39 = vpop.f32.mrb[18].mxu0 }
 0x10a   : > { %v1977_v40 = vpop.f32.mrb[18].mxu1  ;;  %1414 = vst.msk [vmem:[%s2371_s24 + $0x98] sm:$0xff] %vm1394_vm1, %v1881_v39  ;;  %v845_v41 = vpop.f32.mrb[19].mxu0 }
 0x10b   : > { %1478 = vst.msk [vmem:[%s2371_s24 + $0x298] sm:$0xff] %vm1394_vm1, %v1977_v40  ;;  %v1165_v42 = vpop.f32.mrb[19].mxu1  ;;  %1413 = vst.msk [vmem:[%s2371_s24 + $0x90] sm:$0xff] %vm1394_vm1, %v845_v41 }
 0x10c   : > { %1477 = vst.msk [vmem:[%s2371_s24 + $0x290] sm:$0xff] %vm1394_vm1, %v1165_v42 }
 0x10d   : > { %v1884_v43 = vpop.f32.mrb[20].mxu0 }
 0x10e   : > { %v1980_v44 = vpop.f32.mrb[20].mxu1  ;;  %1416 = vst.msk [vmem:[%s2371_s24 + $0xa8] sm:$0xff] %vm1394_vm1, %v1884_v43  ;;  %v855_v45 = vpop.f32.mrb[21].mxu0 }
 0x10f   : > { %1480 = vst.msk [vmem:[%s2371_s24 + $0x2a8] sm:$0xff] %vm1394_vm1, %v1980_v44  ;;  %v1175_v46 = vpop.f32.mrb[21].mxu1  ;;  %1415 = vst.msk [vmem:[%s2371_s24 + $0xa0] sm:$0xff] %vm1394_vm1, %v855_v45 }
 0x110   : > { %1479 = vst.msk [vmem:[%s2371_s24 + $0x2a0] sm:$0xff] %vm1394_vm1, %v1175_v46 }
 0x111   : > { %v1887_v47 = vpop.f32.mrb[22].mxu0 }
 0x112   : > { %v1983_v48 = vpop.f32.mrb[22].mxu1  ;;  %1418 = vst.msk [vmem:[%s2371_s24 + $0xb8] sm:$0xff] %vm1394_vm1, %v1887_v47  ;;  %v865_v49 = vpop.f32.mrb[23].mxu0 }
 0x113   : > { %1482 = vst.msk [vmem:[%s2371_s24 + $0x2b8] sm:$0xff] %vm1394_vm1, %v1983_v48  ;;  %v1185_v50 = vpop.f32.mrb[23].mxu1  ;;  %1417 = vst.msk [vmem:[%s2371_s24 + $0xb0] sm:$0xff] %vm1394_vm1, %v865_v49 }
 0x114   : > { %1481 = vst.msk [vmem:[%s2371_s24 + $0x2b0] sm:$0xff] %vm1394_vm1, %v1185_v50 }
 0x115   : > { %v1890_v51 = vpop.f32.mrb[24].mxu0 }
 0x116   : > { %v1986_v52 = vpop.f32.mrb[24].mxu1  ;;  %1420 = vst.msk [vmem:[%s2371_s24 + $0xc8] sm:$0xff] %vm1394_vm1, %v1890_v51  ;;  %v875_v53 = vpop.f32.mrb[25].mxu0 }
 0x117   : > { %1484 = vst.msk [vmem:[%s2371_s24 + $0x2c8] sm:$0xff] %vm1394_vm1, %v1986_v52  ;;  %v1195_v54 = vpop.f32.mrb[25].mxu1  ;;  %1419 = vst.msk [vmem:[%s2371_s24 + $0xc0] sm:$0xff] %vm1394_vm1, %v875_v53 }
 0x118   : > { %1483 = vst.msk [vmem:[%s2371_s24 + $0x2c0] sm:$0xff] %vm1394_vm1, %v1195_v54 }
 0x119   : > { %v1893_v55 = vpop.f32.mrb[26].mxu0 }
 0x11a   : > { %v1989_v56 = vpop.f32.mrb[26].mxu1  ;;  %1422 = vst.msk [vmem:[%s2371_s24 + $0xd8] sm:$0xff] %vm1394_vm1, %v1893_v55  ;;  %v885_v57 = vpop.f32.mrb[27].mxu0 }
 0x11b   : > { %1486 = vst.msk [vmem:[%s2371_s24 + $0x2d8] sm:$0xff] %vm1394_vm1, %v1989_v56  ;;  %v1205_v58 = vpop.f32.mrb[27].mxu1  ;;  %1421 = vst.msk [vmem:[%s2371_s24 + $0xd0] sm:$0xff] %vm1394_vm1, %v885_v57 }
 0x11c   : > { %1485 = vst.msk [vmem:[%s2371_s24 + $0x2d0] sm:$0xff] %vm1394_vm1, %v1205_v58 }
 0x11d   : > { %v1896_v59 = vpop.f32.mrb[28].mxu0 }
 0x11e   : > { %v1992_v60 = vpop.f32.mrb[28].mxu1  ;;  %1424 = vst.msk [vmem:[%s2371_s24 + $0xe8] sm:$0xff] %vm1394_vm1, %v1896_v59  ;;  %v895_v61 = vpop.f32.mrb[29].mxu0 }
 0x11f   : > { %1488 = vst.msk [vmem:[%s2371_s24 + $0x2e8] sm:$0xff] %vm1394_vm1, %v1992_v60  ;;  %v1215_v62 = vpop.f32.mrb[29].mxu1  ;;  %1423 = vst.msk [vmem:[%s2371_s24 + $0xe0] sm:$0xff] %vm1394_vm1, %v895_v61 }
 0x120   : > { %1487 = vst.msk [vmem:[%s2371_s24 + $0x2e0] sm:$0xff] %vm1394_vm1, %v1215_v62 }
 0x121   : > { %v1899_v63 = vpop.f32.mrb[30].mxu0 }
 0x122   : > { %v1995_v0 = vpop.f32.mrb[30].mxu1  ;;  %1426 = vst.msk [vmem:[%s2371_s24 + $0xf8] sm:$0xff] %vm1394_vm1, %v1899_v63  ;;  %v905_v1 = vpop.f32.mrb[31].mxu0 }
 0x123   : > { %1490 = vst.msk [vmem:[%s2371_s24 + $0x2f8] sm:$0xff] %vm1394_vm1, %v1995_v0  ;;  %v1225_v2 = vpop.f32.mrb[31].mxu1  ;;  %1425 = vst.msk [vmem:[%s2371_s24 + $0xf0] sm:$0xff] %vm1394_vm1, %v905_v1 }
 0x124   : > { %1489 = vst.msk [vmem:[%s2371_s24 + $0x2f0] sm:$0xff] %vm1394_vm1, %v1225_v2 }
 0x125   : > { %v1902_v3 = vpop.f32.mrb[32].mxu0 }
 0x126   : > { %v1998_v4 = vpop.f32.mrb[32].mxu1  ;;  %1428 = vst.msk [vmem:[%s2371_s24 + $0x108] sm:$0xff] %vm1394_vm1, %v1902_v3  ;;  %v915_v5 = vpop.f32.mrb[33].mxu0 }
 0x127   : > { %1492 = vst.msk [vmem:[%s2371_s24 + $0x308] sm:$0xff] %vm1394_vm1, %v1998_v4  ;;  %v1235_v6 = vpop.f32.mrb[33].mxu1  ;;  %1427 = vst.msk [vmem:[%s2371_s24 + $0x100] sm:$0xff] %vm1394_vm1, %v915_v5 }
 0x128   : > { %1491 = vst.msk [vmem:[%s2371_s24 + $0x300] sm:$0xff] %vm1394_vm1, %v1235_v6 }
 0x129   : > { %v1905_v7 = vpop.f32.mrb[34].mxu0 }
 0x12a   : > { %v2001_v8 = vpop.f32.mrb[34].mxu1  ;;  %1430 = vst.msk [vmem:[%s2371_s24 + $0x118] sm:$0xff] %vm1394_vm1, %v1905_v7  ;;  %v925_v9 = vpop.f32.mrb[35].mxu0 }
 0x12b   : > { %1494 = vst.msk [vmem:[%s2371_s24 + $0x318] sm:$0xff] %vm1394_vm1, %v2001_v8  ;;  %v1245_v10 = vpop.f32.mrb[35].mxu1  ;;  %1429 = vst.msk [vmem:[%s2371_s24 + $0x110] sm:$0xff] %vm1394_vm1, %v925_v9 }
 0x12c   : > { %1493 = vst.msk [vmem:[%s2371_s24 + $0x310] sm:$0xff] %vm1394_vm1, %v1245_v10 }
 0x12d   : > { %v1908_v11 = vpop.f32.mrb[36].mxu0 }
 0x12e   : > { %v2004_v12 = vpop.f32.mrb[36].mxu1  ;;  %1432 = vst.msk [vmem:[%s2371_s24 + $0x128] sm:$0xff] %vm1394_vm1, %v1908_v11  ;;  %v935_v13 = vpop.f32.mrb[37].mxu0 }
 0x12f   : > { %1496 = vst.msk [vmem:[%s2371_s24 + $0x328] sm:$0xff] %vm1394_vm1, %v2004_v12  ;;  %v1255_v14 = vpop.f32.mrb[37].mxu1  ;;  %1431 = vst.msk [vmem:[%s2371_s24 + $0x120] sm:$0xff] %vm1394_vm1, %v935_v13 }
 0x130   : > { %1495 = vst.msk [vmem:[%s2371_s24 + $0x320] sm:$0xff] %vm1394_vm1, %v1255_v14 }
 0x131   : > { %v1911_v15 = vpop.f32.mrb[38].mxu0 }
 0x132   : > { %v2007_v16 = vpop.f32.mrb[38].mxu1  ;;  %1434 = vst.msk [vmem:[%s2371_s24 + $0x138] sm:$0xff] %vm1394_vm1, %v1911_v15  ;;  %v945_v17 = vpop.f32.mrb[39].mxu0 }
 0x133   : > { %1498 = vst.msk [vmem:[%s2371_s24 + $0x338] sm:$0xff] %vm1394_vm1, %v2007_v16  ;;  %v1265_v18 = vpop.f32.mrb[39].mxu1  ;;  %1433 = vst.msk [vmem:[%s2371_s24 + $0x130] sm:$0xff] %vm1394_vm1, %v945_v17 }
 0x134   : > { %1497 = vst.msk [vmem:[%s2371_s24 + $0x330] sm:$0xff] %vm1394_vm1, %v1265_v18 }
 0x135   : > { %v1914_v19 = vpop.f32.mrb[40].mxu0 }
 0x136   : > { %v2010_v20 = vpop.f32.mrb[40].mxu1  ;;  %1436 = vst.msk [vmem:[%s2371_s24 + $0x148] sm:$0xff] %vm1394_vm1, %v1914_v19  ;;  %v955_v21 = vpop.f32.mrb[41].mxu0 }
 0x137   : > { %1500 = vst.msk [vmem:[%s2371_s24 + $0x348] sm:$0xff] %vm1394_vm1, %v2010_v20  ;;  %v1275_v22 = vpop.f32.mrb[41].mxu1  ;;  %1435 = vst.msk [vmem:[%s2371_s24 + $0x140] sm:$0xff] %vm1394_vm1, %v955_v21 }
 0x138   : > { %1499 = vst.msk [vmem:[%s2371_s24 + $0x340] sm:$0xff] %vm1394_vm1, %v1275_v22 }
 0x139   : > { %v1917_v23 = vpop.f32.mrb[42].mxu0 }
 0x13a   : > { %v2013_v24 = vpop.f32.mrb[42].mxu1  ;;  %1438 = vst.msk [vmem:[%s2371_s24 + $0x158] sm:$0xff] %vm1394_vm1, %v1917_v23  ;;  %v965_v25 = vpop.f32.mrb[43].mxu0 }
 0x13b   : > { %1502 = vst.msk [vmem:[%s2371_s24 + $0x358] sm:$0xff] %vm1394_vm1, %v2013_v24  ;;  %v1285_v26 = vpop.f32.mrb[43].mxu1  ;;  %1437 = vst.msk [vmem:[%s2371_s24 + $0x150] sm:$0xff] %vm1394_vm1, %v965_v25 }
 0x13c   : > { %1501 = vst.msk [vmem:[%s2371_s24 + $0x350] sm:$0xff] %vm1394_vm1, %v1285_v26 }
 0x13d   : > { %v1920_v27 = vpop.f32.mrb[44].mxu0 }
 0x13e   : > { %v2016_v28 = vpop.f32.mrb[44].mxu1  ;;  %1440 = vst.msk [vmem:[%s2371_s24 + $0x168] sm:$0xff] %vm1394_vm1, %v1920_v27  ;;  %v975_v29 = vpop.f32.mrb[45].mxu0 }
 0x13f   : > { %1504 = vst.msk [vmem:[%s2371_s24 + $0x368] sm:$0xff] %vm1394_vm1, %v2016_v28  ;;  %v1295_v30 = vpop.f32.mrb[45].mxu1  ;;  %1439 = vst.msk [vmem:[%s2371_s24 + $0x160] sm:$0xff] %vm1394_vm1, %v975_v29 }
 0x140   : > { %1503 = vst.msk [vmem:[%s2371_s24 + $0x360] sm:$0xff] %vm1394_vm1, %v1295_v30 }
 0x141   : > { %v1923_v31 = vpop.f32.mrb[46].mxu0 }
 0x142   : > { %v2019_v32 = vpop.f32.mrb[46].mxu1  ;;  %1442 = vst.msk [vmem:[%s2371_s24 + $0x178] sm:$0xff] %vm1394_vm1, %v1923_v31  ;;  %v985_v33 = vpop.f32.mrb[47].mxu0 }
 0x143   : > { %1506 = vst.msk [vmem:[%s2371_s24 + $0x378] sm:$0xff] %vm1394_vm1, %v2019_v32  ;;  %v1305_v34 = vpop.f32.mrb[47].mxu1  ;;  %1441 = vst.msk [vmem:[%s2371_s24 + $0x170] sm:$0xff] %vm1394_vm1, %v985_v33 }
 0x144   : > { %1505 = vst.msk [vmem:[%s2371_s24 + $0x370] sm:$0xff] %vm1394_vm1, %v1305_v34 }
 0x145   : > { %v1926_v35 = vpop.f32.mrb[48].mxu0 }
 0x146   : > { %v2022_v36 = vpop.f32.mrb[48].mxu1  ;;  %1444 = vst.msk [vmem:[%s2371_s24 + $0x188] sm:$0xff] %vm1394_vm1, %v1926_v35  ;;  %v995_v37 = vpop.f32.mrb[49].mxu0 }
 0x147   : > { %1508 = vst.msk [vmem:[%s2371_s24 + $0x388] sm:$0xff] %vm1394_vm1, %v2022_v36  ;;  %v1315_v38 = vpop.f32.mrb[49].mxu1  ;;  %1443 = vst.msk [vmem:[%s2371_s24 + $0x180] sm:$0xff] %vm1394_vm1, %v995_v37 }
 0x148   : > { %1507 = vst.msk [vmem:[%s2371_s24 + $0x380] sm:$0xff] %vm1394_vm1, %v1315_v38 }
 0x149   : > { %v1929_v39 = vpop.f32.mrb[50].mxu0 }
 0x14a   : > { %v2025_v40 = vpop.f32.mrb[50].mxu1  ;;  %1446 = vst.msk [vmem:[%s2371_s24 + $0x198] sm:$0xff] %vm1394_vm1, %v1929_v39  ;;  %v1005_v41 = vpop.f32.mrb[51].mxu0 }
 0x14b   : > { %1510 = vst.msk [vmem:[%s2371_s24 + $0x398] sm:$0xff] %vm1394_vm1, %v2025_v40  ;;  %v1325_v42 = vpop.f32.mrb[51].mxu1  ;;  %1445 = vst.msk [vmem:[%s2371_s24 + $0x190] sm:$0xff] %vm1394_vm1, %v1005_v41 }
 0x14c   : > { %1509 = vst.msk [vmem:[%s2371_s24 + $0x390] sm:$0xff] %vm1394_vm1, %v1325_v42 }
 0x14d   : > { %v1932_v43 = vpop.f32.mrb[52].mxu0 }
 0x14e   : > { %v2028_v44 = vpop.f32.mrb[52].mxu1  ;;  %1448 = vst.msk [vmem:[%s2371_s24 + $0x1a8] sm:$0xff] %vm1394_vm1, %v1932_v43  ;;  %v1015_v45 = vpop.f32.mrb[53].mxu0 }
 0x14f   : > { %1512 = vst.msk [vmem:[%s2371_s24 + $0x3a8] sm:$0xff] %vm1394_vm1, %v2028_v44  ;;  %v1335_v46 = vpop.f32.mrb[53].mxu1  ;;  %1447 = vst.msk [vmem:[%s2371_s24 + $0x1a0] sm:$0xff] %vm1394_vm1, %v1015_v45 }
 0x150   : > { %1511 = vst.msk [vmem:[%s2371_s24 + $0x3a0] sm:$0xff] %vm1394_vm1, %v1335_v46 }
 0x151   : > { %v1935_v47 = vpop.f32.mrb[54].mxu0 }
 0x152   : > { %v2031_v48 = vpop.f32.mrb[54].mxu1  ;;  %1450 = vst.msk [vmem:[%s2371_s24 + $0x1b8] sm:$0xff] %vm1394_vm1, %v1935_v47  ;;  %v1025_v49 = vpop.f32.mrb[55].mxu0 }
 0x153   : > { %1514 = vst.msk [vmem:[%s2371_s24 + $0x3b8] sm:$0xff] %vm1394_vm1, %v2031_v48  ;;  %v1345_v50 = vpop.f32.mrb[55].mxu1  ;;  %1449 = vst.msk [vmem:[%s2371_s24 + $0x1b0] sm:$0xff] %vm1394_vm1, %v1025_v49 }
 0x154   : > { %1513 = vst.msk [vmem:[%s2371_s24 + $0x3b0] sm:$0xff] %vm1394_vm1, %v1345_v50 }
 0x155   : > { %v1938_v51 = vpop.f32.mrb[56].mxu0 }
 0x156   : > { %v2034_v52 = vpop.f32.mrb[56].mxu1  ;;  %1452 = vst.msk [vmem:[%s2371_s24 + $0x1c8] sm:$0xff] %vm1394_vm1, %v1938_v51  ;;  %v1035_v53 = vpop.f32.mrb[57].mxu0 }
 0x157   : > { %1516 = vst.msk [vmem:[%s2371_s24 + $0x3c8] sm:$0xff] %vm1394_vm1, %v2034_v52  ;;  %v1355_v54 = vpop.f32.mrb[57].mxu1  ;;  %1451 = vst.msk [vmem:[%s2371_s24 + $0x1c0] sm:$0xff] %vm1394_vm1, %v1035_v53 }
 0x158   : > { %1515 = vst.msk [vmem:[%s2371_s24 + $0x3c0] sm:$0xff] %vm1394_vm1, %v1355_v54 }
 0x159   : > { %v1941_v55 = vpop.f32.mrb[58].mxu0 }
 0x15a   : > { %v2037_v56 = vpop.f32.mrb[58].mxu1  ;;  %1454 = vst.msk [vmem:[%s2371_s24 + $0x1d8] sm:$0xff] %vm1394_vm1, %v1941_v55  ;;  %v1045_v57 = vpop.f32.mrb[59].mxu0 }
 0x15b   : > { %1518 = vst.msk [vmem:[%s2371_s24 + $0x3d8] sm:$0xff] %vm1394_vm1, %v2037_v56  ;;  %v1365_v58 = vpop.f32.mrb[59].mxu1  ;;  %1453 = vst.msk [vmem:[%s2371_s24 + $0x1d0] sm:$0xff] %vm1394_vm1, %v1045_v57 }
 0x15c   : > { %1517 = vst.msk [vmem:[%s2371_s24 + $0x3d0] sm:$0xff] %vm1394_vm1, %v1365_v58 }
 0x15d   : > { %v1944_v59 = vpop.f32.mrb[60].mxu0 }
 0x15e   : > { %v2040_v60 = vpop.f32.mrb[60].mxu1  ;;  %1456 = vst.msk [vmem:[%s2371_s24 + $0x1e8] sm:$0xff] %vm1394_vm1, %v1944_v59  ;;  %v1055_v61 = vpop.f32.mrb[61].mxu0 }
 0x15f   : > { %1520 = vst.msk [vmem:[%s2371_s24 + $0x3e8] sm:$0xff] %vm1394_vm1, %v2040_v60  ;;  %v1375_v62 = vpop.f32.mrb[61].mxu1  ;;  %1455 = vst.msk [vmem:[%s2371_s24 + $0x1e0] sm:$0xff] %vm1394_vm1, %v1055_v61 }
 0x160   : > { %1519 = vst.msk [vmem:[%s2371_s24 + $0x3e0] sm:$0xff] %vm1394_vm1, %v1375_v62 }
 0x161   : > { %v1947_v63 = vpop.f32.mrb[62].mxu0 }
 0x162   : > { %v2043_v0 = vpop.f32.mrb[62].mxu1  ;;  %1458 = vst.msk [vmem:[%s2371_s24 + $0x1f8] sm:$0xff] %vm1394_vm1, %v1947_v63  ;;  %v1065_v1 = vpop.f32.mrb[63].mxu0 }
 0x163   : > { %1522 = vst.msk [vmem:[%s2371_s24 + $0x3f8] sm:$0xff] %vm1394_vm1, %v2043_v0  ;;  %v1385_v2 = vpop.f32.mrb[63].mxu1  ;;  %1457 = vst.msk [vmem:[%s2371_s24 + $0x1f0] sm:$0xff] %vm1394_vm1, %v1065_v1 }
 0x164   : > { %1521 = vst.msk [vmem:[%s2371_s24 + $0x3f0] sm:$0xff] %vm1394_vm1, %v1385_v2 }
 0x165 PF: > { %s13_s12 = sadd.s32 1, %s2064_s12  }
 0x166   : > { %p10_p4 = scmp.ge.s32.totalorder %s13_s12, 10  }
 0x168   :  { %12 = sbr.rel (!%p10_p4) target bundleno = 1 (0x1), region = 62 }

// kernel: masknet2_forward.8
= control target key start
LH: loop header
LB: loop body
LE: loop exit
PB: predicated region body
PF: predicated region fallthrough
CT: control target
= control target key end

     0   :  { %s2192_s12 = smov 0   ;;  %s2895_s0 = inlined_call_operand.vmem [shape: f32[1,128], index: 0, kind: input, shape index: {}]   ;;  %s2896_s1 = inlined_call_operand.vmem [shape: f32[2048,128], index: 1, kind: input, shape index: {}]   ;;  %s2897_s2 = inlined_call_operand.vmem [shape: f32[128,16], index: 2, kind: input, shape index: {}]   ;;  %s2898_s3 = inlined_call_operand.vmem [shape: f32[2048,16], index: 3, kind: output, shape index: {}]  }
   0x1 LB: > { %s1727_s13 = sadd.s32 4294967295, %s2170_s12   ;;  %p1731_p0 = scmp.ge.s32.totalorder %s2170_s12, 1  ;;  %s2170_s12 = sphi %s2192_s12, %s13_s12  }
   0x2   : > { %p138_p1 = scmp.lt.s32.totalorder %s2170_s12, 3 }
   0x4   : > { %p139_p2 = pnand %p1731_p0, %p138_p1 }
   0x5   : > { %v821_v0 = vld [vmem:[%s2897_s2] sm:$0xff] (!%p139_p2)  ;;  %v822_v1 = vld [vmem:[%s2897_s2 + $0x8] sm:$0xff] (!%p139_p2)  ;;  %v823_v2 = vld [vmem:[%s2897_s2 + $0x10] sm:$0xff] (!%p139_p2)  ;;  %s1732_s20 = sshll.u32 (!%p139_p2), %s1727_s13, 7 }
   0x6   : > { %142 = sbr.rel (%p139_p2) target bundleno = 378 (0x17a), region = 32  ;;  %v2107_v3 = vpack.c.bf16 (!%p139_p2), %v822_v1, %v821_v0  ;;  %v824_v4 = vld [vmem:[%s2897_s2 + $0x18] sm:$0xff] (!%p139_p2)  ;;  %p163_p3 = scmp.lt.s32.totalorder (!%p139_p2), %s1732_s20, 255  ;;  %v825_v6 = vld [vmem:[%s2897_s2 + $0x20] sm:$0xff] (!%p139_p2)  ;;  %v826_v7 = vld [vmem:[%s2897_s2 + $0x28] sm:$0xff] (!%p139_p2) }
   0x7   : > { %v2111_v5 = vpack.c.bf16 (!%p139_p2), %v824_v4, %v823_v2  ;;  %v2115_v8 = vpack.c.bf16 (!%p139_p2), %v826_v7, %v825_v6  ;;  %v2224_v9 = vld [vmem:[%s2895_s0] ss:$0 sm:$0xff] (!%p139_p2)  ;;  %v827_v10 = vld [vmem:[%s2897_s2 + $0x30] sm:$0xff] (!%p139_p2)  ;;  %v828_v11 = vld [vmem:[%s2897_s2 + $0x38] sm:$0xff] (!%p139_p2) }
   0x8   : > { %2108 = vmatprep.subr.bf16.mxu0 (!%p139_p2), %v2107_v3  ;;  %2139 = vmatprep.subr.bf16.mxu1 (!%p139_p2), %v2107_v3  ;;  %v2119_v16 = vpack.c.bf16 (!%p139_p2), %v828_v11, %v827_v10  ;;  %v829_v17 = vld [vmem:[%s2897_s2 + $0x40] sm:$0xff] (!%p139_p2)  ;;  %v830_v18 = vld [vmem:[%s2897_s2 + $0x48] sm:$0xff] (!%p139_p2)  ;;  %v831_v24 = vld [vmem:[%s2897_s2 + $0x50] sm:$0xff] (!%p139_p2) }
   0x9   : > { %2110 = vmatpush3.bf16.msra.mxu0 (!%p139_p2), %v2107_v3  ;;  %2147 = vmatpush3.bf16.msra.mxu1 (!%p139_p2), %v2107_v3  ;;  %v2123_v23 = vpack.c.bf16 (!%p139_p2), %v830_v18, %v829_v17  ;;  %v832_v25 = vld [vmem:[%s2897_s2 + $0x58] sm:$0xff] (!%p139_p2)  ;;  %v833_v28 = vld [vmem:[%s2897_s2 + $0x60] sm:$0xff] (!%p139_p2)  ;;  %v834_v29 = vld [vmem:[%s2897_s2 + $0x68] sm:$0xff] (!%p139_p2) }
   0xa   : > { %2112 = vmatprep.subr.bf16.mxu0 (!%p139_p2), %v2111_v5  ;;  %2140 = vmatprep.subr.bf16.mxu1 (!%p139_p2), %v2111_v5  ;;  %v2127_v26 = vpack.c.bf16 (!%p139_p2), %v832_v25, %v831_v24  ;;  %v2131_v34 = vpack.c.bf16 (!%p139_p2), %v834_v29, %v833_v28  ;;  %v835_v36 = vld [vmem:[%s2897_s2 + $0x70] sm:$0xff] (!%p139_p2)  ;;  %v836_v37 = vld [vmem:[%s2897_s2 + $0x78] sm:$0xff] (!%p139_p2) }
   0xb   : > { %v2135_v43 = vpack.c.bf16 (!%p139_p2), %v836_v37, %v835_v36 }
   0xd   : > { %s2900_s20 = smov (!%p163_p3, %s1732_s20), 255  ;;  %2114 = vmatpush3.bf16.msra.mxu0 %v2111_v5  ;;  %2148 = vmatpush3.bf16.msra.mxu1 %v2111_v5 }
   0xe   : > { %s1733_s27 = sshll.u32 %s2900_s20, 3  ;;  %2116 = vmatprep.subr.bf16.mxu0 %v2115_v8  ;;  %2141 = vmatprep.subr.bf16.mxu1 %v2115_v8 }
   0xf   : > { %s2237_s9 = scalar_lea.vmem %s2896_s1, %s1733_s27  ;;  %s2634_s6 = scalar_lea.vmem %s2898_s3, %s1733_s27 }
  0x10   : > { %v174_v12 = vld [vmem:[%s2237_s9] sm:$0xff]  ;;  %v175_v27 = vld [vmem:[%s2237_s9 + $0x8] sm:$0xff]  ;;  %v176_v31 = vld [vmem:[%s2237_s9 + $0x10] sm:$0xff] }
  0x11   : > { %v238_v13 = vld [vmem:[%s2237_s9 + $0x200] sm:$0xff]  ;;  %v309_v14 = vmul.f32 %v2224_v9, %v174_v12  ;;  %2118 = vmatpush3.bf16.msra.mxu0 %v2115_v8  ;;  %2149 = vmatpush3.bf16.msra.mxu1 %v2115_v8  ;;  %v239_v30 = vld [vmem:[%s2237_s9 + $0x208] sm:$0xff]  ;;  %v240_v32 = vld [vmem:[%s2237_s9 + $0x210] sm:$0xff]  ;;  %v310_v33 = vmul.f32 %v2224_v9, %v175_v27  ;;  %v311_v38 = vmul.f32 %v2224_v9, %v176_v31 }
  0x12   : > { %v373_v15 = vmul.f32 %v2224_v9, %v238_v13  ;;  %2120 = vmatprep.subr.bf16.mxu0 %v2119_v16  ;;  %2142 = vmatprep.subr.bf16.mxu1 %v2119_v16  ;;  %v374_v35 = vmul.f32 %v2224_v9, %v239_v30  ;;  %v375_v39 = vmul.f32 %v2224_v9, %v240_v32  ;;  %v177_v40 = vld [vmem:[%s2237_s9 + $0x18] sm:$0xff]  ;;  %v178_v42 = vld [vmem:[%s2237_s9 + $0x20] sm:$0xff]  ;;  %v179_v47 = vld [vmem:[%s2237_s9 + $0x28] sm:$0xff] }
  0x13   : > { %vm437_vm0 = vcmp.ge.f32.partialorder %v309_v14, 0.0  ;;  %v565_v19 = vmul.f32 0.2, %v309_v14  ;;  %vm438_vm2 = vcmp.ge.f32.partialorder %v310_v33, 0.0  ;;  %v241_v41 = vld [vmem:[%s2237_s9 + $0x218] sm:$0xff]  ;;  %v242_v46 = vld [vmem:[%s2237_s9 + $0x220] sm:$0xff]  ;;  %v312_v50 = vmul.f32 %v2224_v9, %v177_v40 }
  0x14   : > { %vm501_vm1 = vcmp.ge.f32.partialorder %v373_v15, 0.0  ;;  %v629_v20 = vmul.f32 0.2, %v373_v15  ;;  %v566_v44 = vmul.f32 0.2, %v310_v33  ;;  %vm502_vm3 = vcmp.ge.f32.partialorder %v374_v35, 0.0 }
  0x15   : > { %v693_v21 = vsel %vm437_vm0, %v309_v14, %v565_v19  ;;  %2122 = vmatpush3.bf16.msra.mxu0 %v2119_v16  ;;  %2150 = vmatpush3.bf16.msra.mxu1 %v2119_v16  ;;  %v630_v45 = vmul.f32 0.2, %v374_v35  ;;  %v567_v48 = vmul.f32 0.2, %v311_v38  ;;  %v631_v49 = vmul.f32 0.2, %v375_v39 }
  0x16   : > { %v757_v22 = vsel %vm501_vm1, %v373_v15, %v629_v20  ;;  %1915 = vmatprep.mubr.f32.mxu0 %v693_v21  ;;  %2124 = vmatprep.subr.bf16.mxu0 %v2123_v23  ;;  %vm439_vm4 = vcmp.ge.f32.partialorder %v311_v38, 0.0  ;;  %vm503_vm5 = vcmp.ge.f32.partialorder %v375_v39, 0.0  ;;  %v376_v51 = vmul.f32 %v2224_v9, %v241_v41  ;;  %v243_v53 = vld [vmem:[%s2237_s9 + $0x228] sm:$0xff]  ;;  %v180_v58 = vld [vmem:[%s2237_s9 + $0x30] sm:$0xff]  ;;  %v181_v0 = vld [vmem:[%s2237_s9 + $0x38] sm:$0xff] }
  0x17   : > { %2011 = vmatprep.mubr.f32.mxu1 %v757_v22  ;;  %2143 = vmatprep.subr.bf16.mxu1 %v2123_v23  ;;  %v313_v52 = vmul.f32 %v2224_v9, %v178_v42  ;;  %v377_v54 = vmul.f32 %v2224_v9, %v242_v46  ;;  %v314_v55 = vmul.f32 %v2224_v9, %v179_v47  ;;  %v244_v59 = vld [vmem:[%s2237_s9 + $0x230] sm:$0xff]  ;;  %v568_v62 = vmul.f32 0.2, %v312_v50  ;;  %v245_v1 = vld [vmem:[%s2237_s9 + $0x238] sm:$0xff]  ;;  %v182_v2 = vld [vmem:[%s2237_s9 + $0x40] sm:$0xff] }
  0x18   : > { %v694_v56 = vsel %vm438_vm2, %v310_v33, %v566_v44  ;;  %v758_v57 = vsel %vm502_vm3, %v374_v35, %v630_v45  ;;  %v695_v60 = vsel %vm439_vm4, %v311_v38, %v567_v48  ;;  %v759_v61 = vsel %vm503_vm5, %v375_v39, %v631_v49  ;;  %v246_v8 = vld [vmem:[%s2237_s9 + $0x240] sm:$0xff]  ;;  %v183_v19 = vld [vmem:[%s2237_s9 + $0x48] sm:$0xff]  ;;  %v184_v24 = vld [vmem:[%s2237_s9 + $0x50] sm:$0xff] }
  0x19   : > { %2126 = vmatpush3.bf16.msra.mxu0 %v2123_v23  ;;  %2151 = vmatpush3.bf16.msra.mxu1 %v2123_v23  ;;  %v378_v63 = vmul.f32 %v2224_v9, %v243_v53  ;;  %vm440_vm6 = vcmp.ge.f32.partialorder %v312_v50, 0.0  ;;  %vm504_vm7 = vcmp.ge.f32.partialorder %v376_v51, 0.0  ;;  %v632_v3 = vmul.f32 0.2, %v376_v51  ;;  %v247_v20 = vld [vmem:[%s2237_s9 + $0x248] sm:$0xff]  ;;  %v248_v25 = vld [vmem:[%s2237_s9 + $0x250] sm:$0xff] }
  0x1a   : > { %2128 = vmatprep.subr.bf16.mxu0 %v2127_v26  ;;  %2144 = vmatprep.subr.bf16.mxu1 %v2127_v26  ;;  %v569_v4 = vmul.f32 0.2, %v313_v52  ;;  %vm441_vm8 = vcmp.ge.f32.partialorder %v313_v52, 0.0  ;;  %v633_v5 = vmul.f32 0.2, %v377_v54  ;;  %v315_v7 = vmul.f32 %v2224_v9, %v180_v58  ;;  %v249_v32 = vld [vmem:[%s2237_s9 + $0x258] sm:$0xff] }
  0x1b   : > { %v570_v6 = vmul.f32 0.2, %v314_v55  ;;  %vm505_vm9 = vcmp.ge.f32.partialorder %v377_v54, 0.0  ;;  %vm442_vm10 = vcmp.ge.f32.partialorder %v314_v55, 0.0  ;;  %v379_v10 = vmul.f32 %v2224_v9, %v244_v59  ;;  %v186_v36 = vld [vmem:[%s2237_s9 + $0x60] sm:$0xff]  ;;  %v187_v49 = vld [vmem:[%s2237_s9 + $0x68] sm:$0xff] }
  0x1c   : > { %v316_v11 = vmul.f32 %v2224_v9, %v181_v0  ;;  %v696_v12 = vsel %vm440_vm6, %v312_v50, %v568_v62  ;;  %v634_v13 = vmul.f32 0.2, %v378_v63  ;;  %v380_v14 = vmul.f32 %v2224_v9, %v245_v1  ;;  %v250_v37 = vld [vmem:[%s2237_s9 + $0x260] sm:$0xff]  ;;  %v251_v50 = vld [vmem:[%s2237_s9 + $0x268] sm:$0xff]  ;;  %v188_v53 = vld [vmem:[%s2237_s9 + $0x70] sm:$0xff] }
  0x1d   : > { %2130 = vmatpush3.bf16.msra.mxu0 %v2127_v26  ;;  %2152 = vmatpush3.bf16.msra.mxu1 %v2127_v26  ;;  %v317_v15 = vmul.f32 %v2224_v9, %v182_v2  ;;  %v760_v16 = vsel %vm504_vm7, %v376_v51, %v632_v3  ;;  %v697_v17 = vsel %vm441_vm8, %v313_v52, %v569_v4  ;;  %vm506_vm11 = vcmp.ge.f32.partialorder %v378_v63, 0.0  ;;  %v185_v26 = vld [vmem:[%s2237_s9 + $0x58] sm:$0xff] }
  0x1e   : > { %2132 = vmatprep.subr.bf16.mxu0 %v2131_v34  ;;  %2145 = vmatprep.subr.bf16.mxu1 %v2131_v34  ;;  %v381_v18 = vmul.f32 %v2224_v9, %v246_v8  ;;  %v761_v21 = vsel %vm505_vm9, %v377_v54, %v633_v5  ;;  %v698_v22 = vsel %vm442_vm10, %v314_v55, %v570_v6  ;;  %vm443_vm12 = vcmp.ge.f32.partialorder %v315_v7, 0.0  ;;  %v252_v54 = vld [vmem:[%s2237_s9 + $0x270] sm:$0xff]  ;;  %v253_v5 = vld [vmem:[%s2237_s9 + $0x278] sm:$0xff] }
  0x1f   : > { %v571_v23 = vmul.f32 0.2, %v315_v7  ;;  %vm507_vm13 = vcmp.ge.f32.partialorder %v379_v10, 0.0  ;;  %v635_v27 = vmul.f32 0.2, %v379_v10  ;;  %vm444_vm14 = vcmp.ge.f32.partialorder %v316_v11, 0.0 }
  0x20   : > { %v572_v28 = vmul.f32 0.2, %v316_v11  ;;  %v762_v29 = vsel %vm506_vm11, %v378_v63, %v634_v13  ;;  %vm508_vm15 = vcmp.ge.f32.partialorder %v380_v14, 0.0  ;;  %v636_v30 = vmul.f32 0.2, %v380_v14 }
  0x21   : > { %2134 = vmatpush3.bf16.msra.mxu0 %v2131_v34  ;;  %2153 = vmatpush3.bf16.msra.mxu1 %v2131_v34  ;;  %v573_v31 = vmul.f32 0.2, %v317_v15  ;;  %vm445_vm0 = vcmp.ge.f32.partialorder %v317_v15, 0.0  ;;  %v637_v33 = vmul.f32 0.2, %v381_v18  ;;  %v318_v34 = vmul.f32 %v2224_v9, %v183_v19 }
  0x22   : > { %2136 = vmatprep.subr.bf16.mxu0 %v2135_v43  ;;  %2146 = vmatprep.subr.bf16.mxu1 %v2135_v43  ;;  %v382_v35 = vmul.f32 %v2224_v9, %v247_v20  ;;  %v699_v38 = vsel %vm443_vm12, %v315_v7, %v571_v23  ;;  %vm509_vm1 = vcmp.ge.f32.partialorder %v381_v18, 0.0  ;;  %v319_v39 = vmul.f32 %v2224_v9, %v184_v24 }
  0x23   : > { %v383_v40 = vmul.f32 %v2224_v9, %v248_v25  ;;  %v763_v41 = vsel %vm507_vm13, %v379_v10, %v635_v27  ;;  %v700_v42 = vsel %vm444_vm14, %v316_v11, %v572_v28  ;;  %v384_v44 = vmul.f32 %v2224_v9, %v249_v32  ;;  %v190_v11 = vld [vmem:[%s2237_s9 + $0x80] sm:$0xff]  ;;  %v256_v28 = vld [vmem:[%s2237_s9 + $0x290] sm:$0xff] }
  0x24   : > { %v764_v45 = vsel %vm508_vm15, %v380_v14, %v636_v30  ;;  %v701_v46 = vsel %vm445_vm0, %v317_v15, %v573_v31  ;;  %v321_v47 = vmul.f32 %v2224_v9, %v186_v36  ;;  %v385_v48 = vmul.f32 %v2224_v9, %v250_v37 }
  0x25   : > { %2138 = vmatpush3.bf16.msra.mxu0 %v2135_v43  ;;  %2154 = vmatpush3.bf16.msra.mxu1 %v2135_v43  ;;  %v320_v43 = vmul.f32 %v2224_v9, %v185_v26  ;;  %v765_v51 = vsel %vm509_vm1, %v381_v18, %v637_v33  ;;  %vm446_vm2 = vcmp.ge.f32.partialorder %v318_v34, 0.0  ;;  %v574_v52 = vmul.f32 0.2, %v318_v34  ;;  %v255_v18 = vld [vmem:[%s2237_s9 + $0x288] sm:$0xff] }
  0x26   : > { %vm510_vm3 = vcmp.ge.f32.partialorder %v382_v35, 0.0  ;;  %v638_v55 = vmul.f32 0.2, %v382_v35  ;;  %vm447_vm4 = vcmp.ge.f32.partialorder %v319_v39, 0.0  ;;  %vm511_vm5 = vcmp.ge.f32.partialorder %v383_v40, 0.0 }
  0x27   : > { %v639_v58 = vmul.f32 0.2, %v383_v40  ;;  %vm448_vm6 = vcmp.ge.f32.partialorder %v320_v43, 0.0  ;;  %v576_v59 = vmul.f32 0.2, %v320_v43  ;;  %vm512_vm7 = vcmp.ge.f32.partialorder %v384_v44, 0.0 }
  0x28   : > { %1916 = vmatmul.mubr.f32.vlgmr.msra.gmra.mrb[0].mxu0 %v694_v56  ;;  %2012 = vmatmul.mubr.f32.vlgmr.msra.gmra.mrb[0].mxu1 %v758_v57  ;;  %v575_v56 = vmul.f32 0.2, %v319_v39  ;;  %v189_v57 = vld [vmem:[%s2237_s9 + $0x78] sm:$0xff]  ;;  %v641_v62 = vmul.f32 0.2, %v385_v48  ;;  %v322_v63 = vmul.f32 %v2224_v9, %v187_v49  ;;  %vm449_vm8 = vcmp.ge.f32.partialorder %v321_v47, 0.0 }
  0x29   : > { %1918 = vmatprep.mubr.f32.mxu0 %v695_v60  ;;  %2014 = vmatprep.mubr.f32.mxu1 %v759_v61  ;;  %v640_v60 = vmul.f32 0.2, %v384_v44  ;;  %v577_v61 = vmul.f32 0.2, %v321_v47  ;;  %vm513_vm9 = vcmp.ge.f32.partialorder %v385_v48, 0.0  ;;  %v386_v0 = vmul.f32 %v2224_v9, %v251_v50 }
  0x2a   : > { %v323_v1 = vmul.f32 %v2224_v9, %v188_v53  ;;  %v702_v2 = vsel %vm446_vm2, %v318_v34, %v574_v52  ;;  %v766_v3 = vsel %vm510_vm3, %v382_v35, %v638_v55  ;;  %v387_v4 = vmul.f32 %v2224_v9, %v252_v54  ;;  %v193_v35 = vld [vmem:[%s2237_s9 + $0x98] sm:$0xff]  ;;  %v259_v55 = vld [vmem:[%s2237_s9 + $0x2a8] sm:$0xff] }
  0x2b   : > { %v703_v6 = vsel %vm447_vm4, %v319_v39, %v575_v56  ;;  %v767_v7 = vsel %vm511_vm5, %v383_v40, %v639_v58  ;;  %v704_v8 = vsel %vm448_vm6, %v320_v43, %v576_v59  ;;  %v324_v10 = vmul.f32 %v2224_v9, %v189_v57  ;;  %v257_v39 = vld [vmem:[%s2237_s9 + $0x298] sm:$0xff]  ;;  %v194_v40 = vld [vmem:[%s2237_s9 + $0xa0] sm:$0xff]  ;;  %v196_v59 = vld [vmem:[%s2237_s9 + $0xb0] sm:$0xff] }
  0x2c   : > { %1919 = vmatmul.mubr.f32.gmra.mrb[2].mxu0 %v696_v12  ;;  %2015 = vmatmul.mubr.f32.gmra.mrb[2].mxu1 %v760_v16  ;;  %v768_v12 = vsel %vm512_vm7, %v384_v44, %v640_v60  ;;  %v705_v13 = vsel %vm449_vm8, %v321_v47, %v577_v61  ;;  %v769_v14 = vsel %vm513_vm9, %v385_v48, %v641_v62  ;;  %v578_v15 = vmul.f32 0.2, %v322_v63  ;;  %v254_v16 = vld [vmem:[%s2237_s9 + $0x280] sm:$0xff]  ;;  %v195_v48 = vld [vmem:[%s2237_s9 + $0xa8] sm:$0xff] }
  0x2d   : > { %1921 = vmatprep.mubr.f32.mxu0 %v697_v17  ;;  %2017 = vmatprep.mubr.f32.mxu1 %v761_v21  ;;  %v191_v17 = vld [vmem:[%s2237_s9 + $0x88] sm:$0xff]  ;;  %vm450_vm10 = vcmp.ge.f32.partialorder %v322_v63, 0.0  ;;  %v642_v19 = vmul.f32 0.2, %v386_v0  ;;  %v579_v20 = vmul.f32 0.2, %v323_v1  ;;  %v388_v21 = vmul.f32 %v2224_v9, %v253_v5 }
  0x2e   : > { %vm514_vm11 = vcmp.ge.f32.partialorder %v386_v0, 0.0  ;;  %vm451_vm12 = vcmp.ge.f32.partialorder %v323_v1, 0.0  ;;  %v643_v23 = vmul.f32 0.2, %v387_v4  ;;  %v325_v24 = vmul.f32 %v2224_v9, %v190_v11  ;;  %v258_v44 = vld [vmem:[%s2237_s9 + $0x2a0] sm:$0xff] }
  0x2f   : > { %vm515_vm13 = vcmp.ge.f32.partialorder %v387_v4, 0.0  ;;  %v580_v25 = vmul.f32 0.2, %v324_v10  ;;  %v389_v26 = vmul.f32 %v2224_v9, %v254_v16  ;;  %v326_v27 = vmul.f32 %v2224_v9, %v191_v17  ;;  %v198_v5 = vld [vmem:[%s2237_s9 + $0xc0] sm:$0xff] }
  0x30   : > { %1922 = vmatmul.mubr.f32.gmra.mrb[4].mxu0 %v698_v22  ;;  %2018 = vmatmul.mubr.f32.gmra.mrb[4].mxu1 %v762_v29  ;;  %v192_v22 = vld [vmem:[%s2237_s9 + $0x90] sm:$0xff]  ;;  %v706_v29 = vsel %vm450_vm10, %v322_v63, %v578_v15  ;;  %vm452_vm14 = vcmp.ge.f32.partialorder %v324_v10, 0.0  ;;  %v390_v30 = vmul.f32 %v2224_v9, %v255_v18  ;;  %v770_v32 = vsel %vm514_vm11, %v386_v0, %v642_v19  ;;  %v197_v0 = vld [vmem:[%s2237_s9 + $0xb8] sm:$0xff] }
  0x31   : > { %1924 = vmatprep.mubr.f32.mxu0 %v699_v38  ;;  %2020 = vmatprep.mubr.f32.mxu1 %v763_v41  ;;  %v327_v31 = vmul.f32 %v2224_v9, %v192_v22  ;;  %v707_v33 = vsel %vm451_vm12, %v323_v1, %v579_v20  ;;  %vm516_vm15 = vcmp.ge.f32.partialorder %v388_v21, 0.0  ;;  %v644_v34 = vmul.f32 0.2, %v388_v21  ;;  %v260_v63 = vld [vmem:[%s2237_s9 + $0x2b0] sm:$0xff]  ;;  %v261_v1 = vld [vmem:[%s2237_s9 + $0x2b8] sm:$0xff]  ;;  %v199_v20 = vld [vmem:[%s2237_s9 + $0xc8] sm:$0xff] }
  0x32   : > { %v771_v36 = vsel %vm515_vm13, %v387_v4, %v643_v23  ;;  %vm453_vm0 = vcmp.ge.f32.partialorder %v325_v24, 0.0  ;;  %v581_v37 = vmul.f32 0.2, %v325_v24  ;;  %v391_v38 = vmul.f32 %v2224_v9, %v256_v28 }
  0x33   : > { %v708_v41 = vsel %vm452_vm14, %v324_v10, %v580_v25  ;;  %vm517_vm1 = vcmp.ge.f32.partialorder %v389_v26, 0.0  ;;  %v582_v43 = vmul.f32 0.2, %v326_v27  ;;  %vm454_vm2 = vcmp.ge.f32.partialorder %v326_v27, 0.0  ;;  %v200_v25 = vld [vmem:[%s2237_s9 + $0xd0] sm:$0xff] }
  0x34   : > { %1925 = vmatmul.mubr.f32.gmra.mrb[6].mxu0 %v700_v42  ;;  %2021 = vmatmul.mubr.f32.gmra.mrb[6].mxu1 %v764_v45  ;;  %v645_v42 = vmul.f32 0.2, %v389_v26  ;;  %v646_v45 = vmul.f32 0.2, %v390_v30  ;;  %v328_v47 = vmul.f32 %v2224_v9, %v193_v35  ;;  %vm518_vm3 = vcmp.ge.f32.partialorder %v390_v30, 0.0 }
  0x35   : > { %1927 = vmatprep.mubr.f32.mxu0 %v701_v46  ;;  %2023 = vmatprep.mubr.f32.mxu1 %v765_v51  ;;  %v583_v46 = vmul.f32 0.2, %v327_v31  ;;  %vm455_vm4 = vcmp.ge.f32.partialorder %v327_v31, 0.0  ;;  %v392_v49 = vmul.f32 %v2224_v9, %v257_v39  ;;  %v329_v50 = vmul.f32 %v2224_v9, %v194_v40  ;;  %v265_v40 = vld [vmem:[%s2237_s9 + $0x2d8] sm:$0xff] }
  0x36   : > { %v772_v51 = vsel %vm516_vm15, %v388_v21, %v644_v34  ;;  %v709_v52 = vsel %vm453_vm0, %v325_v24, %v581_v37  ;;  %v647_v53 = vmul.f32 0.2, %v391_v38  ;;  %v393_v54 = vmul.f32 %v2224_v9, %v258_v44  ;;  %v263_v24 = vld [vmem:[%s2237_s9 + $0x2c8] sm:$0xff]  ;;  %v202_v44 = vld [vmem:[%s2237_s9 + $0xe0] sm:$0xff] }
  0x37   : > { %v773_v56 = vsel %vm517_vm1, %v389_v26, %v645_v42  ;;  %v710_v57 = vsel %vm454_vm2, %v326_v27, %v582_v43  ;;  %vm519_vm5 = vcmp.ge.f32.partialorder %v391_v38, 0.0  ;;  %v330_v58 = vmul.f32 %v2224_v9, %v195_v48  ;;  %v266_v48 = vld [vmem:[%s2237_s9 + $0x2e0] sm:$0xff] }
  0x38   : > { %1928 = vmatmul.mubr.f32.gmra.mrb[8].mxu0 %v702_v2  ;;  %2024 = vmatmul.mubr.f32.gmra.mrb[8].mxu1 %v766_v3  ;;  %v774_v60 = vsel %vm518_vm3, %v390_v30, %v646_v45  ;;  %v711_v61 = vsel %vm455_vm4, %v327_v31, %v583_v46  ;;  %vm456_vm6 = vcmp.ge.f32.partialorder %v328_v47, 0.0  ;;  %v584_v62 = vmul.f32 0.2, %v328_v47 }
  0x39   : > { %1930 = vmatprep.mubr.f32.mxu0 %v703_v6  ;;  %2026 = vmatprep.mubr.f32.mxu1 %v767_v7  ;;  %vm520_vm7 = vcmp.ge.f32.partialorder %v392_v49, 0.0  ;;  %v648_v2 = vmul.f32 0.2, %v392_v49  ;;  %v585_v3 = vmul.f32 0.2, %v329_v50  ;;  %v394_v4 = vmul.f32 %v2224_v9, %v259_v55 }
  0x3a   : > { %v775_v6 = vsel %vm519_vm5, %v391_v38, %v647_v53  ;;  %vm457_vm8 = vcmp.ge.f32.partialorder %v329_v50, 0.0  ;;  %v649_v7 = vmul.f32 0.2, %v393_v54  ;;  %vm521_vm9 = vcmp.ge.f32.partialorder %v393_v54, 0.0 }
  0x3b   : > { %v586_v10 = vmul.f32 0.2, %v330_v58  ;;  %v395_v11 = vmul.f32 %v2224_v9, %v260_v63  ;;  %vm458_vm10 = vcmp.ge.f32.partialorder %v330_v58, 0.0  ;;  %v396_v15 = vmul.f32 %v2224_v9, %v261_v1 }
  0x3c   : > { %1931 = vmatmul.mubr.f32.gmra.mrb[10].mxu0 %v704_v8  ;;  %2027 = vmatmul.mubr.f32.gmra.mrb[10].mxu1 %v768_v12  ;;  %v331_v8 = vmul.f32 %v2224_v9, %v196_v59  ;;  %v332_v12 = vmul.f32 %v2224_v9, %v197_v0  ;;  %v333_v16 = vmul.f32 %v2224_v9, %v198_v5  ;;  %vm522_vm11 = vcmp.ge.f32.partialorder %v394_v4, 0.0 }
  0x3d   : > { %1933 = vmatprep.mubr.f32.mxu0 %v705_v13  ;;  %2029 = vmatprep.mubr.f32.mxu1 %v769_v14  ;;  %v262_v13 = vld [vmem:[%s2237_s9 + $0x2c0] sm:$0xff]  ;;  %v712_v14 = vsel %vm456_vm6, %v328_v47, %v584_v62  ;;  %v776_v17 = vsel %vm520_vm7, %v392_v49, %v648_v2  ;;  %v713_v18 = vsel %vm457_vm8, %v329_v50, %v585_v3  ;;  %v650_v19 = vmul.f32 0.2, %v394_v4  ;;  %v203_v49 = vld [vmem:[%s2237_s9 + $0xe8] sm:$0xff] }
  0x3e   : > { %v777_v21 = vsel %vm521_vm9, %v393_v54, %v649_v7  ;;  %vm459_vm12 = vcmp.ge.f32.partialorder %v331_v8, 0.0  ;;  %v587_v22 = vmul.f32 0.2, %v331_v8  ;;  %v397_v23 = vmul.f32 %v2224_v9, %v262_v13  ;;  %v267_v50 = vld [vmem:[%s2237_s9 + $0x2e8] sm:$0xff]  ;;  %v204_v54 = vld [vmem:[%s2237_s9 + $0xf0] sm:$0xff] }
  0x3f   : > { %v714_v26 = vsel %vm458_vm10, %v330_v58, %v586_v10  ;;  %vm523_vm13 = vcmp.ge.f32.partialorder %v395_v11, 0.0  ;;  %v651_v27 = vmul.f32 0.2, %v395_v11  ;;  %v588_v28 = vmul.f32 0.2, %v332_v12  ;;  %v206_v10 = vld [vmem:[%s2237_s9 + $0x100] sm:$0xff] }
  0x40   : > { %1934 = vmatmul.mubr.f32.gmra.mrb[12].mxu0 %v706_v29  ;;  %2030 = vmatmul.mubr.f32.gmra.mrb[12].mxu1 %v770_v32  ;;  %v264_v29 = vld [vmem:[%s2237_s9 + $0x2d0] sm:$0xff]  ;;  %vm460_vm14 = vcmp.ge.f32.partialorder %v332_v12, 0.0  ;;  %v652_v30 = vmul.f32 0.2, %v396_v15  ;;  %v589_v31 = vmul.f32 0.2, %v333_v16  ;;  %v334_v32 = vmul.f32 %v2224_v9, %v199_v20 }
  0x41   : > { %1936 = vmatprep.mubr.f32.mxu0 %v707_v33  ;;  %2032 = vmatprep.mubr.f32.mxu1 %v771_v36  ;;  %v201_v33 = vld [vmem:[%s2237_s9 + $0xd8] sm:$0xff]  ;;  %vm524_vm15 = vcmp.ge.f32.partialorder %v396_v15, 0.0  ;;  %vm461_vm0 = vcmp.ge.f32.partialorder %v333_v16, 0.0  ;;  %v398_v34 = vmul.f32 %v2224_v9, %v263_v24  ;;  %v335_v35 = vmul.f32 %v2224_v9, %v200_v25  ;;  %v271_v25 = vld [vmem:[%s2237_s9 + $0x308] sm:$0xff] }
  0x42   : > { %v778_v36 = vsel %vm522_vm11, %v394_v4, %v650_v19  ;;  %v715_v37 = vsel %vm459_vm12, %v331_v8, %v587_v22  ;;  %v653_v38 = vmul.f32 0.2, %v397_v23  ;;  %v399_v39 = vmul.f32 %v2224_v9, %v264_v29  ;;  %v205_v4 = vld [vmem:[%s2237_s9 + $0xf8] sm:$0xff]  ;;  %v208_v29 = vld [vmem:[%s2237_s9 + $0x110] sm:$0xff] }
  0x43   : > { %v716_v42 = vsel %vm460_vm14, %v332_v12, %v588_v28  ;;  %vm525_vm1 = vcmp.ge.f32.partialorder %v397_v23, 0.0  ;;  %v336_v43 = vmul.f32 %v2224_v9, %v201_v33  ;;  %v780_v45 = vsel %vm524_vm15, %v396_v15, %v652_v30  ;;  %v269_v8 = vld [vmem:[%s2237_s9 + $0x2f8] sm:$0xff]  ;;  %v272_v33 = vld [vmem:[%s2237_s9 + $0x310] sm:$0xff] }
  0x44   : > { %1937 = vmatmul.mubr.f32.gmra.mrb[14].mxu0 %v708_v41  ;;  %2033 = vmatmul.mubr.f32.gmra.mrb[14].mxu1 %v772_v51  ;;  %v779_v41 = vsel %vm523_vm13, %v395_v11, %v651_v27  ;;  %v717_v46 = vsel %vm461_vm0, %v333_v16, %v589_v31  ;;  %vm462_vm2 = vcmp.ge.f32.partialorder %v334_v32, 0.0  ;;  %v590_v47 = vmul.f32 0.2, %v334_v32 }
  0x45   : > { %1939 = vmatprep.mubr.f32.mxu0 %v709_v52  ;;  %2035 = vmatprep.mubr.f32.mxu1 %v773_v56  ;;  %vm526_vm3 = vcmp.ge.f32.partialorder %v398_v34, 0.0  ;;  %v654_v51 = vmul.f32 0.2, %v398_v34  ;;  %v591_v52 = vmul.f32 0.2, %v335_v35  ;;  %v400_v53 = vmul.f32 %v2224_v9, %v265_v40 }
  0x46   : > { %v781_v55 = vsel %vm525_vm1, %v397_v23, %v653_v38  ;;  %vm463_vm4 = vcmp.ge.f32.partialorder %v335_v35, 0.0  ;;  %v655_v56 = vmul.f32 0.2, %v399_v39  ;;  %vm527_vm5 = vcmp.ge.f32.partialorder %v399_v39, 0.0 }
  0x47   : > { %v592_v58 = vmul.f32 0.2, %v336_v43  ;;  %v401_v59 = vmul.f32 %v2224_v9, %v266_v48  ;;  %v718_v62 = vsel %vm462_vm2, %v334_v32, %v590_v47  ;;  %vm464_vm6 = vcmp.ge.f32.partialorder %v336_v43, 0.0 }
  0x48   : > { %1940 = vmatmul.mubr.f32.gmra.mrb[16].mxu0 %v710_v57  ;;  %2036 = vmatmul.mubr.f32.gmra.mrb[16].mxu1 %v774_v60  ;;  %v337_v57 = vmul.f32 %v2224_v9, %v202_v44  ;;  %v338_v60 = vmul.f32 %v2224_v9, %v203_v49  ;;  %v402_v63 = vmul.f32 %v2224_v9, %v267_v50  ;;  %vm528_vm7 = vcmp.ge.f32.partialorder %v400_v53, 0.0 }
  0x49   : > { %1942 = vmatprep.mubr.f32.mxu0 %v711_v61  ;;  %2038 = vmatprep.mubr.f32.mxu1 %v775_v6  ;;  %v268_v61 = vld [vmem:[%s2237_s9 + $0x2f0] sm:$0xff]  ;;  %v339_v0 = vmul.f32 %v2224_v9, %v204_v54  ;;  %v782_v1 = vsel %vm526_vm3, %v398_v34, %v654_v51  ;;  %v719_v2 = vsel %vm463_vm4, %v335_v35, %v591_v52  ;;  %v656_v3 = vmul.f32 0.2, %v400_v53  ;;  %v209_v34 = vld [vmem:[%s2237_s9 + $0x118] sm:$0xff] }
  0x4a   : > { %v783_v5 = vsel %vm527_vm5, %v399_v39, %v655_v56  ;;  %vm465_vm8 = vcmp.ge.f32.partialorder %v337_v57, 0.0  ;;  %v593_v6 = vmul.f32 0.2, %v337_v57  ;;  %v403_v7 = vmul.f32 %v2224_v9, %v268_v61  ;;  %v273_v35 = vld [vmem:[%s2237_s9 + $0x318] sm:$0xff]  ;;  %v210_v39 = vld [vmem:[%s2237_s9 + $0x120] sm:$0xff] }
  0x4b   : > { %v720_v11 = vsel %vm464_vm6, %v336_v43, %v592_v58  ;;  %vm529_vm9 = vcmp.ge.f32.partialorder %v401_v59, 0.0  ;;  %v657_v12 = vmul.f32 0.2, %v401_v59  ;;  %v594_v13 = vmul.f32 0.2, %v338_v60  ;;  %v212_v58 = vld [vmem:[%s2237_s9 + $0x130] sm:$0xff] }
  0x4c   : > { %1943 = vmatmul.mubr.f32.gmra.mrb[18].mxu0 %v712_v14  ;;  %2039 = vmatmul.mubr.f32.gmra.mrb[18].mxu1 %v776_v17  ;;  %v270_v14 = vld [vmem:[%s2237_s9 + $0x300] sm:$0xff]  ;;  %vm466_vm10 = vcmp.ge.f32.partialorder %v338_v60, 0.0  ;;  %v658_v15 = vmul.f32 0.2, %v402_v63  ;;  %v595_v16 = vmul.f32 0.2, %v339_v0  ;;  %v340_v17 = vmul.f32 %v2224_v9, %v205_v4 }
  0x4d   : > { %1945 = vmatprep.mubr.f32.mxu0 %v713_v18  ;;  %2041 = vmatprep.mubr.f32.mxu1 %v777_v21  ;;  %v207_v18 = vld [vmem:[%s2237_s9 + $0x108] sm:$0xff]  ;;  %vm530_vm11 = vcmp.ge.f32.partialorder %v402_v63, 0.0  ;;  %vm467_vm12 = vcmp.ge.f32.partialorder %v339_v0, 0.0  ;;  %v404_v19 = vmul.f32 %v2224_v9, %v269_v8  ;;  %v341_v20 = vmul.f32 %v2224_v9, %v206_v10  ;;  %v277_v10 = vld [vmem:[%s2237_s9 + $0x338] sm:$0xff] }
  0x4e   : > { %v784_v21 = vsel %vm528_vm7, %v400_v53, %v656_v3  ;;  %v721_v22 = vsel %vm465_vm8, %v337_v57, %v593_v6  ;;  %v659_v23 = vmul.f32 0.2, %v403_v7  ;;  %v405_v24 = vmul.f32 %v2224_v9, %v270_v14  ;;  %v211_v53 = vld [vmem:[%s2237_s9 + $0x128] sm:$0xff]  ;;  %v214_v14 = vld [vmem:[%s2237_s9 + $0x140] sm:$0xff] }
  0x4f   : > { %v722_v27 = vsel %vm466_vm10, %v338_v60, %v594_v13  ;;  %vm531_vm13 = vcmp.ge.f32.partialorder %v403_v7, 0.0  ;;  %v342_v28 = vmul.f32 %v2224_v9, %v207_v18  ;;  %v786_v30 = vsel %vm530_vm11, %v402_v63, %v658_v15  ;;  %v275_v57 = vld [vmem:[%s2237_s9 + $0x328] sm:$0xff]  ;;  %v278_v18 = vld [vmem:[%s2237_s9 + $0x340] sm:$0xff] }
  0x50   : > { %1946 = vmatmul.mubr.f32.gmra.mrb[20].mxu0 %v714_v26  ;;  %2042 = vmatmul.mubr.f32.gmra.mrb[20].mxu1 %v778_v36  ;;  %v785_v26 = vsel %vm529_vm9, %v401_v59, %v657_v12  ;;  %v723_v31 = vsel %vm467_vm12, %v339_v0, %v595_v16  ;;  %vm468_vm14 = vcmp.ge.f32.partialorder %v340_v17, 0.0  ;;  %v596_v32 = vmul.f32 0.2, %v340_v17 }
  0x51   : > { %1948 = vmatprep.mubr.f32.mxu0 %v715_v37  ;;  %2044 = vmatprep.mubr.f32.mxu1 %v779_v41  ;;  %vm532_vm15 = vcmp.ge.f32.partialorder %v404_v19, 0.0  ;;  %v660_v36 = vmul.f32 0.2, %v404_v19  ;;  %v597_v37 = vmul.f32 0.2, %v341_v20  ;;  %v406_v38 = vmul.f32 %v2224_v9, %v271_v25 }
  0x52   : > { %v787_v40 = vsel %vm531_vm13, %v403_v7, %v659_v23  ;;  %vm469_vm0 = vcmp.ge.f32.partialorder %v341_v20, 0.0  ;;  %v661_v41 = vmul.f32 0.2, %v405_v24  ;;  %vm533_vm1 = vcmp.ge.f32.partialorder %v405_v24, 0.0 }
  0x53   : > { %v598_v43 = vmul.f32 0.2, %v342_v28  ;;  %v407_v44 = vmul.f32 %v2224_v9, %v272_v33  ;;  %v724_v47 = vsel %vm468_vm14, %v340_v17, %v596_v32  ;;  %vm470_vm2 = vcmp.ge.f32.partialorder %v342_v28, 0.0  ;;  %v2499_v33 = vld [vmem:[%s2895_s0] ss:$0 sm:$0xff] }
  0x54   : > { %1949 = vmatmul.mubr.f32.gmra.mrb[22].mxu0 %v716_v42  ;;  %2045 = vmatmul.mubr.f32.gmra.mrb[22].mxu1 %v780_v45  ;;  %v343_v42 = vmul.f32 %v2224_v9, %v208_v29  ;;  %v344_v45 = vmul.f32 %v2224_v9, %v209_v34  ;;  %v408_v48 = vmul.f32 %v2224_v9, %v273_v35  ;;  %vm534_vm3 = vcmp.ge.f32.partialorder %v406_v38, 0.0 }
  0x55   : > { %1951 = vmatprep.mubr.f32.mxu0 %v717_v46  ;;  %2047 = vmatprep.mubr.f32.mxu1 %v781_v55  ;;  %v274_v46 = vld [vmem:[%s2237_s9 + $0x320] sm:$0xff]  ;;  %v345_v49 = vmul.f32 %v2224_v9, %v210_v39  ;;  %v788_v50 = vsel %vm532_vm15, %v404_v19, %v660_v36  ;;  %v725_v51 = vsel %vm469_vm0, %v341_v20, %v597_v37  ;;  %v662_v52 = vmul.f32 0.2, %v406_v38  ;;  %v215_v19 = vld [vmem:[%s2237_s9 + $0x148] sm:$0xff] }
  0x56   : > { %v789_v54 = vsel %vm533_vm1, %v405_v24, %v661_v41  ;;  %vm471_vm4 = vcmp.ge.f32.partialorder %v343_v42, 0.0  ;;  %v599_v55 = vmul.f32 0.2, %v343_v42  ;;  %v409_v56 = vmul.f32 %v2224_v9, %v274_v46  ;;  %v279_v20 = vld [vmem:[%s2237_s9 + $0x348] sm:$0xff]  ;;  %v216_v24 = vld [vmem:[%s2237_s9 + $0x150] sm:$0xff] }
  0x57   : > { %v726_v59 = vsel %vm470_vm2, %v342_v28, %v598_v43  ;;  %vm535_vm5 = vcmp.ge.f32.partialorder %v407_v44, 0.0  ;;  %v663_v60 = vmul.f32 0.2, %v407_v44  ;;  %v600_v61 = vmul.f32 0.2, %v344_v45  ;;  %v218_v43 = vld [vmem:[%s2237_s9 + $0x160] sm:$0xff] }
  0x58   : > { %1952 = vmatmul.mubr.f32.gmra.mrb[24].mxu0 %v718_v62  ;;  %2048 = vmatmul.mubr.f32.gmra.mrb[24].mxu1 %v782_v1  ;;  %v276_v62 = vld [vmem:[%s2237_s9 + $0x330] sm:$0xff]  ;;  %vm472_vm6 = vcmp.ge.f32.partialorder %v344_v45, 0.0  ;;  %v664_v63 = vmul.f32 0.2, %v408_v48  ;;  %v601_v0 = vmul.f32 0.2, %v345_v49  ;;  %v346_v1 = vmul.f32 %v2224_v9, %v211_v53 }
  0x59   : > { %1954 = vmatprep.mubr.f32.mxu0 %v719_v2  ;;  %2050 = vmatprep.mubr.f32.mxu1 %v783_v5  ;;  %v213_v2 = vld [vmem:[%s2237_s9 + $0x138] sm:$0xff]  ;;  %vm536_vm7 = vcmp.ge.f32.partialorder %v408_v48, 0.0  ;;  %vm473_vm8 = vcmp.ge.f32.partialorder %v345_v49, 0.0  ;;  %v410_v3 = vmul.f32 %v2224_v9, %v275_v57  ;;  %v347_v4 = vmul.f32 %v2224_v9, %v212_v58  ;;  %v283_v58 = vld [vmem:[%s2237_s9 + $0x368] sm:$0xff] }
  0x5a   : > { %v790_v5 = vsel %vm534_vm3, %v406_v38, %v662_v52  ;;  %v727_v6 = vsel %vm471_vm4, %v343_v42, %v599_v55  ;;  %v665_v7 = vmul.f32 0.2, %v409_v56  ;;  %v411_v8 = vmul.f32 %v2224_v9, %v276_v62  ;;  %v217_v38 = vld [vmem:[%s2237_s9 + $0x158] sm:$0xff]  ;;  %v220_v62 = vld [vmem:[%s2237_s9 + $0x170] sm:$0xff] }
  0x5b   : > { %v728_v12 = vsel %vm472_vm6, %v344_v45, %v600_v61  ;;  %vm537_vm9 = vcmp.ge.f32.partialorder %v409_v56, 0.0  ;;  %v348_v13 = vmul.f32 %v2224_v9, %v213_v2  ;;  %v792_v15 = vsel %vm536_vm7, %v408_v48, %v664_v63  ;;  %v281_v42 = vld [vmem:[%s2237_s9 + $0x358] sm:$0xff]  ;;  %v284_v2 = vld [vmem:[%s2237_s9 + $0x370] sm:$0xff] }
  0x5c   : > { %1955 = vmatmul.mubr.f32.gmra.mrb[26].mxu0 %v720_v11  ;;  %2051 = vmatmul.mubr.f32.gmra.mrb[26].mxu1 %v784_v21  ;;  %v791_v11 = vsel %vm535_vm5, %v407_v44, %v663_v60  ;;  %v729_v16 = vsel %vm473_vm8, %v345_v49, %v601_v0  ;;  %vm474_vm10 = vcmp.ge.f32.partialorder %v346_v1, 0.0  ;;  %v602_v17 = vmul.f32 0.2, %v346_v1 }
  0x5d   : > { %1957 = vmatprep.mubr.f32.mxu0 %v721_v22  ;;  %2053 = vmatprep.mubr.f32.mxu1 %v785_v26  ;;  %vm538_vm11 = vcmp.ge.f32.partialorder %v410_v3, 0.0  ;;  %v666_v21 = vmul.f32 0.2, %v410_v3  ;;  %v603_v22 = vmul.f32 0.2, %v347_v4  ;;  %v412_v23 = vmul.f32 %v2224_v9, %v277_v10 }
  0x5e   : > { %v793_v25 = vsel %vm537_vm9, %v409_v56, %v665_v7  ;;  %vm475_vm12 = vcmp.ge.f32.partialorder %v347_v4, 0.0  ;;  %v667_v26 = vmul.f32 0.2, %v411_v8  ;;  %vm539_vm13 = vcmp.ge.f32.partialorder %v411_v8, 0.0 }
  0x5f   : > { %v604_v28 = vmul.f32 0.2, %v348_v13  ;;  %v413_v29 = vmul.f32 %v2224_v9, %v278_v18  ;;  %v730_v32 = vsel %vm474_vm10, %v346_v1, %v602_v17  ;;  %vm476_vm14 = vcmp.ge.f32.partialorder %v348_v13, 0.0 }
  0x60   : > { %1958 = vmatmul.mubr.f32.gmra.mrb[28].mxu0 %v722_v27  ;;  %2054 = vmatmul.mubr.f32.gmra.mrb[28].mxu1 %v786_v30  ;;  %v349_v27 = vmul.f32 %v2224_v9, %v214_v14  ;;  %v350_v30 = vmul.f32 %v2224_v9, %v215_v19  ;;  %v414_v34 = vmul.f32 %v2499_v33, %v279_v20  ;;  %vm540_vm15 = vcmp.ge.f32.partialorder %v412_v23, 0.0 }
  0x61   : > { %1960 = vmatprep.mubr.f32.mxu0 %v723_v31  ;;  %2056 = vmatprep.mubr.f32.mxu1 %v787_v40  ;;  %v280_v31 = vld [vmem:[%s2237_s9 + $0x350] sm:$0xff]  ;;  %v351_v35 = vmul.f32 %v2499_v33, %v216_v24  ;;  %v794_v36 = vsel %vm538_vm11, %v410_v3, %v666_v21  ;;  %v731_v9 = vsel %vm475_vm12, %v347_v4, %v603_v22  ;;  %v668_v37 = vmul.f32 0.2, %v412_v23  ;;  %v221_v3 = vld [vmem:[%s2237_s9 + $0x178] sm:$0xff]  ;;  %v287_v24 = vld [vmem:[%s2237_s9 + $0x388] sm:$0xff] }
  0x62   : > { %v795_v39 = vsel %vm539_vm13, %v411_v8, %v667_v26  ;;  %vm477_vm0 = vcmp.ge.f32.partialorder %v349_v27, 0.0  ;;  %v605_v40 = vmul.f32 0.2, %v349_v27  ;;  %v415_v41 = vmul.f32 %v2499_v33, %v280_v31  ;;  %v285_v4 = vld [vmem:[%s2237_s9 + $0x378] sm:$0xff]  ;;  %v222_v8 = vld [vmem:[%s2237_s9 + $0x180] sm:$0xff] }
  0x63   : > { %v732_v44 = vsel %vm476_vm14, %v348_v13, %v604_v28  ;;  %vm541_vm1 = vcmp.ge.f32.partialorder %v413_v29, 0.0  ;;  %v669_v45 = vmul.f32 0.2, %v413_v29  ;;  %v606_v46 = vmul.f32 0.2, %v350_v30  ;;  %v286_v13 = vld [vmem:[%s2237_s9 + $0x380] sm:$0xff] }
  0x64   : > { %1961 = vmatmul.mubr.f32.gmra.mrb[30].mxu0 %v724_v47  ;;  %2057 = vmatmul.mubr.f32.gmra.mrb[30].mxu1 %v788_v50  ;;  %v282_v47 = vld [vmem:[%s2237_s9 + $0x360] sm:$0xff]  ;;  %vm478_vm2 = vcmp.ge.f32.partialorder %v350_v30, 0.0  ;;  %v670_v48 = vmul.f32 0.2, %v414_v34  ;;  %v607_v49 = vmul.f32 0.2, %v351_v35  ;;  %v352_v50 = vmul.f32 %v2499_v33, %v217_v38 }
  0x65   : > { %1963 = vmatprep.mubr.f32.mxu0 %v725_v51  ;;  %2059 = vmatprep.mubr.f32.mxu1 %v789_v54  ;;  %v219_v51 = vld [vmem:[%s2237_s9 + $0x168] sm:$0xff]  ;;  %vm542_vm3 = vcmp.ge.f32.partialorder %v414_v34, 0.0  ;;  %vm479_vm4 = vcmp.ge.f32.partialorder %v351_v35, 0.0  ;;  %v416_v52 = vmul.f32 %v2499_v33, %v281_v42  ;;  %v353_v53 = vmul.f32 %v2499_v33, %v218_v43 }
  0x66   : > { %v796_v54 = vsel %vm540_vm15, %v412_v23, %v668_v37  ;;  %v733_v55 = vsel %vm477_vm0, %v349_v27, %v605_v40  ;;  %v671_v56 = vmul.f32 0.2, %v415_v41  ;;  %v417_v57 = vmul.f32 %v2499_v33, %v282_v47  ;;  %v223_v23 = vld [vmem:[%s2237_s9 + $0x188] sm:$0xff]  ;;  %v226_v47 = vld [vmem:[%s2237_s9 + $0x1a0] sm:$0xff] }
  0x67   : > { %v734_v60 = vsel %vm478_vm2, %v350_v30, %v606_v46  ;;  %vm543_vm5 = vcmp.ge.f32.partialorder %v415_v41, 0.0  ;;  %v354_v61 = vmul.f32 %v2499_v33, %v219_v51  ;;  %v798_v63 = vsel %vm542_vm3, %v414_v34, %v670_v48  ;;  %v289_v34 = vld [vmem:[%s2237_s9 + $0x398] sm:$0xff]  ;;  %v290_v51 = vld [vmem:[%s2237_s9 + $0x3a0] sm:$0xff] }
  0x68   : > { %1964 = vmatmul.mubr.f32.gmra.mrb[32].mxu0 %v726_v59  ;;  %2060 = vmatmul.mubr.f32.gmra.mrb[32].mxu1 %v790_v5  ;;  %v797_v59 = vsel %vm541_vm1, %v413_v29, %v669_v45  ;;  %v735_v0 = vsel %vm479_vm4, %v351_v35, %v607_v49  ;;  %vm480_vm6 = vcmp.ge.f32.partialorder %v352_v50, 0.0  ;;  %v608_v1 = vmul.f32 0.2, %v352_v50  ;;  %v288_v29 = vld [vmem:[%s2237_s9 + $0x390] sm:$0xff] }
  0x69   : > { %1966 = vmatprep.mubr.f32.mxu0 %v727_v6  ;;  %2062 = vmatprep.mubr.f32.mxu1 %v791_v11  ;;  %vm544_vm7 = vcmp.ge.f32.partialorder %v416_v52, 0.0  ;;  %v672_v5 = vmul.f32 0.2, %v416_v52  ;;  %v609_v6 = vmul.f32 0.2, %v353_v53  ;;  %v418_v7 = vmul.f32 %v2499_v33, %v283_v58 }
  0x6a   : > { %v799_v10 = vsel %vm543_vm5, %v415_v41, %v671_v56  ;;  %vm481_vm8 = vcmp.ge.f32.partialorder %v353_v53, 0.0  ;;  %v673_v11 = vmul.f32 0.2, %v417_v57  ;;  %vm545_vm9 = vcmp.ge.f32.partialorder %v417_v57, 0.0  ;;  %v291_v56 = vld [vmem:[%s2237_s9 + $0x3a8] sm:$0xff] }
  0x6b   : > { %v610_v14 = vmul.f32 0.2, %v354_v61  ;;  %v736_v17 = vsel %vm480_vm6, %v352_v50, %v608_v1  ;;  %vm482_vm10 = vcmp.ge.f32.partialorder %v354_v61, 0.0  ;;  %v420_v18 = vmul.f32 %v2499_v33, %v285_v4 }
  0x6c   : > { %1967 = vmatmul.mubr.f32.gmra.mrb[34].mxu0 %v728_v12  ;;  %2063 = vmatmul.mubr.f32.gmra.mrb[34].mxu1 %v792_v15  ;;  %v355_v12 = vmul.f32 %v2499_v33, %v220_v62  ;;  %v419_v15 = vmul.f32 %v2499_v33, %v284_v2  ;;  %v357_v19 = vmul.f32 %v2499_v33, %v222_v8  ;;  %vm546_vm11 = vcmp.ge.f32.partialorder %v418_v7, 0.0 }
  0x6d   : > { %1969 = vmatprep.mubr.f32.mxu0 %v729_v16  ;;  %2065 = vmatprep.mubr.f32.mxu1 %v793_v25  ;;  %v356_v16 = vmul.f32 %v2499_v33, %v221_v3  ;;  %v800_v20 = vsel %vm544_vm7, %v416_v52, %v672_v5  ;;  %v737_v21 = vsel %vm481_vm8, %v353_v53, %v609_v6  ;;  %v224_v25 = vld [vmem:[%s2237_s9 + $0x190] sm:$0xff]  ;;  %v674_v27 = vmul.f32 0.2, %v418_v7  ;;  %v227_v52 = vld [vmem:[%s2237_s9 + $0x1a8] sm:$0xff] }
  0x6e   : > { %v421_v22 = vmul.f32 %v2499_v33, %v286_v13  ;;  %v801_v26 = vsel %vm545_vm9, %v417_v57, %v673_v11  ;;  %vm483_vm12 = vcmp.ge.f32.partialorder %v355_v12, 0.0  ;;  %v611_v28 = vmul.f32 0.2, %v355_v12  ;;  %v229_v11 = vld [vmem:[%s2237_s9 + $0x1b8] sm:$0xff] }
  0x6f   : > { %v738_v30 = vsel %vm482_vm10, %v354_v61, %v610_v14  ;;  %vm547_vm13 = vcmp.ge.f32.partialorder %v419_v15, 0.0  ;;  %v675_v31 = vmul.f32 0.2, %v419_v15  ;;  %vm484_vm14 = vcmp.ge.f32.partialorder %v356_v16, 0.0 }
  0x70   : > { %1970 = vmatmul.mubr.f32.gmra.mrb[36].mxu0 %v730_v32  ;;  %2066 = vmatmul.mubr.f32.gmra.mrb[36].mxu1 %v794_v36  ;;  %v225_v32 = vld [vmem:[%s2237_s9 + $0x198] sm:$0xff]  ;;  %v612_v35 = vmul.f32 0.2, %v356_v16  ;;  %v676_v36 = vmul.f32 0.2, %v420_v18  ;;  %v358_v37 = vmul.f32 %v2499_v33, %v223_v23  ;;  %vm548_vm15 = vcmp.ge.f32.partialorder %v420_v18, 0.0 }
  0x71   : > { %1972 = vmatprep.mubr.f32.mxu0 %v731_v9  ;;  %2068 = vmatprep.mubr.f32.mxu1 %v795_v39  ;;  %v613_v9 = vmul.f32 0.2, %v357_v19  ;;  %vm485_vm0 = vcmp.ge.f32.partialorder %v357_v19, 0.0  ;;  %v677_v38 = vmul.f32 0.2, %v421_v22  ;;  %v422_v39 = vmul.f32 %v2499_v33, %v287_v24  ;;  %v295_v24 = vld [vmem:[%s2237_s9 + $0x3c8] sm:$0xff] }
  0x72   : > { %v802_v40 = vsel %vm546_vm11, %v418_v7, %v674_v27  ;;  %vm549_vm1 = vcmp.ge.f32.partialorder %v421_v22, 0.0  ;;  %v359_v41 = vmul.f32 %v2499_v33, %v224_v25  ;;  %v423_v42 = vmul.f32 %v2499_v33, %v288_v29  ;;  %v232_v25 = vld [vmem:[%s2237_s9 + $0x1d0] sm:$0xff] }
  0x73   : > { %v739_v43 = vsel %vm483_vm12, %v355_v12, %v611_v28  ;;  %v360_v45 = vmul.f32 %v2499_v33, %v225_v32  ;;  %v424_v46 = vmul.f32 %v2499_v33, %v289_v34  ;;  %v740_v48 = vsel %vm484_vm14, %v356_v16, %v612_v35  ;;  %v293_v12 = vld [vmem:[%s2237_s9 + $0x3b8] sm:$0xff]  ;;  %v230_v16 = vld [vmem:[%s2237_s9 + $0x1c0] sm:$0xff] }
  0x74   : > { %1973 = vmatmul.mubr.f32.gmra.mrb[38].mxu0 %v732_v44  ;;  %2069 = vmatmul.mubr.f32.gmra.mrb[38].mxu1 %v796_v54  ;;  %v803_v44 = vsel %vm547_vm13, %v419_v15, %v675_v31  ;;  %v804_v49 = vsel %vm548_vm15, %v420_v18, %v676_v36  ;;  %v741_v50 = vsel %vm485_vm0, %v357_v19, %v613_v9  ;;  %vm486_vm2 = vcmp.ge.f32.partialorder %v358_v37, 0.0  ;;  %v231_v18 = vld [vmem:[%s2237_s9 + $0x1c8] sm:$0xff]  ;;  %v296_v9 = vld [vmem:[%s2237_s9 + $0x3d0] sm:$0xff] }
  0x75   : > { %1975 = vmatprep.mubr.f32.mxu0 %v733_v55  ;;  %2071 = vmatprep.mubr.f32.mxu1 %v797_v59  ;;  %v805_v53 = vsel %vm549_vm1, %v421_v22, %v677_v38  ;;  %v614_v54 = vmul.f32 0.2, %v358_v37  ;;  %vm550_vm3 = vcmp.ge.f32.partialorder %v422_v39, 0.0  ;;  %v678_v55 = vmul.f32 0.2, %v422_v39 }
  0x76   : > { %vm487_vm4 = vcmp.ge.f32.partialorder %v359_v41, 0.0  ;;  %v615_v57 = vmul.f32 0.2, %v359_v41  ;;  %v679_v58 = vmul.f32 0.2, %v423_v42  ;;  %v361_v59 = vmul.f32 %v2499_v33, %v226_v47 }
  0x77   : > { %vm551_vm5 = vcmp.ge.f32.partialorder %v423_v42, 0.0  ;;  %v616_v61 = vmul.f32 0.2, %v360_v45  ;;  %v680_v62 = vmul.f32 0.2, %v424_v46  ;;  %vm488_vm6 = vcmp.ge.f32.partialorder %v360_v45, 0.0 }
  0x78   : > { %1976 = vmatmul.mubr.f32.gmra.mrb[40].mxu0 %v734_v60  ;;  %2072 = vmatmul.mubr.f32.gmra.mrb[40].mxu1 %v798_v63  ;;  %v228_v60 = vld [vmem:[%s2237_s9 + $0x1b0] sm:$0xff]  ;;  %v425_v63 = vmul.f32 %v2499_v33, %v290_v51  ;;  %vm552_vm7 = vcmp.ge.f32.partialorder %v424_v46, 0.0  ;;  %v362_v1 = vmul.f32 %v2499_v33, %v227_v52  ;;  %v426_v2 = vmul.f32 %v2499_v33, %v291_v56  ;;  %v235_v56 = vld [vmem:[%s2237_s9 + $0x1e8] sm:$0xff] }
  0x79   : > { %1978 = vmatprep.mubr.f32.mxu0 %v735_v0  ;;  %2074 = vmatprep.mubr.f32.mxu1 %v799_v10  ;;  %v292_v0 = vld [vmem:[%s2237_s9 + $0x3b0] sm:$0xff]  ;;  %v742_v3 = vsel %vm486_vm2, %v358_v37, %v614_v54  ;;  %v806_v4 = vsel %vm550_vm3, %v422_v39, %v678_v55  ;;  %v363_v5 = vmul.f32 %v2499_v33, %v228_v60  ;;  %v617_v8 = vmul.f32 0.2, %v361_v59  ;;  %v233_v39 = vld [vmem:[%s2237_s9 + $0x1d8] sm:$0xff] }
  0x7a   : > { %v743_v6 = vsel %vm487_vm4, %v359_v41, %v615_v57  ;;  %v807_v7 = vsel %vm551_vm5, %v423_v42, %v679_v58  ;;  %v427_v10 = vmul.f32 %v2499_v33, %v292_v0  ;;  %v744_v13 = vsel %vm488_vm6, %v360_v45, %v616_v61  ;;  %v299_v61 = vld [vmem:[%s2237_s9 + $0x3e8] sm:$0xff] }
  0x7b   : > { %v808_v14 = vsel %vm552_vm7, %v424_v46, %v680_v62  ;;  %vm489_vm8 = vcmp.ge.f32.partialorder %v361_v59, 0.0  ;;  %v681_v15 = vmul.f32 0.2, %v425_v63  ;;  %vm553_vm9 = vcmp.ge.f32.partialorder %v425_v63, 0.0 }
  0x7c   : > { %1979 = vmatmul.mubr.f32.gmra.mrb[42].mxu0 %v736_v17  ;;  %2075 = vmatmul.mubr.f32.gmra.mrb[42].mxu1 %v800_v20  ;;  %v294_v17 = vld [vmem:[%s2237_s9 + $0x3c0] sm:$0xff]  ;;  %vm490_vm10 = vcmp.ge.f32.partialorder %v362_v1, 0.0  ;;  %v618_v19 = vmul.f32 0.2, %v362_v1  ;;  %v682_v20 = vmul.f32 0.2, %v426_v2  ;;  %v364_v22 = vmul.f32 %v2499_v33, %v229_v11 }
  0x7d   : > { %1981 = vmatprep.mubr.f32.mxu0 %v737_v21  ;;  %2077 = vmatprep.mubr.f32.mxu1 %v801_v26  ;;  %vm554_vm11 = vcmp.ge.f32.partialorder %v426_v2, 0.0  ;;  %v619_v21 = vmul.f32 0.2, %v363_v5  ;;  %v428_v23 = vmul.f32 %v2499_v33, %v293_v12  ;;  %v745_v26 = vsel %vm489_vm8, %v361_v59, %v617_v8 }
  0x7e   : > { %vm491_vm12 = vcmp.ge.f32.partialorder %v363_v5, 0.0  ;;  %v683_v27 = vmul.f32 0.2, %v427_v10  ;;  %v365_v28 = vmul.f32 %v2499_v33, %v230_v16  ;;  %v809_v29 = vsel %vm553_vm9, %v425_v63, %v681_v15 }
  0x7f   : > { %vm555_vm13 = vcmp.ge.f32.partialorder %v427_v10, 0.0  ;;  %v366_v31 = vmul.f32 %v2499_v33, %v231_v18  ;;  %v746_v32 = vsel %vm490_vm10, %v362_v1, %v618_v19  ;;  %v810_v34 = vsel %vm554_vm11, %v426_v2, %v682_v20  ;;  %v236_v1 = vld [vmem:[%s2237_s9 + $0x1f0] sm:$0xff] }
  0x80   : > { %1982 = vmatmul.mubr.f32.gmra.mrb[44].mxu0 %v738_v30  ;;  %2078 = vmatmul.mubr.f32.gmra.mrb[44].mxu1 %v802_v40  ;;  %v429_v30 = vmul.f32 %v2499_v33, %v294_v17  ;;  %v430_v35 = vmul.f32 %v2499_v33, %v295_v24  ;;  %v367_v36 = vmul.f32 %v2499_v33, %v232_v25  ;;  %vm492_vm14 = vcmp.ge.f32.partialorder %v364_v22, 0.0  ;;  %v297_v40 = vld [vmem:[%s2237_s9 + $0x3d8] sm:$0xff]  ;;  %v300_v2 = vld [vmem:[%s2237_s9 + $0x3f0] sm:$0xff] }
  0x81   : > { %1984 = vmatprep.mubr.f32.mxu0 %v739_v43  ;;  %2080 = vmatprep.mubr.f32.mxu1 %v803_v44  ;;  %v747_v37 = vsel %vm491_vm12, %v363_v5, %v619_v21  ;;  %v620_v38 = vmul.f32 0.2, %v364_v22  ;;  %vm556_vm15 = vcmp.ge.f32.partialorder %v428_v23, 0.0  ;;  %v811_v41 = vsel %vm555_vm13, %v427_v10, %v683_v27  ;;  %v234_v44 = vld [vmem:[%s2237_s9 + $0x1e0] sm:$0xff] }
  0x82   : > { %v684_v42 = vmul.f32 0.2, %v428_v23  ;;  %vm493_vm0 = vcmp.ge.f32.partialorder %v365_v28, 0.0  ;;  %v621_v43 = vmul.f32 0.2, %v365_v28  ;;  %vm557_vm1 = vcmp.ge.f32.partialorder %v429_v30, 0.0 }
  0x83   : > { %v685_v45 = vmul.f32 0.2, %v429_v30  ;;  %v622_v46 = vmul.f32 0.2, %v366_v31  ;;  %v431_v47 = vmul.f32 %v2499_v33, %v296_v9  ;;  %vm494_vm2 = vcmp.ge.f32.partialorder %v366_v31, 0.0 }
  0x84   : > { %1985 = vmatmul.mubr.f32.gmra.mrb[46].mxu0 %v740_v48  ;;  %2081 = vmatmul.mubr.f32.gmra.mrb[46].mxu1 %v804_v49  ;;  %v298_v48 = vld [vmem:[%s2237_s9 + $0x3e0] sm:$0xff]  ;;  %vm558_vm3 = vcmp.ge.f32.partialorder %v430_v35, 0.0  ;;  %v686_v49 = vmul.f32 0.2, %v430_v35  ;;  %vm495_vm4 = vcmp.ge.f32.partialorder %v367_v36, 0.0  ;;  %v368_v51 = vmul.f32 %v2499_v33, %v233_v39 }
  0x85   : > { %1987 = vmatprep.mubr.f32.mxu0 %v741_v50  ;;  %2083 = vmatprep.mubr.f32.mxu1 %v805_v53  ;;  %v623_v50 = vmul.f32 0.2, %v367_v36  ;;  %v432_v52 = vmul.f32 %v2499_v33, %v297_v40  ;;  %v369_v53 = vmul.f32 %v2499_v33, %v234_v44  ;;  %v748_v54 = vsel %vm492_vm14, %v364_v22, %v620_v38 }
  0x86   : > { %v812_v55 = vsel %vm556_vm15, %v428_v23, %v684_v42  ;;  %v749_v57 = vsel %vm493_vm0, %v365_v28, %v621_v43  ;;  %v813_v58 = vsel %vm557_vm1, %v429_v30, %v685_v45  ;;  %v687_v59 = vmul.f32 0.2, %v431_v47 }
  0x87   : > { %v433_v60 = vmul.f32 %v2499_v33, %v298_v48  ;;  %v750_v62 = vsel %vm494_vm2, %v366_v31, %v622_v46  ;;  %v814_v63 = vsel %vm558_vm3, %v430_v35, %v686_v49  ;;  %v751_v0 = vsel %vm495_vm4, %v367_v36, %v623_v50 }
  0x88   : > { %1988 = vmatmul.mubr.f32.gmra.mrb[48].mxu0 %v742_v3  ;;  %2084 = vmatmul.mubr.f32.gmra.mrb[48].mxu1 %v806_v4  ;;  %vm559_vm5 = vcmp.ge.f32.partialorder %v431_v47, 0.0  ;;  %v624_v3 = vmul.f32 0.2, %v368_v51  ;;  %v688_v4 = vmul.f32 0.2, %v432_v52  ;;  %vm496_vm6 = vcmp.ge.f32.partialorder %v368_v51, 0.0 }
  0x89   : > { %1990 = vmatprep.mubr.f32.mxu0 %v743_v6  ;;  %2086 = vmatprep.mubr.f32.mxu1 %v807_v7  ;;  %v625_v5 = vmul.f32 0.2, %v369_v53  ;;  %v370_v6 = vmul.f32 %v2499_v33, %v235_v56  ;;  %vm560_vm7 = vcmp.ge.f32.partialorder %v432_v52, 0.0  ;;  %vm497_vm8 = vcmp.ge.f32.partialorder %v369_v53, 0.0 }
  0x8a   : > { %v434_v7 = vmul.f32 %v2499_v33, %v299_v61  ;;  %v815_v8 = vsel %vm559_vm5, %v431_v47, %v687_v59  ;;  %v689_v10 = vmul.f32 0.2, %v433_v60  ;;  %v371_v11 = vmul.f32 %v2499_v33, %v236_v1 }
  0x8b   : > { %v435_v12 = vmul.f32 %v2499_v33, %v300_v2  ;;  %vm561_vm9 = vcmp.ge.f32.partialorder %v433_v60, 0.0  ;;  %v752_v15 = vsel %vm496_vm6, %v368_v51, %v624_v3  ;;  %v816_v16 = vsel %vm560_vm7, %v432_v52, %v688_v4 }
  0x8c   : > { %1991 = vmatmul.mubr.f32.gmra.mrb[50].mxu0 %v744_v13  ;;  %2087 = vmatmul.mubr.f32.gmra.mrb[50].mxu1 %v808_v14  ;;  %v237_v13 = vld [vmem:[%s2237_s9 + $0x1f8] sm:$0xff]  ;;  %v753_v17 = vsel %vm497_vm8, %v369_v53, %v625_v5  ;;  %vm498_vm10 = vcmp.ge.f32.partialorder %v370_v6, 0.0  ;;  %v626_v18 = vmul.f32 0.2, %v370_v6  ;;  %v690_v19 = vmul.f32 0.2, %v434_v7 }
  0x8d   : > { %1993 = vmatprep.mubr.f32.mxu0 %v745_v26  ;;  %2089 = vmatprep.mubr.f32.mxu1 %v809_v29  ;;  %v301_v14 = vld [vmem:[%s2237_s9 + $0x3f8] sm:$0xff]  ;;  %v372_v20 = vmul.f32 %v2499_v33, %v237_v13  ;;  %v817_v22 = vsel %vm561_vm9, %v433_v60, %v689_v10  ;;  %vm562_vm11 = vcmp.ge.f32.partialorder %v434_v7, 0.0  ;;  %v627_v23 = vmul.f32 0.2, %v371_v11 }
  0x8e   : > { %v436_v21 = vmul.f32 %v2499_v33, %v301_v14  ;;  %v691_v24 = vmul.f32 0.2, %v435_v12  ;;  %vm499_vm12 = vcmp.ge.f32.partialorder %v371_v11, 0.0  ;;  %vm563_vm13 = vcmp.ge.f32.partialorder %v435_v12, 0.0 }
  0x8f   : > { %v754_v25 = vsel %vm498_vm10, %v370_v6, %v626_v18  ;;  %v818_v26 = vsel %vm562_vm11, %v434_v7, %v690_v19  ;;  %v628_v27 = vmul.f32 0.2, %v372_v20  ;;  %v755_v29 = vsel %vm499_vm12, %v371_v11, %v627_v23 }
  0x90   : > { %1994 = vmatmul.mubr.f32.gmra.mrb[52].mxu0 %v746_v32  ;;  %2090 = vmatmul.mubr.f32.gmra.mrb[52].mxu1 %v810_v34  ;;  %v692_v28 = vmul.f32 0.2, %v436_v21  ;;  %v819_v30 = vsel %vm563_vm13, %v435_v12, %v691_v24  ;;  %vm500_vm14 = vcmp.ge.f32.partialorder %v372_v20, 0.0  ;;  %vm564_vm15 = vcmp.ge.f32.partialorder %v436_v21, 0.0 }
  0x91   : > { %1996 = vmatprep.mubr.f32.mxu0 %v747_v37  ;;  %2092 = vmatprep.mubr.f32.mxu1 %v811_v41  ;;  %v756_v33 = vsel %vm500_vm14, %v372_v20, %v628_v27  ;;  %vm1542_vm0 = vcmask 130048  }
  0x92   : > { %v820_v31 = vsel %vm564_vm15, %v436_v21, %v692_v28 }
  0x94   : > { %1997 = vmatmul.mubr.f32.gmra.mrb[54].mxu0 %v748_v54  ;;  %2093 = vmatmul.mubr.f32.gmra.mrb[54].mxu1 %v812_v55 }
  0x95   : > { %1999 = vmatprep.mubr.f32.mxu0 %v749_v57  ;;  %2095 = vmatprep.mubr.f32.mxu1 %v813_v58 }
  0x98   : > { %2000 = vmatmul.mubr.f32.gmra.mrb[56].mxu0 %v750_v62  ;;  %2096 = vmatmul.mubr.f32.gmra.mrb[56].mxu1 %v814_v63 }
  0x99   : > { %2002 = vmatprep.mubr.f32.mxu0 %v751_v0  ;;  %2098 = vmatprep.mubr.f32.mxu1 %v815_v8 }
  0x9c   : > { %2003 = vmatmul.mubr.f32.gmra.mrb[58].mxu0 %v752_v15  ;;  %2099 = vmatmul.mubr.f32.gmra.mrb[58].mxu1 %v816_v16 }
  0x9d   : > { %2005 = vmatprep.mubr.f32.mxu0 %v753_v17  ;;  %2101 = vmatprep.mubr.f32.mxu1 %v817_v22 }
  0xa0   : > { %2006 = vmatmul.mubr.f32.gmra.mrb[60].mxu0 %v754_v25  ;;  %2102 = vmatmul.mubr.f32.gmra.mrb[60].mxu1 %v818_v26 }
  0xa1   : > { %2008 = vmatprep.mubr.f32.mxu0 %v755_v29  ;;  %2104 = vmatprep.mubr.f32.mxu1 %v819_v30 }
  0xa4   : > { %2009 = vmatmul.mubr.f32.gmra.mrb[62].mxu0 %v756_v33  ;;  %2105 = vmatmul.mubr.f32.gmra.mrb[62].mxu1 %v820_v31 }
  0xfb   : > { %v1917_v32 = vpop.f32.mrb[0].mxu0  ;;  %v2013_v34 = vpop.f32.mrb[0].mxu1 }
  0xfc   : > { %1544 = vst.msk [vmem:[%s2634_s6 + $0x8] sm:$0xff] %vm1542_vm0, %v1917_v32  ;;  %1608 = vst.msk [vmem:[%s2634_s6 + $0x208] sm:$0xff] %vm1542_vm0, %v2013_v34  ;;  %v903_v35 = vpop.f32.mrb[1].mxu0  ;;  %v1223_v36 = vpop.f32.mrb[1].mxu1 }
  0xfd   : > { %1543 = vst.msk [vmem:[%s2634_s6] sm:$0xff] %vm1542_vm0, %v903_v35  ;;  %1607 = vst.msk [vmem:[%s2634_s6 + $0x200] sm:$0xff] %vm1542_vm0, %v1223_v36 }
  0xff   : > { %v1920_v9 = vpop.f32.mrb[2].mxu0  ;;  %v2016_v37 = vpop.f32.mrb[2].mxu1 }
 0x100   : > { %1546 = vst.msk [vmem:[%s2634_s6 + $0x18] sm:$0xff] %vm1542_vm0, %v1920_v9  ;;  %1610 = vst.msk [vmem:[%s2634_s6 + $0x218] sm:$0xff] %vm1542_vm0, %v2016_v37  ;;  %v913_v38 = vpop.f32.mrb[3].mxu0  ;;  %v1233_v39 = vpop.f32.mrb[3].mxu1 }
 0x101   : > { %1545 = vst.msk [vmem:[%s2634_s6 + $0x10] sm:$0xff] %vm1542_vm0, %v913_v38  ;;  %1609 = vst.msk [vmem:[%s2634_s6 + $0x210] sm:$0xff] %vm1542_vm0, %v1233_v39 }
 0x103   : > { %v1923_v40 = vpop.f32.mrb[4].mxu0  ;;  %v2019_v41 = vpop.f32.mrb[4].mxu1 }
 0x104   : > { %1548 = vst.msk [vmem:[%s2634_s6 + $0x28] sm:$0xff] %vm1542_vm0, %v1923_v40  ;;  %1612 = vst.msk [vmem:[%s2634_s6 + $0x228] sm:$0xff] %vm1542_vm0, %v2019_v41  ;;  %v923_v42 = vpop.f32.mrb[5].mxu0  ;;  %v1243_v43 = vpop.f32.mrb[5].mxu1 }
 0x105   : > { %1547 = vst.msk [vmem:[%s2634_s6 + $0x20] sm:$0xff] %vm1542_vm0, %v923_v42  ;;  %1611 = vst.msk [vmem:[%s2634_s6 + $0x220] sm:$0xff] %vm1542_vm0, %v1243_v43 }
 0x107   : > { %v1926_v44 = vpop.f32.mrb[6].mxu0  ;;  %v2022_v45 = vpop.f32.mrb[6].mxu1 }
 0x108   : > { %1550 = vst.msk [vmem:[%s2634_s6 + $0x38] sm:$0xff] %vm1542_vm0, %v1926_v44  ;;  %1614 = vst.msk [vmem:[%s2634_s6 + $0x238] sm:$0xff] %vm1542_vm0, %v2022_v45  ;;  %v933_v46 = vpop.f32.mrb[7].mxu0  ;;  %v1253_v47 = vpop.f32.mrb[7].mxu1 }
 0x109   : > { %1549 = vst.msk [vmem:[%s2634_s6 + $0x30] sm:$0xff] %vm1542_vm0, %v933_v46  ;;  %1613 = vst.msk [vmem:[%s2634_s6 + $0x230] sm:$0xff] %vm1542_vm0, %v1253_v47 }
 0x10b   : > { %v1929_v48 = vpop.f32.mrb[8].mxu0  ;;  %v2025_v49 = vpop.f32.mrb[8].mxu1 }
 0x10c   : > { %1552 = vst.msk [vmem:[%s2634_s6 + $0x48] sm:$0xff] %vm1542_vm0, %v1929_v48  ;;  %1616 = vst.msk [vmem:[%s2634_s6 + $0x248] sm:$0xff] %vm1542_vm0, %v2025_v49  ;;  %v943_v50 = vpop.f32.mrb[9].mxu0  ;;  %v1263_v51 = vpop.f32.mrb[9].mxu1 }
 0x10d   : > { %1551 = vst.msk [vmem:[%s2634_s6 + $0x40] sm:$0xff] %vm1542_vm0, %v943_v50  ;;  %1615 = vst.msk [vmem:[%s2634_s6 + $0x240] sm:$0xff] %vm1542_vm0, %v1263_v51 }
 0x10f   : > { %v1932_v52 = vpop.f32.mrb[10].mxu0  ;;  %v2028_v53 = vpop.f32.mrb[10].mxu1 }
 0x110   : > { %1554 = vst.msk [vmem:[%s2634_s6 + $0x58] sm:$0xff] %vm1542_vm0, %v1932_v52  ;;  %1618 = vst.msk [vmem:[%s2634_s6 + $0x258] sm:$0xff] %vm1542_vm0, %v2028_v53  ;;  %v953_v54 = vpop.f32.mrb[11].mxu0  ;;  %v1273_v55 = vpop.f32.mrb[11].mxu1 }
 0x111   : > { %1553 = vst.msk [vmem:[%s2634_s6 + $0x50] sm:$0xff] %vm1542_vm0, %v953_v54  ;;  %1617 = vst.msk [vmem:[%s2634_s6 + $0x250] sm:$0xff] %vm1542_vm0, %v1273_v55 }
 0x113   : > { %v1935_v56 = vpop.f32.mrb[12].mxu0  ;;  %v2031_v57 = vpop.f32.mrb[12].mxu1 }
 0x114   : > { %1556 = vst.msk [vmem:[%s2634_s6 + $0x68] sm:$0xff] %vm1542_vm0, %v1935_v56  ;;  %1620 = vst.msk [vmem:[%s2634_s6 + $0x268] sm:$0xff] %vm1542_vm0, %v2031_v57  ;;  %v963_v58 = vpop.f32.mrb[13].mxu0  ;;  %v1283_v59 = vpop.f32.mrb[13].mxu1 }
 0x115   : > { %1555 = vst.msk [vmem:[%s2634_s6 + $0x60] sm:$0xff] %vm1542_vm0, %v963_v58  ;;  %1619 = vst.msk [vmem:[%s2634_s6 + $0x260] sm:$0xff] %vm1542_vm0, %v1283_v59 }
 0x117   : > { %v1938_v60 = vpop.f32.mrb[14].mxu0  ;;  %v2034_v61 = vpop.f32.mrb[14].mxu1 }
 0x118   : > { %1558 = vst.msk [vmem:[%s2634_s6 + $0x78] sm:$0xff] %vm1542_vm0, %v1938_v60  ;;  %1622 = vst.msk [vmem:[%s2634_s6 + $0x278] sm:$0xff] %vm1542_vm0, %v2034_v61  ;;  %v973_v62 = vpop.f32.mrb[15].mxu0  ;;  %v1293_v63 = vpop.f32.mrb[15].mxu1 }
 0x119   : > { %1557 = vst.msk [vmem:[%s2634_s6 + $0x70] sm:$0xff] %vm1542_vm0, %v973_v62  ;;  %1621 = vst.msk [vmem:[%s2634_s6 + $0x270] sm:$0xff] %vm1542_vm0, %v1293_v63 }
 0x11b   : > { %v1941_v0 = vpop.f32.mrb[16].mxu0  ;;  %v2037_v1 = vpop.f32.mrb[16].mxu1 }
 0x11c   : > { %1560 = vst.msk [vmem:[%s2634_s6 + $0x88] sm:$0xff] %vm1542_vm0, %v1941_v0  ;;  %1624 = vst.msk [vmem:[%s2634_s6 + $0x288] sm:$0xff] %vm1542_vm0, %v2037_v1  ;;  %v983_v2 = vpop.f32.mrb[17].mxu0  ;;  %v1303_v3 = vpop.f32.mrb[17].mxu1 }
 0x11d   : > { %1559 = vst.msk [vmem:[%s2634_s6 + $0x80] sm:$0xff] %vm1542_vm0, %v983_v2  ;;  %1623 = vst.msk [vmem:[%s2634_s6 + $0x280] sm:$0xff] %vm1542_vm0, %v1303_v3 }
 0x11f   : > { %v1944_v4 = vpop.f32.mrb[18].mxu0  ;;  %v2040_v5 = vpop.f32.mrb[18].mxu1 }
 0x120   : > { %1562 = vst.msk [vmem:[%s2634_s6 + $0x98] sm:$0xff] %vm1542_vm0, %v1944_v4  ;;  %1626 = vst.msk [vmem:[%s2634_s6 + $0x298] sm:$0xff] %vm1542_vm0, %v2040_v5  ;;  %v993_v6 = vpop.f32.mrb[19].mxu0  ;;  %v1313_v7 = vpop.f32.mrb[19].mxu1 }
 0x121   : > { %1561 = vst.msk [vmem:[%s2634_s6 + $0x90] sm:$0xff] %vm1542_vm0, %v993_v6  ;;  %1625 = vst.msk [vmem:[%s2634_s6 + $0x290] sm:$0xff] %vm1542_vm0, %v1313_v7 }
 0x123   : > { %v1947_v8 = vpop.f32.mrb[20].mxu0  ;;  %v2043_v10 = vpop.f32.mrb[20].mxu1 }
 0x124   : > { %1564 = vst.msk [vmem:[%s2634_s6 + $0xa8] sm:$0xff] %vm1542_vm0, %v1947_v8  ;;  %1628 = vst.msk [vmem:[%s2634_s6 + $0x2a8] sm:$0xff] %vm1542_vm0, %v2043_v10  ;;  %v1003_v11 = vpop.f32.mrb[21].mxu0  ;;  %v1323_v12 = vpop.f32.mrb[21].mxu1 }
 0x125   : > { %1563 = vst.msk [vmem:[%s2634_s6 + $0xa0] sm:$0xff] %vm1542_vm0, %v1003_v11  ;;  %1627 = vst.msk [vmem:[%s2634_s6 + $0x2a0] sm:$0xff] %vm1542_vm0, %v1323_v12 }
 0x127   : > { %v1950_v13 = vpop.f32.mrb[22].mxu0  ;;  %v2046_v14 = vpop.f32.mrb[22].mxu1 }
 0x128   : > { %1566 = vst.msk [vmem:[%s2634_s6 + $0xb8] sm:$0xff] %vm1542_vm0, %v1950_v13  ;;  %1630 = vst.msk [vmem:[%s2634_s6 + $0x2b8] sm:$0xff] %vm1542_vm0, %v2046_v14  ;;  %v1013_v15 = vpop.f32.mrb[23].mxu0  ;;  %v1333_v16 = vpop.f32.mrb[23].mxu1 }
 0x129   : > { %1565 = vst.msk [vmem:[%s2634_s6 + $0xb0] sm:$0xff] %vm1542_vm0, %v1013_v15  ;;  %1629 = vst.msk [vmem:[%s2634_s6 + $0x2b0] sm:$0xff] %vm1542_vm0, %v1333_v16 }
 0x12b   : > { %v1953_v17 = vpop.f32.mrb[24].mxu0  ;;  %v2049_v18 = vpop.f32.mrb[24].mxu1 }
 0x12c   : > { %1568 = vst.msk [vmem:[%s2634_s6 + $0xc8] sm:$0xff] %vm1542_vm0, %v1953_v17  ;;  %1632 = vst.msk [vmem:[%s2634_s6 + $0x2c8] sm:$0xff] %vm1542_vm0, %v2049_v18  ;;  %v1023_v19 = vpop.f32.mrb[25].mxu0  ;;  %v1343_v20 = vpop.f32.mrb[25].mxu1 }
 0x12d   : > { %1567 = vst.msk [vmem:[%s2634_s6 + $0xc0] sm:$0xff] %vm1542_vm0, %v1023_v19  ;;  %1631 = vst.msk [vmem:[%s2634_s6 + $0x2c0] sm:$0xff] %vm1542_vm0, %v1343_v20 }
 0x12f   : > { %v1956_v21 = vpop.f32.mrb[26].mxu0  ;;  %v2052_v22 = vpop.f32.mrb[26].mxu1 }
 0x130   : > { %1570 = vst.msk [vmem:[%s2634_s6 + $0xd8] sm:$0xff] %vm1542_vm0, %v1956_v21  ;;  %1634 = vst.msk [vmem:[%s2634_s6 + $0x2d8] sm:$0xff] %vm1542_vm0, %v2052_v22  ;;  %v1033_v23 = vpop.f32.mrb[27].mxu0  ;;  %v1353_v24 = vpop.f32.mrb[27].mxu1 }
 0x131   : > { %1569 = vst.msk [vmem:[%s2634_s6 + $0xd0] sm:$0xff] %vm1542_vm0, %v1033_v23  ;;  %1633 = vst.msk [vmem:[%s2634_s6 + $0x2d0] sm:$0xff] %vm1542_vm0, %v1353_v24 }
 0x133   : > { %v1959_v25 = vpop.f32.mrb[28].mxu0  ;;  %v2055_v26 = vpop.f32.mrb[28].mxu1 }
 0x134   : > { %1572 = vst.msk [vmem:[%s2634_s6 + $0xe8] sm:$0xff] %vm1542_vm0, %v1959_v25  ;;  %1636 = vst.msk [vmem:[%s2634_s6 + $0x2e8] sm:$0xff] %vm1542_vm0, %v2055_v26  ;;  %v1043_v27 = vpop.f32.mrb[29].mxu0  ;;  %v1363_v28 = vpop.f32.mrb[29].mxu1 }
 0x135   : > { %1571 = vst.msk [vmem:[%s2634_s6 + $0xe0] sm:$0xff] %vm1542_vm0, %v1043_v27  ;;  %1635 = vst.msk [vmem:[%s2634_s6 + $0x2e0] sm:$0xff] %vm1542_vm0, %v1363_v28 }
 0x137   : > { %v1962_v29 = vpop.f32.mrb[30].mxu0  ;;  %v2058_v30 = vpop.f32.mrb[30].mxu1 }
 0x138   : > { %1574 = vst.msk [vmem:[%s2634_s6 + $0xf8] sm:$0xff] %vm1542_vm0, %v1962_v29  ;;  %1638 = vst.msk [vmem:[%s2634_s6 + $0x2f8] sm:$0xff] %vm1542_vm0, %v2058_v30  ;;  %v1053_v33 = vpop.f32.mrb[31].mxu0  ;;  %v1373_v31 = vpop.f32.mrb[31].mxu1 }
 0x139   : > { %1573 = vst.msk [vmem:[%s2634_s6 + $0xf0] sm:$0xff] %vm1542_vm0, %v1053_v33  ;;  %1637 = vst.msk [vmem:[%s2634_s6 + $0x2f0] sm:$0xff] %vm1542_vm0, %v1373_v31 }
 0x13b   : > { %v1965_v32 = vpop.f32.mrb[32].mxu0  ;;  %v2061_v34 = vpop.f32.mrb[32].mxu1 }
 0x13c   : > { %1576 = vst.msk [vmem:[%s2634_s6 + $0x108] sm:$0xff] %vm1542_vm0, %v1965_v32  ;;  %1640 = vst.msk [vmem:[%s2634_s6 + $0x308] sm:$0xff] %vm1542_vm0, %v2061_v34  ;;  %v1063_v35 = vpop.f32.mrb[33].mxu0  ;;  %v1383_v36 = vpop.f32.mrb[33].mxu1 }
 0x13d   : > { %1575 = vst.msk [vmem:[%s2634_s6 + $0x100] sm:$0xff] %vm1542_vm0, %v1063_v35  ;;  %1639 = vst.msk [vmem:[%s2634_s6 + $0x300] sm:$0xff] %vm1542_vm0, %v1383_v36 }
 0x13f   : > { %v1968_v9 = vpop.f32.mrb[34].mxu0  ;;  %v2064_v37 = vpop.f32.mrb[34].mxu1 }
 0x140   : > { %1578 = vst.msk [vmem:[%s2634_s6 + $0x118] sm:$0xff] %vm1542_vm0, %v1968_v9  ;;  %1642 = vst.msk [vmem:[%s2634_s6 + $0x318] sm:$0xff] %vm1542_vm0, %v2064_v37  ;;  %v1073_v38 = vpop.f32.mrb[35].mxu0  ;;  %v1393_v39 = vpop.f32.mrb[35].mxu1 }
 0x141   : > { %1577 = vst.msk [vmem:[%s2634_s6 + $0x110] sm:$0xff] %vm1542_vm0, %v1073_v38  ;;  %1641 = vst.msk [vmem:[%s2634_s6 + $0x310] sm:$0xff] %vm1542_vm0, %v1393_v39 }
 0x143   : > { %v1971_v40 = vpop.f32.mrb[36].mxu0  ;;  %v2067_v41 = vpop.f32.mrb[36].mxu1 }
 0x144   : > { %1580 = vst.msk [vmem:[%s2634_s6 + $0x128] sm:$0xff] %vm1542_vm0, %v1971_v40  ;;  %1644 = vst.msk [vmem:[%s2634_s6 + $0x328] sm:$0xff] %vm1542_vm0, %v2067_v41  ;;  %v1083_v42 = vpop.f32.mrb[37].mxu0  ;;  %v1403_v43 = vpop.f32.mrb[37].mxu1 }
 0x145   : > { %1579 = vst.msk [vmem:[%s2634_s6 + $0x120] sm:$0xff] %vm1542_vm0, %v1083_v42  ;;  %1643 = vst.msk [vmem:[%s2634_s6 + $0x320] sm:$0xff] %vm1542_vm0, %v1403_v43 }
 0x147   : > { %v1974_v44 = vpop.f32.mrb[38].mxu0  ;;  %v2070_v45 = vpop.f32.mrb[38].mxu1 }
 0x148   : > { %1582 = vst.msk [vmem:[%s2634_s6 + $0x138] sm:$0xff] %vm1542_vm0, %v1974_v44  ;;  %1646 = vst.msk [vmem:[%s2634_s6 + $0x338] sm:$0xff] %vm1542_vm0, %v2070_v45  ;;  %v1093_v46 = vpop.f32.mrb[39].mxu0  ;;  %v1413_v47 = vpop.f32.mrb[39].mxu1 }
 0x149   : > { %1581 = vst.msk [vmem:[%s2634_s6 + $0x130] sm:$0xff] %vm1542_vm0, %v1093_v46  ;;  %1645 = vst.msk [vmem:[%s2634_s6 + $0x330] sm:$0xff] %vm1542_vm0, %v1413_v47 }
 0x14b   : > { %v1977_v48 = vpop.f32.mrb[40].mxu0  ;;  %v2073_v49 = vpop.f32.mrb[40].mxu1 }
 0x14c   : > { %1584 = vst.msk [vmem:[%s2634_s6 + $0x148] sm:$0xff] %vm1542_vm0, %v1977_v48  ;;  %1648 = vst.msk [vmem:[%s2634_s6 + $0x348] sm:$0xff] %vm1542_vm0, %v2073_v49  ;;  %v1103_v50 = vpop.f32.mrb[41].mxu0  ;;  %v1423_v51 = vpop.f32.mrb[41].mxu1 }
 0x14d   : > { %1583 = vst.msk [vmem:[%s2634_s6 + $0x140] sm:$0xff] %vm1542_vm0, %v1103_v50  ;;  %1647 = vst.msk [vmem:[%s2634_s6 + $0x340] sm:$0xff] %vm1542_vm0, %v1423_v51 }
 0x14f   : > { %v1980_v52 = vpop.f32.mrb[42].mxu0  ;;  %v2076_v53 = vpop.f32.mrb[42].mxu1 }
 0x150   : > { %1586 = vst.msk [vmem:[%s2634_s6 + $0x158] sm:$0xff] %vm1542_vm0, %v1980_v52  ;;  %1650 = vst.msk [vmem:[%s2634_s6 + $0x358] sm:$0xff] %vm1542_vm0, %v2076_v53  ;;  %v1113_v54 = vpop.f32.mrb[43].mxu0  ;;  %v1433_v55 = vpop.f32.mrb[43].mxu1 }
 0x151   : > { %1585 = vst.msk [vmem:[%s2634_s6 + $0x150] sm:$0xff] %vm1542_vm0, %v1113_v54  ;;  %1649 = vst.msk [vmem:[%s2634_s6 + $0x350] sm:$0xff] %vm1542_vm0, %v1433_v55 }
 0x153   : > { %v1983_v56 = vpop.f32.mrb[44].mxu0  ;;  %v2079_v57 = vpop.f32.mrb[44].mxu1 }
 0x154   : > { %1588 = vst.msk [vmem:[%s2634_s6 + $0x168] sm:$0xff] %vm1542_vm0, %v1983_v56  ;;  %1652 = vst.msk [vmem:[%s2634_s6 + $0x368] sm:$0xff] %vm1542_vm0, %v2079_v57  ;;  %v1123_v58 = vpop.f32.mrb[45].mxu0  ;;  %v1443_v59 = vpop.f32.mrb[45].mxu1 }
 0x155   : > { %1587 = vst.msk [vmem:[%s2634_s6 + $0x160] sm:$0xff] %vm1542_vm0, %v1123_v58  ;;  %1651 = vst.msk [vmem:[%s2634_s6 + $0x360] sm:$0xff] %vm1542_vm0, %v1443_v59 }
 0x157   : > { %v1986_v60 = vpop.f32.mrb[46].mxu0  ;;  %v2082_v61 = vpop.f32.mrb[46].mxu1 }
 0x158   : > { %1590 = vst.msk [vmem:[%s2634_s6 + $0x178] sm:$0xff] %vm1542_vm0, %v1986_v60  ;;  %1654 = vst.msk [vmem:[%s2634_s6 + $0x378] sm:$0xff] %vm1542_vm0, %v2082_v61  ;;  %v1133_v62 = vpop.f32.mrb[47].mxu0  ;;  %v1453_v63 = vpop.f32.mrb[47].mxu1 }
 0x159   : > { %1589 = vst.msk [vmem:[%s2634_s6 + $0x170] sm:$0xff] %vm1542_vm0, %v1133_v62  ;;  %1653 = vst.msk [vmem:[%s2634_s6 + $0x370] sm:$0xff] %vm1542_vm0, %v1453_v63 }
 0x15b   : > { %v1989_v0 = vpop.f32.mrb[48].mxu0  ;;  %v2085_v1 = vpop.f32.mrb[48].mxu1 }
 0x15c   : > { %1592 = vst.msk [vmem:[%s2634_s6 + $0x188] sm:$0xff] %vm1542_vm0, %v1989_v0  ;;  %1656 = vst.msk [vmem:[%s2634_s6 + $0x388] sm:$0xff] %vm1542_vm0, %v2085_v1  ;;  %v1143_v2 = vpop.f32.mrb[49].mxu0  ;;  %v1463_v3 = vpop.f32.mrb[49].mxu1 }
 0x15d   : > { %1591 = vst.msk [vmem:[%s2634_s6 + $0x180] sm:$0xff] %vm1542_vm0, %v1143_v2  ;;  %1655 = vst.msk [vmem:[%s2634_s6 + $0x380] sm:$0xff] %vm1542_vm0, %v1463_v3 }
 0x15f   : > { %v1992_v4 = vpop.f32.mrb[50].mxu0  ;;  %v2088_v5 = vpop.f32.mrb[50].mxu1 }
 0x160   : > { %1594 = vst.msk [vmem:[%s2634_s6 + $0x198] sm:$0xff] %vm1542_vm0, %v1992_v4  ;;  %1658 = vst.msk [vmem:[%s2634_s6 + $0x398] sm:$0xff] %vm1542_vm0, %v2088_v5  ;;  %v1153_v6 = vpop.f32.mrb[51].mxu0  ;;  %v1473_v7 = vpop.f32.mrb[51].mxu1 }
 0x161   : > { %1593 = vst.msk [vmem:[%s2634_s6 + $0x190] sm:$0xff] %vm1542_vm0, %v1153_v6  ;;  %1657 = vst.msk [vmem:[%s2634_s6 + $0x390] sm:$0xff] %vm1542_vm0, %v1473_v7 }
 0x163   : > { %v1995_v8 = vpop.f32.mrb[52].mxu0  ;;  %v2091_v10 = vpop.f32.mrb[52].mxu1 }
 0x164   : > { %1596 = vst.msk [vmem:[%s2634_s6 + $0x1a8] sm:$0xff] %vm1542_vm0, %v1995_v8  ;;  %1660 = vst.msk [vmem:[%s2634_s6 + $0x3a8] sm:$0xff] %vm1542_vm0, %v2091_v10  ;;  %v1163_v11 = vpop.f32.mrb[53].mxu0  ;;  %v1483_v12 = vpop.f32.mrb[53].mxu1 }
 0x165   : > { %1595 = vst.msk [vmem:[%s2634_s6 + $0x1a0] sm:$0xff] %vm1542_vm0, %v1163_v11  ;;  %1659 = vst.msk [vmem:[%s2634_s6 + $0x3a0] sm:$0xff] %vm1542_vm0, %v1483_v12 }
 0x167   : > { %v1998_v13 = vpop.f32.mrb[54].mxu0  ;;  %v2094_v14 = vpop.f32.mrb[54].mxu1 }
 0x168   : > { %1598 = vst.msk [vmem:[%s2634_s6 + $0x1b8] sm:$0xff] %vm1542_vm0, %v1998_v13  ;;  %1662 = vst.msk [vmem:[%s2634_s6 + $0x3b8] sm:$0xff] %vm1542_vm0, %v2094_v14  ;;  %v1173_v15 = vpop.f32.mrb[55].mxu0  ;;  %v1493_v16 = vpop.f32.mrb[55].mxu1 }
 0x169   : > { %1597 = vst.msk [vmem:[%s2634_s6 + $0x1b0] sm:$0xff] %vm1542_vm0, %v1173_v15  ;;  %1661 = vst.msk [vmem:[%s2634_s6 + $0x3b0] sm:$0xff] %vm1542_vm0, %v1493_v16 }
 0x16b   : > { %v2001_v17 = vpop.f32.mrb[56].mxu0  ;;  %v2097_v18 = vpop.f32.mrb[56].mxu1 }
 0x16c   : > { %1600 = vst.msk [vmem:[%s2634_s6 + $0x1c8] sm:$0xff] %vm1542_vm0, %v2001_v17  ;;  %1664 = vst.msk [vmem:[%s2634_s6 + $0x3c8] sm:$0xff] %vm1542_vm0, %v2097_v18  ;;  %v1183_v19 = vpop.f32.mrb[57].mxu0  ;;  %v1503_v20 = vpop.f32.mrb[57].mxu1 }
 0x16d   : > { %1599 = vst.msk [vmem:[%s2634_s6 + $0x1c0] sm:$0xff] %vm1542_vm0, %v1183_v19  ;;  %1663 = vst.msk [vmem:[%s2634_s6 + $0x3c0] sm:$0xff] %vm1542_vm0, %v1503_v20 }
 0x16f   : > { %v2004_v21 = vpop.f32.mrb[58].mxu0  ;;  %v2100_v22 = vpop.f32.mrb[58].mxu1 }
 0x170   : > { %1602 = vst.msk [vmem:[%s2634_s6 + $0x1d8] sm:$0xff] %vm1542_vm0, %v2004_v21  ;;  %1666 = vst.msk [vmem:[%s2634_s6 + $0x3d8] sm:$0xff] %vm1542_vm0, %v2100_v22  ;;  %v1193_v23 = vpop.f32.mrb[59].mxu0  ;;  %v1513_v24 = vpop.f32.mrb[59].mxu1 }
 0x171   : > { %1601 = vst.msk [vmem:[%s2634_s6 + $0x1d0] sm:$0xff] %vm1542_vm0, %v1193_v23  ;;  %1665 = vst.msk [vmem:[%s2634_s6 + $0x3d0] sm:$0xff] %vm1542_vm0, %v1513_v24 }
 0x173   : > { %v2007_v25 = vpop.f32.mrb[60].mxu0  ;;  %v2103_v26 = vpop.f32.mrb[60].mxu1 }
 0x174   : > { %1604 = vst.msk [vmem:[%s2634_s6 + $0x1e8] sm:$0xff] %vm1542_vm0, %v2007_v25  ;;  %1668 = vst.msk [vmem:[%s2634_s6 + $0x3e8] sm:$0xff] %vm1542_vm0, %v2103_v26  ;;  %v1203_v27 = vpop.f32.mrb[61].mxu0  ;;  %v1523_v28 = vpop.f32.mrb[61].mxu1 }
 0x175   : > { %1603 = vst.msk [vmem:[%s2634_s6 + $0x1e0] sm:$0xff] %vm1542_vm0, %v1203_v27  ;;  %1667 = vst.msk [vmem:[%s2634_s6 + $0x3e0] sm:$0xff] %vm1542_vm0, %v1523_v28 }
 0x177   : > { %v2010_v29 = vpop.f32.mrb[62].mxu0  ;;  %v2106_v30 = vpop.f32.mrb[62].mxu1 }
 0x178   : > { %1606 = vst.msk [vmem:[%s2634_s6 + $0x1f8] sm:$0xff] %vm1542_vm0, %v2010_v29  ;;  %1670 = vst.msk [vmem:[%s2634_s6 + $0x3f8] sm:$0xff] %vm1542_vm0, %v2106_v30  ;;  %v1213_v33 = vpop.f32.mrb[63].mxu0  ;;  %v1533_v31 = vpop.f32.mrb[63].mxu1 }
 0x179   : > { %1605 = vst.msk [vmem:[%s2634_s6 + $0x1f0] sm:$0xff] %vm1542_vm0, %v1213_v33  ;;  %1669 = vst.msk [vmem:[%s2634_s6 + $0x3f0] sm:$0xff] %vm1542_vm0, %v1533_v31 }
 0x17a PF: > { %s13_s12 = sadd.s32 1, %s2170_s12  }
 0x17b   : > { %p10_p4 = scmp.ge.s32.totalorder %s13_s12, 4  }
 0x17d   :  { %12 = sbr.rel (!%p10_p4) target bundleno = 1 (0x1), region = 62 }

// kernel: tile.18
= control target key start
LH: loop header
LB: loop body
LE: loop exit
PB: predicated region body
PF: predicated region fallthrough
CT: control target
= control target key end

     0   :  { %s28_s0 = inlined_call_operand.vmem [shape: f32[16], index: 0, kind: input, shape index: {}]   ;;  %s29_s1 = inlined_call_operand.vmem [shape: f32[9,16], index: 1, kind: output, shape index: {}]  }
   0x1   :  { %v4_v0 = vld [vmem:[%s28_s0] ss:$0 sm:$0xff] }
   0x2   :  { %5 = vst [vmem:[%s29_s1] sm:$0xff] %v4_v0  ;;  %8 = vst [vmem:[%s29_s1 + $0x8] sm:$0xff] %v4_v0 }

// kernel: masknet2_forward.9
= control target key start
LH: loop header
LB: loop body
LE: loop exit
PB: predicated region body
PF: predicated region fallthrough
CT: control target
= control target key end

     0   :  { %v147_v0 = vlaneseq  ;;  %v1784_v1 = vmov 0.0|0.0   ;;  %vm687_vm1 = vcmask 130048   ;;  %s3159_s2 = inlined_call_operand.vmem [shape: f32[144,16], index: 2, kind: input, shape index: {}]   ;;  %s3160_s0 = inlined_call_operand.vmem [shape: f32[1,144], index: 0, kind: input, shape index: {}]   ;;  %s3161_s1 = inlined_call_operand.vmem [shape: f32[512,144], index: 1, kind: input, shape index: {}]   ;;  %s3162_s3 = inlined_call_operand.vmem [shape: f32[512,16], index: 3, kind: output, shape index: {0}]   ;;  %s3163_s4 = inlined_call_operand.vmem [shape: f32[1,16], index: 4, kind: output, shape index: {1}]   ;;  %s3164_s5 = inlined_call_operand.vmem [shape: f32[1,16], index: 5, kind: output, shape index: {2}]  }
   0x1   :  { %1738 = vmatprep.subr.bf16.mxu0 %v1784_v1  ;;  %v669_v2 = vld [vmem:[%s3159_s2] sm:$0xff]  ;;  %v670_v3 = vld [vmem:[%s3159_s2 + $0x8] sm:$0xff]  ;;  %v671_v4 = vld [vmem:[%s3159_s2 + $0x10] sm:$0xff]  ;;  %1765 = vmatprep.subr.bf16.mxu1 %v1784_v1 }
   0x2   :  { %v1739_v5 = vpack.c.bf16 %v670_v3, %v669_v2  ;;  %v672_v6 = vld [vmem:[%s3159_s2 + $0x18] sm:$0xff]  ;;  %v148_v7 = vshrl.u32 %v147_v0, 7  ;;  %v673_v10 = vld [vmem:[%s3159_s2 + $0x20] sm:$0xff]  ;;  %v674_v11 = vld [vmem:[%s3159_s2 + $0x28] sm:$0xff] }
   0x3   :  { %v1742_v8 = vpack.c.bf16 %v672_v6, %v671_v4  ;;  %v18_v12 = vld [vmem:[%s3161_s1 + $0x8] sm:$0xff]  ;;  %v145_v13 = vld [vmem:[%s3160_s0] sm:$0x3]  ;;  %v1745_v14 = vpack.c.bf16 %v674_v11, %v673_v10  ;;  %v675_v16 = vld [vmem:[%s3159_s2 + $0x30] sm:$0xff] }
   0x4   :  { %1740 = vmatpush1.bf16.msra.mxu0 %v1739_v5  ;;  %v153_v9 = vsub.s32 1, %v148_v7  ;;  %1774 = vmatpush1.bf16.msra.mxu1 %v1739_v5  ;;  %v676_v17 = vld [vmem:[%s3159_s2 + $0x38] sm:$0xff]  ;;  %v677_v21 = vld [vmem:[%s3159_s2 + $0x40] sm:$0xff]  ;;  %v678_v22 = vld [vmem:[%s3159_s2 + $0x48] sm:$0xff]  ;;  %v149_v28 = vsub.s32 0, %v148_v7 }
   0x5   :  { %1741 = vmatprep.subr.bf16.mxu0 %v1784_v1  ;;  %1766 = vmatprep.subr.bf16.mxu1 %v1784_v1  ;;  %v1748_v19 = vpack.c.bf16 %v676_v17, %v675_v16  ;;  %v1751_v24 = vpack.c.bf16 %v678_v22, %v677_v21  ;;  %v679_v25 = vld [vmem:[%s3159_s2 + $0x50] sm:$0xff]  ;;  %v680_v26 = vld [vmem:[%s3159_s2 + $0x58] sm:$0xff]  ;;  %v681_v29 = vld [vmem:[%s3159_s2 + $0x60] sm:$0xff] }
   0x6   :  { %v1843_v15 = vrot.slane %v145_v13, %v153_v9  ;;  %v1754_v27 = vpack.c.bf16 %v680_v26, %v679_v25  ;;  %v682_v30 = vld [vmem:[%s3159_s2 + $0x68] sm:$0xff]  ;;  %v1879_v32 = vrot.slane %v145_v13, %v149_v28  ;;  %v683_v33 = vld [vmem:[%s3159_s2 + $0x70] sm:$0xff]  ;;  %v684_v34 = vld [vmem:[%s3159_s2 + $0x78] sm:$0xff] }
   0x7   :  { %v1757_v31 = vpack.c.bf16 %v682_v30, %v681_v29  ;;  %v17_v35 = vld [vmem:[%s3161_s1] sm:$0xff]  ;;  %v20_v36 = vld [vmem:[%s3161_s1 + $0x18] sm:$0xff]  ;;  %v1760_v37 = vpack.c.bf16 %v684_v34, %v683_v33  ;;  %v19_v40 = vld [vmem:[%s3161_s1 + $0x10] sm:$0xff] }
   0x8   :  { %1743 = vmatpush1.bf16.msra.mxu0 %v1742_v8  ;;  %1775 = vmatpush1.bf16.msra.mxu1 %v1742_v8  ;;  %v158_v18 = vmul.f32 %v1843_v15, %v18_v12  ;;  %v685_v38 = vld [vmem:[%s3159_s2 + $0x80] sm:$0xff]  ;;  %v157_v39 = vmul.f32 %v1879_v32, %v17_v35  ;;  %v22_v41 = vld [vmem:[%s3161_s1 + $0x28] sm:$0xff]  ;;  %v160_v43 = vmul.f32 %v1843_v15, %v20_v36  ;;  %v24_v45 = vld [vmem:[%s3161_s1 + $0x38] sm:$0xff] }
   0x9   :  { %1744 = vmatprep.subr.bf16.mxu0 %v1784_v1  ;;  %1767 = vmatprep.subr.bf16.mxu1 %v1784_v1  ;;  %v686_v42 = vld [vmem:[%s3159_s2 + $0x88] sm:$0xff]  ;;  %v21_v44 = vld [vmem:[%s3161_s1 + $0x20] sm:$0xff]  ;;  %v159_v46 = vmul.f32 %v1879_v32, %v19_v40  ;;  %v162_v47 = vmul.f32 %v1843_v15, %v22_v41  ;;  %v23_v48 = vld [vmem:[%s3161_s1 + $0x30] sm:$0xff]  ;;  %v164_v52 = vmul.f32 %v1843_v15, %v24_v45 }
   0xa   :  { %vm286_vm0 = vcmp.ge.f32.partialorder %v158_v18, 0.0  ;;  %v414_v20 = vmul.f32 0.2, %v158_v18  ;;  %v1763_v49 = vpack.c.bf16 %v686_v42, %v685_v38  ;;  %v413_v50 = vmul.f32 0.2, %v157_v39  ;;  %v26_v57 = vld [vmem:[%s3161_s1 + $0x48] sm:$0xff] }
   0xb   :  { %v161_v51 = vmul.f32 %v1879_v32, %v21_v44  ;;  %vm285_vm2 = vcmp.ge.f32.partialorder %v157_v39, 0.0  ;;  %v416_v53 = vmul.f32 0.2, %v160_v43  ;;  %vm288_vm3 = vcmp.ge.f32.partialorder %v160_v43, 0.0  ;;  %v25_v58 = vld [vmem:[%s3161_s1 + $0x40] sm:$0xff]  ;;  %v82_v62 = vld [vmem:[%s3161_s1 + $0x208] sm:$0xff] }
   0xc   :  { %1746 = vmatpush1.bf16.msra.mxu0 %v1745_v14  ;;  %1776 = vmatpush1.bf16.msra.mxu1 %v1745_v14  ;;  %v542_v23 = vsel %vm286_vm0, %v158_v18, %v414_v20  ;;  %v163_v54 = vmul.f32 %v1879_v32, %v23_v48  ;;  %v415_v55 = vmul.f32 0.2, %v159_v46  ;;  %v418_v56 = vmul.f32 0.2, %v162_v47  ;;  %v28_v0 = vld [vmem:[%s3161_s1 + $0x58] sm:$0xff]  ;;  %v27_v3 = vld [vmem:[%s3161_s1 + $0x50] sm:$0xff] }
   0xd   :  { %1747 = vmatprep.subr.bf16.mxu0 %v1784_v1  ;;  %1768 = vmatprep.subr.bf16.mxu1 %v1784_v1  ;;  %v541_v59 = vsel %vm285_vm2, %v157_v39, %v413_v50  ;;  %vm287_vm4 = vcmp.ge.f32.partialorder %v159_v46, 0.0  ;;  %v417_v60 = vmul.f32 0.2, %v161_v51  ;;  %v420_v61 = vmul.f32 0.2, %v164_v52  ;;  %v30_v4 = vld [vmem:[%s3161_s1 + $0x68] sm:$0xff] }
   0xe   :  { %1674 = vmatprep.mubr.msk.f32.mxu0 %vm687_vm1, %v542_v23  ;;  %v544_v63 = vsel %vm288_vm3, %v160_v43, %v416_v53  ;;  %vm290_vm5 = vcmp.ge.f32.partialorder %v162_v47, 0.0  ;;  %vm289_vm6 = vcmp.ge.f32.partialorder %v161_v51, 0.0  ;;  %vm292_vm7 = vcmp.ge.f32.partialorder %v164_v52, 0.0  ;;  %v81_v8 = vld [vmem:[%s3161_s1 + $0x200] sm:$0xff]  ;;  %v84_v13 = vld [vmem:[%s3161_s1 + $0x218] sm:$0xff]  ;;  %v34_v35 = vld [vmem:[%s3161_s1 + $0x88] sm:$0xff] }
   0xf   :  { %v166_v2 = vmul.f32 %v1843_v15, %v26_v57  ;;  %v543_v5 = vsel %vm287_vm4, %v159_v46, %v415_v55  ;;  %vm291_vm8 = vcmp.ge.f32.partialorder %v163_v54, 0.0  ;;  %v165_v6 = vmul.f32 %v1879_v32, %v25_v58  ;;  %v29_v20 = vld [vmem:[%s3161_s1 + $0x60] sm:$0xff]  ;;  %v32_v23 = vld [vmem:[%s3161_s1 + $0x78] sm:$0xff]  ;;  %v86_v38 = vld [vmem:[%s3161_s1 + $0x228] sm:$0xff] }
  0x10   :  { %1749 = vmatpush1.bf16.msra.mxu0 %v1748_v19  ;;  %1777 = vmatpush1.bf16.msra.mxu1 %v1748_v19  ;;  %v222_v7 = vmul.f32 %v1843_v15, %v82_v62  ;;  %v546_v9 = vsel %vm290_vm5, %v162_v47, %v418_v56  ;;  %v545_v10 = vsel %vm289_vm6, %v161_v51, %v417_v60  ;;  %v85_v42 = vld [vmem:[%s3161_s1 + $0x220] sm:$0xff]  ;;  %v36_v53 = vld [vmem:[%s3161_s1 + $0x98] sm:$0xff]  ;;  %v87_v58 = vld [vmem:[%s3161_s1 + $0x230] sm:$0xff] }
  0x11   :  { %1750 = vmatprep.subr.bf16.mxu0 %v1784_v1  ;;  %1769 = vmatprep.subr.bf16.mxu1 %v1784_v1  ;;  %v548_v11 = vsel %vm292_vm7, %v164_v52, %v420_v61  ;;  %v168_v12 = vmul.f32 %v1843_v15, %v28_v0  ;;  %v167_v14 = vmul.f32 %v1879_v32, %v27_v3  ;;  %vm294_vm10 = vcmp.ge.f32.partialorder %v166_v2, 0.0  ;;  %v33_v52 = vld [vmem:[%s3161_s1 + $0x80] sm:$0xff]  ;;  %v88_v56 = vld [vmem:[%s3161_s1 + $0x238] sm:$0xff]  ;;  %v35_v62 = vld [vmem:[%s3161_s1 + $0x90] sm:$0xff] }
  0x12   :  { %v170_v16 = vmul.f32 %v1843_v15, %v30_v4  ;;  %vm350_vm9 = vcmp.ge.f32.partialorder %v222_v7, 0.0  ;;  %v478_v17 = vmul.f32 0.2, %v222_v7  ;;  %v422_v19 = vmul.f32 0.2, %v166_v2  ;;  %v38_v3 = vld [vmem:[%s3161_s1 + $0xa8] sm:$0xff] }
  0x13   :  { %v221_v21 = vmul.f32 %v1879_v32, %v81_v8  ;;  %vm293_vm11 = vcmp.ge.f32.partialorder %v165_v6, 0.0  ;;  %v421_v22 = vmul.f32 0.2, %v165_v6  ;;  %v224_v26 = vmul.f32 %v1843_v15, %v84_v13 }
  0x14   :  { %1752 = vmatpush1.bf16.msra.mxu0 %v1751_v24  ;;  %1778 = vmatpush1.bf16.msra.mxu1 %v1751_v24  ;;  %v31_v24 = vld [vmem:[%s3161_s1 + $0x70] sm:$0xff]  ;;  %v606_v25 = vsel %vm350_vm9, %v222_v7, %v478_v17  ;;  %vm296_vm12 = vcmp.ge.f32.partialorder %v168_v12, 0.0  ;;  %v424_v28 = vmul.f32 0.2, %v168_v12  ;;  %vm295_vm14 = vcmp.ge.f32.partialorder %v167_v14, 0.0 }
  0x15   :  { %1753 = vmatprep.subr.bf16.mxu0 %v1784_v1  ;;  %1770 = vmatprep.subr.bf16.mxu1 %v1784_v1  ;;  %vm349_vm13 = vcmp.ge.f32.partialorder %v221_v21, 0.0  ;;  %v477_v29 = vmul.f32 0.2, %v221_v21  ;;  %v423_v30 = vmul.f32 0.2, %v167_v14  ;;  %vm352_vm15 = vcmp.ge.f32.partialorder %v224_v26, 0.0 }
  0x16   :  { %1706 = vmatprep.mubr.msk.f32.mxu1 %vm687_vm1, %v606_v25  ;;  %v426_v33 = vmul.f32 0.2, %v170_v16  ;;  %v169_v34 = vmul.f32 %v1879_v32, %v29_v20  ;;  %v550_v39 = vsel %vm294_vm10, %v166_v2, %v422_v19  ;;  %vm298_vm0 = vcmp.ge.f32.partialorder %v170_v16, 0.0  ;;  %v92_v25 = vld [vmem:[%s3161_s1 + $0x258] sm:$0xff] }
  0x17   :  { %v605_v36 = vsel %vm349_vm13, %v221_v21, %v477_v29  ;;  %v172_v40 = vmul.f32 %v1843_v15, %v32_v23  ;;  %v549_v43 = vsel %vm293_vm11, %v165_v6, %v421_v22  ;;  %v171_v44 = vmul.f32 %v1879_v32, %v31_v24  ;;  %v90_v6 = vld [vmem:[%s3161_s1 + $0x248] sm:$0xff]  ;;  %v37_v21 = vld [vmem:[%s3161_s1 + $0xa0] sm:$0xff]  ;;  %v40_v22 = vld [vmem:[%s3161_s1 + $0xb8] sm:$0xff] }
  0x18   :  { %1755 = vmatpush1.bf16.msra.mxu0 %v1754_v27  ;;  %1779 = vmatpush1.bf16.msra.mxu1 %v1754_v27  ;;  %v83_v27 = vld [vmem:[%s3161_s1 + $0x210] sm:$0xff]  ;;  %v552_v46 = vsel %vm296_vm12, %v168_v12, %v424_v28  ;;  %v551_v47 = vsel %vm295_vm14, %v167_v14, %v423_v30  ;;  %v174_v48 = vmul.f32 %v1843_v15, %v34_v35  ;;  %v425_v51 = vmul.f32 0.2, %v169_v34 }
  0x19   :  { %1756 = vmatprep.subr.bf16.mxu0 %v1784_v1  ;;  %1771 = vmatprep.subr.bf16.mxu1 %v1784_v1  ;;  %v554_v50 = vsel %vm298_vm0, %v170_v16, %v426_v33  ;;  %v225_v55 = vmul.f32 %v1879_v32, %v85_v42  ;;  %vm297_vm3 = vcmp.ge.f32.partialorder %v169_v34, 0.0  ;;  %vm300_vm4 = vcmp.ge.f32.partialorder %v172_v40, 0.0 }
  0x1a   :  { %vm299_vm6 = vcmp.ge.f32.partialorder %v171_v44, 0.0  ;;  %v427_v61 = vmul.f32 0.2, %v171_v44  ;;  %v228_v0 = vmul.f32 %v1843_v15, %v88_v56  ;;  %v173_v2 = vmul.f32 %v1879_v32, %v33_v52 }
  0x1b   :  { %vm353_vm7 = vcmp.ge.f32.partialorder %v225_v55, 0.0  ;;  %v481_v60 = vmul.f32 0.2, %v225_v55  ;;  %v553_v7 = vsel %vm297_vm3, %v169_v34, %v425_v51  ;;  %v176_v8 = vmul.f32 %v1843_v15, %v36_v53 }
  0x1c   :  { %1758 = vmatpush1.bf16.msra.mxu0 %v1757_v31  ;;  %1780 = vmatpush1.bf16.msra.mxu1 %v1757_v31  ;;  %v480_v31 = vmul.f32 0.2, %v224_v26  ;;  %vm356_vm9 = vcmp.ge.f32.partialorder %v228_v0, 0.0  ;;  %v175_v12 = vmul.f32 %v1879_v32, %v35_v62  ;;  %v555_v14 = vsel %vm299_vm6, %v171_v44, %v427_v61  ;;  %v93_v44 = vld [vmem:[%s3161_s1 + $0x260] sm:$0xff] }
  0x1d   :  { %1759 = vmatprep.subr.bf16.mxu0 %v1784_v1  ;;  %1772 = vmatprep.subr.bf16.mxu1 %v1784_v1  ;;  %v609_v4 = vsel %vm353_vm7, %v225_v55, %v481_v60  ;;  %v178_v16 = vmul.f32 %v1843_v15, %v38_v3  ;;  %v429_v20 = vmul.f32 0.2, %v173_v2  ;;  %vm301_vm11 = vcmp.ge.f32.partialorder %v173_v2, 0.0  ;;  %v44_v55 = vld [vmem:[%s3161_s1 + $0xd8] sm:$0xff]  ;;  %v95_v60 = vld [vmem:[%s3161_s1 + $0x270] sm:$0xff] }
  0x1e   :  { %v608_v41 = vsel %vm352_vm15, %v224_v26, %v480_v31  ;;  %vm304_vm12 = vcmp.ge.f32.partialorder %v176_v8, 0.0  ;;  %v432_v28 = vmul.f32 0.2, %v176_v8  ;;  %vm303_vm14 = vcmp.ge.f32.partialorder %v175_v12, 0.0  ;;  %v39_v31 = vld [vmem:[%s3161_s1 + $0xb0] sm:$0xff] }
  0x1f   :  { %v431_v30 = vmul.f32 0.2, %v175_v12  ;;  %vm306_vm0 = vcmp.ge.f32.partialorder %v178_v16, 0.0  ;;  %v232_v34 = vmul.f32 %v1843_v15, %v92_v25  ;;  %v434_v35 = vmul.f32 0.2, %v178_v16  ;;  %v100_v25 = vld [vmem:[%s3161_s1 + $0x298] sm:$0xff] }
  0x20   :  { %1761 = vmatpush1.bf16.msra.mxu0 %v1760_v37  ;;  %1781 = vmatpush1.bf16.msra.mxu1 %v1760_v37  ;;  %v223_v37 = vmul.f32 %v1879_v32, %v83_v27  ;;  %v91_v27 = vld [vmem:[%s3161_s1 + $0x250] sm:$0xff]  ;;  %v180_v42 = vmul.f32 %v1843_v15, %v40_v22  ;;  %v45_v22 = vld [vmem:[%s3161_s1 + $0xe0] sm:$0xff] }
  0x21   :  { %1762 = vmatprep.subr.bf16.mxu0 %v1784_v1  ;;  %1773 = vmatprep.subr.bf16.mxu1 %v1784_v1  ;;  %v419_v1 = vmul.f32 0.2, %v163_v54  ;;  %v562_v52 = vsel %vm306_vm0, %v178_v16, %v434_v35 }
  0x22   :  { %vm351_vm2 = vcmp.ge.f32.partialorder %v223_v37, 0.0  ;;  %v479_v45 = vmul.f32 0.2, %v223_v37  ;;  %v436_v61 = vmul.f32 0.2, %v180_v42 }
  0x23   :  { %v547_v18 = vsel %vm291_vm8, %v163_v54, %v419_v1  ;;  %vm302_vm8 = vcmp.ge.f32.partialorder %v174_v48, 0.0  ;;  %v430_v1 = vmul.f32 0.2, %v174_v48 }
  0x24   :  { %1764 = vmatpush1.bf16.msra.mxu0 %v1763_v49  ;;  %1782 = vmatpush1.bf16.msra.mxu1 %v1763_v49  ;;  %v226_v49 = vmul.f32 %v1843_v15, %v86_v38  ;;  %v607_v54 = vsel %vm351_vm2, %v223_v37, %v479_v45  ;;  %v42_v37 = vld [vmem:[%s3161_s1 + $0xc8] sm:$0xff]  ;;  %vm360_vm2 = vcmp.ge.f32.partialorder %v232_v34, 0.0  ;;  %v560_v45 = vsel %vm304_vm12, %v176_v8, %v432_v28 }
  0x25   :  { %v2034_v19 = vsel %vm302_vm8, %v174_v48, %v430_v1  ;;  %v559_v48 = vsel %vm303_vm14, %v175_v12, %v431_v30  ;;  %v98_v8 = vld [vmem:[%s3161_s1 + $0x288] sm:$0xff]  ;;  %v97_v12 = vld [vmem:[%s3161_s1 + $0x280] sm:$0xff] }
  0x26   :  { %vm354_vm5 = vcmp.ge.f32.partialorder %v226_v49, 0.0  ;;  %v482_v57 = vmul.f32 0.2, %v226_v49 }
  0x27   :  { %945 = vmatmul.mubr.f32.vlgmr.msra.gmra.mrb[0].mxu0 %v541_v59  ;;  %1105 = vmatmul.mubr.f32.vlgmr.msra.gmra.mrb[0].mxu1 %v605_v36  ;;  %v428_v59 = vmul.f32 0.2, %v172_v40  ;;  %v177_v36 = vmul.f32 %v1879_v32, %v37_v21 }
  0x28   :  { %1675 = vmatprep.mubr.msk.f32.mxu0 %vm687_vm1, %v544_v63  ;;  %1707 = vmatprep.mubr.msk.f32.mxu1 %vm687_vm1, %v608_v41  ;;  %v610_v63 = vsel %vm354_vm5, %v226_v49, %v482_v57  ;;  %v557_v41 = vsel %vm301_vm11, %v173_v2, %v429_v20  ;;  %v182_v49 = vmul.f32 %v1843_v15, %v42_v37  ;;  %vm308_vm5 = vcmp.ge.f32.partialorder %v180_v42, 0.0 }
  0x29   :  { %v433_v53 = vmul.f32 0.2, %v177_v36  ;;  %v233_v57 = vmul.f32 %v1879_v32, %v93_v44  ;;  %v238_v20 = vmul.f32 %v1843_v15, %v98_v8  ;;  %v185_v37 = vmul.f32 %v1879_v32, %v45_v22  ;;  %v50_v44 = vld [vmem:[%s3161_s1 + $0x108] sm:$0xff] }
  0x2a   :  { %v438_v3 = vmul.f32 0.2, %v182_v49 }
  0x2b   :  { %950 = vmatmul.mubr.f32.gmra.mrb[2].mxu0 %v543_v5  ;;  %1110 = vmatmul.mubr.f32.gmra.mrb[2].mxu1 %v607_v54  ;;  %v227_v5 = vmul.f32 %v1879_v32, %v87_v58  ;;  %v41_v54 = vld [vmem:[%s3161_s1 + $0xc0] sm:$0xff]  ;;  %v96_v58 = vld [vmem:[%s3161_s1 + $0x278] sm:$0xff]  ;;  %vm361_vm8 = vcmp.ge.f32.partialorder %v233_v57, 0.0  ;;  %v489_v62 = vmul.f32 0.2, %v233_v57 }
  0x2c   :  { %1676 = vmatprep.mubr.msk.f32.mxu0 %vm687_vm1, %v546_v9  ;;  %1708 = vmatprep.mubr.msk.f32.mxu1 %vm687_vm1, %v610_v63  ;;  %v484_v9 = vmul.f32 0.2, %v228_v0  ;;  %v236_v2 = vmul.f32 %v1843_v15, %v96_v58  ;;  %v494_v28 = vmul.f32 0.2, %v238_v20  ;;  %v104_v58 = vld [vmem:[%s3161_s1 + $0x2b8] sm:$0xff] }
  0x2d   :  { %vm355_vm10 = vcmp.ge.f32.partialorder %v227_v5, 0.0  ;;  %v483_v13 = vmul.f32 0.2, %v227_v5 }
  0x2e   :  { %v612_v17 = vsel %vm356_vm9, %v228_v0, %v484_v9  ;;  %vm310_vm9 = vcmp.ge.f32.partialorder %v182_v49, 0.0  ;;  %v43_v0 = vld [vmem:[%s3161_s1 + $0xd0] sm:$0xff] }
  0x2f   :  { %955 = vmatmul.mubr.f32.gmra.mrb[4].mxu0 %v545_v10  ;;  %1115 = vmatmul.mubr.f32.gmra.mrb[4].mxu1 %v609_v4  ;;  %v89_v10 = vld [vmem:[%s3161_s1 + $0x240] sm:$0xff]  ;;  %v611_v23 = vsel %vm355_vm10, %v227_v5, %v483_v13  ;;  %v181_v4 = vmul.f32 %v1879_v32, %v41_v54  ;;  %v46_v5 = vld [vmem:[%s3161_s1 + $0xe8] sm:$0xff]  ;;  %vm364_vm10 = vcmp.ge.f32.partialorder %v236_v2, 0.0  ;;  %v564_v13 = vsel %vm308_vm5, %v180_v42, %v436_v61 }
  0x30   :  { %1677 = vmatprep.mubr.msk.f32.mxu0 %vm687_vm1, %v548_v11  ;;  %v556_v11 = vsel %vm300_vm4, %v172_v40, %v428_v59  ;;  %1709 = vmatprep.mubr.msk.f32.mxu1 %vm687_vm1, %v612_v17  ;;  %v229_v24 = vmul.f32 %v1879_v32, %v89_v10  ;;  %v94_v40 = vld [vmem:[%s3161_s1 + $0x268] sm:$0xff]  ;;  %vm305_vm4 = vcmp.ge.f32.partialorder %v177_v36, 0.0  ;;  %v184_v10 = vmul.f32 %v1843_v15, %v44_v55 }
  0x31   :  { %v234_v51 = vmul.f32 %v1843_v15, %v94_v40  ;;  %v561_v9 = vsel %vm305_vm4, %v177_v36, %v433_v53  ;;  %vm309_vm12 = vcmp.ge.f32.partialorder %v181_v4, 0.0  ;;  %v437_v21 = vmul.f32 0.2, %v181_v4 }
  0x32   :  { %vm357_vm15 = vcmp.ge.f32.partialorder %v229_v24, 0.0  ;;  %v485_v29 = vmul.f32 0.2, %v229_v24  ;;  %vm312_vm14 = vcmp.ge.f32.partialorder %v184_v10, 0.0  ;;  %v240_v36 = vmul.f32 %v1843_v15, %v100_v25  ;;  %v56_v25 = vld [vmem:[%s3161_s1 + $0x138] sm:$0xff] }
  0x33   :  { %960 = vmatmul.mubr.f32.gmra.mrb[6].mxu0 %v547_v18  ;;  %v230_v18 = vmul.f32 %v1843_v15, %v90_v6  ;;  %1120 = vmatmul.mubr.f32.gmra.mrb[6].mxu1 %v611_v23  ;;  %vm362_vm6 = vcmp.ge.f32.partialorder %v234_v51, 0.0  ;;  %v490_v59 = vmul.f32 0.2, %v234_v51  ;;  %v617_v6 = vsel %vm361_vm8, %v233_v57, %v489_v62  ;;  %v103_v62 = vld [vmem:[%s3161_s1 + $0x2b0] sm:$0xff] }
  0x34   :  { %1678 = vmatprep.mubr.msk.f32.mxu0 %vm687_vm1, %v550_v39  ;;  %v613_v38 = vsel %vm357_vm15, %v229_v24, %v485_v29  ;;  %v231_v39 = vmul.f32 %v1879_v32, %v91_v27  ;;  %v237_v24 = vmul.f32 %v1879_v32, %v97_v12  ;;  %v440_v27 = vmul.f32 0.2, %v184_v10  ;;  %v99_v29 = vld [vmem:[%s3161_s1 + $0x290] sm:$0xff] }
  0x35   :  { %vm358_vm13 = vcmp.ge.f32.partialorder %v230_v18, 0.0  ;;  %v486_v26 = vmul.f32 0.2, %v230_v18  ;;  %v618_v1 = vsel %vm362_vm6, %v234_v51, %v490_v59  ;;  %v239_v40 = vmul.f32 %v1879_v32, %v99_v29 }
  0x36   :  { %vm359_vm3 = vcmp.ge.f32.partialorder %v231_v39, 0.0  ;;  %vm365_vm15 = vcmp.ge.f32.partialorder %v237_v24, 0.0  ;;  %v565_v42 = vsel %vm309_vm12, %v181_v4, %v437_v21  ;;  %vm313_vm5 = vcmp.ge.f32.partialorder %v185_v37, 0.0 }
  0x37   :  { %965 = vmatmul.mubr.f32.gmra.mrb[8].mxu0 %v549_v43  ;;  %v614_v33 = vsel %vm358_vm13, %v230_v18, %v486_v26  ;;  %v488_v43 = vmul.f32 0.2, %v232_v34  ;;  %v186_v18 = vmul.f32 %v1843_v15, %v46_v5  ;;  %v566_v26 = vsel %vm310_vm9, %v182_v49, %v438_v3  ;;  %v49_v49 = vld [vmem:[%s3161_s1 + $0x100] sm:$0xff] }
  0x38   :  { %1679 = vmatprep.mubr.msk.f32.mxu0 %vm687_vm1, %v552_v46  ;;  %1710 = vmatprep.mubr.msk.f32.mxu1 %vm687_vm1, %v614_v33  ;;  %v179_v46 = vmul.f32 %v1879_v32, %v39_v31  ;;  %vm366_vm13 = vcmp.ge.f32.partialorder %v238_v20, 0.0  ;;  %v493_v31 = vmul.f32 0.2, %v237_v24  ;;  %vm367_vm4 = vcmp.ge.f32.partialorder %v239_v40, 0.0 }
  0x39   :  { %1125 = vmatmul.mubr.f32.gmra.mrb[8].mxu1 %v613_v38  ;;  %v442_v33 = vmul.f32 0.2, %v186_v18  ;;  %v622_v35 = vsel %vm366_vm13, %v238_v20, %v494_v28  ;;  %v47_v38 = vld [vmem:[%s3161_s1 + $0xf0] sm:$0xff]  ;;  %v190_v55 = vmul.f32 %v1843_v15, %v50_v44  ;;  %v441_v59 = vmul.f32 0.2, %v185_v37  ;;  %v53_v20 = vld [vmem:[%s3161_s1 + $0x120] sm:$0xff] }
  0x3a   :  { %vm307_vm7 = vcmp.ge.f32.partialorder %v179_v46, 0.0  ;;  %v435_v63 = vmul.f32 0.2, %v179_v46  ;;  %v244_v4 = vmul.f32 %v1843_v15, %v104_v58  ;;  %v243_v8 = vmul.f32 %v1879_v32, %v103_v62  ;;  %v108_v28 = vld [vmem:[%s3161_s1 + $0x2d8] sm:$0xff]  ;;  %v110_v44 = vld [vmem:[%s3161_s1 + $0x2e8] sm:$0xff] }
  0x3b   :  { %970 = vmatmul.mubr.f32.gmra.mrb[10].mxu0 %v551_v47  ;;  %v487_v47 = vmul.f32 0.2, %v231_v39  ;;  %v446_v5 = vmul.f32 0.2, %v190_v55 }
  0x3c   :  { %1680 = vmatprep.mubr.msk.f32.mxu0 %vm687_vm1, %v554_v50  ;;  %v616_v50 = vsel %vm360_vm2, %v232_v34, %v488_v43  ;;  %v563_v17 = vsel %vm307_vm7, %v179_v46, %v435_v63  ;;  %v48_v34 = vld [vmem:[%s3161_s1 + $0xf8] sm:$0xff]  ;;  %vm314_vm2 = vcmp.ge.f32.partialorder %v186_v18, 0.0  ;;  %v568_v43 = vsel %vm312_vm14, %v184_v10, %v440_v27  ;;  %v101_v46 = vld [vmem:[%s3161_s1 + $0x2a0] sm:$0xff] }
  0x3d   :  { %1711 = vmatprep.mubr.msk.f32.mxu1 %vm687_vm1, %v616_v50  ;;  %v615_v56 = vsel %vm359_vm3, %v231_v39, %v487_v47  ;;  %v621_v39 = vsel %vm365_vm15, %v237_v24, %v493_v31  ;;  %vm368_vm3 = vcmp.ge.f32.partialorder %v240_v36, 0.0  ;;  %v495_v50 = vmul.f32 0.2, %v239_v40 }
  0x3e   :  { %1130 = vmatmul.mubr.f32.gmra.mrb[10].mxu1 %v615_v56  ;;  %v2159_v51 = vsel %vm314_vm2, %v186_v18, %v442_v33  ;;  %v241_v57 = vmul.f32 %v1879_v32, %v101_v46  ;;  %v569_v10 = vsel %vm313_vm5, %v185_v37, %v441_v59  ;;  %v500_v12 = vmul.f32 0.2, %v244_v4  ;;  %v107_v33 = vld [vmem:[%s3161_s1 + $0x2d0] sm:$0xff]  ;;  %v58_v46 = vld [vmem:[%s3161_s1 + $0x148] sm:$0xff]  ;;  %v112_v59 = vld [vmem:[%s3161_s1 + $0x2f8] sm:$0xff] }
  0x3f   :  { %975 = vmatmul.mubr.f32.gmra.mrb[12].mxu0 %v553_v7  ;;  %1712 = vmatprep.mubr.msk.f32.mxu1 %vm687_vm1, %v618_v1  ;;  %v235_v7 = vmul.f32 %v1879_v32, %v95_v60  ;;  %v623_v56 = vsel %vm367_vm4, %v239_v40, %v495_v50  ;;  %v189_v60 = vmul.f32 %v1879_v32, %v49_v49  ;;  %vm371_vm13 = vcmp.ge.f32.partialorder %v243_v8, 0.0 }
  0x40   :  { %1681 = vmatprep.mubr.msk.f32.mxu0 %vm687_vm1, %v556_v11  ;;  %v492_v11 = vmul.f32 0.2, %v236_v2  ;;  %vm369_vm8 = vcmp.ge.f32.partialorder %v241_v57, 0.0  ;;  %v248_v40 = vmul.f32 %v1843_v15, %v108_v28 }
  0x41   :  { %vm363_vm11 = vcmp.ge.f32.partialorder %v235_v7, 0.0  ;;  %v491_v16 = vmul.f32 0.2, %v235_v7  ;;  %vm317_vm12 = vcmp.ge.f32.partialorder %v189_v60, 0.0 }
  0x42   :  { %1135 = vmatmul.mubr.f32.gmra.mrb[12].mxu1 %v617_v6  ;;  %v51_v6 = vld [vmem:[%s3161_s1 + $0x110] sm:$0xff]  ;;  %vm376_vm4 = vcmp.ge.f32.partialorder %v248_v40, 0.0 }
  0x43   :  { %980 = vmatmul.mubr.f32.gmra.mrb[14].mxu0 %v555_v14  ;;  %v183_v14 = vmul.f32 %v1879_v32, %v43_v0  ;;  %v619_v23 = vsel %vm363_vm11, %v235_v7, %v491_v16  ;;  %v497_v0 = vmul.f32 0.2, %v241_v57  ;;  %vm372_vm11 = vcmp.ge.f32.partialorder %v244_v4, 0.0  ;;  %v54_v16 = vld [vmem:[%s3161_s1 + $0x128] sm:$0xff] }
  0x44   :  { %1682 = vmatprep.mubr.msk.f32.mxu0 %vm687_vm1, %v2034_v19  ;;  %v620_v19 = vsel %vm364_vm10, %v236_v2, %v492_v11  ;;  %v52_v2 = vld [vmem:[%s3161_s1 + $0x118] sm:$0xff]  ;;  %vm318_vm10 = vcmp.ge.f32.partialorder %v190_v55, 0.0  ;;  %v445_v11 = vmul.f32 0.2, %v189_v60  ;;  %v628_v21 = vsel %vm372_vm11, %v244_v4, %v500_v12 }
  0x45   :  { %1713 = vmatprep.mubr.msk.f32.mxu1 %vm687_vm1, %v620_v19  ;;  %v439_v30 = vmul.f32 0.2, %v183_v14  ;;  %vm311_vm0 = vcmp.ge.f32.partialorder %v183_v14, 0.0  ;;  %v625_v7 = vsel %vm369_vm8, %v241_v57, %v497_v0  ;;  %v2205_v24 = vmul.f32 %v1879_v32, %v51_v6 }
  0x46   :  { %1140 = vmatmul.mubr.f32.gmra.mrb[14].mxu1 %v619_v23  ;;  %v574_v23 = vsel %vm318_vm10, %v190_v55, %v446_v5  ;;  %v2217_v29 = vsel %vm317_vm12, %v189_v60, %v445_v11  ;;  %v252_v5 = vmul.f32 %v1843_v15, %v112_v59  ;;  %v113_v11 = vld [vmem:[%s3161_s1 + $0x300] sm:$0xff] }
  0x47   :  { %985 = vmatmul.mubr.f32.gmra.mrb[16].mxu0 %v557_v41  ;;  %1714 = vmatprep.mubr.msk.f32.mxu1 %vm687_vm1, %v622_v35  ;;  %v102_v41 = vld [vmem:[%s3161_s1 + $0x2a8] sm:$0xff]  ;;  %v2152_v47 = vsel %vm311_vm0, %v183_v14, %v439_v30  ;;  %v2192_v14 = vmul.f32 %v1843_v15, %v52_v2  ;;  %v194_v30 = vmul.f32 %v1843_v15, %v54_v16  ;;  %v55_v35 = vld [vmem:[%s3161_s1 + $0x130] sm:$0xff]  ;;  %vm319_vm2 = vcmp.ge.f32.partialorder %v2205_v24, 0.0  ;;  %v121_v59 = vld [vmem:[%s3161_s1 + $0x340] sm:$0xff] }
  0x48   :  { %1683 = vmatprep.mubr.msk.f32.mxu0 %vm687_vm1, %v560_v45  ;;  %v496_v45 = vmul.f32 0.2, %v240_v36  ;;  %v242_v54 = vmul.f32 %v1843_v15, %v102_v41  ;;  %v447_v41 = vmul.f32 0.2, %v2205_v24  ;;  %vm380_vm11 = vcmp.ge.f32.partialorder %v252_v5, 0.0 }
  0x49   :  { %vm320_vm15 = vcmp.ge.f32.partialorder %v2192_v14, 0.0  ;;  %v448_v37 = vmul.f32 0.2, %v2192_v14  ;;  %v450_v49 = vmul.f32 0.2, %v194_v30 }
  0x4a   :  { %1145 = vmatmul.mubr.f32.gmra.mrb[16].mxu1 %v621_v39  ;;  %v624_v53 = vsel %vm368_vm3, %v240_v36, %v496_v45  ;;  %vm370_vm6 = vcmp.ge.f32.partialorder %v242_v54, 0.0  ;;  %v498_v61 = vmul.f32 0.2, %v242_v54  ;;  %vm322_vm3 = vcmp.ge.f32.partialorder %v194_v30, 0.0 }
  0x4b   :  { %990 = vmatmul.mubr.f32.gmra.mrb[18].mxu0 %v559_v48  ;;  %v188_v48 = vmul.f32 %v1843_v15, %v48_v34  ;;  %1715 = vmatprep.mubr.msk.f32.mxu1 %vm687_vm1, %v624_v53  ;;  %v193_v34 = vmul.f32 %v1879_v32, %v53_v20  ;;  %v195_v45 = vmul.f32 %v1879_v32, %v55_v35  ;;  %v508_v16 = vmul.f32 0.2, %v252_v5  ;;  %v120_v35 = vld [vmem:[%s3161_s1 + $0x338] sm:$0xff] }
  0x4c   :  { %1684 = vmatprep.mubr.msk.f32.mxu0 %vm687_vm1, %v562_v52  ;;  %v187_v52 = vmul.f32 %v1879_v32, %v47_v38  ;;  %v626_v3 = vsel %vm370_vm6, %v242_v54, %v498_v61  ;;  %v196_v38 = vmul.f32 %v1843_v15, %v56_v25  ;;  %v250_v54 = vmul.f32 %v1843_v15, %v110_v44  ;;  %v59_v25 = vld [vmem:[%s3161_s1 + $0x150] sm:$0xff] }
  0x4d   :  { %vm316_vm7 = vcmp.ge.f32.partialorder %v188_v48, 0.0  ;;  %v444_v63 = vmul.f32 0.2, %v188_v48  ;;  %vm321_vm5 = vcmp.ge.f32.partialorder %v193_v34, 0.0  ;;  %v576_v60 = vsel %vm320_vm15, %v2192_v14, %v448_v37  ;;  %v60_v14 = vld [vmem:[%s3161_s1 + $0x158] sm:$0xff] }
  0x4e   :  { %1150 = vmatmul.mubr.f32.gmra.mrb[18].mxu1 %v623_v56  ;;  %vm315_vm9 = vcmp.ge.f32.partialorder %v187_v52, 0.0  ;;  %v443_v1 = vmul.f32 0.2, %v187_v52  ;;  %v452_v55 = vmul.f32 0.2, %v196_v38  ;;  %v198_v56 = vmul.f32 %v1843_v15, %v58_v46 }
  0x4f   :  { %995 = vmatmul.mubr.f32.gmra.mrb[20].mxu0 %v561_v9  ;;  %1716 = vmatprep.mubr.msk.f32.mxu1 %vm687_vm1, %v626_v3  ;;  %v106_v9 = vld [vmem:[%s3161_s1 + $0x2c8] sm:$0xff]  ;;  %v572_v18 = vsel %vm316_vm7, %v188_v48, %v444_v63  ;;  %v109_v48 = vld [vmem:[%s3161_s1 + $0x2e0] sm:$0xff]  ;;  %vm324_vm7 = vcmp.ge.f32.partialorder %v196_v38, 0.0  ;;  %v451_v61 = vmul.f32 0.2, %v195_v45  ;;  %vm378_vm8 = vcmp.ge.f32.partialorder %v250_v54, 0.0 }
  0x50   :  { %1685 = vmatprep.mubr.msk.f32.mxu0 %vm687_vm1, %v564_v13  ;;  %v105_v13 = vld [vmem:[%s3161_s1 + $0x2c0] sm:$0xff]  ;;  %v571_v19 = vsel %vm315_vm9, %v187_v52, %v443_v1  ;;  %v246_v22 = vmul.f32 %v1843_v15, %v106_v9  ;;  %v249_v58 = vmul.f32 %v1879_v32, %v109_v48  ;;  %v506_v62 = vmul.f32 0.2, %v250_v54  ;;  %v111_v63 = vld [vmem:[%s3161_s1 + $0x2f0] sm:$0xff] }
  0x51   :  { %v245_v27 = vmul.f32 %v1879_v32, %v105_v13  ;;  %v57_v52 = vld [vmem:[%s3161_s1 + $0x140] sm:$0xff]  ;;  %vm323_vm9 = vcmp.ge.f32.partialorder %v195_v45, 0.0  ;;  %v575_v2 = vsel %vm319_vm2, %v2205_v24, %v447_v41  ;;  %v578_v3 = vsel %vm322_vm3, %v194_v30, %v450_v49 }
  0x52   :  { %1155 = vmatmul.mubr.f32.gmra.mrb[20].mxu1 %v625_v7  ;;  %vm374_vm14 = vcmp.ge.f32.partialorder %v246_v22, 0.0  ;;  %v502_v31 = vmul.f32 0.2, %v246_v22  ;;  %v2266_v0 = vmul.f32 %v1879_v32, %v57_v52  ;;  %vm377_vm10 = vcmp.ge.f32.partialorder %v249_v58, 0.0  ;;  %v117_v30 = vld [vmem:[%s3161_s1 + $0x320] sm:$0xff]  ;;  %v64_v52 = vld [vmem:[%s3161_s1 + $0x178] sm:$0xff] }
  0x53   :  { %1000 = vmatmul.mubr.f32.gmra.mrb[22].mxu0 %v563_v17  ;;  %v499_v17 = vmul.f32 0.2, %v243_v8  ;;  %1717 = vmatprep.mubr.msk.f32.mxu1 %vm687_vm1, %v628_v21  ;;  %vm373_vm0 = vcmp.ge.f32.partialorder %v245_v27, 0.0  ;;  %v501_v36 = vmul.f32 0.2, %v245_v27  ;;  %v634_v4 = vsel %vm378_vm8, %v250_v54, %v506_v62 }
  0x54   :  { %1686 = vmatprep.mubr.msk.f32.mxu0 %vm687_vm1, %v566_v26  ;;  %v630_v39 = vsel %vm374_vm14, %v246_v22, %v502_v31  ;;  %v505_v1 = vmul.f32 0.2, %v249_v58  ;;  %v454_v7 = vmul.f32 0.2, %v198_v56  ;;  %v251_v9 = vmul.f32 %v1879_v32, %v111_v63  ;;  %v124_v63 = vld [vmem:[%s3161_s1 + $0x358] sm:$0xff] }
  0x55   :  { %v627_v26 = vsel %vm371_vm13, %v243_v8, %v499_v17  ;;  %v580_v12 = vsel %vm324_vm7, %v196_v38, %v452_v55  ;;  %v2285_v13 = vsel %vm323_vm9, %v195_v45, %v451_v61  ;;  %v116_v17 = vld [vmem:[%s3161_s1 + $0x318] sm:$0xff]  ;;  %vm326_vm12 = vcmp.ge.f32.partialorder %v198_v56, 0.0 }
  0x56   :  { %1160 = vmatmul.mubr.f32.gmra.mrb[22].mxu1 %v627_v26  ;;  %v633_v8 = vsel %vm377_vm10, %v249_v58, %v505_v1  ;;  %vm325_vm13 = vcmp.ge.f32.partialorder %v2266_v0, 0.0  ;;  %vm379_vm14 = vcmp.ge.f32.partialorder %v251_v9, 0.0  ;;  %v453_v20 = vmul.f32 0.2, %v2266_v0 }
  0x57   :  { %1005 = vmatmul.mubr.f32.gmra.mrb[24].mxu0 %v565_v42  ;;  %1718 = vmatprep.mubr.msk.f32.mxu1 %vm687_vm1, %v630_v39  ;;  %v629_v42 = vsel %vm373_vm0, %v245_v27, %v501_v36  ;;  %v636_v21 = vsel %vm380_vm11, %v252_v5, %v508_v16  ;;  %v200_v24 = vmul.f32 %v1843_v15, %v60_v14  ;;  %v126_v16 = vld [vmem:[%s3161_s1 + $0x368] sm:$0xff] }
  0x58   :  { %1687 = vmatprep.mubr.msk.f32.mxu0 %vm687_vm1, %v568_v43  ;;  %v247_v43 = vmul.f32 %v1879_v32, %v107_v33  ;;  %v256_v27 = vmul.f32 %v1843_v15, %v116_v17  ;;  %v582_v31 = vsel %vm326_vm12, %v198_v56, %v454_v7  ;;  %v62_v33 = vld [vmem:[%s3161_s1 + $0x168] sm:$0xff]  ;;  %v257_v41 = vmul.f32 %v1879_v32, %v117_v30 }
  0x59   :  { %v260_v46 = vmul.f32 %v1843_v15, %v120_v35  ;;  %v456_v48 = vmul.f32 0.2, %v200_v24  ;;  %v202_v49 = vmul.f32 %v1843_v15, %v62_v33  ;;  %v261_v7 = vmul.f32 %v1879_v32, %v121_v59  ;;  %v128_v33 = vld [vmem:[%s3161_s1 + $0x378] sm:$0xff] }
  0x5a   :  { %1165 = vmatmul.mubr.f32.gmra.mrb[24].mxu1 %v629_v42  ;;  %vm375_vm6 = vcmp.ge.f32.partialorder %v247_v43, 0.0  ;;  %v503_v50 = vmul.f32 0.2, %v247_v43  ;;  %vm384_vm2 = vcmp.ge.f32.partialorder %v256_v27, 0.0  ;;  %v512_v37 = vmul.f32 0.2, %v256_v27 }
  0x5b   :  { %1010 = vmatmul.mubr.f32.gmra.mrb[26].mxu0 %v2152_v47  ;;  %v504_v47 = vmul.f32 0.2, %v248_v40  ;;  %v119_v42 = vld [vmem:[%s3161_s1 + $0x330] sm:$0xff]  ;;  %v513_v54 = vmul.f32 0.2, %v257_v41  ;;  %vm388_vm7 = vcmp.ge.f32.partialorder %v260_v46, 0.0 }
  0x5c   :  { %1688 = vmatprep.mubr.msk.f32.mxu0 %vm687_vm1, %v2159_v51  ;;  %v449_v51 = vmul.f32 0.2, %v193_v34  ;;  %v631_v57 = vsel %vm375_vm6, %v247_v43, %v503_v50  ;;  %v199_v43 = vmul.f32 %v1879_v32, %v59_v25  ;;  %v640_v45 = vsel %vm384_vm2, %v256_v27, %v512_v37  ;;  %v61_v50 = vld [vmem:[%s3161_s1 + $0x160] sm:$0xff]  ;;  %v67_v37 = vld [vmem:[%s3161_s1 + $0x190] sm:$0xff] }
  0x5d   :  { %v632_v53 = vsel %vm376_vm4, %v248_v40, %v504_v47  ;;  %v122_v47 = vld [vmem:[%s3161_s1 + $0x348] sm:$0xff]  ;;  %v259_v55 = vmul.f32 %v1879_v32, %v119_v42  ;;  %vm385_vm6 = vcmp.ge.f32.partialorder %v257_v41, 0.0  ;;  %v201_v62 = vmul.f32 %v1879_v32, %v61_v50 }
  0x5e   :  { %1719 = vmatprep.mubr.msk.f32.mxu1 %vm687_vm1, %v632_v53  ;;  %v577_v6 = vsel %vm321_vm5, %v193_v34, %v449_v51  ;;  %vm328_vm5 = vcmp.ge.f32.partialorder %v200_v24, 0.0  ;;  %v262_v58 = vmul.f32 %v1843_v15, %v122_v47  ;;  %v455_v61 = vmul.f32 0.2, %v199_v43 }
  0x5f   :  { %1015 = vmatmul.mubr.f32.gmra.mrb[28].mxu0 %v569_v10  ;;  %1170 = vmatmul.mubr.f32.gmra.mrb[26].mxu1 %v631_v57  ;;  %v114_v10 = vld [vmem:[%s3161_s1 + $0x308] sm:$0xff]  ;;  %v516_v57 = vmul.f32 0.2, %v260_v46  ;;  %v584_v1 = vsel %vm328_vm5, %v200_v24, %v456_v48  ;;  %vm327_vm8 = vcmp.ge.f32.partialorder %v199_v43, 0.0  ;;  %vm330_vm9 = vcmp.ge.f32.partialorder %v202_v49, 0.0 }
  0x60   :  { %1689 = vmatprep.mubr.msk.f32.mxu0 %vm687_vm1, %v572_v18  ;;  %1720 = vmatprep.mubr.msk.f32.mxu1 %vm687_vm1, %v634_v4  ;;  %v115_v18 = vld [vmem:[%s3161_s1 + $0x310] sm:$0xff]  ;;  %v254_v22 = vmul.f32 %v1843_v15, %v114_v10  ;;  %v66_v4 = vld [vmem:[%s3161_s1 + $0x188] sm:$0xff]  ;;  %v641_v5 = vsel %vm385_vm6, %v257_v41, %v513_v54  ;;  %vm387_vm10 = vcmp.ge.f32.partialorder %v259_v55, 0.0  ;;  %v264_v10 = vmul.f32 %v1843_v15, %v124_v63  ;;  %v72_v54 = vld [vmem:[%s3161_s1 + $0x1b8] sm:$0xff] }
  0x61   :  { %v255_v28 = vmul.f32 %v1879_v32, %v115_v18  ;;  %vm390_vm11 = vcmp.ge.f32.partialorder %v262_v58, 0.0  ;;  %vm329_vm12 = vcmp.ge.f32.partialorder %v201_v62, 0.0  ;;  %v266_v27 = vmul.f32 %v1843_v15, %v126_v16 }
  0x62   :  { %vm382_vm15 = vcmp.ge.f32.partialorder %v254_v22, 0.0  ;;  %v510_v34 = vmul.f32 0.2, %v254_v22  ;;  %v207_v48 = vmul.f32 %v1879_v32, %v67_v37 }
  0x63   :  { %1020 = vmatmul.mubr.f32.gmra.mrb[30].mxu0 %v571_v19  ;;  %1175 = vmatmul.mubr.f32.gmra.mrb[28].mxu1 %v633_v8  ;;  %v507_v19 = vmul.f32 0.2, %v251_v9  ;;  %vm383_vm3 = vcmp.ge.f32.partialorder %v255_v28, 0.0  ;;  %v511_v39 = vmul.f32 0.2, %v255_v28  ;;  %v644_v8 = vsel %vm388_vm7, %v260_v46, %v516_v57 }
  0x64   :  { %1690 = vmatprep.mubr.msk.f32.mxu0 %vm687_vm1, %v574_v23  ;;  %v253_v23 = vmul.f32 %v1879_v32, %v113_v11  ;;  %1721 = vmatprep.mubr.msk.f32.mxu1 %vm687_vm1, %v636_v21  ;;  %v638_v38 = vsel %vm382_vm15, %v254_v22, %v510_v34  ;;  %v123_v11 = vld [vmem:[%s3161_s1 + $0x350] sm:$0xff]  ;;  %v68_v21 = vld [vmem:[%s3161_s1 + $0x198] sm:$0xff]  ;;  %vm392_vm15 = vcmp.ge.f32.partialorder %v264_v10, 0.0  ;;  %v463_v63 = vmul.f32 0.2, %v207_v48 }
  0x65   :  { %v635_v26 = vsel %vm379_vm14, %v251_v9, %v507_v19  ;;  %v639_v53 = vsel %vm383_vm3, %v255_v28, %v511_v39  ;;  %v518_v9 = vmul.f32 0.2, %v262_v58  ;;  %v206_v19 = vmul.f32 %v1843_v15, %v66_v4  ;;  %v125_v28 = vld [vmem:[%s3161_s1 + $0x360] sm:$0xff] }
  0x66   :  { %vm381_vm0 = vcmp.ge.f32.partialorder %v253_v23, 0.0  ;;  %v509_v36 = vmul.f32 0.2, %v253_v23  ;;  %v263_v24 = vmul.f32 %v1879_v32, %v123_v11  ;;  %vm389_vm14 = vcmp.ge.f32.partialorder %v261_v7, 0.0 }
  0x67   :  { %1025 = vmatmul.mubr.f32.gmra.mrb[32].mxu0 %v2217_v29  ;;  %v118_v29 = vld [vmem:[%s3161_s1 + $0x328] sm:$0xff]  ;;  %1180 = vmatmul.mubr.f32.gmra.mrb[30].mxu1 %v635_v26  ;;  %v646_v25 = vsel %vm390_vm11, %v262_v58, %v518_v9  ;;  %v520_v26 = vmul.f32 0.2, %v264_v10  ;;  %v462_v35 = vmul.f32 0.2, %v206_v19  ;;  %vm334_vm2 = vcmp.ge.f32.partialorder %v206_v19, 0.0 }
  0x68   :  { %1691 = vmatprep.mubr.msk.f32.mxu0 %vm687_vm1, %v576_v60  ;;  %v258_v40 = vmul.f32 %v1843_v15, %v118_v29  ;;  %1722 = vmatprep.mubr.msk.f32.mxu1 %vm687_vm1, %v638_v38  ;;  %v637_v44 = vsel %vm381_vm0, %v253_v23, %v509_v36  ;;  %v581_v60 = vsel %vm325_vm13, %v2266_v0, %v453_v20  ;;  %v63_v0 = vld [vmem:[%s3161_s1 + $0x170] sm:$0xff]  ;;  %v65_v20 = vld [vmem:[%s3161_s1 + $0x180] sm:$0xff]  ;;  %v517_v23 = vmul.f32 0.2, %v261_v7  ;;  %v70_v38 = vld [vmem:[%s3161_s1 + $0x1a8] sm:$0xff] }
  0x69   :  { %v203_v14 = vmul.f32 %v1879_v32, %v63_v0  ;;  %v208_v36 = vmul.f32 %v1843_v15, %v68_v21  ;;  %v265_v41 = vmul.f32 %v1879_v32, %v125_v28  ;;  %v648_v42 = vsel %vm392_vm15, %v264_v10, %v520_v26 }
  0x6a   :  { %vm386_vm4 = vcmp.ge.f32.partialorder %v258_v40, 0.0  ;;  %v514_v51 = vmul.f32 0.2, %v258_v40  ;;  %v645_v39 = vsel %vm389_vm14, %v261_v7, %v517_v23  ;;  %vm391_vm3 = vcmp.ge.f32.partialorder %v263_v24, 0.0  ;;  %v76_v23 = vld [vmem:[%s3161_s1 + $0x1d8] sm:$0xff] }
  0x6b   :  { %1030 = vmatmul.mubr.f32.gmra.mrb[34].mxu0 %v575_v2  ;;  %1185 = vmatmul.mubr.f32.gmra.mrb[32].mxu1 %v637_v44  ;;  %v458_v2 = vmul.f32 0.2, %v202_v49  ;;  %v459_v30 = vmul.f32 0.2, %v203_v14  ;;  %vm331_vm0 = vcmp.ge.f32.partialorder %v203_v14, 0.0  ;;  %v268_v44 = vmul.f32 %v1843_v15, %v128_v33 }
  0x6c   :  { %1692 = vmatprep.mubr.msk.f32.mxu0 %vm687_vm1, %v578_v3  ;;  %1723 = vmatprep.mubr.msk.f32.mxu1 %vm687_vm1, %v640_v45  ;;  %v642_v56 = vsel %vm386_vm4, %v258_v40, %v514_v51  ;;  %v204_v3 = vmul.f32 %v1843_v15, %v64_v52  ;;  %v519_v40 = vmul.f32 0.2, %v263_v24  ;;  %v127_v45 = vld [vmem:[%s3161_s1 + $0x370] sm:$0xff]  ;;  %vm394_vm4 = vcmp.ge.f32.partialorder %v266_v27, 0.0 }
  0x6d   :  { %v586_v17 = vsel %vm330_vm9, %v202_v49, %v458_v2  ;;  %v587_v46 = vsel %vm331_vm0, %v203_v14, %v459_v30  ;;  %v130_v49 = vld [vmem:[%s3161_s1 + $0x388] sm:$0xff]  ;;  %v590_v50 = vsel %vm334_vm2, %v206_v19, %v462_v35  ;;  %v464_v51 = vmul.f32 0.2, %v208_v36  ;;  %v132_v2 = vld [vmem:[%s3161_s1 + $0x398] sm:$0xff]  ;;  %v133_v30 = vld [vmem:[%s3161_s1 + $0x3a0] sm:$0xff] }
  0x6e   :  { %v460_v18 = vmul.f32 0.2, %v204_v3  ;;  %vm332_vm13 = vcmp.ge.f32.partialorder %v204_v3, 0.0  ;;  %v210_v52 = vmul.f32 %v1843_v15, %v70_v38  ;;  %vm336_vm6 = vcmp.ge.f32.partialorder %v208_v36, 0.0  ;;  %v136_v35 = vld [vmem:[%s3161_s1 + $0x3b8] sm:$0xff] }
  0x6f   :  { %1035 = vmatmul.mubr.f32.gmra.mrb[36].mxu0 %v577_v6  ;;  %1190 = vmatmul.mubr.f32.gmra.mrb[34].mxu1 %v639_v53  ;;  %v515_v6 = vmul.f32 0.2, %v259_v55  ;;  %v69_v53 = vld [vmem:[%s3161_s1 + $0x1a0] sm:$0xff]  ;;  %v267_v57 = vmul.f32 %v1879_v32, %v127_v45  ;;  %vm393_vm7 = vcmp.ge.f32.partialorder %v265_v41, 0.0  ;;  %v524_v59 = vmul.f32 0.2, %v268_v44 }
  0x70   :  { %1693 = vmatprep.mubr.msk.f32.mxu0 %vm687_vm1, %v580_v12  ;;  %1724 = vmatprep.mubr.msk.f32.mxu1 %vm687_vm1, %v642_v56  ;;  %v583_v12 = vsel %vm327_vm8, %v199_v43, %v455_v61  ;;  %v588_v34 = vsel %vm332_vm13, %v204_v3, %v460_v18  ;;  %v522_v43 = vmul.f32 0.2, %v266_v27  ;;  %v521_v56 = vmul.f32 0.2, %v265_v41  ;;  %v129_v61 = vld [vmem:[%s3161_s1 + $0x380] sm:$0xff]  ;;  %v134_v18 = vld [vmem:[%s3161_s1 + $0x3a8] sm:$0xff] }
  0x71   :  { %v643_v22 = vsel %vm387_vm10, %v259_v55, %v515_v6  ;;  %v647_v55 = vsel %vm391_vm3, %v263_v24, %v519_v40  ;;  %vm396_vm8 = vcmp.ge.f32.partialorder %v268_v44, 0.0  ;;  %v592_v3 = vsel %vm336_vm6, %v208_v36, %v464_v51  ;;  %v74_v6 = vld [vmem:[%s3161_s1 + $0x1c8] sm:$0xff] }
  0x72   :  { %v650_v58 = vsel %vm394_vm4, %v266_v27, %v522_v43  ;;  %vm335_vm9 = vcmp.ge.f32.partialorder %v207_v48, 0.0  ;;  %v466_v0 = vmul.f32 0.2, %v210_v52  ;;  %v212_v4 = vmul.f32 %v1843_v15, %v72_v54  ;;  %v78_v40 = vld [vmem:[%s3161_s1 + $0x1e8] sm:$0xff] }
  0x73   :  { %1040 = vmatmul.mubr.f32.gmra.mrb[38].mxu0 %v2285_v13  ;;  %v457_v13 = vmul.f32 0.2, %v201_v62  ;;  %1195 = vmatmul.mubr.f32.gmra.mrb[36].mxu1 %v641_v5  ;;  %v71_v5 = vld [vmem:[%s3161_s1 + $0x1b0] sm:$0xff]  ;;  %vm338_vm10 = vcmp.ge.f32.partialorder %v210_v52, 0.0  ;;  %v649_v7 = vsel %vm393_vm7, %v265_v41, %v521_v56  ;;  %v269_v9 = vmul.f32 %v1879_v32, %v129_v61  ;;  %v138_v51 = vld [vmem:[%s3161_s1 + $0x3c8] sm:$0xff]  ;;  %v80_v56 = vld [vmem:[%s3161_s1 + $0x1f8] sm:$0xff] }
  0x74   :  { %1694 = vmatprep.mubr.msk.f32.mxu0 %vm687_vm1, %v582_v31  ;;  %1725 = vmatprep.mubr.msk.f32.mxu1 %vm687_vm1, %v644_v8  ;;  %v205_v31 = vmul.f32 %v1879_v32, %v65_v20  ;;  %v523_v8 = vmul.f32 0.2, %v267_v57  ;;  %v652_v10 = vsel %vm396_vm8, %v268_v44, %v524_v59  ;;  %vm395_vm11 = vcmp.ge.f32.partialorder %v267_v57, 0.0 }
  0x75   :  { %v585_v29 = vsel %vm329_vm12, %v201_v62, %v457_v13  ;;  %v131_v13 = vld [vmem:[%s3161_s1 + $0x390] sm:$0xff]  ;;  %v591_v14 = vsel %vm335_vm9, %v207_v48, %v463_v63  ;;  %v594_v19 = vsel %vm338_vm10, %v210_v52, %v466_v0  ;;  %v468_v20 = vmul.f32 0.2, %v212_v4  ;;  %v137_v63 = vld [vmem:[%s3161_s1 + $0x3c0] sm:$0xff]  ;;  %v140_v0 = vld [vmem:[%s3161_s1 + $0x3d8] sm:$0xff] }
  0x76   :  { %v461_v47 = vmul.f32 0.2, %v205_v31  ;;  %vm333_vm5 = vcmp.ge.f32.partialorder %v205_v31, 0.0  ;;  %v214_v21 = vmul.f32 %v1843_v15, %v74_v6  ;;  %vm340_vm14 = vcmp.ge.f32.partialorder %v212_v4, 0.0 }
  0x77   :  { %1045 = vmatmul.mubr.f32.gmra.mrb[40].mxu0 %v581_v60  ;;  %1200 = vmatmul.mubr.f32.gmra.mrb[38].mxu1 %v643_v22  ;;  %v270_v60 = vmul.f32 %v1843_v15, %v130_v49  ;;  %v73_v22 = vld [vmem:[%s3161_s1 + $0x1c0] sm:$0xff]  ;;  %v651_v24 = vsel %vm395_vm11, %v267_v57, %v523_v8  ;;  %v271_v26 = vmul.f32 %v1879_v32, %v131_v13  ;;  %vm397_vm15 = vcmp.ge.f32.partialorder %v269_v9, 0.0 }
  0x78   :  { %1695 = vmatprep.mubr.msk.f32.mxu0 %vm687_vm1, %v584_v1  ;;  %1726 = vmatprep.mubr.msk.f32.mxu1 %vm687_vm1, %v646_v25  ;;  %v589_v62 = vsel %vm333_vm5, %v205_v31, %v461_v47  ;;  %v209_v1 = vmul.f32 %v1879_v32, %v69_v53  ;;  %v525_v25 = vmul.f32 0.2, %v269_v9  ;;  %v596_v36 = vsel %vm340_vm14, %v212_v4, %v468_v20  ;;  %v135_v47 = vld [vmem:[%s3161_s1 + $0x3b0] sm:$0xff] }
  0x79   :  { %v526_v11 = vmul.f32 0.2, %v270_v60  ;;  %vm398_vm12 = vcmp.ge.f32.partialorder %v270_v60, 0.0  ;;  %v470_v37 = vmul.f32 0.2, %v214_v21  ;;  %v216_v38 = vmul.f32 %v1843_v15, %v76_v23 }
  0x7a   :  { %v465_v16 = vmul.f32 0.2, %v209_v1  ;;  %vm337_vm13 = vcmp.ge.f32.partialorder %v209_v1, 0.0  ;;  %vm342_vm3 = vcmp.ge.f32.partialorder %v214_v21, 0.0  ;;  %v653_v41 = vsel %vm397_vm15, %v269_v9, %v525_v25 }
  0x7b   :  { %1050 = vmatmul.mubr.f32.gmra.mrb[42].mxu0 %v583_v12  ;;  %1205 = vmatmul.mubr.f32.gmra.mrb[40].mxu1 %v645_v39  ;;  %v272_v12 = vmul.f32 %v1843_v15, %v132_v2  ;;  %v654_v27 = vsel %vm398_vm12, %v270_v60, %v526_v11  ;;  %v75_v39 = vld [vmem:[%s3161_s1 + $0x1d0] sm:$0xff]  ;;  %v273_v43 = vmul.f32 %v1879_v32, %v133_v30  ;;  %vm399_vm4 = vcmp.ge.f32.partialorder %v271_v26, 0.0 }
  0x7c   :  { %1696 = vmatprep.mubr.msk.f32.mxu0 %vm687_vm1, %v586_v17  ;;  %1727 = vmatprep.mubr.msk.f32.mxu1 %vm687_vm1, %v648_v42  ;;  %v211_v17 = vmul.f32 %v1879_v32, %v71_v5  ;;  %v593_v31 = vsel %vm337_vm13, %v209_v1, %v465_v16  ;;  %v527_v42 = vmul.f32 0.2, %v271_v26  ;;  %v598_v52 = vsel %vm342_vm3, %v214_v21, %v470_v37 }
  0x7d   :  { %v528_v28 = vmul.f32 0.2, %v272_v12  ;;  %vm400_vm0 = vcmp.ge.f32.partialorder %v272_v12, 0.0  ;;  %v472_v53 = vmul.f32 0.2, %v216_v38  ;;  %v218_v54 = vmul.f32 %v1843_v15, %v78_v40  ;;  %v143_v40 = vld [vmem:[%s3161_s1 + $0x3f0] sm:$0xff] }
  0x7e   :  { %v467_v33 = vmul.f32 0.2, %v211_v17  ;;  %vm339_vm2 = vcmp.ge.f32.partialorder %v211_v17, 0.0  ;;  %vm344_vm7 = vcmp.ge.f32.partialorder %v216_v38, 0.0  ;;  %v655_v57 = vsel %vm399_vm4, %v271_v26, %v527_v42 }
  0x7f   :  { %1055 = vmatmul.mubr.f32.gmra.mrb[44].mxu0 %v585_v29  ;;  %1210 = vmatmul.mubr.f32.gmra.mrb[42].mxu1 %v647_v55  ;;  %v274_v29 = vmul.f32 %v1843_v15, %v134_v18  ;;  %v656_v44 = vsel %vm400_vm0, %v272_v12, %v528_v28  ;;  %v77_v55 = vld [vmem:[%s3161_s1 + $0x1e0] sm:$0xff]  ;;  %v275_v59 = vmul.f32 %v1879_v32, %v135_v47  ;;  %vm401_vm8 = vcmp.ge.f32.partialorder %v273_v43, 0.0 }
  0x80   :  { %1697 = vmatprep.mubr.msk.f32.mxu0 %vm687_vm1, %v588_v34  ;;  %1728 = vmatprep.mubr.msk.f32.mxu1 %vm687_vm1, %v650_v58  ;;  %v213_v34 = vmul.f32 %v1879_v32, %v73_v22  ;;  %v595_v48 = vsel %vm339_vm2, %v211_v17, %v467_v33  ;;  %v529_v58 = vmul.f32 0.2, %v273_v43  ;;  %v600_v4 = vsel %vm344_vm7, %v216_v38, %v472_v53  ;;  %v142_v17 = vld [vmem:[%s3161_s1 + $0x3e8] sm:$0xff]  ;;  %v141_v28 = vld [vmem:[%s3161_s1 + $0x3e0] sm:$0xff] }
  0x81   :  { %v530_v45 = vmul.f32 0.2, %v274_v29  ;;  %vm402_vm5 = vcmp.ge.f32.partialorder %v274_v29, 0.0  ;;  %v474_v5 = vmul.f32 0.2, %v218_v54  ;;  %v220_v6 = vmul.f32 %v1843_v15, %v80_v56 }
  0x82   :  { %v469_v49 = vmul.f32 0.2, %v213_v34  ;;  %vm341_vm6 = vcmp.ge.f32.partialorder %v213_v34, 0.0  ;;  %vm346_vm11 = vcmp.ge.f32.partialorder %v218_v54, 0.0  ;;  %v657_v8 = vsel %vm401_vm8, %v273_v43, %v529_v58 }
  0x83   :  { %1060 = vmatmul.mubr.f32.gmra.mrb[46].mxu0 %v587_v46  ;;  %1215 = vmatmul.mubr.f32.gmra.mrb[44].mxu1 %v649_v7  ;;  %v276_v46 = vmul.f32 %v1843_v15, %v136_v35  ;;  %v658_v60 = vsel %vm402_vm5, %v274_v29, %v530_v45  ;;  %v79_v7 = vld [vmem:[%s3161_s1 + $0x1f0] sm:$0xff]  ;;  %v531_v9 = vmul.f32 0.2, %v275_v59  ;;  %vm403_vm12 = vcmp.ge.f32.partialorder %v275_v59, 0.0  ;;  %v144_v29 = vld [vmem:[%s3161_s1 + $0x3f8] sm:$0xff] }
  0x84   :  { %1698 = vmatprep.mubr.msk.f32.mxu0 %vm687_vm1, %v590_v50  ;;  %1729 = vmatprep.mubr.msk.f32.mxu1 %vm687_vm1, %v652_v10  ;;  %v215_v50 = vmul.f32 %v1879_v32, %v75_v39  ;;  %v597_v1 = vsel %vm341_vm6, %v213_v34, %v469_v49  ;;  %v277_v10 = vmul.f32 %v1879_v32, %v137_v63  ;;  %vm348_vm15 = vcmp.ge.f32.partialorder %v220_v6, 0.0 }
  0x85   :  { %v532_v61 = vmul.f32 0.2, %v276_v46  ;;  %vm404_vm9 = vcmp.ge.f32.partialorder %v276_v46, 0.0  ;;  %v280_v13 = vmul.f32 %v1843_v15, %v140_v0  ;;  %v602_v18 = vsel %vm346_vm11, %v218_v54, %v474_v5 }
  0x86   :  { %v471_v2 = vmul.f32 0.2, %v215_v50  ;;  %vm343_vm10 = vcmp.ge.f32.partialorder %v215_v50, 0.0  ;;  %v219_v20 = vmul.f32 %v1879_v32, %v79_v7  ;;  %v476_v21 = vmul.f32 0.2, %v220_v6 }
  0x87   :  { %1065 = vmatmul.mubr.f32.gmra.mrb[48].mxu0 %v589_v62  ;;  %1220 = vmatmul.mubr.f32.gmra.mrb[46].mxu1 %v651_v24  ;;  %v278_v62 = vmul.f32 %v1843_v15, %v138_v51  ;;  %v660_v11 = vsel %vm404_vm9, %v276_v46, %v532_v61  ;;  %v659_v22 = vsel %vm403_vm12, %v275_v59, %v531_v9  ;;  %v533_v23 = vmul.f32 0.2, %v277_v10 }
  0x88   :  { %1699 = vmatprep.mubr.msk.f32.mxu0 %vm687_vm1, %v592_v3  ;;  %1730 = vmatprep.mubr.msk.f32.mxu1 %vm687_vm1, %v654_v27  ;;  %v217_v3 = vmul.f32 %v1879_v32, %v77_v55  ;;  %v599_v16 = vsel %vm343_vm10, %v215_v50, %v471_v2  ;;  %vm405_vm0 = vcmp.ge.f32.partialorder %v277_v10, 0.0  ;;  %v536_v26 = vmul.f32 0.2, %v280_v13 }
  0x89   :  { %v534_v12 = vmul.f32 0.2, %v278_v62  ;;  %vm406_vm14 = vcmp.ge.f32.partialorder %v278_v62, 0.0  ;;  %v282_v27 = vmul.f32 %v1843_v15, %v142_v17  ;;  %vm408_vm2 = vcmp.ge.f32.partialorder %v280_v13, 0.0 }
  0x8a   :  { %vm345_vm13 = vcmp.ge.f32.partialorder %v217_v3, 0.0  ;;  %vm347_vm3 = vcmp.ge.f32.partialorder %v219_v20, 0.0  ;;  %v604_v33 = vsel %vm348_vm15, %v220_v6, %v476_v21  ;;  %v661_v34 = vsel %vm405_vm0, %v277_v10, %v533_v23 }
  0x8b   :  { %1070 = vmatmul.mubr.f32.gmra.mrb[50].mxu0 %v591_v14  ;;  %1225 = vmatmul.mubr.f32.gmra.mrb[48].mxu1 %v653_v41  ;;  %v139_v14 = vld [vmem:[%s3161_s1 + $0x3d0] sm:$0xff]  ;;  %v662_v25 = vsel %vm406_vm14, %v278_v62, %v534_v12  ;;  %v664_v37 = vsel %vm408_vm2, %v280_v13, %v536_v26  ;;  %v538_v38 = vmul.f32 0.2, %v282_v27  ;;  %v284_v39 = vmul.f32 %v1843_v15, %v144_v29 }
  0x8c   :  { %1700 = vmatprep.mubr.msk.f32.mxu0 %vm687_vm1, %v594_v19  ;;  %1731 = vmatprep.mubr.msk.f32.mxu1 %vm687_vm1, %v656_v44  ;;  %v473_v19 = vmul.f32 0.2, %v217_v3  ;;  %v279_v24 = vmul.f32 %v1879_v32, %v139_v14  ;;  %vm410_vm5 = vcmp.ge.f32.partialorder %v282_v27, 0.0  ;;  %v283_v44 = vmul.f32 %v1879_v32, %v143_v40 }
  0x8d   :  { %v666_v45 = vsel %vm410_vm5, %v282_v27, %v538_v38  ;;  %v540_v15 = vmul.f32 0.2, %v284_v39  ;;  %vm412_vm7 = vcmp.ge.f32.partialorder %v284_v39, 0.0  ;;  %vm1462_vm9 = vcmask 122880  }
  0x8e   :  { %v601_v30 = vsel %vm345_vm13, %v217_v3, %v473_v19  ;;  %v535_v35 = vmul.f32 0.2, %v279_v24  ;;  %vm407_vm4 = vcmp.ge.f32.partialorder %v279_v24, 0.0  ;;  %v539_v47 = vmul.f32 0.2, %v283_v44 }
  0x8f   :  { %1075 = vmatmul.mubr.f32.gmra.mrb[52].mxu0 %v593_v31  ;;  %1230 = vmatmul.mubr.f32.gmra.mrb[50].mxu1 %v655_v57  ;;  %v475_v31 = vmul.f32 0.2, %v219_v20  ;;  %vm411_vm8 = vcmp.ge.f32.partialorder %v283_v44, 0.0 }
  0x90   :  { %1701 = vmatprep.mubr.msk.f32.mxu0 %vm687_vm1, %v596_v36  ;;  %1732 = vmatprep.mubr.msk.f32.mxu1 %vm687_vm1, %v658_v60  ;;  %v281_v36 = vmul.f32 %v1879_v32, %v141_v28  ;;  %v663_v42 = vsel %vm407_vm4, %v279_v24, %v535_v35  ;;  %v667_v49 = vsel %vm411_vm8, %v283_v44, %v539_v47 }
  0x91   :  { %v603_v41 = vsel %vm347_vm3, %v219_v20, %v475_v31 }
  0x92   :  { %v537_v43 = vmul.f32 0.2, %v281_v36  ;;  %vm409_vm6 = vcmp.ge.f32.partialorder %v281_v36, 0.0 }
  0x93   :  { %1080 = vmatmul.mubr.f32.gmra.mrb[54].mxu0 %v595_v48  ;;  %1235 = vmatmul.mubr.f32.gmra.mrb[52].mxu1 %v657_v8  ;;  %v668_v48 = vsel %vm412_vm7, %v284_v39, %v540_v15 }
  0x94   :  { %1702 = vmatprep.mubr.msk.f32.mxu0 %vm687_vm1, %v598_v52  ;;  %1733 = vmatprep.mubr.msk.f32.mxu1 %vm687_vm1, %v660_v11  ;;  %v665_v46 = vsel %vm409_vm6, %v281_v36, %v537_v43 }
  0x97   :  { %1085 = vmatmul.mubr.f32.gmra.mrb[56].mxu0 %v597_v1  ;;  %1240 = vmatmul.mubr.f32.gmra.mrb[54].mxu1 %v659_v22 }
  0x98   :  { %1703 = vmatprep.mubr.msk.f32.mxu0 %vm687_vm1, %v600_v4  ;;  %1734 = vmatprep.mubr.msk.f32.mxu1 %vm687_vm1, %v662_v25 }
  0x9b   :  { %1090 = vmatmul.mubr.f32.gmra.mrb[58].mxu0 %v599_v16  ;;  %1245 = vmatmul.mubr.f32.gmra.mrb[56].mxu1 %v661_v34 }
  0x9c   :  { %1704 = vmatprep.mubr.msk.f32.mxu0 %vm687_vm1, %v602_v18  ;;  %1735 = vmatprep.mubr.msk.f32.mxu1 %vm687_vm1, %v664_v37 }
  0x9f   :  { %1095 = vmatmul.mubr.f32.gmra.mrb[60].mxu0 %v601_v30  ;;  %1250 = vmatmul.mubr.f32.gmra.mrb[58].mxu1 %v663_v42 }
  0xa0   :  { %1705 = vmatprep.mubr.msk.f32.mxu0 %vm687_vm1, %v604_v33  ;;  %1736 = vmatprep.mubr.msk.f32.mxu1 %vm687_vm1, %v666_v45 }
  0xa3   :  { %1100 = vmatmul.mubr.f32.gmra.mrb[62].mxu0 %v603_v41  ;;  %1255 = vmatmul.mubr.f32.gmra.mrb[60].mxu1 %v665_v46 }
  0xa4   :  { %1737 = vmatprep.mubr.msk.f32.mxu1 %vm687_vm1, %v668_v48 }
  0xa7   :  { %1260 = vmatmul.mubr.f32.gmra.mrb[62].mxu1 %v667_v49 }
  0xfa   :  { %v946_v50 = vpop.f32.mrb[0].mxu0  ;;  %v2589_v62 = vpop.f32.mrb[0].mxu1 }
  0xfb   :  { %1265 = vst.msk [vmem:[%s3162_s3] sm:$0xff] %vm687_vm1, %v946_v50  ;;  %v948_v32 = vpop.f32.mrb[1].mxu0  ;;  %v1464_v51 = vmul.f32 %v946_v50, %v946_v50  ;;  %v1329_v53 = vsel %vm687_vm1, %v946_v50, 0.0  ;;  %1297 = vst.msk [vmem:[%s3162_s3 + $0x100] sm:$0xff] %vm687_vm1, %v2589_v62  ;;  %v1108_v3 = vpop.f32.mrb[1].mxu1 }
  0xfd   :  { %v1528_v58 = vsel %vm687_vm1, %v1464_v51, 0.0 }
  0xfe   :  { %v951_v52 = vpop.f32.mrb[2].mxu0  ;;  %v2602_v7 = vpop.f32.mrb[2].mxu1 }
  0xff   :  { %1266 = vst.msk [vmem:[%s3162_s3 + $0x8] sm:$0xff] %vm687_vm1, %v951_v52  ;;  %v1330_v54 = vsel %vm687_vm1, %v951_v52, 0.0  ;;  %v1465_v55 = vmul.f32 %v951_v52, %v951_v52  ;;  %v953_v56 = vpop.f32.mrb[3].mxu0  ;;  %1298 = vst.msk [vmem:[%s3162_s3 + $0x108] sm:$0xff] %vm687_vm1, %v2602_v7  ;;  %v1113_v11 = vpop.f32.mrb[3].mxu1 }
 0x100   :  { %v1331_v57 = vadd.f32 %v1330_v54, %v1329_v53 }
 0x101   :  { %v1529_v59 = vsel %vm687_vm1, %v1465_v55, 0.0 }
 0x102   :  { %v1530_v60 = vadd.f32 %v1529_v59, %v1528_v58  ;;  %v956_v61 = vpop.f32.mrb[4].mxu0  ;;  %v2615_v17 = vpop.f32.mrb[4].mxu1 }
 0x103   :  { %1267 = vst.msk [vmem:[%s3162_s3 + $0x10] sm:$0xff] %vm687_vm1, %v956_v61  ;;  %v1332_v63 = vsel %vm687_vm1, %v956_v61, 0.0  ;;  %v1466_v1 = vmul.f32 %v956_v61, %v956_v61  ;;  %v958_v2 = vpop.f32.mrb[5].mxu0  ;;  %1299 = vst.msk [vmem:[%s3162_s3 + $0x110] sm:$0xff] %vm687_vm1, %v2615_v17  ;;  %v1118_v21 = vpop.f32.mrb[5].mxu1 }
 0x104   :  { %v1333_v0 = vadd.f32 %v1332_v63, %v1331_v57 }
 0x105   :  { %v1531_v4 = vsel %vm687_vm1, %v1466_v1, 0.0 }
 0x106   :  { %v1532_v5 = vadd.f32 %v1531_v4, %v1530_v60  ;;  %v961_v6 = vpop.f32.mrb[6].mxu0  ;;  %v2628_v26 = vpop.f32.mrb[6].mxu1 }
 0x107   :  { %1268 = vst.msk [vmem:[%s3162_s3 + $0x18] sm:$0xff] %vm687_vm1, %v961_v6  ;;  %v1334_v8 = vsel %vm687_vm1, %v961_v6, 0.0  ;;  %v1467_v9 = vmul.f32 %v961_v6, %v961_v6  ;;  %v963_v10 = vpop.f32.mrb[7].mxu0  ;;  %1300 = vst.msk [vmem:[%s3162_s3 + $0x118] sm:$0xff] %vm687_vm1, %v2628_v26  ;;  %v1123_v30 = vpop.f32.mrb[7].mxu1 }
 0x108   :  { %v1335_v12 = vadd.f32 %v1334_v8, %v1333_v0 }
 0x109   :  { %v1533_v13 = vsel %vm687_vm1, %v1467_v9, 0.0 }
 0x10a   :  { %v1534_v14 = vadd.f32 %v1533_v13, %v1532_v5  ;;  %v966_v16 = vpop.f32.mrb[8].mxu0 }
 0x10b   :  { %1269 = vst.msk [vmem:[%s3162_s3 + $0x20] sm:$0xff] %vm687_vm1, %v966_v16  ;;  %v1336_v18 = vsel %vm687_vm1, %v966_v16, 0.0  ;;  %v1468_v19 = vmul.f32 %v966_v16, %v966_v16  ;;  %v968_v20 = vpop.f32.mrb[9].mxu0 }
 0x10c   :  { %v1337_v22 = vadd.f32 %v1336_v18, %v1335_v12  ;;  %v2641_v36 = vpop.f32.mrb[8].mxu1 }
 0x10d   :  { %v1535_v23 = vsel %vm687_vm1, %v1468_v19, 0.0  ;;  %1301 = vst.msk [vmem:[%s3162_s3 + $0x120] sm:$0xff] %vm687_vm1, %v2641_v36  ;;  %v1128_v40 = vpop.f32.mrb[9].mxu1 }
 0x10e   :  { %v1536_v24 = vadd.f32 %v1535_v23, %v1534_v14  ;;  %v971_v25 = vpop.f32.mrb[10].mxu0 }
 0x10f   :  { %1270 = vst.msk [vmem:[%s3162_s3 + $0x28] sm:$0xff] %vm687_vm1, %v971_v25  ;;  %v1338_v27 = vsel %vm687_vm1, %v971_v25, 0.0  ;;  %v1469_v28 = vmul.f32 %v971_v25, %v971_v25  ;;  %v973_v29 = vpop.f32.mrb[11].mxu0 }
 0x110   :  { %v1339_v31 = vadd.f32 %v1338_v27, %v1337_v22 }
 0x111   :  { %v1537_v33 = vsel %vm687_vm1, %v1469_v28, 0.0  ;;  %v2654_v45 = vpop.f32.mrb[10].mxu1 }
 0x112   :  { %v1538_v34 = vadd.f32 %v1537_v33, %v1536_v24  ;;  %v976_v35 = vpop.f32.mrb[12].mxu0  ;;  %1302 = vst.msk [vmem:[%s3162_s3 + $0x128] sm:$0xff] %vm687_vm1, %v2654_v45  ;;  %v1133_v48 = vpop.f32.mrb[11].mxu1 }
 0x113   :  { %1271 = vst.msk [vmem:[%s3162_s3 + $0x30] sm:$0xff] %vm687_vm1, %v976_v35  ;;  %v1340_v37 = vsel %vm687_vm1, %v976_v35, 0.0  ;;  %v1470_v38 = vmul.f32 %v976_v35, %v976_v35  ;;  %v978_v39 = vpop.f32.mrb[13].mxu0 }
 0x114   :  { %v1341_v41 = vadd.f32 %v1340_v37, %v1339_v31 }
 0x115   :  { %v1539_v42 = vsel %vm687_vm1, %v1470_v38, 0.0  ;;  %v2667_v52 = vpop.f32.mrb[12].mxu1 }
 0x116   :  { %v1540_v43 = vadd.f32 %v1539_v42, %v1538_v34  ;;  %v981_v44 = vpop.f32.mrb[14].mxu0  ;;  %1303 = vst.msk [vmem:[%s3162_s3 + $0x130] sm:$0xff] %vm687_vm1, %v2667_v52  ;;  %v1138_v56 = vpop.f32.mrb[13].mxu1 }
 0x117   :  { %1272 = vst.msk [vmem:[%s3162_s3 + $0x38] sm:$0xff] %vm687_vm1, %v981_v44  ;;  %v1342_v15 = vsel %vm687_vm1, %v981_v44, 0.0  ;;  %v1471_v46 = vmul.f32 %v981_v44, %v981_v44  ;;  %v983_v47 = vpop.f32.mrb[15].mxu0 }
 0x118   :  { %v1343_v49 = vadd.f32 %v1342_v15, %v1341_v41 }
 0x119   :  { %v1541_v50 = vsel %vm687_vm1, %v1471_v46, 0.0  ;;  %v2680_v61 = vpop.f32.mrb[14].mxu1 }
 0x11a   :  { %v1542_v32 = vadd.f32 %v1541_v50, %v1540_v43  ;;  %v986_v51 = vpop.f32.mrb[16].mxu0  ;;  %1304 = vst.msk [vmem:[%s3162_s3 + $0x138] sm:$0xff] %vm687_vm1, %v2680_v61  ;;  %v1143_v3 = vpop.f32.mrb[15].mxu1 }
 0x11b   :  { %1273 = vst.msk [vmem:[%s3162_s3 + $0x40] sm:$0xff] %vm687_vm1, %v986_v51  ;;  %v1344_v53 = vsel %vm687_vm1, %v986_v51, 0.0  ;;  %v1472_v54 = vmul.f32 %v986_v51, %v986_v51  ;;  %v988_v55 = vpop.f32.mrb[17].mxu0 }
 0x11c   :  { %v1345_v57 = vadd.f32 %v1344_v53, %v1343_v49 }
 0x11d   :  { %v1543_v58 = vsel %vm687_vm1, %v1472_v54, 0.0  ;;  %v2693_v8 = vpop.f32.mrb[16].mxu1 }
 0x11e   :  { %v1544_v59 = vadd.f32 %v1543_v58, %v1542_v32  ;;  %v991_v60 = vpop.f32.mrb[18].mxu0  ;;  %1305 = vst.msk [vmem:[%s3162_s3 + $0x140] sm:$0xff] %vm687_vm1, %v2693_v8  ;;  %v1148_v12 = vpop.f32.mrb[17].mxu1 }
 0x11f   :  { %1274 = vst.msk [vmem:[%s3162_s3 + $0x48] sm:$0xff] %vm687_vm1, %v991_v60  ;;  %v1346_v63 = vsel %vm687_vm1, %v991_v60, 0.0  ;;  %v1473_v1 = vmul.f32 %v991_v60, %v991_v60  ;;  %v993_v2 = vpop.f32.mrb[19].mxu0 }
 0x120   :  { %v1347_v0 = vadd.f32 %v1346_v63, %v1345_v57 }
 0x121   :  { %v1545_v4 = vsel %vm687_vm1, %v1473_v1, 0.0  ;;  %v2706_v19 = vpop.f32.mrb[18].mxu1 }
 0x122   :  { %v1546_v5 = vadd.f32 %v1545_v4, %v1544_v59  ;;  %v996_v6 = vpop.f32.mrb[20].mxu0  ;;  %1306 = vst.msk [vmem:[%s3162_s3 + $0x148] sm:$0xff] %vm687_vm1, %v2706_v19  ;;  %v1153_v23 = vpop.f32.mrb[19].mxu1 }
 0x123   :  { %1275 = vst.msk [vmem:[%s3162_s3 + $0x50] sm:$0xff] %vm687_vm1, %v996_v6  ;;  %v1348_v9 = vsel %vm687_vm1, %v996_v6, 0.0  ;;  %v1474_v10 = vmul.f32 %v996_v6, %v996_v6  ;;  %v998_v11 = vpop.f32.mrb[21].mxu0 }
 0x124   :  { %v1349_v13 = vadd.f32 %v1348_v9, %v1347_v0 }
 0x125   :  { %v1547_v14 = vsel %vm687_vm1, %v1474_v10, 0.0  ;;  %v2719_v29 = vpop.f32.mrb[20].mxu1 }
 0x126   :  { %v1548_v16 = vadd.f32 %v1547_v14, %v1546_v5  ;;  %v1001_v18 = vpop.f32.mrb[22].mxu0  ;;  %1307 = vst.msk [vmem:[%s3162_s3 + $0x150] sm:$0xff] %vm687_vm1, %v2719_v29  ;;  %v1158_v34 = vpop.f32.mrb[21].mxu1 }
 0x127   :  { %1276 = vst.msk [vmem:[%s3162_s3 + $0x58] sm:$0xff] %vm687_vm1, %v1001_v18  ;;  %v1350_v20 = vsel %vm687_vm1, %v1001_v18, 0.0  ;;  %v1475_v21 = vmul.f32 %v1001_v18, %v1001_v18  ;;  %v1003_v22 = vpop.f32.mrb[23].mxu0 }
 0x128   :  { %v1351_v24 = vadd.f32 %v1350_v20, %v1349_v13 }
 0x129   :  { %v1549_v25 = vsel %vm687_vm1, %v1475_v21, 0.0  ;;  %v2732_v40 = vpop.f32.mrb[22].mxu1 }
 0x12a   :  { %v1550_v27 = vadd.f32 %v1549_v25, %v1548_v16  ;;  %v1006_v28 = vpop.f32.mrb[24].mxu0  ;;  %1308 = vst.msk [vmem:[%s3162_s3 + $0x158] sm:$0xff] %vm687_vm1, %v2732_v40  ;;  %v1163_v44 = vpop.f32.mrb[23].mxu1 }
 0x12b   :  { %1277 = vst.msk [vmem:[%s3162_s3 + $0x60] sm:$0xff] %vm687_vm1, %v1006_v28  ;;  %v1352_v30 = vsel %vm687_vm1, %v1006_v28, 0.0  ;;  %v1476_v31 = vmul.f32 %v1006_v28, %v1006_v28  ;;  %v1008_v33 = vpop.f32.mrb[25].mxu0 }
 0x12c   :  { %v1353_v35 = vadd.f32 %v1352_v30, %v1351_v24 }
 0x12d   :  { %v1551_v37 = vsel %vm687_vm1, %v1476_v31, 0.0  ;;  %v2745_v49 = vpop.f32.mrb[24].mxu1 }
 0x12e   :  { %v1552_v38 = vadd.f32 %v1551_v37, %v1550_v27  ;;  %v1011_v39 = vpop.f32.mrb[26].mxu0  ;;  %1309 = vst.msk [vmem:[%s3162_s3 + $0x160] sm:$0xff] %vm687_vm1, %v2745_v49  ;;  %v1168_v53 = vpop.f32.mrb[25].mxu1 }
 0x12f   :  { %1278 = vst.msk [vmem:[%s3162_s3 + $0x68] sm:$0xff] %vm687_vm1, %v1011_v39  ;;  %v1354_v41 = vsel %vm687_vm1, %v1011_v39, 0.0  ;;  %v1477_v42 = vmul.f32 %v1011_v39, %v1011_v39  ;;  %v1013_v43 = vpop.f32.mrb[27].mxu0 }
 0x130   :  { %v1355_v15 = vadd.f32 %v1354_v41, %v1353_v35 }
 0x131   :  { %v1553_v46 = vsel %vm687_vm1, %v1477_v42, 0.0 }
 0x132   :  { %v1554_v47 = vadd.f32 %v1553_v46, %v1552_v38  ;;  %v1016_v48 = vpop.f32.mrb[28].mxu0  ;;  %v2758_v58 = vpop.f32.mrb[26].mxu1 }
 0x133   :  { %1279 = vst.msk [vmem:[%s3162_s3 + $0x70] sm:$0xff] %vm687_vm1, %v1016_v48  ;;  %v1356_v50 = vsel %vm687_vm1, %v1016_v48, 0.0  ;;  %v1478_v32 = vmul.f32 %v1016_v48, %v1016_v48  ;;  %v1018_v51 = vpop.f32.mrb[29].mxu0  ;;  %1310 = vst.msk [vmem:[%s3162_s3 + $0x168] sm:$0xff] %vm687_vm1, %v2758_v58  ;;  %v1173_v1 = vpop.f32.mrb[27].mxu1 }
 0x134   :  { %v1357_v54 = vadd.f32 %v1356_v50, %v1355_v15 }
 0x135   :  { %v1555_v55 = vsel %vm687_vm1, %v1478_v32, 0.0 }
 0x136   :  { %v1556_v56 = vadd.f32 %v1555_v55, %v1554_v47  ;;  %v1021_v57 = vpop.f32.mrb[30].mxu0  ;;  %v2771_v5 = vpop.f32.mrb[28].mxu1 }
 0x137   :  { %1280 = vst.msk [vmem:[%s3162_s3 + $0x78] sm:$0xff] %vm687_vm1, %v1021_v57  ;;  %v1358_v59 = vsel %vm687_vm1, %v1021_v57, 0.0  ;;  %v1479_v60 = vmul.f32 %v1021_v57, %v1021_v57  ;;  %v1023_v63 = vpop.f32.mrb[31].mxu0  ;;  %1311 = vst.msk [vmem:[%s3162_s3 + $0x170] sm:$0xff] %vm687_vm1, %v2771_v5  ;;  %v1178_v11 = vpop.f32.mrb[29].mxu1 }
 0x138   :  { %v1359_v2 = vadd.f32 %v1358_v59, %v1357_v54 }
 0x139   :  { %v1557_v3 = vsel %vm687_vm1, %v1479_v60, 0.0 }
 0x13a   :  { %v1558_v0 = vadd.f32 %v1557_v3, %v1556_v56  ;;  %v1026_v4 = vpop.f32.mrb[32].mxu0  ;;  %v2784_v18 = vpop.f32.mrb[30].mxu1 }
 0x13b   :  { %1281 = vst.msk [vmem:[%s3162_s3 + $0x80] sm:$0xff] %vm687_vm1, %v1026_v4  ;;  %v1360_v6 = vsel %vm687_vm1, %v1026_v4, 0.0  ;;  %v1480_v9 = vmul.f32 %v1026_v4, %v1026_v4  ;;  %v1028_v10 = vpop.f32.mrb[33].mxu0  ;;  %1312 = vst.msk [vmem:[%s3162_s3 + $0x178] sm:$0xff] %vm687_vm1, %v2784_v18  ;;  %v1183_v23 = vpop.f32.mrb[31].mxu1 }
 0x13c   :  { %v1361_v12 = vadd.f32 %v1360_v6, %v1359_v2 }
 0x13d   :  { %v1559_v13 = vsel %vm687_vm1, %v1480_v9, 0.0 }
 0x13e   :  { %v1560_v14 = vadd.f32 %v1559_v13, %v1558_v0  ;;  %v1031_v16 = vpop.f32.mrb[34].mxu0  ;;  %v2797_v30 = vpop.f32.mrb[32].mxu1 }
 0x13f   :  { %1282 = vst.msk [vmem:[%s3162_s3 + $0x88] sm:$0xff] %vm687_vm1, %v1031_v16  ;;  %v1362_v20 = vsel %vm687_vm1, %v1031_v16, 0.0  ;;  %v1481_v21 = vmul.f32 %v1031_v16, %v1031_v16  ;;  %v1033_v22 = vpop.f32.mrb[35].mxu0  ;;  %1313 = vst.msk [vmem:[%s3162_s3 + $0x180] sm:$0xff] %vm687_vm1, %v2797_v30  ;;  %v1188_v35 = vpop.f32.mrb[33].mxu1 }
 0x140   :  { %v1363_v24 = vadd.f32 %v1362_v20, %v1361_v12 }
 0x141   :  { %v1561_v25 = vsel %vm687_vm1, %v1481_v21, 0.0 }
 0x142   :  { %v1562_v27 = vadd.f32 %v1561_v25, %v1560_v14  ;;  %v1036_v28 = vpop.f32.mrb[36].mxu0  ;;  %v2810_v42 = vpop.f32.mrb[34].mxu1 }
 0x143   :  { %1283 = vst.msk [vmem:[%s3162_s3 + $0x90] sm:$0xff] %vm687_vm1, %v1036_v28  ;;  %v1364_v31 = vsel %vm687_vm1, %v1036_v28, 0.0  ;;  %v1482_v33 = vmul.f32 %v1036_v28, %v1036_v28  ;;  %v1038_v34 = vpop.f32.mrb[37].mxu0  ;;  %1314 = vst.msk [vmem:[%s3162_s3 + $0x188] sm:$0xff] %vm687_vm1, %v2810_v42  ;;  %v1193_v46 = vpop.f32.mrb[35].mxu1 }
 0x144   :  { %v1365_v37 = vadd.f32 %v1364_v31, %v1363_v24 }
 0x145   :  { %v1563_v38 = vsel %vm687_vm1, %v1482_v33, 0.0 }
 0x146   :  { %v1564_v39 = vadd.f32 %v1563_v38, %v1562_v27  ;;  %v1041_v41 = vpop.f32.mrb[38].mxu0  ;;  %v2823_v51 = vpop.f32.mrb[36].mxu1 }
 0x147   :  { %1284 = vst.msk [vmem:[%s3162_s3 + $0x98] sm:$0xff] %vm687_vm1, %v1041_v41  ;;  %v1366_v43 = vsel %vm687_vm1, %v1041_v41, 0.0  ;;  %v1483_v44 = vmul.f32 %v1041_v41, %v1041_v41  ;;  %v1043_v15 = vpop.f32.mrb[39].mxu0  ;;  %1315 = vst.msk [vmem:[%s3162_s3 + $0x190] sm:$0xff] %vm687_vm1, %v2823_v51  ;;  %v1198_v56 = vpop.f32.mrb[37].mxu1 }
 0x148   :  { %v1367_v47 = vadd.f32 %v1366_v43, %v1365_v37 }
 0x149   :  { %v1565_v48 = vsel %vm687_vm1, %v1483_v44, 0.0 }
 0x14a   :  { %v1566_v50 = vadd.f32 %v1565_v48, %v1564_v39  ;;  %v1046_v32 = vpop.f32.mrb[40].mxu0  ;;  %v2836_v1 = vpop.f32.mrb[38].mxu1 }
 0x14b   :  { %1285 = vst.msk [vmem:[%s3162_s3 + $0xa0] sm:$0xff] %vm687_vm1, %v1046_v32  ;;  %v1368_v53 = vsel %vm687_vm1, %v1046_v32, 0.0  ;;  %v1484_v54 = vmul.f32 %v1046_v32, %v1046_v32  ;;  %v1048_v55 = vpop.f32.mrb[41].mxu0  ;;  %1316 = vst.msk [vmem:[%s3162_s3 + $0x198] sm:$0xff] %vm687_vm1, %v2836_v1  ;;  %v1203_v4 = vpop.f32.mrb[39].mxu1 }
 0x14c   :  { %v1369_v57 = vadd.f32 %v1368_v53, %v1367_v47 }
 0x14d   :  { %v1567_v59 = vsel %vm687_vm1, %v1484_v54, 0.0 }
 0x14e   :  { %v1568_v60 = vadd.f32 %v1567_v59, %v1566_v50  ;;  %v1051_v63 = vpop.f32.mrb[42].mxu0  ;;  %v2849_v12 = vpop.f32.mrb[40].mxu1 }
 0x14f   :  { %1286 = vst.msk [vmem:[%s3162_s3 + $0xa8] sm:$0xff] %vm687_vm1, %v1051_v63  ;;  %v1370_v2 = vsel %vm687_vm1, %v1051_v63, 0.0  ;;  %v1485_v3 = vmul.f32 %v1051_v63, %v1051_v63  ;;  %v1053_v0 = vpop.f32.mrb[43].mxu0  ;;  %1317 = vst.msk [vmem:[%s3162_s3 + $0x1a0] sm:$0xff] %vm687_vm1, %v2849_v12  ;;  %v1208_v20 = vpop.f32.mrb[41].mxu1 }
 0x150   :  { %v1371_v6 = vadd.f32 %v1370_v2, %v1369_v57 }
 0x151   :  { %v1569_v9 = vsel %vm687_vm1, %v1485_v3, 0.0 }
 0x152   :  { %v1570_v10 = vadd.f32 %v1569_v9, %v1568_v60  ;;  %v1056_v11 = vpop.f32.mrb[44].mxu0  ;;  %v2862_v25 = vpop.f32.mrb[42].mxu1 }
 0x153   :  { %1287 = vst.msk [vmem:[%s3162_s3 + $0xb0] sm:$0xff] %vm687_vm1, %v1056_v11  ;;  %v1372_v13 = vsel %vm687_vm1, %v1056_v11, 0.0  ;;  %v1486_v14 = vmul.f32 %v1056_v11, %v1056_v11  ;;  %v1058_v16 = vpop.f32.mrb[45].mxu0  ;;  %1318 = vst.msk [vmem:[%s3162_s3 + $0x1a8] sm:$0xff] %vm687_vm1, %v2862_v25  ;;  %v1213_v33 = vpop.f32.mrb[43].mxu1 }
 0x154   :  { %v1373_v21 = vadd.f32 %v1372_v13, %v1371_v6 }
 0x155   :  { %v1571_v22 = vsel %vm687_vm1, %v1486_v14, 0.0 }
 0x156   :  { %v1572_v23 = vadd.f32 %v1571_v22, %v1570_v10  ;;  %v1061_v24 = vpop.f32.mrb[46].mxu0  ;;  %v2875_v39 = vpop.f32.mrb[44].mxu1 }
 0x157   :  { %1288 = vst.msk [vmem:[%s3162_s3 + $0xb8] sm:$0xff] %vm687_vm1, %v1061_v24  ;;  %v1374_v27 = vsel %vm687_vm1, %v1061_v24, 0.0  ;;  %v1487_v28 = vmul.f32 %v1061_v24, %v1061_v24  ;;  %v1063_v31 = vpop.f32.mrb[47].mxu0  ;;  %1319 = vst.msk [vmem:[%s3162_s3 + $0x1b0] sm:$0xff] %vm687_vm1, %v2875_v39  ;;  %v1218_v15 = vpop.f32.mrb[45].mxu1 }
 0x158   :  { %v1375_v34 = vadd.f32 %v1374_v27, %v1373_v21 }
 0x159   :  { %v1573_v35 = vsel %vm687_vm1, %v1487_v28, 0.0 }
 0x15a   :  { %v1574_v37 = vadd.f32 %v1573_v35, %v1572_v23  ;;  %v1066_v38 = vpop.f32.mrb[48].mxu0  ;;  %v2888_v32 = vpop.f32.mrb[46].mxu1 }
 0x15b   :  { %1289 = vst.msk [vmem:[%s3162_s3 + $0xc0] sm:$0xff] %vm687_vm1, %v1066_v38  ;;  %v1376_v41 = vsel %vm687_vm1, %v1066_v38, 0.0  ;;  %v1488_v43 = vmul.f32 %v1066_v38, %v1066_v38  ;;  %v1068_v44 = vpop.f32.mrb[49].mxu0  ;;  %1320 = vst.msk [vmem:[%s3162_s3 + $0x1b8] sm:$0xff] %vm687_vm1, %v2888_v32  ;;  %v1223_v56 = vpop.f32.mrb[47].mxu1 }
 0x15c   :  { %v1377_v46 = vadd.f32 %v1376_v41, %v1375_v34 }
 0x15d   :  { %v1575_v47 = vsel %vm687_vm1, %v1488_v43, 0.0 }
 0x15e   :  { %v1576_v48 = vadd.f32 %v1575_v47, %v1574_v37  ;;  %v1071_v50 = vpop.f32.mrb[50].mxu0  ;;  %v2901_v2 = vpop.f32.mrb[48].mxu1 }
 0x15f   :  { %1290 = vst.msk [vmem:[%s3162_s3 + $0xc8] sm:$0xff] %vm687_vm1, %v1071_v50  ;;  %v1378_v53 = vsel %vm687_vm1, %v1071_v50, 0.0  ;;  %v1489_v54 = vmul.f32 %v1071_v50, %v1071_v50  ;;  %v1073_v55 = vpop.f32.mrb[51].mxu0  ;;  %1321 = vst.msk [vmem:[%s3162_s3 + $0x1c0] sm:$0xff] %vm687_vm1, %v2901_v2  ;;  %v1228_v6 = vpop.f32.mrb[49].mxu1 }
 0x160   :  { %v1379_v57 = vadd.f32 %v1378_v53, %v1377_v46 }
 0x161   :  { %v1577_v59 = vsel %vm687_vm1, %v1489_v54, 0.0 }
 0x162   :  { %v1578_v60 = vadd.f32 %v1577_v59, %v1576_v48  ;;  %v1076_v63 = vpop.f32.mrb[52].mxu0  ;;  %v2914_v14 = vpop.f32.mrb[50].mxu1 }
 0x163   :  { %1291 = vst.msk [vmem:[%s3162_s3 + $0xd0] sm:$0xff] %vm687_vm1, %v1076_v63  ;;  %v1380_v3 = vsel %vm687_vm1, %v1076_v63, 0.0  ;;  %v1490_v0 = vmul.f32 %v1076_v63, %v1076_v63  ;;  %v1078_v4 = vpop.f32.mrb[53].mxu0  ;;  %1322 = vst.msk [vmem:[%s3162_s3 + $0x1c8] sm:$0xff] %vm687_vm1, %v2914_v14  ;;  %v1233_v22 = vpop.f32.mrb[51].mxu1 }
 0x164   :  { %v1381_v9 = vadd.f32 %v1380_v3, %v1379_v57 }
 0x165   :  { %v1579_v10 = vsel %vm687_vm1, %v1490_v0, 0.0 }
 0x166   :  { %v1580_v11 = vadd.f32 %v1579_v10, %v1578_v60  ;;  %v1081_v13 = vpop.f32.mrb[54].mxu0  ;;  %v2927_v31 = vpop.f32.mrb[52].mxu1 }
 0x167   :  { %1292 = vst.msk [vmem:[%s3162_s3 + $0xd8] sm:$0xff] %vm687_vm1, %v1081_v13  ;;  %v1382_v16 = vsel %vm687_vm1, %v1081_v13, 0.0  ;;  %v1491_v20 = vmul.f32 %v1081_v13, %v1081_v13  ;;  %v1083_v21 = vpop.f32.mrb[55].mxu0  ;;  %1323 = vst.msk [vmem:[%s3162_s3 + $0x1d0] sm:$0xff] %vm687_vm1, %v2927_v31  ;;  %v1238_v37 = vpop.f32.mrb[53].mxu1 }
 0x168   :  { %v1383_v23 = vadd.f32 %v1382_v16, %v1381_v9  ;;  %v1394_v37 = vsel %vm687_vm1, %v2602_v7, 0.0 }
 0x169   :  { %v1581_v24 = vsel %vm687_vm1, %v1491_v20, 0.0 }
 0x16a   :  { %v1582_v27 = vadd.f32 %v1581_v24, %v1580_v11  ;;  %v1086_v28 = vpop.f32.mrb[56].mxu0  ;;  %v2940_v15 = vpop.f32.mrb[54].mxu1  ;;  %v1496_v11 = vmul.f32 %v2589_v62, %v2589_v62  ;;  %v1497_v24 = vmul.f32 %v2602_v7, %v2602_v7  ;;  %v1499_v7 = vmul.f32 %v2628_v26, %v2628_v26 }
 0x16b   :  { %1293 = vst.msk [vmem:[%s3162_s3 + $0xe0] sm:$0xff] %vm687_vm1, %v1086_v28  ;;  %v1384_v33 = vsel %vm687_vm1, %v1086_v28, 0.0  ;;  %v1492_v34 = vmul.f32 %v1086_v28, %v1086_v28  ;;  %v1088_v35 = vpop.f32.mrb[57].mxu0  ;;  %1324 = vst.msk [vmem:[%s3162_s3 + $0x1d8] sm:$0xff] %vm687_vm1, %v2940_v15  ;;  %v1243_v50 = vpop.f32.mrb[55].mxu1 }
 0x16c   :  { %v1385_v38 = vadd.f32 %v1384_v33, %v1383_v23  ;;  %v1392_v23 = vsel %vm687_vm1, %v2589_v62, 0.0  ;;  %v1591_v35 = vsel %vm687_vm1, %v1496_v11, 0.0 }
 0x16d   :  { %v1583_v41 = vsel %vm687_vm1, %v1492_v34, 0.0 }
 0x16e   :  { %v1584_v43 = vadd.f32 %v1583_v41, %v1582_v27  ;;  %v1091_v44 = vpop.f32.mrb[58].mxu0  ;;  %v2953_v57 = vpop.f32.mrb[56].mxu1 }
 0x16f   :  { %1294 = vst.msk [vmem:[%s3162_s3 + $0xe8] sm:$0xff] %vm687_vm1, %v1091_v44  ;;  %v1386_v46 = vsel %vm687_vm1, %v1091_v44, 0.0  ;;  %v1493_v47 = vmul.f32 %v1091_v44, %v1091_v44  ;;  %v1093_v48 = vpop.f32.mrb[59].mxu0  ;;  %1325 = vst.msk [vmem:[%s3162_s3 + $0x1e0] sm:$0xff] %vm687_vm1, %v2953_v57  ;;  %v1248_v3 = vpop.f32.mrb[57].mxu1  ;;  %v1593_v44 = vsel %vm687_vm1, %v1497_v24, 0.0  ;;  %v1504_v24 = vmul.f32 %v2693_v8, %v2693_v8 }
 0x170   :  { %v1387_v53 = vadd.f32 %v1386_v46, %v1385_v38  ;;  %v1498_v38 = vmul.f32 %v2615_v17, %v2615_v17  ;;  %v1396_v46 = vsel %vm687_vm1, %v2615_v17, 0.0 }
 0x171   :  { %v1585_v54 = vsel %vm687_vm1, %v1493_v47, 0.0 }
 0x172   :  { %v1586_v55 = vadd.f32 %v1585_v54, %v1584_v43  ;;  %v1096_v56 = vpop.f32.mrb[60].mxu0  ;;  %v2966_v10 = vpop.f32.mrb[58].mxu1  ;;  %v1398_v54 = vsel %vm687_vm1, %v2628_v26, 0.0  ;;  %v1501_v26 = vmul.f32 %v2654_v45, %v2654_v45 }
 0x173   :  { %1295 = vst.msk [vmem:[%s3162_s3 + $0xf0] sm:$0xff] %vm687_vm1, %v1096_v56  ;;  %v1388_v59 = vsel %vm687_vm1, %v1096_v56, 0.0  ;;  %v1494_v60 = vmul.f32 %v1096_v56, %v1096_v56  ;;  %v1098_v63 = vpop.f32.mrb[61].mxu0  ;;  %1326 = vst.msk [vmem:[%s3162_s3 + $0x1e8] sm:$0xff] %vm687_vm1, %v2966_v10  ;;  %v1253_v21 = vpop.f32.mrb[59].mxu1 }
 0x174   :  { %v1389_v0 = vadd.f32 %v1388_v59, %v1387_v53  ;;  %v1595_v53 = vsel %vm687_vm1, %v1498_v38, 0.0  ;;  %v1400_v63 = vsel %vm687_vm1, %v2641_v36, 0.0 }
 0x175   :  { %v1587_v4 = vsel %vm687_vm1, %v1494_v60, 0.0  ;;  %v1597_v60 = vsel %vm687_vm1, %v1499_v7, 0.0  ;;  %v1507_v7 = vmul.f32 %v2732_v40, %v2732_v40 }
 0x176   :  { %v1588_v6 = vadd.f32 %v1587_v4, %v1586_v55  ;;  %v1101_v9 = vpop.f32.mrb[62].mxu0  ;;  %v2985_v34 = vpop.f32.mrb[60].mxu1  ;;  %v1500_v55 = vmul.f32 %v2641_v36, %v2641_v36  ;;  %v1404_v36 = vsel %vm687_vm1, %v2667_v52, 0.0 }
 0x177   :  { %1296 = vst.msk [vmem:[%s3162_s3 + $0xf8] sm:$0xff] %vm687_vm1, %v1101_v9  ;;  %v1390_v13 = vsel %vm687_vm1, %v1101_v9, 0.0  ;;  %v1495_v16 = vmul.f32 %v1101_v9, %v1101_v9  ;;  %v1103_v20 = vpop.f32.mrb[63].mxu0  ;;  %1327 = vst.msk [vmem:[%s3162_s3 + $0x1f0] sm:$0xff] %vm687_vm1, %v2985_v34  ;;  %v1258_v62 = vpop.f32.mrb[61].mxu1  ;;  %v1502_v9 = vmul.f32 %v2667_v52, %v2667_v52  ;;  %v1408_v52 = vsel %vm687_vm1, %v2693_v8, 0.0 }
 0x178   :  { %v1391_v22 = vadd.f32 %v1390_v13, %v1389_v0  ;;  %v1599_v4 = vsel %vm687_vm1, %v1500_v55, 0.0  ;;  %v1503_v20 = vmul.f32 %v2680_v61, %v2680_v61  ;;  %v1607_v62 = vsel %vm687_vm1, %v1504_v24, 0.0 }
 0x179   :  { %v1589_v27 = vsel %vm687_vm1, %v1495_v16, 0.0  ;;  %v1601_v16 = vsel %vm687_vm1, %v1501_v26, 0.0  ;;  %v1412_v8 = vsel %vm687_vm1, %v2719_v29, 0.0 }
 0x17a   :  { %v1393_v28 = vadd.f32 %v1392_v23, %v1391_v22  ;;  %v1590_v33 = vadd.f32 %v1589_v27, %v1588_v6  ;;  %v3002_v50 = vpop.f32.mrb[62].mxu1  ;;  %v1402_v6 = vsel %vm687_vm1, %v2654_v45, 0.0  ;;  %v1603_v23 = vsel %vm687_vm1, %v1502_v9, 0.0 }
 0x17b   :  { %1328 = vst.msk [vmem:[%s3162_s3 + $0x1f8] sm:$0xff] %vm687_vm1, %v3002_v50  ;;  %v1263_v17 = vpop.f32.mrb[63].mxu1  ;;  %v1406_v45 = vsel %vm687_vm1, %v2680_v61, 0.0  ;;  %v1410_v61 = vsel %vm687_vm1, %v2706_v19, 0.0  ;;  %v1511_v9 = vmul.f32 %v2784_v18, %v2784_v18 }
 0x17c   :  { %v1395_v41 = vadd.f32 %v1394_v37, %v1393_v28  ;;  %v1592_v43 = vadd.f32 %v1591_v35, %v1590_v33  ;;  %v1605_v33 = vsel %vm687_vm1, %v1503_v20, 0.0  ;;  %v1505_v35 = vmul.f32 %v2706_v19, %v2706_v19 }
 0x17d   :  { %v1414_v19 = vsel %vm687_vm1, %v2732_v40, 0.0  ;;  %v1418_v40 = vsel %vm687_vm1, %v2758_v58, 0.0 }
 0x17e   :  { %v1397_v47 = vadd.f32 %v1396_v46, %v1395_v41  ;;  %v1594_v48 = vadd.f32 %v1593_v44, %v1592_v43  ;;  %v1506_v41 = vmul.f32 %v2719_v29, %v2719_v29  ;;  %v1609_v46 = vsel %vm687_vm1, %v1505_v35, 0.0 }
 0x17f   :  { %v1416_v29 = vsel %vm687_vm1, %v2745_v49, 0.0 }
 0x180   :  { %v1399_v56 = vadd.f32 %v1398_v54, %v1397_v47  ;;  %v1596_v59 = vadd.f32 %v1595_v53, %v1594_v48  ;;  %v1611_v53 = vsel %vm687_vm1, %v1506_v41, 0.0  ;;  %v1508_v54 = vmul.f32 %v2745_v49, %v2745_v49 }
 0x181   :  { %v1420_v49 = vsel %vm687_vm1, %v2771_v5, 0.0  ;;  %v1516_v41 = vmul.f32 %v2849_v12, %v2849_v12 }
 0x182   :  { %v1401_v3 = vadd.f32 %v1400_v63, %v1399_v56  ;;  %v1598_v0 = vadd.f32 %v1597_v60, %v1596_v59  ;;  %v1613_v56 = vsel %vm687_vm1, %v1507_v7, 0.0  ;;  %v1509_v59 = vmul.f32 %v2758_v58, %v2758_v58 }
 0x183   :  { %v1615_v26 = vsel %vm687_vm1, %v1508_v54, 0.0  ;;  %v1422_v58 = vsel %vm687_vm1, %v2784_v18, 0.0  ;;  %v1426_v18 = vsel %vm687_vm1, %v2810_v42, 0.0 }
 0x184   :  { %v1403_v11 = vadd.f32 %v1402_v6, %v1401_v3  ;;  %v1600_v13 = vadd.f32 %v1599_v4, %v1598_v0  ;;  %v1510_v3 = vmul.f32 %v2771_v5, %v2771_v5  ;;  %v1617_v6 = vsel %vm687_vm1, %v1509_v59, 0.0 }
 0x185   :  { %v1424_v5 = vsel %vm687_vm1, %v2797_v30, 0.0 }
 0x186   :  { %v1405_v21 = vadd.f32 %v1404_v36, %v1403_v11  ;;  %v1602_v22 = vadd.f32 %v1601_v16, %v1600_v13  ;;  %v1619_v16 = vsel %vm687_vm1, %v1510_v3, 0.0  ;;  %v1512_v36 = vmul.f32 %v2797_v30, %v2797_v30 }
 0x187   :  { %v1428_v30 = vsel %vm687_vm1, %v2823_v51, 0.0  ;;  %v1521_v3 = vmul.f32 %v2914_v14, %v2914_v14 }
 0x188   :  { %v1407_v27 = vadd.f32 %v1406_v45, %v1405_v21  ;;  %v1604_v28 = vadd.f32 %v1603_v23, %v1602_v22  ;;  %v1621_v22 = vsel %vm687_vm1, %v1511_v9, 0.0  ;;  %v1513_v23 = vmul.f32 %v2810_v42, %v2810_v42 }
 0x189   :  { %v1430_v42 = vsel %vm687_vm1, %v2836_v1, 0.0 }
 0x18a   :  { %v1606_v37 = vadd.f32 %v1605_v33, %v1604_v28  ;;  %v1409_v38 = vadd.f32 %v1408_v52, %v1407_v27  ;;  %v1623_v27 = vsel %vm687_vm1, %v1512_v36, 0.0  ;;  %v1514_v28 = vmul.f32 %v2823_v51, %v2823_v51 }
 0x18b   :  { %v1625_v35 = vsel %vm687_vm1, %v1513_v23, 0.0  ;;  %v1432_v51 = vsel %vm687_vm1, %v2849_v12, 0.0  ;;  %v1436_v12 = vsel %vm687_vm1, %v2875_v39, 0.0 }
 0x18c   :  { %v1411_v43 = vadd.f32 %v1410_v61, %v1409_v38  ;;  %v1608_v44 = vadd.f32 %v1607_v62, %v1606_v37  ;;  %v1515_v37 = vmul.f32 %v2836_v1, %v2836_v1  ;;  %v1627_v61 = vsel %vm687_vm1, %v1514_v28, 0.0 }
 0x18d   :  { %v1434_v1 = vsel %vm687_vm1, %v2862_v25, 0.0  ;;  %v1526_v28 = vmul.f32 %v2985_v34, %v2985_v34 }
 0x18e   :  { %v1413_v47 = vadd.f32 %v1412_v8, %v1411_v43  ;;  %v1610_v48 = vadd.f32 %v1609_v46, %v1608_v44  ;;  %v1629_v46 = vsel %vm687_vm1, %v1515_v37, 0.0  ;;  %v1517_v8 = vmul.f32 %v2862_v25, %v2862_v25 }
 0x18f   :  { %v1438_v25 = vsel %vm687_vm1, %v2888_v32, 0.0  ;;  %v1454_v37 = vsel %vm687_vm1, %v3002_v50, 0.0 }
 0x190   :  { %v1415_v55 = vadd.f32 %v1414_v19, %v1413_v47  ;;  %v1612_v17 = vadd.f32 %v1611_v53, %v1610_v48  ;;  %v1631_v48 = vsel %vm687_vm1, %v1516_v41, 0.0  ;;  %v1518_v53 = vmul.f32 %v2875_v39, %v2875_v39 }
 0x191   :  { %v1440_v39 = vsel %vm687_vm1, %v2901_v2, 0.0 }
 0x192   :  { %v1417_v60 = vadd.f32 %v1416_v29, %v1415_v55  ;;  %v1614_v63 = vadd.f32 %v1613_v56, %v1612_v17  ;;  %v1633_v55 = vsel %vm687_vm1, %v1517_v8, 0.0  ;;  %v1519_v17 = vmul.f32 %v2888_v32, %v2888_v32 }
 0x193   :  { %v1635_v59 = vsel %vm687_vm1, %v1518_v53, 0.0  ;;  %v1442_v32 = vsel %vm687_vm1, %v2914_v14, 0.0  ;;  %v1446_v14 = vsel %vm687_vm1, %v2940_v15, 0.0 }
 0x194   :  { %v1419_v0 = vadd.f32 %v1418_v40, %v1417_v60  ;;  %v1616_v4 = vadd.f32 %v1615_v26, %v1614_v63  ;;  %v1520_v60 = vmul.f32 %v2901_v2, %v2901_v2  ;;  %v1637_v40 = vsel %vm687_vm1, %v1519_v17, 0.0 }
 0x195   :  { %v1444_v2 = vsel %vm687_vm1, %v2927_v31, 0.0 }
 0x196   :  { %v1421_v11 = vadd.f32 %v1420_v49, %v1419_v0  ;;  %v1618_v13 = vadd.f32 %v1617_v6, %v1616_v4  ;;  %v1639_v6 = vsel %vm687_vm1, %v1520_v60, 0.0  ;;  %v1522_v49 = vmul.f32 %v2927_v31, %v2927_v31 }
 0x197   :  { %v1448_v31 = vsel %vm687_vm1, %v2953_v57, 0.0 }
 0x198   :  { %v1423_v20 = vadd.f32 %v1422_v58, %v1421_v11  ;;  %v1620_v21 = vadd.f32 %v1619_v16, %v1618_v13  ;;  %v1641_v13 = vsel %vm687_vm1, %v1521_v3, 0.0  ;;  %v1523_v16 = vmul.f32 %v2940_v15, %v2940_v15 }
 0x199   :  { %v1450_v15 = vsel %vm687_vm1, %v2966_v10, 0.0 }
 0x19a   :  { %v1425_v45 = vadd.f32 %v1424_v5, %v1423_v20  ;;  %v1622_v24 = vadd.f32 %v1621_v22, %v1620_v21  ;;  %v1643_v20 = vsel %vm687_vm1, %v1522_v49, 0.0  ;;  %v1524_v21 = vmul.f32 %v2953_v57, %v2953_v57 }
 0x19b   :  { %v1645_v23 = vsel %vm687_vm1, %v1523_v16, 0.0 }
 0x19c   :  { %v1624_v33 = vadd.f32 %v1623_v27, %v1622_v24  ;;  %v1427_v52 = vadd.f32 %v1426_v18, %v1425_v45  ;;  %v1525_v45 = vmul.f32 %v2966_v10, %v2966_v10  ;;  %v1647_v18 = vsel %vm687_vm1, %v1524_v21, 0.0 }
 0x19d   :  { %v1651_v10 = vsel %vm687_vm1, %v1526_v28, 0.0 }
 0x19e   :  { %v1626_v38 = vadd.f32 %v1625_v35, %v1624_v33  ;;  %v1429_v62 = vadd.f32 %v1428_v30, %v1427_v52  ;;  %v1527_v33 = vmul.f32 %v3002_v50, %v3002_v50  ;;  %v1649_v57 = vsel %vm687_vm1, %v1525_v45, 0.0 }
 0x19f   :  { %v1452_v30 = vsel %vm687_vm1, %v2985_v34, 0.0 }
 0x1a0   :  { %v1628_v43 = vadd.f32 %v1627_v61, %v1626_v38  ;;  %v1431_v44 = vadd.f32 %v1430_v42, %v1429_v62  ;;  %v1653_v61 = vsel %vm687_vm1, %v1527_v33, 0.0 }
 0x1a2   :  { %v1630_v7 = vadd.f32 %v1629_v46, %v1628_v43  ;;  %v1433_v47 = vadd.f32 %v1432_v51, %v1431_v44 }
 0x1a4   :  { %v1632_v19 = vadd.f32 %v1631_v48, %v1630_v7  ;;  %v1435_v54 = vadd.f32 %v1434_v1, %v1433_v47 }
 0x1a6   :  { %v1634_v56 = vadd.f32 %v1633_v55, %v1632_v19  ;;  %v1437_v29 = vadd.f32 %v1436_v12, %v1435_v54 }
 0x1a8   :  { %v1636_v63 = vadd.f32 %v1635_v59, %v1634_v56  ;;  %v1439_v26 = vadd.f32 %v1438_v25, %v1437_v29 }
 0x1aa   :  { %v1638_v0 = vadd.f32 %v1637_v40, %v1636_v63  ;;  %v1441_v4 = vadd.f32 %v1440_v39, %v1439_v26 }
 0x1ac   :  { %v1640_v9 = vadd.f32 %v1639_v6, %v1638_v0  ;;  %v1443_v11 = vadd.f32 %v1442_v32, %v1441_v4 }
 0x1ae   :  { %v1642_v58 = vadd.f32 %v1641_v13, %v1640_v9  ;;  %v1445_v36 = vadd.f32 %v1444_v2, %v1443_v11 }
 0x1b0   :  { %v1644_v22 = vadd.f32 %v1643_v20, %v1642_v58  ;;  %v1447_v5 = vadd.f32 %v1446_v14, %v1445_v36 }
 0x1b2   :  { %v1646_v24 = vadd.f32 %v1645_v23, %v1644_v22  ;;  %v1449_v27 = vadd.f32 %v1448_v31, %v1447_v5 }
 0x1b4   :  { %v1648_v52 = vadd.f32 %v1647_v18, %v1646_v24  ;;  %v1451_v35 = vadd.f32 %v1450_v15, %v1449_v27 }
 0x1b6   :  { %v1650_v38 = vadd.f32 %v1649_v57, %v1648_v52  ;;  %v1453_v62 = vadd.f32 %v1452_v30, %v1451_v35 }
 0x1b8   :  { %v1652_v42 = vadd.f32 %v1651_v10, %v1650_v38  ;;  %v1455_v41 = vadd.f32 %v1454_v37, %v1453_v62 }
 0x1ba   :  { %v1456_v43 = vrot.slane %v1455_v41, 4  ;;  %v1654_v44 = vadd.f32 %v1653_v61, %v1652_v42 }
 0x1bc   :  { %v1457_v46 = vadd.f32 %v1456_v43, %v1455_v41  ;;  %v1655_v51 = vrot.slane %v1654_v44, 4 }
 0x1be   :  { %v1458_v8 = vrot.slane %v1457_v46, 2  ;;  %v1656_v7 = vadd.f32 %v1655_v51, %v1654_v44 }
 0x1c0   :  { %v1459_v47 = vadd.f32 %v1458_v8, %v1457_v46  ;;  %v1657_v48 = vrot.slane %v1656_v7, 2 }
 0x1c2   :  { %v1460_v34 = vrot.slane %v1459_v47, 1  ;;  %v1658_v1 = vadd.f32 %v1657_v48, %v1656_v7 }
 0x1c4   :  { %v1461_v50 = vadd.f32 %v1460_v34, %v1459_v47  ;;  %v1659_v53 = vrot.slane %v1658_v1, 1 }
 0x1c6   :  { %1463 = vst.msk [vmem:[%s3163_s4] sm:$0x1] %vm1462_vm9, %v1461_v50  ;;  %v1660_v19 = vadd.f32 %v1659_v53, %v1658_v1 }
 0x1c8   :  { %1661 = vst.msk [vmem:[%s3164_s5] sm:$0x1] %vm1462_vm9, %v1660_v19 }

// kernel: tile.19
= control target key start
LH: loop header
LB: loop body
LE: loop exit
PB: predicated region body
PF: predicated region fallthrough
CT: control target
= control target key end

     0   :  { %s74_s10 = smov 112   ;;  %s75_s11 = smov 80   ;;  %vm4_vm0 = vcmask 130048   ;;  %vm10_vm1 = vcmask 1048448   ;;  %vm16_vm2 = vcmask 917248   ;;  %vm22_vm3 = vcmask 786048   ;;  %s121_s0 = inlined_call_operand.vmem [shape: f32[9,16], index: 0, kind: input, shape index: {}]   ;;  %s122_s1 = inlined_call_operand.vmem [shape: f32[1,144], index: 1, kind: output, shape index: {}]  }
   0x1   :  { %v59_v0 = vld [vmem:[%s121_s0 + $0x7] sm:$0x1]   ;;  %v61_v1 = vld [vmem:[%s121_s0 + $0x5] sm:$0x1]   ;;  %v60_v2 = vld [vmem:[%s121_s0 + $0x6] sm:$0x1]  }
   0x2   :  { %8 = vrot.lane.b32.xlu0 %v59_v0, %s74_s10  ;;  %20 = vrot.lane.b32.xlu1 %v61_v1, %s75_s11  ;;  %v62_v3 = vld [vmem:[%s121_s0 + $0x4] sm:$0x1]   ;;  %s2_s16 = smov 3  ;;  %s76_s19 = smov 96   ;;  %v63_v5 = vld [vmem:[%s121_s0 + $0x3] sm:$0x1]  }
   0x3   :  { %v3_v4 = vld [vmem:[%s121_s0] ss:$8 sm:%s2_s16]   ;;  %s77_s20 = smov 64   ;;  %v64_v6 = vld [vmem:[%s121_s0 + $0x2] sm:$0x1]   ;;  %s78_s25 = smov 48  }
   0x4   :  { %5 = vst.msk [vmem:[#allocation0] ss:$8 sm:$0x3] %vm4_vm0, %v3_v4   ;;  %s79_s26 = smov 32   ;;  %v65_v7 = vld [vmem:[%s121_s0 + $0x1] sm:$0x1]  }
   0x5   :  { %s80_s0 = smov 16   ;;  %vm28_vm4 = vcmask 654848   ;;  %vm34_vm5 = vcmask 523648   ;;  %vm40_vm6 = vcmask 392448   ;;  %vm46_vm7 = vcmask 261248  }
   0x6   :  { %14 = vrot.lane.b32.xlu0 %v60_v2, %s76_s19  ;;  %26 = vrot.lane.b32.xlu1 %v62_v3, %s77_s20 }
   0xa   :  { %32 = vrot.lane.b32.xlu0 %v63_v5, %s78_s25  ;;  %38 = vrot.lane.b32.xlu1 %v64_v6, %s79_s26 }
   0xb   :  { %v55_v8 = vld [vmem:[#allocation0 + $0x8] sm:$0x1] }
   0xc   :  { %66 = vst [vmem:[%s122_s1 + $0x1] sm:$0x1] %v55_v8 }
   0xe   :  { %44 = vrot.lane.b32.xlu0 %v65_v7, %s80_s0 }
  0x74   :  { %v9_v9 = vpop.permute.xlu0 %8   ;;  %v21_v10 = vpop.permute.xlu1 %20  }
  0x75   :  { %11 = vst.msk [vmem:[#allocation0] sm:$0x1] %vm10_vm1, %v9_v9  }
  0x78   :  { %v15_v11 = vpop.permute.xlu0 %14   ;;  %v27_v12 = vpop.permute.xlu1 %26  }
  0x79   :  { %17 = vst.msk [vmem:[#allocation0] sm:$0x1] %vm16_vm2, %v15_v11  }
  0x7a   :  { %23 = vst.msk [vmem:[#allocation0] sm:$0x1] %vm22_vm3, %v21_v10  }
  0x7b   :  { %29 = vst.msk [vmem:[#allocation0] sm:$0x1] %vm28_vm4, %v27_v12  }
  0x7c   :  { %v33_v13 = vpop.permute.xlu0 %32   ;;  %v39_v14 = vpop.permute.xlu1 %38  }
  0x7d   :  { %35 = vst.msk [vmem:[#allocation0] sm:$0x1] %vm34_vm5, %v33_v13  }
  0x7e   :  { %41 = vst.msk [vmem:[#allocation0] sm:$0x1] %vm40_vm6, %v39_v14  }
  0x80   :  { %v45_v15 = vpop.permute.xlu0 %44  }
  0x81   :  { %47 = vst.msk [vmem:[#allocation0] sm:$0x1] %vm46_vm7, %v45_v15  }
  0x88   :  { %v51_v16 = vld [vmem:[#allocation0] sm:$0x1] }
  0x89   :  { %53 = vst [vmem:[%s122_s1] sm:$0x1] %v51_v16 }

// kernel: masknet2_forward.10
= control target key start
LH: loop header
LB: loop body
LE: loop exit
PB: predicated region body
PF: predicated region fallthrough
CT: control target
= control target key end

     0   :  { %v48_v0 = vlaneseq  ;;  %v481_v1 = vmov 0.0|0.0   ;;  %vm204_vm0 = vcmask 130048   ;;  %s805_s2 = inlined_call_operand.vmem [shape: f32[144,32], index: 2, kind: input, shape index: {}]   ;;  %s806_s0 = inlined_call_operand.vmem [shape: f32[1,144], index: 0, kind: input, shape index: {}]   ;;  %s807_s1 = inlined_call_operand.vmem [shape: f32[128,144], index: 1, kind: input, shape index: {}]   ;;  %s808_s3 = inlined_call_operand.vmem [shape: f32[128,32], index: 3, kind: output, shape index: {}]  }
   0x1   :  { %435 = vmatprep.subr.bf16.mxu0 %v481_v1  ;;  %462 = vmatprep.subr.bf16.mxu1 %v481_v1  ;;  %v186_v2 = vld [vmem:[%s805_s2] sm:$0xff]  ;;  %v187_v3 = vld [vmem:[%s805_s2 + $0x8] sm:$0xff]  ;;  %v188_v4 = vld [vmem:[%s805_s2 + $0x10] sm:$0xff] }
   0x2   :  { %v436_v5 = vpack.c.bf16 %v187_v3, %v186_v2  ;;  %v189_v6 = vld [vmem:[%s805_s2 + $0x18] sm:$0xff]  ;;  %v49_v7 = vshrl.u32 %v48_v0, 7  ;;  %v190_v10 = vld [vmem:[%s805_s2 + $0x20] sm:$0xff]  ;;  %v191_v11 = vld [vmem:[%s805_s2 + $0x28] sm:$0xff] }
   0x3   :  { %v439_v8 = vpack.c.bf16 %v189_v6, %v188_v4  ;;  %v15_v12 = vld [vmem:[%s807_s1 + $0x8] sm:$0xff]  ;;  %v46_v13 = vld [vmem:[%s806_s0] sm:$0x3]  ;;  %v442_v15 = vpack.c.bf16 %v191_v11, %v190_v10  ;;  %v192_v16 = vld [vmem:[%s805_s2 + $0x30] sm:$0xff] }
   0x4   :  { %437 = vmatpush1.bf16.msra.mxu0 %v436_v5  ;;  %471 = vmatpush1.bf16.msra.mxu1 %v436_v5  ;;  %v54_v9 = vsub.s32 1, %v49_v7  ;;  %v31_v14 = vld [vmem:[%s807_s1 + $0x88] sm:$0xff]  ;;  %v193_v17 = vld [vmem:[%s805_s2 + $0x38] sm:$0xff]  ;;  %v194_v24 = vld [vmem:[%s805_s2 + $0x40] sm:$0xff]  ;;  %v50_v31 = vsub.s32 0, %v49_v7 }
   0x5   :  { %438 = vmatprep.subr.bf16.mxu0 %v481_v1  ;;  %463 = vmatprep.subr.bf16.mxu1 %v481_v1  ;;  %v445_v21 = vpack.c.bf16 %v193_v17, %v192_v16  ;;  %v195_v25 = vld [vmem:[%s805_s2 + $0x48] sm:$0xff]  ;;  %v196_v29 = vld [vmem:[%s805_s2 + $0x50] sm:$0xff]  ;;  %v197_v30 = vld [vmem:[%s805_s2 + $0x58] sm:$0xff] }
   0x6   :  { %v539_v18 = vrot.slane %v46_v13, %v54_v9  ;;  %v448_v28 = vpack.c.bf16 %v195_v25, %v194_v24  ;;  %v451_v32 = vpack.c.bf16 %v197_v30, %v196_v29  ;;  %v198_v33 = vld [vmem:[%s805_s2 + $0x60] sm:$0xff]  ;;  %v199_v34 = vld [vmem:[%s805_s2 + $0x68] sm:$0xff]  ;;  %v571_v35 = vrot.slane %v46_v13, %v50_v31  ;;  %v200_v37 = vld [vmem:[%s805_s2 + $0x70] sm:$0xff] }
   0x7   :  { %v454_v36 = vpack.c.bf16 %v199_v34, %v198_v33  ;;  %v14_v38 = vld [vmem:[%s807_s1] sm:$0xff]  ;;  %v201_v40 = vld [vmem:[%s805_s2 + $0x78] sm:$0xff]  ;;  %v16_v43 = vld [vmem:[%s807_s1 + $0x10] sm:$0xff] }
   0x8   :  { %440 = vmatpush1.bf16.msra.mxu0 %v439_v8  ;;  %472 = vmatpush1.bf16.msra.mxu1 %v439_v8  ;;  %v59_v19 = vmul.f32 %v539_v18, %v15_v12  ;;  %v75_v20 = vmul.f32 %v539_v18, %v31_v14  ;;  %v30_v39 = vld [vmem:[%s807_s1 + $0x80] sm:$0xff]  ;;  %v17_v41 = vld [vmem:[%s807_s1 + $0x18] sm:$0xff]  ;;  %v32_v44 = vld [vmem:[%s807_s1 + $0x90] sm:$0xff]  ;;  %v58_v47 = vmul.f32 %v571_v35, %v14_v38 }
   0x9   :  { %441 = vmatprep.subr.bf16.mxu0 %v481_v1  ;;  %464 = vmatprep.subr.bf16.mxu1 %v481_v1  ;;  %v33_v42 = vld [vmem:[%s807_s1 + $0x98] sm:$0xff]  ;;  %v202_v45 = vld [vmem:[%s805_s2 + $0x80] sm:$0xff]  ;;  %v203_v46 = vld [vmem:[%s805_s2 + $0x88] sm:$0xff]  ;;  %v74_v48 = vmul.f32 %v571_v35, %v30_v39  ;;  %v457_v49 = vpack.c.bf16 %v201_v40, %v200_v37  ;;  %v61_v50 = vmul.f32 %v539_v18, %v17_v41 }
   0xa   :  { %vm91_vm1 = vcmp.ge.f32.partialorder %v59_v19, 0.0  ;;  %v123_v22 = vmul.f32 0.2, %v59_v19  ;;  %vm107_vm2 = vcmp.ge.f32.partialorder %v75_v20, 0.0  ;;  %v139_v23 = vmul.f32 0.2, %v75_v20 }
   0xb   :  { %v77_v51 = vmul.f32 %v539_v18, %v33_v42  ;;  %v60_v52 = vmul.f32 %v571_v35, %v16_v43  ;;  %v76_v53 = vmul.f32 %v571_v35, %v32_v44  ;;  %v19_v54 = vld [vmem:[%s807_s1 + $0x28] sm:$0xff]  ;;  %v460_v55 = vpack.c.bf16 %v203_v46, %v202_v45  ;;  %v18_v57 = vld [vmem:[%s807_s1 + $0x20] sm:$0xff]  ;;  %v21_v0 = vld [vmem:[%s807_s1 + $0x38] sm:$0xff] }
   0xc   :  { %443 = vmatpush1.bf16.msra.mxu0 %v442_v15  ;;  %473 = vmatpush1.bf16.msra.mxu1 %v442_v15  ;;  %v155_v26 = vsel %vm91_vm1, %v59_v19, %v123_v22  ;;  %v171_v27 = vsel %vm107_vm2, %v75_v20, %v139_v23  ;;  %v35_v56 = vld [vmem:[%s807_s1 + $0xa8] sm:$0xff]  ;;  %v34_v58 = vld [vmem:[%s807_s1 + $0xa0] sm:$0xff]  ;;  %vm90_vm3 = vcmp.ge.f32.partialorder %v58_v47, 0.0  ;;  %v122_v59 = vmul.f32 0.2, %v58_v47  ;;  %v37_v5 = vld [vmem:[%s807_s1 + $0xb8] sm:$0xff] }
   0xd   :  { %444 = vmatprep.subr.bf16.mxu0 %v481_v1  ;;  %465 = vmatprep.subr.bf16.mxu1 %v481_v1  ;;  %vm106_vm4 = vcmp.ge.f32.partialorder %v74_v48, 0.0  ;;  %v138_v60 = vmul.f32 0.2, %v74_v48  ;;  %vm93_vm5 = vcmp.ge.f32.partialorder %v61_v50, 0.0  ;;  %v125_v61 = vmul.f32 0.2, %v61_v50 }
   0xe   :  { %419 = vmatprep.mubr.msk.f32.mxu0 %vm204_vm0, %v155_v26  ;;  %427 = vmatprep.mubr.msk.f32.mxu1 %vm204_vm0, %v171_v27  ;;  %v141_v62 = vmul.f32 0.2, %v77_v51  ;;  %v63_v63 = vmul.f32 %v539_v18, %v19_v54  ;;  %vm109_vm6 = vcmp.ge.f32.partialorder %v77_v51, 0.0  ;;  %v124_v2 = vmul.f32 0.2, %v60_v52  ;;  %v20_v14 = vld [vmem:[%s807_s1 + $0x30] sm:$0xff] }
   0xf   :  { %v140_v3 = vmul.f32 0.2, %v76_v53  ;;  %v79_v4 = vmul.f32 %v539_v18, %v35_v56  ;;  %vm92_vm7 = vcmp.ge.f32.partialorder %v60_v52, 0.0  ;;  %vm108_vm8 = vcmp.ge.f32.partialorder %v76_v53, 0.0  ;;  %v36_v15 = vld [vmem:[%s807_s1 + $0xb0] sm:$0xff]  ;;  %v23_v20 = vld [vmem:[%s807_s1 + $0x48] sm:$0xff] }
  0x10   :  { %446 = vmatpush1.bf16.msra.mxu0 %v445_v21  ;;  %474 = vmatpush1.bf16.msra.mxu1 %v445_v21  ;;  %v62_v6 = vmul.f32 %v571_v35, %v18_v57  ;;  %v78_v7 = vmul.f32 %v571_v35, %v34_v58  ;;  %v154_v8 = vsel %vm90_vm3, %v58_v47, %v122_v59  ;;  %v127_v12 = vmul.f32 0.2, %v63_v63  ;;  %v39_v21 = vld [vmem:[%s807_s1 + $0xc8] sm:$0xff]  ;;  %v22_v22 = vld [vmem:[%s807_s1 + $0x40] sm:$0xff]  ;;  %v25_v29 = vld [vmem:[%s807_s1 + $0x58] sm:$0xff] }
  0x11   :  { %447 = vmatprep.subr.bf16.mxu0 %v481_v1  ;;  %466 = vmatprep.subr.bf16.mxu1 %v481_v1  ;;  %v170_v9 = vsel %vm106_vm4, %v74_v48, %v138_v60  ;;  %v157_v10 = vsel %vm93_vm5, %v61_v50, %v125_v61  ;;  %v173_v11 = vsel %vm109_vm6, %v77_v51, %v141_v62  ;;  %vm95_vm9 = vcmp.ge.f32.partialorder %v63_v63, 0.0  ;;  %v41_v41 = vld [vmem:[%s807_s1 + $0xd8] sm:$0xff]  ;;  %v24_v44 = vld [vmem:[%s807_s1 + $0x50] sm:$0xff]  ;;  %v26_v61 = vld [vmem:[%s807_s1 + $0x60] sm:$0xff] }
  0x12   :  { %v81_v13 = vmul.f32 %v539_v18, %v37_v5  ;;  %v156_v16 = vsel %vm92_vm7, %v60_v52, %v124_v2  ;;  %v172_v17 = vsel %vm108_vm8, %v76_v53, %v140_v3  ;;  %v143_v19 = vmul.f32 0.2, %v79_v4  ;;  %v40_v45 = vld [vmem:[%s807_s1 + $0xd0] sm:$0xff]  ;;  %v43_v53 = vld [vmem:[%s807_s1 + $0xe8] sm:$0xff]  ;;  %v42_v3 = vld [vmem:[%s807_s1 + $0xe0] sm:$0xff] }
  0x13   :  { %vm111_vm10 = vcmp.ge.f32.partialorder %v79_v4, 0.0  ;;  %vm94_vm11 = vcmp.ge.f32.partialorder %v62_v6, 0.0  ;;  %v126_v23 = vmul.f32 0.2, %v62_v6  ;;  %v142_v24 = vmul.f32 0.2, %v78_v7 }
  0x14   :  { %449 = vmatpush1.bf16.msra.mxu0 %v448_v28  ;;  %475 = vmatpush1.bf16.msra.mxu1 %v448_v28  ;;  %vm110_vm12 = vcmp.ge.f32.partialorder %v78_v7, 0.0  ;;  %v64_v26 = vmul.f32 %v571_v35, %v20_v14  ;;  %v80_v27 = vmul.f32 %v571_v35, %v36_v15  ;;  %v38_v28 = vld [vmem:[%s807_s1 + $0xc0] sm:$0xff]  ;;  %v159_v30 = vsel %vm95_vm9, %v63_v63, %v127_v12 }
  0x15   :  { %450 = vmatprep.subr.bf16.mxu0 %v481_v1  ;;  %467 = vmatprep.subr.bf16.mxu1 %v481_v1  ;;  %v145_v31 = vmul.f32 0.2, %v81_v13  ;;  %v175_v33 = vsel %vm111_vm10, %v79_v4, %v143_v19  ;;  %vm113_vm14 = vcmp.ge.f32.partialorder %v81_v13, 0.0  ;;  %v83_v34 = vmul.f32 %v539_v18, %v39_v21  ;;  %v44_v19 = vld [vmem:[%s807_s1 + $0xf0] sm:$0xff] }
  0x16   :  { %v158_v37 = vsel %vm94_vm11, %v62_v6, %v126_v23  ;;  %v174_v38 = vsel %vm110_vm12, %v78_v7, %v142_v24  ;;  %v82_v39 = vmul.f32 %v571_v35, %v38_v28  ;;  %v69_v40 = vmul.f32 %v539_v18, %v25_v29  ;;  %v29_v7 = vld [vmem:[%s807_s1 + $0x78] sm:$0xff] }
  0x17   :  { %vm96_vm15 = vcmp.ge.f32.partialorder %v64_v26, 0.0  ;;  %v128_v43 = vmul.f32 0.2, %v64_v26  ;;  %vm112_vm1 = vcmp.ge.f32.partialorder %v80_v27, 0.0  ;;  %v177_v46 = vsel %vm113_vm14, %v81_v13, %v145_v31 }
  0x18   :  { %452 = vmatpush1.bf16.msra.mxu0 %v451_v32  ;;  %476 = vmatpush1.bf16.msra.mxu1 %v451_v32  ;;  %v67_v32 = vmul.f32 %v539_v18, %v23_v20  ;;  %v144_v47 = vmul.f32 0.2, %v80_v27  ;;  %vm115_vm3 = vcmp.ge.f32.partialorder %v83_v34, 0.0  ;;  %v147_v50 = vmul.f32 0.2, %v83_v34 }
  0x19   :  { %453 = vmatprep.subr.bf16.mxu0 %v481_v1  ;;  %468 = vmatprep.subr.bf16.mxu1 %v481_v1  ;;  %v85_v52 = vmul.f32 %v539_v18, %v41_v41  ;;  %vm114_vm5 = vcmp.ge.f32.partialorder %v82_v39, 0.0  ;;  %v146_v54 = vmul.f32 0.2, %v82_v39  ;;  %vm101_vm6 = vcmp.ge.f32.partialorder %v69_v40, 0.0 }
  0x1a   :  { %vm99_vm2 = vcmp.ge.f32.partialorder %v67_v32, 0.0  ;;  %v131_v48 = vmul.f32 0.2, %v67_v32  ;;  %v68_v56 = vmul.f32 %v571_v35, %v24_v44  ;;  %v84_v57 = vmul.f32 %v571_v35, %v40_v45 }
  0x1b   :  { %v160_v59 = vsel %vm96_vm15, %v64_v26, %v128_v43  ;;  %v176_v60 = vsel %vm112_vm1, %v80_v27, %v144_v47  ;;  %v179_v63 = vsel %vm115_vm3, %v83_v34, %v147_v50  ;;  %v87_v2 = vmul.f32 %v539_v18, %v43_v53 }
  0x1c   :  { %455 = vmatpush1.bf16.msra.mxu0 %v454_v36  ;;  %477 = vmatpush1.bf16.msra.mxu1 %v454_v36  ;;  %v66_v36 = vmul.f32 %v571_v35, %v22_v22  ;;  %v163_v62 = vsel %vm99_vm2, %v67_v32, %v131_v48  ;;  %v178_v5 = vsel %vm114_vm5, %v82_v39, %v146_v54  ;;  %vm117_vm7 = vcmp.ge.f32.partialorder %v85_v52, 0.0 }
  0x1d   :  { %456 = vmatprep.subr.bf16.mxu0 %v481_v1  ;;  %469 = vmatprep.subr.bf16.mxu1 %v481_v1  ;;  %vm100_vm8 = vcmp.ge.f32.partialorder %v68_v56, 0.0  ;;  %vm116_vm9 = vcmp.ge.f32.partialorder %v84_v57, 0.0  ;;  %v86_v12 = vmul.f32 %v571_v35, %v42_v3  ;;  %v151_v14 = vmul.f32 0.2, %v87_v2 }
  0x1e   :  { %v130_v51 = vmul.f32 0.2, %v66_v36  ;;  %vm98_vm4 = vcmp.ge.f32.partialorder %v66_v36, 0.0  ;;  %v73_v15 = vmul.f32 %v539_v18, %v29_v7  ;;  %vm119_vm11 = vcmp.ge.f32.partialorder %v87_v2, 0.0 }
  0x1f   :  { %v150_v23 = vmul.f32 0.2, %v86_v12  ;;  %v183_v26 = vsel %vm119_vm11, %v87_v2, %v151_v14  ;;  %vm398_vm3 = vcmask 261120  }
  0x20   :  { %458 = vmatpush1.bf16.msra.mxu0 %v457_v49  ;;  %478 = vmatpush1.bf16.msra.mxu1 %v457_v49  ;;  %v27_v49 = vld [vmem:[%s807_s1 + $0x68] sm:$0xff]  ;;  %v162_v4 = vsel %vm98_vm4, %v66_v36, %v130_v51  ;;  %v137_v27 = vmul.f32 0.2, %v73_v15  ;;  %vm105_vm14 = vcmp.ge.f32.partialorder %v73_v15, 0.0 }
  0x21   :  { %459 = vmatprep.subr.bf16.mxu0 %v481_v1  ;;  %470 = vmatprep.subr.bf16.mxu1 %v481_v1  ;;  %v65_v1 = vmul.f32 %v539_v18, %v21_v0  ;;  %v71_v58 = vmul.f32 %v539_v18, %v27_v49  ;;  %v149_v0 = vmul.f32 0.2, %v85_v52 }
  0x23   :  { %v129_v25 = vmul.f32 0.2, %v65_v1  ;;  %vm97_vm13 = vcmp.ge.f32.partialorder %v65_v1, 0.0  ;;  %vm103_vm10 = vcmp.ge.f32.partialorder %v71_v58, 0.0  ;;  %v181_v13 = vsel %vm117_vm7, %v85_v52, %v149_v0 }
  0x24   :  { %461 = vmatpush1.bf16.msra.mxu0 %v460_v55  ;;  %479 = vmatpush1.bf16.msra.mxu1 %v460_v55  ;;  %v133_v55 = vmul.f32 0.2, %v69_v40 }
  0x25   :  { %v161_v42 = vsel %vm97_vm13, %v65_v1, %v129_v25  ;;  %v148_v1 = vmul.f32 0.2, %v84_v57  ;;  %v88_v25 = vmul.f32 %v571_v35, %v44_v19  ;;  %vm118_vm13 = vcmp.ge.f32.partialorder %v86_v12, 0.0 }
  0x26   :  { %v165_v6 = vsel %vm101_vm6, %v69_v40, %v133_v55 }
  0x27   :  { %318 = vmatmul.mubr.f32.vlgmr.msra.gmra.mrb[0].mxu0 %v154_v8  ;;  %358 = vmatmul.mubr.f32.vlgmr.msra.gmra.mrb[0].mxu1 %v170_v9  ;;  %v45_v8 = vld [vmem:[%s807_s1 + $0xf8] sm:$0xff]  ;;  %v132_v9 = vmul.f32 0.2, %v68_v56  ;;  %v180_v21 = vsel %vm116_vm9, %v84_v57, %v148_v1  ;;  %v152_v32 = vmul.f32 0.2, %v88_v25  ;;  %vm120_vm2 = vcmp.ge.f32.partialorder %v88_v25, 0.0 }
  0x28   :  { %420 = vmatprep.mubr.msk.f32.mxu0 %vm204_vm0, %v157_v10  ;;  %428 = vmatprep.mubr.msk.f32.mxu1 %vm204_vm0, %v173_v11  ;;  %v135_v10 = vmul.f32 0.2, %v71_v58  ;;  %v70_v11 = vmul.f32 %v571_v35, %v26_v61 }
  0x29   :  { %v164_v20 = vsel %vm100_vm8, %v68_v56, %v132_v9  ;;  %v184_v36 = vsel %vm120_vm2, %v88_v25, %v152_v32 }
  0x2a   :  { %v167_v22 = vsel %vm103_vm10, %v71_v58, %v135_v10  ;;  %vm102_vm12 = vcmp.ge.f32.partialorder %v70_v11, 0.0 }
  0x2b   :  { %323 = vmatmul.mubr.f32.gmra.mrb[2].mxu0 %v156_v16  ;;  %363 = vmatmul.mubr.f32.gmra.mrb[2].mxu1 %v172_v17  ;;  %v89_v16 = vmul.f32 %v539_v18, %v45_v8  ;;  %v28_v17 = vld [vmem:[%s807_s1 + $0x70] sm:$0xff]  ;;  %v134_v18 = vmul.f32 0.2, %v70_v11 }
  0x2c   :  { %421 = vmatprep.mubr.msk.f32.mxu0 %vm204_vm0, %v159_v30  ;;  %429 = vmatprep.mubr.msk.f32.mxu1 %vm204_vm0, %v175_v33  ;;  %v72_v24 = vmul.f32 %v571_v35, %v28_v17  ;;  %v182_v30 = vsel %vm118_vm13, %v86_v12, %v150_v23  ;;  %v169_v33 = vsel %vm105_vm14, %v73_v15, %v137_v27 }
  0x2d   :  { %v153_v28 = vmul.f32 0.2, %v89_v16  ;;  %vm121_vm15 = vcmp.ge.f32.partialorder %v89_v16, 0.0  ;;  %v166_v29 = vsel %vm102_vm12, %v70_v11, %v134_v18 }
  0x2e   :  { %v136_v31 = vmul.f32 0.2, %v72_v24  ;;  %vm104_vm1 = vcmp.ge.f32.partialorder %v72_v24, 0.0 }
  0x2f   :  { %328 = vmatmul.mubr.f32.gmra.mrb[4].mxu0 %v158_v37  ;;  %368 = vmatmul.mubr.f32.gmra.mrb[4].mxu1 %v174_v38  ;;  %v185_v34 = vsel %vm121_vm15, %v89_v16, %v153_v28 }
  0x30   :  { %422 = vmatprep.mubr.msk.f32.mxu0 %vm204_vm0, %v161_v42  ;;  %430 = vmatprep.mubr.msk.f32.mxu1 %vm204_vm0, %v177_v46  ;;  %v168_v35 = vsel %vm104_vm1, %v72_v24, %v136_v31 }
  0x33   :  { %333 = vmatmul.mubr.f32.gmra.mrb[6].mxu0 %v160_v59  ;;  %373 = vmatmul.mubr.f32.gmra.mrb[6].mxu1 %v176_v60 }
  0x34   :  { %423 = vmatprep.mubr.msk.f32.mxu0 %vm204_vm0, %v163_v62  ;;  %431 = vmatprep.mubr.msk.f32.mxu1 %vm204_vm0, %v179_v63 }
  0x37   :  { %338 = vmatmul.mubr.f32.gmra.mrb[8].mxu0 %v162_v4  ;;  %378 = vmatmul.mubr.f32.gmra.mrb[8].mxu1 %v178_v5 }
  0x38   :  { %424 = vmatprep.mubr.msk.f32.mxu0 %vm204_vm0, %v165_v6  ;;  %432 = vmatprep.mubr.msk.f32.mxu1 %vm204_vm0, %v181_v13 }
  0x3b   :  { %343 = vmatmul.mubr.f32.gmra.mrb[10].mxu0 %v164_v20  ;;  %383 = vmatmul.mubr.f32.gmra.mrb[10].mxu1 %v180_v21 }
  0x3c   :  { %425 = vmatprep.mubr.msk.f32.mxu0 %vm204_vm0, %v167_v22  ;;  %433 = vmatprep.mubr.msk.f32.mxu1 %vm204_vm0, %v183_v26 }
  0x3f   :  { %348 = vmatmul.mubr.f32.gmra.mrb[12].mxu0 %v166_v29  ;;  %388 = vmatmul.mubr.f32.gmra.mrb[12].mxu1 %v182_v30 }
  0x40   :  { %426 = vmatprep.mubr.msk.f32.mxu0 %vm204_vm0, %v169_v33  ;;  %434 = vmatprep.mubr.msk.f32.mxu1 %vm204_vm0, %v185_v34 }
  0x43   :  { %353 = vmatmul.mubr.f32.gmra.mrb[14].mxu0 %v168_v35  ;;  %393 = vmatmul.mubr.f32.gmra.mrb[14].mxu1 %v184_v36 }
  0xfa   :  { %v319_v37 = vpop.f32.mrb[0].mxu0  ;;  %v359_v38 = vpop.f32.mrb[0].mxu1 }
  0xfb   :  { %399 = vst.msk [vmem:[%s808_s3] sm:$0xff] %vm398_vm3, %v319_v37  ;;  %407 = vst.msk [vmem:[%s808_s3 + $0x40] sm:$0xff] %vm398_vm3, %v359_v38  ;;  %v321_v39 = vpop.f32.mrb[1].mxu0  ;;  %v361_v40 = vpop.f32.mrb[1].mxu1 }
  0xfe   :  { %v324_v41 = vpop.f32.mrb[2].mxu0  ;;  %v364_v42 = vpop.f32.mrb[2].mxu1 }
  0xff   :  { %400 = vst.msk [vmem:[%s808_s3 + $0x8] sm:$0xff] %vm398_vm3, %v324_v41  ;;  %408 = vst.msk [vmem:[%s808_s3 + $0x48] sm:$0xff] %vm398_vm3, %v364_v42  ;;  %v326_v43 = vpop.f32.mrb[3].mxu0  ;;  %v366_v44 = vpop.f32.mrb[3].mxu1 }
 0x102   :  { %v329_v45 = vpop.f32.mrb[4].mxu0  ;;  %v369_v46 = vpop.f32.mrb[4].mxu1 }
 0x103   :  { %401 = vst.msk [vmem:[%s808_s3 + $0x10] sm:$0xff] %vm398_vm3, %v329_v45  ;;  %409 = vst.msk [vmem:[%s808_s3 + $0x50] sm:$0xff] %vm398_vm3, %v369_v46  ;;  %v331_v47 = vpop.f32.mrb[5].mxu0  ;;  %v371_v48 = vpop.f32.mrb[5].mxu1 }
 0x106   :  { %v334_v49 = vpop.f32.mrb[6].mxu0  ;;  %v374_v50 = vpop.f32.mrb[6].mxu1 }
 0x107   :  { %402 = vst.msk [vmem:[%s808_s3 + $0x18] sm:$0xff] %vm398_vm3, %v334_v49  ;;  %410 = vst.msk [vmem:[%s808_s3 + $0x58] sm:$0xff] %vm398_vm3, %v374_v50  ;;  %v336_v51 = vpop.f32.mrb[7].mxu0  ;;  %v376_v52 = vpop.f32.mrb[7].mxu1 }
 0x10a   :  { %v339_v53 = vpop.f32.mrb[8].mxu0  ;;  %v379_v54 = vpop.f32.mrb[8].mxu1 }
 0x10b   :  { %403 = vst.msk [vmem:[%s808_s3 + $0x20] sm:$0xff] %vm398_vm3, %v339_v53  ;;  %411 = vst.msk [vmem:[%s808_s3 + $0x60] sm:$0xff] %vm398_vm3, %v379_v54  ;;  %v341_v55 = vpop.f32.mrb[9].mxu0  ;;  %v381_v56 = vpop.f32.mrb[9].mxu1 }
 0x10e   :  { %v344_v57 = vpop.f32.mrb[10].mxu0  ;;  %v384_v58 = vpop.f32.mrb[10].mxu1 }
 0x10f   :  { %404 = vst.msk [vmem:[%s808_s3 + $0x28] sm:$0xff] %vm398_vm3, %v344_v57  ;;  %412 = vst.msk [vmem:[%s808_s3 + $0x68] sm:$0xff] %vm398_vm3, %v384_v58  ;;  %v346_v59 = vpop.f32.mrb[11].mxu0  ;;  %v386_v60 = vpop.f32.mrb[11].mxu1 }
 0x112   :  { %v349_v61 = vpop.f32.mrb[12].mxu0  ;;  %v389_v62 = vpop.f32.mrb[12].mxu1 }
 0x113   :  { %405 = vst.msk [vmem:[%s808_s3 + $0x30] sm:$0xff] %vm398_vm3, %v349_v61  ;;  %413 = vst.msk [vmem:[%s808_s3 + $0x70] sm:$0xff] %vm398_vm3, %v389_v62  ;;  %v351_v63 = vpop.f32.mrb[13].mxu0  ;;  %v391_v0 = vpop.f32.mrb[13].mxu1 }
 0x116   :  { %v354_v2 = vpop.f32.mrb[14].mxu0  ;;  %v394_v3 = vpop.f32.mrb[14].mxu1 }
 0x117   :  { %406 = vst.msk [vmem:[%s808_s3 + $0x38] sm:$0xff] %vm398_vm3, %v354_v2  ;;  %414 = vst.msk [vmem:[%s808_s3 + $0x78] sm:$0xff] %vm398_vm3, %v394_v3  ;;  %v356_v4 = vpop.f32.mrb[15].mxu0  ;;  %v396_v5 = vpop.f32.mrb[15].mxu1 }

// kernel: tile.23
= control target key start
LH: loop header
LB: loop body
LE: loop exit
PB: predicated region body
PF: predicated region fallthrough
CT: control target
= control target key end

     0   :  { %s22_s0 = inlined_call_operand.vmem [shape: f32[32], index: 0, kind: input, shape index: {}]   ;;  %s23_s1 = inlined_call_operand.vmem [shape: f32[8,32], index: 1, kind: output, shape index: {}]  }
   0x1   :  { %v4_v0 = vld [vmem:[%s22_s0] ss:$0 sm:$0xff] }
   0x2   :  { %5 = vst [vmem:[%s23_s1] sm:$0xff] %v4_v0 }

// kernel: tile.24
= control target key start
LH: loop header
LB: loop body
LE: loop exit
PB: predicated region body
PF: predicated region fallthrough
CT: control target
= control target key end

     0   :  { %s7_s6 = smov 3  ;;  %s14_s9 = smov 3  ;;  %vm4_vm0 = vcmask 261120   ;;  %vm11_vm1 = vcmask 1048320   ;;  %vm18_vm2 = vcmask 785920   ;;  %vm25_vm3 = vcmask 523520   ;;  %s76_s0 = inlined_call_operand.vmem [shape: f32[8,32], index: 0, kind: input, shape index: {}]   ;;  %s77_s1 = inlined_call_operand.vmem [shape: f32[1,256], index: 1, kind: output, shape index: {}]  }
   0x1   :  { %v38_v0 = vld [vmem:[%s76_s0 + $0x3] ss:$4 sm:%s7_s6]   ;;  %s45_s10 = smov 96   ;;  %s21_s11 = smov 3  ;;  %v39_v1 = vld [vmem:[%s76_s0 + $0x2] ss:$4 sm:%s14_s9]  }
   0x2   :  { %9 = vrot.lane.b32.xlu0 %v38_v0, %s45_s10  ;;  %v40_v2 = vld [vmem:[%s76_s0 + $0x1] ss:$4 sm:%s21_s11]   ;;  %s2_s16 = smov 3  ;;  %s46_s17 = smov 32  }
   0x3   :  { %23 = vrot.lane.b32.xlu1 %v40_v2, %s46_s17  ;;  %v3_v3 = vld [vmem:[%s76_s0] ss:$4 sm:%s2_s16]   ;;  %s47_s0 = smov 64  }
   0x4   :  { %5 = vst.msk [vmem:[#allocation0] ss:$8 sm:$0x3] %vm4_vm0, %v3_v3  }
   0x6   :  { %16 = vrot.lane.b32.xlu0 %v39_v1, %s47_s0 }
  0x74   :  { %v10_v4 = vpop.permute.xlu0 %9  }
  0x75   :  { %12 = vst.msk [vmem:[#allocation0] ss:$8 sm:$0x3] %vm11_vm1, %v10_v4   ;;  %v24_v5 = vpop.permute.xlu1 %23  }
  0x78   :  { %v17_v6 = vpop.permute.xlu0 %16  }
  0x79   :  { %19 = vst.msk [vmem:[#allocation0] ss:$8 sm:$0x3] %vm18_vm2, %v17_v6  }
  0x7a   :  { %26 = vst.msk [vmem:[#allocation0] ss:$8 sm:$0x3] %vm25_vm3, %v24_v5  }
  0x81   :  { %v30_v7 = vld [vmem:[#allocation0] sm:$0x1]  ;;  %v34_v8 = vld [vmem:[#allocation0 + $0x8] sm:$0x1] }
  0x82   :  { %32 = vst [vmem:[%s77_s1] sm:$0x1] %v30_v7  ;;  %41 = vst [vmem:[%s77_s1 + $0x1] sm:$0x1] %v34_v8 }

// kernel: masknet2_forward.11
= control target key start
LH: loop header
LB: loop body
LE: loop exit
PB: predicated region body
PF: predicated region fallthrough
CT: control target
= control target key end

     0   :  { %v31_v7 = vlaneseq  ;;  %vm130_vm1 = vcmask 261120   ;;  %vm330_vm13 = vcmask 253952   ;;  %s694_s2 = inlined_call_operand.vmem [shape: f32[288,32], index: 2, kind: input, shape index: {}]   ;;  %s695_s0 = inlined_call_operand.vmem [shape: f32[1,288], index: 0, kind: input, shape index: {}]   ;;  %s696_s1 = inlined_call_operand.vmem [shape: f32[32,288], index: 1, kind: input, shape index: {}]   ;;  %s697_s3 = inlined_call_operand.vmem [shape: f32[32,32], index: 3, kind: output, shape index: {0}]   ;;  %s698_s4 = inlined_call_operand.vmem [shape: f32[1,32], index: 4, kind: output, shape index: {1}]   ;;  %s699_s5 = inlined_call_operand.vmem [shape: f32[1,32], index: 5, kind: output, shape index: {2}]  }
   0x1   :  { %v110_v0 = vld [vmem:[%s694_s2 + $0x80] sm:$0xff]  ;;  %v111_v1 = vld [vmem:[%s694_s2 + $0x88] sm:$0xff]  ;;  %v112_v5 = vld [vmem:[%s694_s2 + $0x90] sm:$0xff] }
   0x2   :  { %v94_v2 = vld [vmem:[%s694_s2] sm:$0xff]  ;;  %v432_v3 = vpack.c.bf16 %v111_v1, %v110_v0  ;;  %v95_v4 = vld [vmem:[%s694_s2 + $0x8] sm:$0xff]  ;;  %v113_v6 = vld [vmem:[%s694_s2 + $0x98] sm:$0xff]  ;;  %v538_v18 = vshrl.u32 %v31_v7, 7 }
   0x3   :  { %v434_v8 = vpack.c.bf16 %v95_v4, %v94_v2  ;;  %v436_v9 = vpack.c.bf16 %v113_v6, %v112_v5  ;;  %v96_v10 = vld [vmem:[%s694_s2 + $0x10] sm:$0xff]  ;;  %v97_v11 = vld [vmem:[%s694_s2 + $0x18] sm:$0xff]  ;;  %v114_v12 = vld [vmem:[%s694_s2 + $0xa0] sm:$0xff] }
   0x4   :  { %433 = vmatprep.subr.bf16.mxu0 %v432_v3  ;;  %v115_v13 = vld [vmem:[%s694_s2 + $0xa8] sm:$0xff]  ;;  %v438_v14 = vpack.c.bf16 %v97_v11, %v96_v10  ;;  %v98_v16 = vld [vmem:[%s694_s2 + $0x20] sm:$0xff]  ;;  %v116_v19 = vld [vmem:[%s694_s2 + $0xb0] sm:$0xff]  ;;  %v37_v27 = vsub.s32 1, %v538_v18  ;;  %v41_v28 = vsub.s32 2, %v538_v18  ;;  %v33_v53 = vsub.s32 0, %v538_v18 }
   0x5   :  { %435 = vmatpush3.bf16.msra.mxu0 %v434_v8  ;;  %v440_v15 = vpack.c.bf16 %v115_v13, %v114_v12  ;;  %v99_v17 = vld [vmem:[%s694_s2 + $0x28] sm:$0xff]  ;;  %v117_v20 = vld [vmem:[%s694_s2 + $0xb8] sm:$0xff]  ;;  %v100_v22 = vld [vmem:[%s694_s2 + $0x30] sm:$0xff] }
   0x6   :  { %437 = vmatprep.subr.bf16.mxu0 %v436_v9  ;;  %v442_v21 = vpack.c.bf16 %v99_v17, %v98_v16  ;;  %v444_v23 = vpack.c.bf16 %v117_v20, %v116_v19  ;;  %v101_v24 = vld [vmem:[%s694_s2 + $0x38] sm:$0xff]  ;;  %v126_v25 = vld [vmem:[%s694_s2 + $0x100] sm:$0xff]  ;;  %v127_v26 = vld [vmem:[%s694_s2 + $0x108] sm:$0xff] }
   0x7   :  { %v118_v29 = vld [vmem:[%s694_s2 + $0xc0] sm:$0xff]  ;;  %v119_v30 = vld [vmem:[%s694_s2 + $0xc8] sm:$0xff]  ;;  %v464_v31 = vpack.c.bf16 %v127_v26, %v126_v25  ;;  %v128_v32 = vld [vmem:[%s694_s2 + $0x110] sm:$0xff]  ;;  %v446_v34 = vpack.c.bf16 %v101_v24, %v100_v22 }
   0x8   :  { %v129_v33 = vld [vmem:[%s694_s2 + $0x118] sm:$0xff]  ;;  %v102_v35 = vld [vmem:[%s694_s2 + $0x40] sm:$0xff]  ;;  %v18_v37 = vld [vmem:[%s696_s1 + $0x8] sm:$0xff]  ;;  %v448_v39 = vpack.c.bf16 %v119_v30, %v118_v29 }
   0x9   :  { %439 = vmatpush3.bf16.msra.mxu0 %v438_v14  ;;  %465 = vmatprep.subr.bf16.mxu1 %v464_v31  ;;  %v468_v36 = vpack.c.bf16 %v129_v33, %v128_v32  ;;  %v29_v38 = vld [vmem:[%s695_s0] sm:$0x7]  ;;  %v103_v40 = vld [vmem:[%s694_s2 + $0x48] sm:$0xff]  ;;  %v19_v42 = vld [vmem:[%s696_s1 + $0x10] sm:$0xff] }
   0xa   :  { %441 = vmatprep.subr.bf16.mxu0 %v440_v15  ;;  %467 = vmatpush3.bf16.msra.mxu1 %v464_v31  ;;  %v584_v41 = vrot.slane %v29_v38, %v37_v27  ;;  %v42_v43 = vrot.slane %v29_v38, %v41_v28  ;;  %v22_v44 = vld [vmem:[%s696_s1 + $0x28] sm:$0xff]  ;;  %v120_v45 = vld [vmem:[%s694_s2 + $0xd0] sm:$0xff]  ;;  %v121_v46 = vld [vmem:[%s694_s2 + $0xd8] sm:$0xff]  ;;  %v450_v50 = vpack.c.bf16 %v103_v40, %v102_v35 }
   0xb   :  { %469 = vmatprep.subr.bf16.mxu1 %v468_v36  ;;  %v104_v51 = vld [vmem:[%s694_s2 + $0x50] sm:$0xff]  ;;  %v105_v52 = vld [vmem:[%s694_s2 + $0x58] sm:$0xff]  ;;  %v452_v54 = vpack.c.bf16 %v121_v46, %v120_v45  ;;  %v122_v55 = vld [vmem:[%s694_s2 + $0xe0] sm:$0xff]  ;;  %v34_v2 = vrot.slane %v29_v38, %v33_v53 }
   0xc   :  { %v47_v47 = vmul.f32 %v584_v41, %v18_v37  ;;  %v48_v48 = vmul.f32 %v42_v43, %v19_v42  ;;  %v51_v49 = vmul.f32 %v42_v43, %v22_v44  ;;  %v123_v56 = vld [vmem:[%s694_s2 + $0xe8] sm:$0xff]  ;;  %v454_v60 = vpack.c.bf16 %v105_v52, %v104_v51  ;;  %v25_v62 = vld [vmem:[%s696_s1 + $0x40] sm:$0xff]  ;;  %v28_v63 = vld [vmem:[%s696_s1 + $0x58] sm:$0xff] }
   0xd   :  { %443 = vmatpush3.bf16.msra.mxu0 %v442_v21  ;;  %v106_v0 = vld [vmem:[%s694_s2 + $0x60] sm:$0xff]  ;;  %v107_v1 = vld [vmem:[%s694_s2 + $0x68] sm:$0xff]  ;;  %v456_v5 = vpack.c.bf16 %v123_v56, %v122_v55  ;;  %v124_v7 = vld [vmem:[%s694_s2 + $0xf0] sm:$0xff]  ;;  %v54_v10 = vmul.f32 %v42_v43, %v25_v62  ;;  %v57_v11 = vmul.f32 %v42_v43, %v28_v63 }
   0xe   :  { %445 = vmatprep.subr.bf16.mxu0 %v444_v23  ;;  %vm59_vm0 = vcmp.ge.f32.partialorder %v47_v47, 0.0  ;;  %v71_v57 = vmul.f32 0.2, %v47_v47  ;;  %471 = vmatpush3.bf16.msra.mxu1 %v468_v36  ;;  %vm60_vm2 = vcmp.ge.f32.partialorder %v48_v48, 0.0  ;;  %v72_v58 = vmul.f32 0.2, %v48_v48 }
   0xf   :  { %vm63_vm3 = vcmp.ge.f32.partialorder %v51_v49, 0.0  ;;  %v75_v59 = vmul.f32 0.2, %v51_v49  ;;  %v17_v6 = vld [vmem:[%s696_s1] sm:$0xff]  ;;  %v125_v8 = vld [vmem:[%s694_s2 + $0xf8] sm:$0xff]  ;;  %v458_v12 = vpack.c.bf16 %v107_v1, %v106_v0  ;;  %vm66_vm4 = vcmp.ge.f32.partialorder %v54_v10, 0.0 }
  0x10   :  { %v83_v61 = vsel %vm59_vm0, %v47_v47, %v71_v57  ;;  %v84_v3 = vsel %vm60_vm2, %v48_v48, %v72_v58  ;;  %v21_v9 = vld [vmem:[%s696_s1 + $0x20] sm:$0xff]  ;;  %v46_v13 = vmul.f32 %v34_v2, %v17_v6  ;;  %v78_v14 = vmul.f32 0.2, %v54_v10  ;;  %v108_v16 = vld [vmem:[%s694_s2 + $0x70] sm:$0xff]  ;;  %v109_v17 = vld [vmem:[%s694_s2 + $0x78] sm:$0xff] }
  0x11   :  { %447 = vmatpush3.bf16.msra.mxu0 %v446_v34  ;;  %207 = vmatprep.mubr.f32.mxu0 %v83_v61  ;;  %v87_v4 = vsel %vm63_vm3, %v51_v49, %v75_v59  ;;  %vm69_vm5 = vcmp.ge.f32.partialorder %v57_v11, 0.0  ;;  %v460_v15 = vpack.c.bf16 %v125_v8, %v124_v7  ;;  %v50_v18 = vmul.f32 %v584_v41, %v21_v9  ;;  %v20_v19 = vld [vmem:[%s696_s1 + $0x18] sm:$0xff]  ;;  %v23_v29 = vld [vmem:[%s696_s1 + $0x30] sm:$0xff]  ;;  %v26_v37 = vld [vmem:[%s696_s1 + $0x48] sm:$0xff] }
  0x12   :  { %449 = vmatprep.subr.bf16.mxu0 %v448_v39  ;;  %426 = vmatprep.mubr.msk.f32.mxu1 %vm130_vm1, %v84_v3  ;;  %v81_v20 = vmul.f32 0.2, %v57_v11  ;;  %v24_v21 = vld [vmem:[%s696_s1 + $0x38] sm:$0xff]  ;;  %v90_v22 = vsel %vm66_vm4, %v54_v10, %v78_v14  ;;  %v462_v24 = vpack.c.bf16 %v109_v17, %v108_v16  ;;  %v70_v25 = vmul.f32 0.2, %v46_v13  ;;  %v27_v30 = vld [vmem:[%s696_s1 + $0x50] sm:$0xff] }
  0x13   :  { %427 = vmatmul.mubr.msk.f32.vlgmr.msra.gmra.mrb[0].mxu1 %vm130_vm1, %v87_v4  ;;  %v49_v26 = vmul.f32 %v34_v2, %v20_v19  ;;  %vm58_vm6 = vcmp.ge.f32.partialorder %v46_v13, 0.0  ;;  %v74_v27 = vmul.f32 0.2, %v50_v18  ;;  %v53_v28 = vmul.f32 %v584_v41, %v24_v21 }
  0x14   :  { %429 = vmatprep.mubr.msk.f32.mxu1 %vm130_vm1, %v90_v22  ;;  %v93_v23 = vsel %vm69_vm5, %v57_v11, %v81_v20  ;;  %vm62_vm7 = vcmp.ge.f32.partialorder %v50_v18, 0.0  ;;  %v82_v31 = vsel %vm58_vm6, %v46_v13, %v70_v25  ;;  %v52_v33 = vmul.f32 %v34_v2, %v23_v29 }
  0x15   :  { %451 = vmatpush3.bf16.msra.mxu0 %v450_v50  ;;  %v73_v32 = vmul.f32 0.2, %v49_v26  ;;  %v86_v34 = vsel %vm62_vm7, %v50_v18, %v74_v27  ;;  %vm61_vm8 = vcmp.ge.f32.partialorder %v49_v26, 0.0  ;;  %v77_v35 = vmul.f32 0.2, %v53_v28 }
  0x16   :  { %453 = vmatprep.subr.bf16.mxu0 %v452_v54  ;;  %v56_v36 = vmul.f32 %v584_v41, %v27_v30  ;;  %vm65_vm9 = vcmp.ge.f32.partialorder %v53_v28, 0.0  ;;  %v76_v39 = vmul.f32 0.2, %v52_v33  ;;  %v55_v40 = vmul.f32 %v34_v2, %v26_v37 }
  0x17   :  { %430 = vmatmul.mubr.msk.f32.gmra.mrb[2].mxu1 %vm130_vm1, %v93_v23  ;;  %v85_v38 = vsel %vm61_vm8, %v49_v26, %v73_v32  ;;  %v89_v42 = vsel %vm65_vm9, %v53_v28, %v77_v35  ;;  %vm64_vm10 = vcmp.ge.f32.partialorder %v52_v33, 0.0 }
  0x18   :  { %v80_v43 = vmul.f32 0.2, %v56_v36  ;;  %vm68_vm11 = vcmp.ge.f32.partialorder %v56_v36, 0.0  ;;  %v88_v44 = vsel %vm64_vm10, %v52_v33, %v76_v39  ;;  %v79_v45 = vmul.f32 0.2, %v55_v40 }
  0x19   :  { %455 = vmatpush3.bf16.msra.mxu0 %v454_v60  ;;  %vm67_vm12 = vcmp.ge.f32.partialorder %v55_v40, 0.0 }
  0x1a   :  { %457 = vmatprep.subr.bf16.mxu0 %v456_v5  ;;  %v92_v46 = vsel %vm68_vm11, %v56_v36, %v80_v43  ;;  %v91_v41 = vsel %vm67_vm12, %v55_v40, %v79_v45 }
  0x1d   :  { %459 = vmatpush3.bf16.msra.mxu0 %v458_v12 }
  0x1e   :  { %461 = vmatprep.subr.bf16.mxu0 %v460_v15 }
  0x21   :  { %463 = vmatpush3.bf16.msra.mxu0 %v462_v24 }
  0x24   :  { %208 = vmatmul.mubr.f32.vlgmr.msra.gmra.mrb[0].mxu0 %v82_v31 }
  0x25   :  { %212 = vmatprep.mubr.f32.mxu0 %v86_v34 }
  0x28   :  { %213 = vmatmul.mubr.f32.gmra.mrb[2].mxu0 %v85_v38 }
  0x29   :  { %217 = vmatprep.mubr.f32.mxu0 %v89_v42 }
  0x2c   :  { %218 = vmatmul.mubr.f32.gmra.mrb[4].mxu0 %v88_v44 }
  0x2d   :  { %222 = vmatprep.mubr.f32.mxu0 %v92_v46 }
  0x30   :  { %223 = vmatmul.mubr.f32.gmra.mrb[6].mxu0 %v91_v41 }
  0xe6   :  { %v428_v47 = vpop.f32.mrb[0].mxu1 }
  0xe7   :  { %v294_v48 = vpop.f32.mrb[1].mxu1 }
  0xea   :  { %v431_v49 = vpop.f32.mrb[2].mxu1 }
  0xeb   :  { %v304_v50 = vpop.f32.mrb[3].mxu1 }
  0xf7   :  { %v398_v51 = vpop.f32.mrb[0].mxu0 }
  0xf8   :  { %v399_v52 = vpop.f32.mrb[1].mxu0 }
  0xf9   :  { %v400_v53 = vadd.f32 %v399_v52, %v398_v51 }
  0xfb   :  { %v295_v54 = vadd.f32 %v400_v53, %v294_v48  ;;  %v401_v55 = vpop.f32.mrb[2].mxu0 }
  0xfc   :  { %v402_v56 = vpop.f32.mrb[3].mxu0 }
  0xfd   :  { %313 = vst.msk [vmem:[%s697_s3] sm:$0xff] %vm130_vm1, %v295_v54  ;;  %v403_v57 = vadd.f32 %v402_v56, %v401_v55  ;;  %v332_v58 = vmul.f32 %v295_v54, %v295_v54  ;;  %v317_v62 = vsel %vm130_vm1, %v295_v54, 0.0 }
  0xff   :  { %v300_v59 = vadd.f32 %v428_v47, %v403_v57  ;;  %v404_v60 = vpop.f32.mrb[4].mxu0  ;;  %v336_v3 = vsel %vm130_vm1, %v332_v58, 0.0 }
 0x100   :  { %v405_v61 = vpop.f32.mrb[5].mxu0 }
 0x101   :  { %314 = vst.msk [vmem:[%s697_s3 + $0x8] sm:$0xff] %vm130_vm1, %v300_v59  ;;  %v318_v63 = vsel %vm130_vm1, %v300_v59, 0.0  ;;  %v333_v0 = vmul.f32 %v300_v59, %v300_v59  ;;  %v406_v1 = vadd.f32 %v405_v61, %v404_v60 }
 0x102   :  { %v319_v2 = vadd.f32 %v318_v63, %v317_v62 }
 0x103   :  { %v337_v4 = vsel %vm130_vm1, %v333_v0, 0.0  ;;  %v305_v5 = vadd.f32 %v406_v1, %v304_v50  ;;  %v407_v6 = vpop.f32.mrb[6].mxu0 }
 0x104   :  { %v338_v7 = vadd.f32 %v337_v4, %v336_v3  ;;  %v408_v8 = vpop.f32.mrb[7].mxu0 }
 0x105   :  { %315 = vst.msk [vmem:[%s697_s3 + $0x10] sm:$0xff] %vm130_vm1, %v305_v5  ;;  %v320_v9 = vsel %vm130_vm1, %v305_v5, 0.0  ;;  %v334_v10 = vmul.f32 %v305_v5, %v305_v5  ;;  %v409_v11 = vadd.f32 %v408_v8, %v407_v6 }
 0x106   :  { %v321_v12 = vadd.f32 %v320_v9, %v319_v2 }
 0x107   :  { %v339_v13 = vsel %vm130_vm1, %v334_v10, 0.0  ;;  %v310_v14 = vadd.f32 %v431_v49, %v409_v11 }
 0x108   :  { %v340_v15 = vadd.f32 %v339_v13, %v338_v7 }
 0x109   :  { %316 = vst.msk [vmem:[%s697_s3 + $0x18] sm:$0xff] %vm130_vm1, %v310_v14  ;;  %v322_v16 = vsel %vm130_vm1, %v310_v14, 0.0  ;;  %v335_v17 = vmul.f32 %v310_v14, %v310_v14 }
 0x10a   :  { %v323_v18 = vadd.f32 %v322_v16, %v321_v12 }
 0x10b   :  { %v341_v19 = vsel %vm130_vm1, %v335_v17, 0.0 }
 0x10c   :  { %v324_v20 = vrot.slane %v323_v18, 4  ;;  %v342_v21 = vadd.f32 %v341_v19, %v340_v15 }
 0x10e   :  { %v325_v22 = vadd.f32 %v324_v20, %v323_v18  ;;  %v343_v23 = vrot.slane %v342_v21, 4 }
 0x110   :  { %v326_v24 = vrot.slane %v325_v22, 2  ;;  %v344_v25 = vadd.f32 %v343_v23, %v342_v21 }
 0x112   :  { %v327_v26 = vadd.f32 %v326_v24, %v325_v22  ;;  %v345_v27 = vrot.slane %v344_v25, 2 }
 0x114   :  { %v328_v28 = vrot.slane %v327_v26, 1  ;;  %v346_v29 = vadd.f32 %v345_v27, %v344_v25 }
 0x116   :  { %v329_v30 = vadd.f32 %v328_v28, %v327_v26  ;;  %v347_v31 = vrot.slane %v346_v29, 1 }
 0x118   :  { %331 = vst.msk [vmem:[%s698_s4] sm:$0x1] %vm330_vm13, %v329_v30  ;;  %v348_v32 = vadd.f32 %v347_v31, %v346_v29 }
 0x11a   :  { %349 = vst.msk [vmem:[%s699_s5] sm:$0x1] %vm330_vm13, %v348_v32 }

// kernel: tile.28
= control target key start
LH: loop header
LB: loop body
LE: loop exit
PB: predicated region body
PF: predicated region fallthrough
CT: control target
= control target key end

     0   :  { %s22_s0 = inlined_call_operand.vmem [shape: f32[64], index: 0, kind: input, shape index: {}]   ;;  %s23_s1 = inlined_call_operand.vmem [shape: f32[4,64], index: 1, kind: output, shape index: {}]  }
   0x1   :  { %v4_v0 = vld [vmem:[%s22_s0] ss:$0 sm:$0xff] }
   0x2   :  { %5 = vst [vmem:[%s23_s1] sm:$0xf] %v4_v0 }

// kernel: tile.29
= control target key start
LH: loop header
LB: loop body
LE: loop exit
PB: predicated region body
PF: predicated region fallthrough
CT: control target
= control target key end

     0   :  { %s6_s8 = smov 3  ;;  %vm8_vm0 = vcmask 523264   ;;  %s30_s9 = smov 64   ;;  %vm15_vm1 = vcmask 1048064   ;;  %s50_s0 = inlined_call_operand.vmem [shape: f32[4,64], index: 0, kind: input, shape index: {}]   ;;  %s51_s1 = inlined_call_operand.vmem [shape: f32[1,256], index: 1, kind: output, shape index: {}]  }
   0x1   :  { %v4_v0 = vld [vmem:[%s50_s0] sm:$0xf]  ;;  %s11_s0 = smov 3 }
   0x2   :  { %5 = vst [vmem:[#allocation1] sm:$0xf] %v4_v0 }
   0x9   :  { %v12_v1 = vld [vmem:[#allocation1 + $0x1] ss:$2 sm:%s11_s0]   ;;  %v7_v2 = vld [vmem:[#allocation1] ss:$2 sm:%s6_s8]  }
   0xa   :  { %13 = vrot.lane.b32.xlu0 %v12_v1, %s30_s9  ;;  %9 = vst.msk [vmem:[#allocation0] ss:$8 sm:$0x3] %vm8_vm0, %v7_v2  }
  0x7c   :  { %v14_v3 = vpop.permute.xlu0 %13  }
  0x7d   :  { %16 = vst.msk [vmem:[#allocation0] ss:$8 sm:$0x3] %vm15_vm1, %v14_v3  }
  0x84   :  { %v20_v4 = vld [vmem:[#allocation0] sm:$0x1]  ;;  %v24_v5 = vld [vmem:[#allocation0 + $0x8] sm:$0x1] }
  0x85   :  { %22 = vst [vmem:[%s51_s1] sm:$0x1] %v20_v4  ;;  %28 = vst [vmem:[%s51_s1 + $0x1] sm:$0x1] %v24_v5 }

// kernel: masknet2_forward.12
= control target key start
LH: loop header
LB: loop body
LE: loop exit
PB: predicated region body
PF: predicated region fallthrough
CT: control target
= control target key end

     0   :  { %v21_v3 = vlaneseq  ;;  %vm141_vm2 = vcmask 523264   ;;  %vm150_vm3 = vcmask 516096   ;;  %s384_s2 = inlined_call_operand.vmem [shape: f32[256,64], index: 2, kind: input, shape index: {}]   ;;  %s385_s0 = inlined_call_operand.vmem [shape: f32[1,256], index: 0, kind: input, shape index: {}]   ;;  %s386_s1 = inlined_call_operand.vmem [shape: f32[8,256], index: 1, kind: input, shape index: {}]   ;;  %s387_s3 = inlined_call_operand.vmem [shape: f32[8,64], index: 3, kind: output, shape index: {0}]   ;;  %s388_s4 = inlined_call_operand.vmem [shape: f32[1,64], index: 4, kind: output, shape index: {1}]   ;;  %s389_s5 = inlined_call_operand.vmem [shape: f32[1,64], index: 5, kind: output, shape index: {2}]  }
   0x1   :  { %v55_v0 = vld [vmem:[%s384_s2 + $0x80] sm:$0xff]  ;;  %v56_v1 = vld [vmem:[%s384_s2 + $0x88] sm:$0xff]  ;;  %v57_v6 = vld [vmem:[%s384_s2 + $0x90] sm:$0xff] }
   0x2   :  { %v39_v2 = vld [vmem:[%s384_s2] sm:$0xff]  ;;  %v208_v4 = vpack.c.bf16 %v56_v1, %v55_v0  ;;  %v40_v5 = vld [vmem:[%s384_s2 + $0x8] sm:$0xff]  ;;  %v58_v7 = vld [vmem:[%s384_s2 + $0x98] sm:$0xff]  ;;  %v22_v15 = vshrl.u32 %v21_v3, 7 }
   0x3   :  { %v210_v8 = vpack.c.bf16 %v40_v5, %v39_v2  ;;  %v212_v9 = vpack.c.bf16 %v58_v7, %v57_v6  ;;  %v41_v10 = vld [vmem:[%s384_s2 + $0x10] sm:$0xff]  ;;  %v42_v11 = vld [vmem:[%s384_s2 + $0x18] sm:$0xff]  ;;  %v59_v12 = vld [vmem:[%s384_s2 + $0xa0] sm:$0xff] }
   0x4   :  { %209 = vmatprep.subr.bf16.mxu0 %v208_v4  ;;  %v60_v13 = vld [vmem:[%s384_s2 + $0xa8] sm:$0xff]  ;;  %v214_v14 = vpack.c.bf16 %v42_v11, %v41_v10  ;;  %v43_v17 = vld [vmem:[%s384_s2 + $0x20] sm:$0xff]  ;;  %v61_v19 = vld [vmem:[%s384_s2 + $0xb0] sm:$0xff]  ;;  %v27_v22 = vsub.s32 1, %v22_v15  ;;  %v23_v40 = vsub.s32 0, %v22_v15 }
   0x5   :  { %211 = vmatpush3.bf16.msra.mxu0 %v210_v8  ;;  %v216_v16 = vpack.c.bf16 %v60_v13, %v59_v12  ;;  %v44_v18 = vld [vmem:[%s384_s2 + $0x28] sm:$0xff]  ;;  %v62_v20 = vld [vmem:[%s384_s2 + $0xb8] sm:$0xff]  ;;  %v45_v24 = vld [vmem:[%s384_s2 + $0x30] sm:$0xff] }
   0x6   :  { %213 = vmatprep.subr.bf16.mxu0 %v212_v9  ;;  %v218_v21 = vpack.c.bf16 %v44_v18, %v43_v17  ;;  %v220_v23 = vpack.c.bf16 %v62_v20, %v61_v19  ;;  %v46_v25 = vld [vmem:[%s384_s2 + $0x38] sm:$0xff]  ;;  %v63_v26 = vld [vmem:[%s384_s2 + $0xc0] sm:$0xff]  ;;  %v64_v27 = vld [vmem:[%s384_s2 + $0xc8] sm:$0xff] }
   0x7   :  { %v18_v28 = vld [vmem:[%s386_s1 + $0x8] sm:$0xff]  ;;  %v19_v29 = vld [vmem:[%s385_s0] sm:$0x3]  ;;  %v222_v30 = vpack.c.bf16 %v46_v25, %v45_v24  ;;  %v224_v32 = vpack.c.bf16 %v64_v27, %v63_v26  ;;  %v65_v35 = vld [vmem:[%s384_s2 + $0xd0] sm:$0xff] }
   0x8   :  { %v28_v31 = vrot.slane %v19_v29, %v27_v22  ;;  %v47_v33 = vld [vmem:[%s384_s2 + $0x40] sm:$0xff]  ;;  %v48_v34 = vld [vmem:[%s384_s2 + $0x48] sm:$0xff]  ;;  %v66_v36 = vld [vmem:[%s384_s2 + $0xd8] sm:$0xff]  ;;  %v24_v48 = vrot.slane %v19_v29, %v23_v40 }
   0x9   :  { %215 = vmatpush3.bf16.msra.mxu0 %v214_v14  ;;  %v226_v38 = vpack.c.bf16 %v48_v34, %v47_v33  ;;  %v228_v41 = vpack.c.bf16 %v66_v36, %v65_v35  ;;  %v49_v42 = vld [vmem:[%s384_s2 + $0x50] sm:$0xff]  ;;  %v50_v43 = vld [vmem:[%s384_s2 + $0x58] sm:$0xff]  ;;  %v67_v44 = vld [vmem:[%s384_s2 + $0xe0] sm:$0xff] }
   0xa   :  { %217 = vmatprep.subr.bf16.mxu0 %v216_v16  ;;  %v32_v37 = vmul.f32 %v28_v31, %v18_v28  ;;  %v68_v45 = vld [vmem:[%s384_s2 + $0xe8] sm:$0xff]  ;;  %v230_v47 = vpack.c.bf16 %v50_v43, %v49_v42  ;;  %v51_v50 = vld [vmem:[%s384_s2 + $0x60] sm:$0xff]  ;;  %v69_v53 = vld [vmem:[%s384_s2 + $0xf0] sm:$0xff] }
   0xb   :  { %v232_v49 = vpack.c.bf16 %v68_v45, %v67_v44  ;;  %v52_v51 = vld [vmem:[%s384_s2 + $0x68] sm:$0xff]  ;;  %v17_v52 = vld [vmem:[%s386_s1] sm:$0xff]  ;;  %v70_v54 = vld [vmem:[%s384_s2 + $0xf8] sm:$0xff] }
   0xc   :  { %vm34_vm0 = vcmp.ge.f32.partialorder %v32_v37, 0.0  ;;  %v36_v39 = vmul.f32 0.2, %v32_v37  ;;  %v234_v55 = vpack.c.bf16 %v52_v51, %v51_v50  ;;  %v31_v56 = vmul.f32 %v24_v48, %v17_v52  ;;  %v53_v58 = vld [vmem:[%s384_s2 + $0x70] sm:$0xff]  ;;  %v54_v59 = vld [vmem:[%s384_s2 + $0x78] sm:$0xff] }
   0xd   :  { %219 = vmatpush3.bf16.msra.mxu0 %v218_v21  ;;  %v236_v57 = vpack.c.bf16 %v70_v54, %v69_v53  ;;  %v238_v60 = vpack.c.bf16 %v54_v59, %v53_v58 }
   0xe   :  { %221 = vmatprep.subr.bf16.mxu0 %v220_v23  ;;  %v38_v46 = vsel %vm34_vm0, %v32_v37, %v36_v39  ;;  %v35_v61 = vmul.f32 0.2, %v31_v56  ;;  %vm33_vm1 = vcmp.ge.f32.partialorder %v31_v56, 0.0 }
   0xf   :  { %135 = vmatprep.mubr.f32.mxu0 %v38_v46 }
  0x10   :  { %v37_v62 = vsel %vm33_vm1, %v31_v56, %v35_v61 }
  0x11   :  { %223 = vmatpush3.bf16.msra.mxu0 %v222_v30 }
  0x12   :  { %225 = vmatprep.subr.bf16.mxu0 %v224_v32 }
  0x15   :  { %227 = vmatpush3.bf16.msra.mxu0 %v226_v38 }
  0x16   :  { %229 = vmatprep.subr.bf16.mxu0 %v228_v41 }
  0x19   :  { %231 = vmatpush3.bf16.msra.mxu0 %v230_v47 }
  0x1a   :  { %233 = vmatprep.subr.bf16.mxu0 %v232_v49 }
  0x1d   :  { %235 = vmatpush3.bf16.msra.mxu0 %v234_v55 }
  0x1e   :  { %237 = vmatprep.subr.bf16.mxu0 %v236_v57 }
  0x21   :  { %239 = vmatpush3.bf16.msra.mxu0 %v238_v60 }
  0x24   :  { %136 = vmatmul.mubr.f32.vlgmr.msra.gmra.mrb[0].mxu0 %v37_v62 }
  0xf7   :  { %v205_v63 = vpop.f32.mrb[0].mxu0 }
  0xf8   :  { %v206_v0 = vpop.f32.mrb[1].mxu0 }
  0xf9   :  { %v207_v1 = vadd.f32 %v206_v0, %v205_v63 }
  0xfb   :  { %142 = vst.msk [vmem:[%s387_s3] sm:$0xff] %vm141_vm2, %v207_v1  ;;  %v143_v2 = vsel %vm141_vm2, %v207_v1, 0.0  ;;  %v152_v3 = vmul.f32 %v207_v1, %v207_v1 }
  0xfc   :  { %v144_v4 = vrot.slane %v143_v2, 4 }
  0xfd   :  { %v153_v5 = vsel %vm141_vm2, %v152_v3, 0.0 }
  0xfe   :  { %v145_v6 = vadd.f32 %v144_v4, %v143_v2  ;;  %v154_v7 = vrot.slane %v153_v5, 4 }
 0x100   :  { %v146_v8 = vrot.slane %v145_v6, 2  ;;  %v155_v9 = vadd.f32 %v154_v7, %v153_v5 }
 0x102   :  { %v147_v10 = vadd.f32 %v146_v8, %v145_v6  ;;  %v156_v11 = vrot.slane %v155_v9, 2 }
 0x104   :  { %v148_v12 = vrot.slane %v147_v10, 1  ;;  %v157_v13 = vadd.f32 %v156_v11, %v155_v9 }
 0x106   :  { %v149_v14 = vadd.f32 %v148_v12, %v147_v10  ;;  %v158_v15 = vrot.slane %v157_v13, 1 }
 0x108   :  { %151 = vst.msk [vmem:[%s388_s4] sm:$0x1] %vm150_vm3, %v149_v14  ;;  %v159_v16 = vadd.f32 %v158_v15, %v157_v13 }
 0x10a   :  { %160 = vst.msk [vmem:[%s389_s5] sm:$0x1] %vm150_vm3, %v159_v16 }

// kernel: masknet2_forward.13
= control target key start
LH: loop header
LB: loop body
LE: loop exit
PB: predicated region body
PF: predicated region fallthrough
CT: control target
= control target key end

     0   :  { %v18_v3 = vlaneseq  ;;  %vm138_vm2 = vcmask 7168   ;;  %s339_s2 = inlined_call_operand.vmem [shape: f32[256,1], index: 2, kind: input, shape index: {}]   ;;  %s340_s0 = inlined_call_operand.vmem [shape: f32[1,256], index: 0, kind: input, shape index: {}]   ;;  %s341_s1 = inlined_call_operand.vmem [shape: f32[8,256], index: 1, kind: input, shape index: {}]   ;;  %s342_s3 = inlined_call_operand.vmem [shape: f32[8,1], index: 3, kind: output, shape index: {}]  }
   0x1   :  { %v52_v0 = vld [vmem:[%s339_s2 + $0x80] sm:$0xff]  ;;  %v53_v1 = vld [vmem:[%s339_s2 + $0x88] sm:$0xff]  ;;  %v54_v6 = vld [vmem:[%s339_s2 + $0x90] sm:$0xff] }
   0x2   :  { %v36_v2 = vld [vmem:[%s339_s2] sm:$0xff]  ;;  %v179_v4 = vpack.c.bf16 %v53_v1, %v52_v0  ;;  %v37_v5 = vld [vmem:[%s339_s2 + $0x8] sm:$0xff]  ;;  %v55_v7 = vld [vmem:[%s339_s2 + $0x98] sm:$0xff]  ;;  %v19_v15 = vshrl.u32 %v18_v3, 7 }
   0x3   :  { %v181_v8 = vpack.c.bf16 %v37_v5, %v36_v2  ;;  %v183_v9 = vpack.c.bf16 %v55_v7, %v54_v6  ;;  %v38_v10 = vld [vmem:[%s339_s2 + $0x10] sm:$0xff]  ;;  %v39_v11 = vld [vmem:[%s339_s2 + $0x18] sm:$0xff]  ;;  %v56_v12 = vld [vmem:[%s339_s2 + $0xa0] sm:$0xff] }
   0x4   :  { %180 = vmatprep.subr.bf16.mxu0 %v179_v4  ;;  %v57_v13 = vld [vmem:[%s339_s2 + $0xa8] sm:$0xff]  ;;  %v185_v14 = vpack.c.bf16 %v39_v11, %v38_v10  ;;  %v40_v17 = vld [vmem:[%s339_s2 + $0x20] sm:$0xff]  ;;  %v58_v19 = vld [vmem:[%s339_s2 + $0xb0] sm:$0xff]  ;;  %v24_v22 = vsub.s32 1, %v19_v15  ;;  %v20_v40 = vsub.s32 0, %v19_v15 }
   0x5   :  { %182 = vmatpush3.bf16.msra.mxu0 %v181_v8  ;;  %v187_v16 = vpack.c.bf16 %v57_v13, %v56_v12  ;;  %v41_v18 = vld [vmem:[%s339_s2 + $0x28] sm:$0xff]  ;;  %v59_v20 = vld [vmem:[%s339_s2 + $0xb8] sm:$0xff]  ;;  %v42_v24 = vld [vmem:[%s339_s2 + $0x30] sm:$0xff] }
   0x6   :  { %184 = vmatprep.subr.bf16.mxu0 %v183_v9  ;;  %v189_v21 = vpack.c.bf16 %v41_v18, %v40_v17  ;;  %v191_v23 = vpack.c.bf16 %v59_v20, %v58_v19  ;;  %v43_v25 = vld [vmem:[%s339_s2 + $0x38] sm:$0xff]  ;;  %v60_v26 = vld [vmem:[%s339_s2 + $0xc0] sm:$0xff]  ;;  %v61_v27 = vld [vmem:[%s339_s2 + $0xc8] sm:$0xff] }
   0x7   :  { %v15_v28 = vld [vmem:[%s341_s1 + $0x8] sm:$0xff]  ;;  %v16_v29 = vld [vmem:[%s340_s0] sm:$0x3]  ;;  %v193_v30 = vpack.c.bf16 %v43_v25, %v42_v24  ;;  %v195_v32 = vpack.c.bf16 %v61_v27, %v60_v26  ;;  %v62_v35 = vld [vmem:[%s339_s2 + $0xd0] sm:$0xff] }
   0x8   :  { %v25_v31 = vrot.slane %v16_v29, %v24_v22  ;;  %v44_v33 = vld [vmem:[%s339_s2 + $0x40] sm:$0xff]  ;;  %v45_v34 = vld [vmem:[%s339_s2 + $0x48] sm:$0xff]  ;;  %v63_v36 = vld [vmem:[%s339_s2 + $0xd8] sm:$0xff]  ;;  %v21_v48 = vrot.slane %v16_v29, %v20_v40 }
   0x9   :  { %186 = vmatpush3.bf16.msra.mxu0 %v185_v14  ;;  %v197_v38 = vpack.c.bf16 %v45_v34, %v44_v33  ;;  %v199_v41 = vpack.c.bf16 %v63_v36, %v62_v35  ;;  %v46_v42 = vld [vmem:[%s339_s2 + $0x50] sm:$0xff]  ;;  %v47_v43 = vld [vmem:[%s339_s2 + $0x58] sm:$0xff]  ;;  %v64_v44 = vld [vmem:[%s339_s2 + $0xe0] sm:$0xff] }
   0xa   :  { %188 = vmatprep.subr.bf16.mxu0 %v187_v16  ;;  %v29_v37 = vmul.f32 %v25_v31, %v15_v28  ;;  %v65_v45 = vld [vmem:[%s339_s2 + $0xe8] sm:$0xff]  ;;  %v201_v47 = vpack.c.bf16 %v47_v43, %v46_v42  ;;  %v48_v50 = vld [vmem:[%s339_s2 + $0x60] sm:$0xff]  ;;  %v66_v53 = vld [vmem:[%s339_s2 + $0xf0] sm:$0xff] }
   0xb   :  { %v203_v49 = vpack.c.bf16 %v65_v45, %v64_v44  ;;  %v49_v51 = vld [vmem:[%s339_s2 + $0x68] sm:$0xff]  ;;  %v14_v52 = vld [vmem:[%s341_s1] sm:$0xff]  ;;  %v67_v54 = vld [vmem:[%s339_s2 + $0xf8] sm:$0xff] }
   0xc   :  { %vm31_vm0 = vcmp.ge.f32.partialorder %v29_v37, 0.0  ;;  %v33_v39 = vmul.f32 0.2, %v29_v37  ;;  %v205_v55 = vpack.c.bf16 %v49_v51, %v48_v50  ;;  %v28_v56 = vmul.f32 %v21_v48, %v14_v52  ;;  %v50_v58 = vld [vmem:[%s339_s2 + $0x70] sm:$0xff]  ;;  %v51_v59 = vld [vmem:[%s339_s2 + $0x78] sm:$0xff] }
   0xd   :  { %190 = vmatpush3.bf16.msra.mxu0 %v189_v21  ;;  %v207_v57 = vpack.c.bf16 %v67_v54, %v66_v53  ;;  %v209_v60 = vpack.c.bf16 %v51_v59, %v50_v58 }
   0xe   :  { %192 = vmatprep.subr.bf16.mxu0 %v191_v23  ;;  %v35_v46 = vsel %vm31_vm0, %v29_v37, %v33_v39  ;;  %v32_v61 = vmul.f32 0.2, %v28_v56  ;;  %vm30_vm1 = vcmp.ge.f32.partialorder %v28_v56, 0.0 }
   0xf   :  { %132 = vmatprep.mubr.f32.mxu0 %v35_v46 }
  0x10   :  { %v34_v62 = vsel %vm30_vm1, %v28_v56, %v32_v61 }
  0x11   :  { %194 = vmatpush3.bf16.msra.mxu0 %v193_v30 }
  0x12   :  { %196 = vmatprep.subr.bf16.mxu0 %v195_v32 }
  0x15   :  { %198 = vmatpush3.bf16.msra.mxu0 %v197_v38 }
  0x16   :  { %200 = vmatprep.subr.bf16.mxu0 %v199_v41 }
  0x19   :  { %202 = vmatpush3.bf16.msra.mxu0 %v201_v47 }
  0x1a   :  { %204 = vmatprep.subr.bf16.mxu0 %v203_v49 }
  0x1d   :  { %206 = vmatpush3.bf16.msra.mxu0 %v205_v55 }
  0x1e   :  { %208 = vmatprep.subr.bf16.mxu0 %v207_v57 }
  0x21   :  { %210 = vmatpush3.bf16.msra.mxu0 %v209_v60 }
  0x24   :  { %133 = vmatmul.mubr.f32.vlgmr.msra.gmra.mrb[0].mxu0 %v34_v62 }
  0xf7   :  { %v176_v63 = vpop.f32.mrb[0].mxu0 }
  0xf8   :  { %v177_v0 = vpop.f32.mrb[1].mxu0 }
  0xf9   :  { %v178_v1 = vadd.f32 %v177_v0, %v176_v63 }
  0xfb   :  { %139 = vst.msk [vmem:[%s342_s3] sm:$0xff] %vm138_vm2, %v178_v1 }

</bundles_post_ra>
